<compile_context>
chip_gen: v7x
topology: tpu7x:2x2x1
jax: 0.10.0
libtpu: 0.0.40
codegen_flags: <defaults>
</compile_context>

<pallas_src>
import math

import jax
import jax.numpy as jnp
import numpy as np
from jax import lax
from jax.experimental import pallas as pl
from jax.experimental.pallas import tpu as pltpu


# ----------------------------------------------------------------------------
# Kernel 1: conv1 (1->32, k=2) + ReLU, conv2 (32->64, k=2, im2col) + ReLU, fused.
#   x_ref : (B, H, W, 1)         f32
#   w1_ref: (2, 2, C1)           f32   (Cin=1 squeezed out)
#   b1_ref: (1, C1)              f32
#   w2_ref: (4*C1, C2)           f32   (im2col matrix: rows = (dh,dw)-major, ci-minor)
#   b2_ref: (1, C2)              f32
#   o_ref : (B*(H-2)*(W-2), C2)  f32   (NHWC rows; free row-major reshape in wrapper)
# ----------------------------------------------------------------------------
def conv_kernel(x_ref, w1_ref, b1_ref, w2_ref, b2_ref, o_ref):
    x = x_ref[...]                       # (B, H, W, 1)
    w1 = w1_ref[...]                     # (2, 2, C1)
    B, H, W, _ = x.shape
    C1 = w1.shape[-1]
    H1, W1 = H - 1, W - 1
    H2, W2 = H - 2, W - 2

    # conv1: Cin == 1, so the 2x2 conv is a shifted broadcast-multiply-accumulate (VPU).
    acc1 = jnp.zeros((B, H1, W1, C1), jnp.float32)
    for dh in range(2):
        for dw in range(2):
            patch = x[:, dh:dh + H1, dw:dw + W1, :]          # (B, H1, W1, 1)
            wslice = w1[dh:dh + 1, dw:dw + 1, :]             # (1, 1, C1)
            acc1 = acc1 + patch * wslice                     # -> (B, H1, W1, C1)
    y1 = jnp.maximum(acc1 + b1_ref[...], 0.0)                # ReLU

    # conv2 via im2col: concatenate the four shifted windows along the channel axis
    # -> (B, H2, W2, 4*C1), flatten rows, one MXU dot with K = 4*C1 = 128.
    cols = [y1[:, dh:dh + H2, dw:dw + W2, :] for dh in range(2) for dw in range(2)]
    patches = jnp.concatenate(cols, axis=-1)                 # (B, H2, W2, 4*C1)
    patches2d = patches.reshape(B * H2 * W2, 4 * C1)         # (B*H2*W2, 128)
    acc2 = jnp.dot(patches2d, w2_ref[...],
                   preferred_element_type=jnp.float32)       # (B*H2*W2, C2)
    o_ref[...] = jnp.maximum(acc2 + b2_ref[...], 0.0)        # ReLU


# ----------------------------------------------------------------------------
# Kernel 2: fc1 + ReLU, tiled over (N, K); K (last grid axis) is the reduction.
#   Weights arrive as bf16; accumulation is f32 in a VMEM scratch.
# ----------------------------------------------------------------------------
def fc1_kernel(x_ref, w_ref, b_ref, o_ref, acc_ref):
    k = pl.program_id(1)

    @pl.when(k == 0)
    def _():
        acc_ref[...] = jnp.zeros_like(acc_ref)

    acc_ref[...] += jnp.dot(x_ref[...].astype(jnp.bfloat16), w_ref[...],
                            preferred_element_type=jnp.float32)

    @pl.when(k == pl.num_programs(1) - 1)
    def _():
        o_ref[...] = jnp.maximum(acc_ref[...] + b_ref[...], 0.0)


def fc1_relu(x, w, b, *, tn=1024, tk=2048):
    M, K = x.shape
    N = w.shape[1]
    grid = (N // tn, K // tk)            # (2, 2) at the sizes used here
    # Dominated by streaming the bf16 wf1 weights from HBM.
    ce = pl.CostEstimate(
        flops=2 * M * K * N,
        transcendentals=0,
        bytes_accessed=K * N * w.dtype.itemsize + M * K * 4 + M * N * 4 + N * 4)
    return pl.pallas_call(
        fc1_kernel,
        out_shape=jax.ShapeDtypeStruct((M, N), jnp.float32),
        grid_spec=pltpu.PrefetchScalarGridSpec(
            num_scalar_prefetch=0,
            grid=grid,
            in_specs=[
                pl.BlockSpec((M, tk), lambda n, k: (0, k)),
                pl.BlockSpec((tk, tn), lambda n, k: (k, n)),
                pl.BlockSpec((1, tn), lambda n, k: (0, n)),
            ],
            out_specs=pl.BlockSpec((M, tn), lambda n, k: (0, n)),
            scratch_shapes=[pltpu.VMEM((M, tn), jnp.float32)],
        ),
        # "parallel" N axis: on v7x the two TensorCores each stream half of wf1;
        # on v5e/v6e (single core) it is a no-op.
        compiler_params=pltpu.CompilerParams(
            dimension_semantics=("parallel", "arbitrary")),
        cost_estimate=ce,
    )(x, w, b)


# ----------------------------------------------------------------------------
# Kernel 3: fc2 + softmax(dim=1), single block (bf16 wf2 = 2 MiB fits VMEM easily).
# ----------------------------------------------------------------------------
def fc2_softmax_kernel(x_ref, w_ref, b_ref, o_ref):
    logits = jnp.dot(x_ref[...].astype(jnp.bfloat16), w_ref[...],
                     preferred_element_type=jnp.float32) + b_ref[...]
    m = jnp.max(logits, axis=-1, keepdims=True)
    e = jnp.exp(logits - m)
    denom = jnp.sum(e, axis=-1, keepdims=True)
    o_ref[...] = e * pl.reciprocal(denom, approx=True)


def fc2_softmax(x, w, b):
    M = x.shape[0]
    N = w.shape[1]
    return pl.pallas_call(
        fc2_softmax_kernel,
        out_shape=jax.ShapeDtypeStruct((M, N), jnp.float32),
    )(x, w, b)


# ----------------------------------------------------------------------------
# Full forward pass (glue in plain JAX, compute in Pallas kernels).
# ----------------------------------------------------------------------------
def model_forward(x_nchw, kparams):
    w1, b1, w2m, b2, wf1, bf1, wf2, bf2 = kparams
    B, C, H, W = x_nchw.shape
    H2, W2 = H - 2, W - 2
    C2 = w2m.shape[-1]

    # C == 1, so NCHW -> NHWC is a free reshape (no transpose needed).
    x_nhwc = x_nchw.reshape(B, H, W, 1)

    conv_out = pl.pallas_call(
        conv_kernel,
        out_shape=jax.ShapeDtypeStruct((B * H2 * W2, C2), jnp.float32),
    )(x_nhwc, w1, b1, w2m, b2)

    # Row-major (free) reshape: (b*HW+p, c) -> (b, p*C2+c). The PyTorch (C,H,W)
    # flatten order is handled by the pre-permuted wf1 rows in prepare_params.
    feat = conv_out.reshape(B, H2 * W2 * C2)

    # TODO(synk): dropout is identity here (inference mode); no RNG dropout applied.
    h1 = fc1_relu(feat, wf1, bf1)
    return fc2_softmax(h1, wf2, bf2)


# ----------------------------------------------------------------------------
# Parameter construction (PyTorch layouts + uniform bounds) and kernel-side prep.
# ----------------------------------------------------------------------------
def make_params(key, *, c1=32, c2=64, k_fc1=4096, n_fc1=2048, n_fc2=512):
    ks = jax.random.split(key, 8)

    def uinit(k, shape, fan_in):
        bound = 1.0 / math.sqrt(fan_in)
        return jax.random.uniform(k, shape, jnp.float32, -bound, bound)

    w1 = uinit(ks[0], (c1, 1, 2, 2), 1 * 2 * 2)       # conv1 OIHW
    b1 = uinit(ks[1], (c1,), 1 * 2 * 2)
    w2 = uinit(ks[2], (c2, c1, 2, 2), c1 * 2 * 2)     # conv2 OIHW
    b2 = uinit(ks[3], (c2,), c1 * 2 * 2)
    wf1 = uinit(ks[4], (n_fc1, k_fc1), k_fc1)         # fc1 (out, in)  PyTorch layout
    bf1 = uinit(ks[5], (n_fc1,), k_fc1)
    wf2 = uinit(ks[6], (n_fc2, n_fc1), n_fc1)         # fc2 (out, in)
    bf2 = uinit(ks[7], (n_fc2,), n_fc1)
    return (w1, b1, w2, b2, wf1, bf1, wf2, bf2)


def prepare_params(params, *, conv_hw):
    """One-time conversion from PyTorch layouts to the kernel layouts:
       - conv weights -> HWIO (conv2 additionally flattened to an im2col matrix),
       - fc weights -> (in, out) and cast to bf16,
       - wf1 rows permuted from PyTorch (C,H,W)-flatten order to NHWC-flatten order,
         so the conv->fc1 glue is a free reshape (no activation transpose)."""
    w1, b1, w2, b2, wf1, bf1, wf2, bf2 = params
    C1 = w1.shape[0]
    C2 = w2.shape[0]
    H2, W2 = conv_hw
    HW = H2 * W2

    w1k = jnp.transpose(w1, (2, 3, 1, 0)).reshape(2, 2, C1)        # (2,2,C1)
    b1k = b1.reshape(1, C1)
    w2k = jnp.transpose(w2, (2, 3, 1, 0)).reshape(4 * C1, C2)      # (4*C1, C2)
    b2k = b2.reshape(1, C2)

    n_fc1 = wf1.shape[0]
    wf1_io = wf1.T                                                  # (C2*HW, n_fc1), rows = c*HW+p
    wf1k = (wf1_io.reshape(C2, HW, n_fc1)
                  .transpose(1, 0, 2)                               # rows = p*C2+c (NHWC order)
                  .reshape(HW * C2, n_fc1)
                  .astype(jnp.bfloat16))
    bf1k = bf1.reshape(1, -1)
    wf2k = wf2.T.astype(jnp.bfloat16)                               # (n_fc1, n_fc2)
    bf2k = bf2.reshape(1, -1)
    return (w1k, b1k, w2k, b2k, wf1k, bf1k, wf2k, bf2k)


# ----------------------------------------------------------------------------
# Pure-JAX reference mirroring PyTorch exactly (NCHW conv, (C,H,W) flatten, x@W.T+b).
# ----------------------------------------------------------------------------
def ref_forward(x_nchw, params):
    w1, b1, w2, b2, wf1, bf1, wf2, bf2 = params
    dn = ('NCHW', 'OIHW', 'NCHW')
    y1 = jax.nn.relu(lax.conv_general_dilated(x_nchw, w1, (1, 1), 'VALID',
                                              dimension_numbers=dn)
                     + b1.reshape(1, -1, 1, 1))
    y2 = jax.nn.relu(lax.conv_general_dilated(y1, w2, (1, 1), 'VALID',
                                              dimension_numbers=dn)
                     + b2.reshape(1, -1, 1, 1))
    feat = y2.reshape(y2.shape[0], -1)
    h1 = jax.nn.relu(feat @ wf1.T + bf1)
    return jax.nn.softmax(h1 @ wf2.T + bf2, axis=1)


if __name__ == "__main__":
    key = jax.random.PRNGKey(0)
    k_x, k_p = jax.random.split(key)

    # Small synthetic input: batch=2, 1 channel, 10x10 "spectrogram" patch.
    # conv1 -> (2, 32, 9, 9), conv2 -> (2, 64, 8, 8), flatten -> (2, 4096).
    # TODO(synk): the original module assumes 24480 fc1 in-features (larger input);
    #             here they are derived from the small synthetic input (4096).
    x = jax.random.normal(k_x, (2, 1, 10, 10), jnp.float32)
    params = make_params(k_p)
    kparams = prepare_params(params, conv_hw=(x.shape[2] - 2, x.shape[3] - 2))

    out = jax.jit(model_forward)(x, kparams)
    out = jax.block_until_ready(out)

    ref = ref_forward(x, params)
    # bf16 fc weights + approx reciprocal -> relaxed tolerance (probs are ~1/512).
    np.testing.assert_allclose(np.asarray(out), np.asarray(ref), rtol=2e-2, atol=1e-3)
    np.testing.assert_allclose(np.asarray(out).sum(axis=1), np.ones(out.shape[0]),
                               rtol=0, atol=2e-3)

    print("KERNEL_OK")
</pallas_src>

<mosaic_0001>
module attributes {stable_mosaic.version = 11 : i64} {
  func.func @conv_kernel(%arg0: memref<2x10x10x1xf32, #tpu.memory_space<vmem>>, %arg1: memref<2x2x32xf32, #tpu.memory_space<vmem>>, %arg2: memref<1x32xf32, #tpu.memory_space<vmem>>, %arg3: memref<128x64xf32, #tpu.memory_space<vmem>>, %arg4: memref<1x64xf32, #tpu.memory_space<vmem>>, %arg5: memref<128x64xf32, #tpu.memory_space<vmem>>) attributes {dimension_semantics = [], scalar_prefetch = 0 : i64, scratch_operands = 0 : i64, tpu.core_type = #tpu.core_type<tc>} {
    %c0 = arith.constant 0 : index
    %c0_0 = arith.constant 0 : index
    %c0_1 = arith.constant 0 : index
    %c0_2 = arith.constant 0 : index
    %0 = vector.load %arg0[%c0, %c0_0, %c0_1, %c0_2] : memref<2x10x10x1xf32, #tpu.memory_space<vmem>>, vector<2x10x10x1xf32>
    %c0_3 = arith.constant 0 : index
    %c0_4 = arith.constant 0 : index
    %c0_5 = arith.constant 0 : index
    %1 = vector.load %arg1[%c0_3, %c0_4, %c0_5] : memref<2x2x32xf32, #tpu.memory_space<vmem>>, vector<2x2x32xf32>
    %cst = arith.constant 0.000000e+00 : f32
    %2 = vector.broadcast %cst : f32 to vector<2x9x9x32xf32>
    %3 = vector.extract_strided_slice %0 {offsets = [0, 0, 0, 0], sizes = [2, 9, 9, 1], strides = [1, 1, 1, 1]} : vector<2x10x10x1xf32> to vector<2x9x9x1xf32>
    %4 = vector.extract_strided_slice %1 {offsets = [0, 0, 0], sizes = [1, 1, 32], strides = [1, 1, 1]} : vector<2x2x32xf32> to vector<1x1x32xf32>
    %5 = vector.shape_cast %4 : vector<1x1x32xf32> to vector<1x1x1x32xf32>
    %6 = vector.broadcast %3 : vector<2x9x9x1xf32> to vector<2x9x9x32xf32>
    %7 = vector.broadcast %5 : vector<1x1x1x32xf32> to vector<2x9x9x32xf32>
    %8 = arith.mulf %6, %7 : vector<2x9x9x32xf32>
    %9 = arith.addf %2, %8 : vector<2x9x9x32xf32>
    %10 = vector.extract_strided_slice %0 {offsets = [0, 0, 1, 0], sizes = [2, 9, 9, 1], strides = [1, 1, 1, 1]} : vector<2x10x10x1xf32> to vector<2x9x9x1xf32>
    %11 = vector.extract_strided_slice %1 {offsets = [0, 1, 0], sizes = [1, 1, 32], strides = [1, 1, 1]} : vector<2x2x32xf32> to vector<1x1x32xf32>
    %12 = vector.shape_cast %11 : vector<1x1x32xf32> to vector<1x1x1x32xf32>
    %13 = vector.broadcast %10 : vector<2x9x9x1xf32> to vector<2x9x9x32xf32>
    %14 = vector.broadcast %12 : vector<1x1x1x32xf32> to vector<2x9x9x32xf32>
    %15 = arith.mulf %13, %14 : vector<2x9x9x32xf32>
    %16 = arith.addf %9, %15 : vector<2x9x9x32xf32>
    %17 = vector.extract_strided_slice %0 {offsets = [0, 1, 0, 0], sizes = [2, 9, 9, 1], strides = [1, 1, 1, 1]} : vector<2x10x10x1xf32> to vector<2x9x9x1xf32>
    %18 = vector.extract_strided_slice %1 {offsets = [1, 0, 0], sizes = [1, 1, 32], strides = [1, 1, 1]} : vector<2x2x32xf32> to vector<1x1x32xf32>
    %19 = vector.shape_cast %18 : vector<1x1x32xf32> to vector<1x1x1x32xf32>
    %20 = vector.broadcast %17 : vector<2x9x9x1xf32> to vector<2x9x9x32xf32>
    %21 = vector.broadcast %19 : vector<1x1x1x32xf32> to vector<2x9x9x32xf32>
    %22 = arith.mulf %20, %21 : vector<2x9x9x32xf32>
    %23 = arith.addf %16, %22 : vector<2x9x9x32xf32>
    %24 = vector.extract_strided_slice %0 {offsets = [0, 1, 1, 0], sizes = [2, 9, 9, 1], strides = [1, 1, 1, 1]} : vector<2x10x10x1xf32> to vector<2x9x9x1xf32>
    %25 = vector.extract_strided_slice %1 {offsets = [1, 1, 0], sizes = [1, 1, 32], strides = [1, 1, 1]} : vector<2x2x32xf32> to vector<1x1x32xf32>
    %26 = vector.shape_cast %25 : vector<1x1x32xf32> to vector<1x1x1x32xf32>
    %27 = vector.broadcast %24 : vector<2x9x9x1xf32> to vector<2x9x9x32xf32>
    %28 = vector.broadcast %26 : vector<1x1x1x32xf32> to vector<2x9x9x32xf32>
    %29 = arith.mulf %27, %28 : vector<2x9x9x32xf32>
    %30 = arith.addf %23, %29 : vector<2x9x9x32xf32>
    %c0_6 = arith.constant 0 : index
    %c0_7 = arith.constant 0 : index
    %31 = vector.load %arg2[%c0_6, %c0_7] : memref<1x32xf32, #tpu.memory_space<vmem>>, vector<1x32xf32>
    %32 = vector.shape_cast %31 : vector<1x32xf32> to vector<1x1x1x32xf32>
    %33 = vector.broadcast %32 : vector<1x1x1x32xf32> to vector<2x9x9x32xf32>
    %34 = arith.addf %30, %33 : vector<2x9x9x32xf32>
    %cst_8 = arith.constant 0.000000e+00 : f32
    %35 = vector.broadcast %cst_8 : f32 to vector<2x9x9x32xf32>
    %36 = arith.maximumf %34, %35 : vector<2x9x9x32xf32>
    %37 = vector.extract_strided_slice %36 {offsets = [0, 0, 0, 0], sizes = [2, 8, 8, 32], strides = [1, 1, 1, 1]} : vector<2x9x9x32xf32> to vector<2x8x8x32xf32>
    %38 = vector.extract_strided_slice %36 {offsets = [0, 0, 1, 0], sizes = [2, 8, 8, 32], strides = [1, 1, 1, 1]} : vector<2x9x9x32xf32> to vector<2x8x8x32xf32>
    %39 = vector.extract_strided_slice %36 {offsets = [0, 1, 0, 0], sizes = [2, 8, 8, 32], strides = [1, 1, 1, 1]} : vector<2x9x9x32xf32> to vector<2x8x8x32xf32>
    %40 = vector.extract_strided_slice %36 {offsets = [0, 1, 1, 0], sizes = [2, 8, 8, 32], strides = [1, 1, 1, 1]} : vector<2x9x9x32xf32> to vector<2x8x8x32xf32>
    %41 = tpu.concatenate %37, %38, %39, %40 in 3 : vector<2x8x8x32xf32>, vector<2x8x8x32xf32>, vector<2x8x8x32xf32>, vector<2x8x8x32xf32> -> vector<2x8x8x128xf32>
    %42 = vector.shape_cast %41 : vector<2x8x8x128xf32> to vector<128x128xf32>
    %c0_9 = arith.constant 0 : index
    %c0_10 = arith.constant 0 : index
    %43 = vector.load %arg3[%c0_9, %c0_10] : memref<128x64xf32, #tpu.memory_space<vmem>>, vector<128x64xf32>
    %cst_11 = arith.constant dense<0.000000e+00> : vector<128x64xf32>
    %44 = tpu.matmul %42, %43, %cst_11 {dimension_numbers = #tpu.dot_dimension_numbers<[1], [0], [0], [1], [0, 0, 1, 1], [], []>} : vector<128x128xf32>, vector<128x64xf32>, vector<128x64xf32> -> vector<128x64xf32>
    %c0_12 = arith.constant 0 : index
    %c0_13 = arith.constant 0 : index
    %45 = vector.load %arg4[%c0_12, %c0_13] : memref<1x64xf32, #tpu.memory_space<vmem>>, vector<1x64xf32>
    %46 = vector.broadcast %45 : vector<1x64xf32> to vector<128x64xf32>
    %47 = arith.addf %44, %46 : vector<128x64xf32>
    %cst_14 = arith.constant 0.000000e+00 : f32
    %48 = vector.broadcast %cst_14 : f32 to vector<128x64xf32>
    %49 = arith.maximumf %47, %48 : vector<128x64xf32>
    %c0_15 = arith.constant 0 : index
    %c0_16 = arith.constant 0 : index
    %50 = vector.load %arg5[%c0_15, %c0_16] : memref<128x64xf32, #tpu.memory_space<vmem>>, vector<128x64xf32>
    tpu.vector_store %arg5[%c0_15, %c0_16], %49 {strides = array<i32>} : memref<128x64xf32, #tpu.memory_space<vmem>>, vector<128x64xf32>,
    return
  }
}

module attributes {stable_mosaic.version = 11 : i64} {
  func.func @fc1_kernel(%arg0: i32, %arg1: i32, %arg2: memref<2x2048xf32, #tpu.memory_space<vmem>>, %arg3: memref<2048x1024xbf16, #tpu.memory_space<vmem>>, %arg4: memref<1x1024xf32, #tpu.memory_space<vmem>>, %arg5: memref<2x1024xf32, #tpu.memory_space<vmem>>, %arg6: memref<2x1024xf32, #tpu.memory_space<vmem>>) attributes {dimension_semantics = [#tpu.dimension_semantics<parallel>, #tpu.dimension_semantics<arbitrary>], iteration_bounds = array<i64: 2, 2>, scalar_prefetch = 0 : i64, scratch_operands = 1 : i64, tpu.core_type = #tpu.core_type<tc>, window_params = [{transform_indices = @transform_0, window_bounds = array<i64: 2, 2048>}, {transform_indices = @transform_1, window_bounds = array<i64: 2048, 1024>}, {transform_indices = @transform_2, window_bounds = array<i64: 1, 1024>}, {transform_indices = @transform_3, window_bounds = array<i64: 2, 1024>}]} {
    %c0_i32 = arith.constant 0 : i32
    %0 = arith.cmpi eq, %arg1, %c0_i32 : i32
    %1 = arith.extui %0 : i1 to i32
    %c0_i32_0 = arith.constant 0 : i32
    %2 = arith.cmpi ne, %1, %c0_i32_0 : i32
    scf.if %2 {
      %cst_9 = arith.constant 0.000000e+00 : f32
      %13 = vector.broadcast %cst_9 : f32 to vector<2x1024xf32>
      %c0_10 = arith.constant 0 : index
      %c0_11 = arith.constant 0 : index
      %14 = vector.load %arg6[%c0_10, %c0_11] : memref<2x1024xf32, #tpu.memory_space<vmem>>, vector<2x1024xf32>
      tpu.vector_store %arg6[%c0_10, %c0_11], %13 {strides = array<i32>} : memref<2x1024xf32, #tpu.memory_space<vmem>>, vector<2x1024xf32>,
    } else {
    }
    %c0 = arith.constant 0 : index
    %c0_1 = arith.constant 0 : index
    %3 = vector.load %arg6[%c0, %c0_1] : memref<2x1024xf32, #tpu.memory_space<vmem>>, vector<2x1024xf32>
    %c0_2 = arith.constant 0 : index
    %c0_3 = arith.constant 0 : index
    %4 = vector.load %arg2[%c0_2, %c0_3] : memref<2x2048xf32, #tpu.memory_space<vmem>>, vector<2x2048xf32>
    %5 = arith.truncf %4 : vector<2x2048xf32> to vector<2x2048xbf16>
    %c0_4 = arith.constant 0 : index
    %c0_5 = arith.constant 0 : index
    %6 = vector.load %arg3[%c0_4, %c0_5] : memref<2048x1024xbf16, #tpu.memory_space<vmem>>, vector<2048x1024xbf16>
    %cst = arith.constant dense<0.000000e+00> : vector<2x1024xf32>
    %7 = tpu.matmul %5, %6, %cst {dimension_numbers = #tpu.dot_dimension_numbers<[1], [0], [0], [1], [0, 0, 1, 1], [], []>} : vector<2x2048xbf16>, vector<2048x1024xbf16>, vector<2x1024xf32> -> vector<2x1024xf32>
    %8 = arith.addf %3, %7 : vector<2x1024xf32>
    %c0_6 = arith.constant 0 : index
    %c0_7 = arith.constant 0 : index
    %9 = vector.load %arg6[%c0_6, %c0_7] : memref<2x1024xf32, #tpu.memory_space<vmem>>, vector<2x1024xf32>
    tpu.vector_store %arg6[%c0_6, %c0_7], %8 {strides = array<i32>} : memref<2x1024xf32, #tpu.memory_space<vmem>>, vector<2x1024xf32>,
    %c1_i32 = arith.constant 1 : i32
    %10 = arith.cmpi eq, %arg1, %c1_i32 : i32
    %11 = arith.extui %10 : i1 to i32
    %c0_i32_8 = arith.constant 0 : i32
    %12 = arith.cmpi ne, %11, %c0_i32_8 : i32
    scf.if %12 {
      %c0_9 = arith.constant 0 : index
      %c0_10 = arith.constant 0 : index
      %13 = vector.load %arg6[%c0_9, %c0_10] : memref<2x1024xf32, #tpu.memory_space<vmem>>, vector<2x1024xf32>
      %c0_11 = arith.constant 0 : index
      %c0_12 = arith.constant 0 : index
      %14 = vector.load %arg4[%c0_11, %c0_12] : memref<1x1024xf32, #tpu.memory_space<vmem>>, vector<1x1024xf32>
      %15 = vector.broadcast %14 : vector<1x1024xf32> to vector<2x1024xf32>
      %16 = arith.addf %13, %15 : vector<2x1024xf32>
      %cst_13 = arith.constant 0.000000e+00 : f32
      %17 = vector.broadcast %cst_13 : f32 to vector<2x1024xf32>
      %18 = arith.maximumf %16, %17 : vector<2x1024xf32>
      %c0_14 = arith.constant 0 : index
      %c0_15 = arith.constant 0 : index
      %19 = vector.load %arg5[%c0_14, %c0_15] : memref<2x1024xf32, #tpu.memory_space<vmem>>, vector<2x1024xf32>
      tpu.vector_store %arg5[%c0_14, %c0_15], %18 {strides = array<i32>} : memref<2x1024xf32, #tpu.memory_space<vmem>>, vector<2x1024xf32>,
    } else {
    }
    return
  }
  func.func @transform_0(%arg0: i32, %arg1: i32) -> (i32, i32) {
    %c0_i32 = arith.constant 0 : i32
    %c0_i32_0 = arith.constant 0 : i32
    return %c0_i32, %arg1 : i32, i32
  }
  func.func @transform_1(%arg0: i32, %arg1: i32) -> (i32, i32) {
    %c0_i32 = arith.constant 0 : i32
    return %arg1, %arg0 : i32, i32
  }
  func.func @transform_2(%arg0: i32, %arg1: i32) -> (i32, i32) {
    %c0_i32 = arith.constant 0 : i32
    %c0_i32_0 = arith.constant 0 : i32
    return %c0_i32, %arg0 : i32, i32
  }
  func.func @transform_3(%arg0: i32, %arg1: i32) -> (i32, i32) {
    %c0_i32 = arith.constant 0 : i32
    %c0_i32_0 = arith.constant 0 : i32
    return %c0_i32, %arg0 : i32, i32
  }
}

module attributes {stable_mosaic.version = 11 : i64} {
  func.func @fc2_softmax_kernel(%arg0: memref<2x2048xf32, #tpu.memory_space<vmem>>, %arg1: memref<2048x512xbf16, #tpu.memory_space<vmem>>, %arg2: memref<1x512xf32, #tpu.memory_space<vmem>>, %arg3: memref<2x512xf32, #tpu.memory_space<vmem>>) attributes {dimension_semantics = [], scalar_prefetch = 0 : i64, scratch_operands = 0 : i64, tpu.core_type = #tpu.core_type<tc>} {
    %c0 = arith.constant 0 : index
    %c0_0 = arith.constant 0 : index
    %0 = vector.load %arg0[%c0, %c0_0] : memref<2x2048xf32, #tpu.memory_space<vmem>>, vector<2x2048xf32>
    %1 = arith.truncf %0 : vector<2x2048xf32> to vector<2x2048xbf16>
    %c0_1 = arith.constant 0 : index
    %c0_2 = arith.constant 0 : index
    %2 = vector.load %arg1[%c0_1, %c0_2] : memref<2048x512xbf16, #tpu.memory_space<vmem>>, vector<2048x512xbf16>
    %cst = arith.constant dense<0.000000e+00> : vector<2x512xf32>
    %3 = tpu.matmul %1, %2, %cst {dimension_numbers = #tpu.dot_dimension_numbers<[1], [0], [0], [1], [0, 0, 1, 1], [], []>} : vector<2x2048xbf16>, vector<2048x512xbf16>, vector<2x512xf32> -> vector<2x512xf32>
    %c0_3 = arith.constant 0 : index
    %c0_4 = arith.constant 0 : index
    %4 = vector.load %arg2[%c0_3, %c0_4] : memref<1x512xf32, #tpu.memory_space<vmem>>, vector<1x512xf32>
    %5 = vector.broadcast %4 : vector<1x512xf32> to vector<2x512xf32>
    %6 = arith.addf %3, %5 : vector<2x512xf32>
    %cst_5 = arith.constant dense<0xFF800000> : vector<2xf32>
    %7 = vector.multi_reduction <maximumf>, %6, %cst_5 [1] : vector<2x512xf32> to vector<2xf32>
    %8 = vector.shape_cast %7 : vector<2xf32> to vector<2x1xf32>
    %9 = vector.broadcast %8 : vector<2x1xf32> to vector<2x512xf32>
    %10 = arith.subf %6, %9 : vector<2x512xf32>
    %11 = math.exp %10 : vector<2x512xf32>
    %cst_6 = arith.constant dense<0.000000e+00> : vector<2xf32>
    %12 = vector.multi_reduction <add>, %11, %cst_6 [1] : vector<2x512xf32> to vector<2xf32>
    %13 = vector.shape_cast %12 : vector<2xf32> to vector<2x1xf32>
    %14 = tpu.reciprocal %13 {approx = true} : vector<2x1xf32> -> vector<2x1xf32>
    %15 = vector.broadcast %14 : vector<2x1xf32> to vector<2x512xf32>
    %16 = arith.mulf %11, %15 : vector<2x512xf32>
    %c0_7 = arith.constant 0 : index
    %c0_8 = arith.constant 0 : index
    %17 = vector.load %arg3[%c0_7, %c0_8] : memref<2x512xf32, #tpu.memory_space<vmem>>, vector<2x512xf32>
    tpu.vector_store %arg3[%c0_7, %c0_8], %16 {strides = array<i32>} : memref<2x512xf32, #tpu.memory_space<vmem>>, vector<2x512xf32>,
    return
  }
}

</mosaic_0001>

<bundles_post_ra>
// kernel: model_forward.3
= control target key start
LH: loop header
LB: loop body
LE: loop exit
PB: predicated region body
PF: predicated region fallthrough
CT: control target
= control target key end

     0   :  { %10 = vsyncpa [#allocation3], 0  ;;  %s2733_s0 = inlined_call_operand.vmem [shape: f32[2,10,10,1], index: 0, kind: input, shape index: {}]   ;;  %s2734_s1 = inlined_call_operand.hbm [shape: f32[2,2,32], index: 1, kind: input, shape index: {}]   ;;  %s2735_s2 = inlined_call_operand.hbm [shape: f32[1,32], index: 2, kind: input, shape index: {}]   ;;  %s2736_s3 = inlined_call_operand.vmem [shape: f32[128,64], index: 3, kind: input, shape index: {}]   ;;  %s2737_s4 = inlined_call_operand.hbm [shape: f32[1,64], index: 4, kind: input, shape index: {}]   ;;  %s2738_s5 = inlined_call_operand.vmem [shape: f32[128,64], index: 5, kind: output, shape index: {}]  }
   0x1   :  { %11 = vsyncpa [#allocation5], 0  ;;  %s1764_s18 = smov [#allocation4]   ;;  %s1765_s20 = smov [#allocation2]  }
   0x2   :  { %s32_s19 = sshll.u32 %s1764_s18, 4  ;;  %s19_s21 = sshll.u32 %s1765_s20, 4  ;;  %s33_s19 = int_to_ptr.vmem [resolvable:$true] %s32_s19  ;;  %s1802_s21 = int_to_ptr.vmem [resolvable:$true] %s19_s21 }
   0x3   :  { %s1694_s24 = scalar_lea.hbm %s2735_s2, 16 }
   0x4   :  { %p1695_p0 = scmp.ne.s32.totalorder %s2735_s2, %s1694_s24  ;;  %p1698_p1 = scmp.lt.u32.totalorder %s1694_s24, %s2735_s2 }
   0x6   :  { %p1700_p2 = pnand %p1698_p1, %p1695_p0 }
   0x8   :  { %1703 = shalt.err (!%p1700_p2)
}
   0x9   :  { %s1704_s29 = scalar_lea.vmem %s33_s19, 16  ;;  %s1708_s30 = scalar_lea.vmem %s33_s19, 32 }
   0xa   :  { %p1705_p3 = scmp.ne.s32.totalorder %s33_s19, %s1704_s29  ;;  %p1709_p4 = scmp.lt.s32.totalorder %s33_s19, %s33_s19 }
   0xb   :  { %p1710_p5 = scmp.lt.s32.totalorder %s1708_s30, %s1704_s29 }
   0xd   :  { %p1711_p6 = por %p1710_p5, %p1709_p4 }
   0xf   :  { %p1712_p7 = pnand %p1711_p6, %p1705_p3 }
  0x11   :  { %1715 = shalt.err (!%p1712_p7)
}
  0x12   :  { %35 = dma.hbm_to_vmem [thread:$0]  %s2735_s2, 16, %s33_s19, [#allocation5]  }
  0x13   :  { %s1716_s10 = scalar_lea.hbm %s2734_s1, 64 }
  0x14   :  { %p1717_p8 = scmp.ne.s32.totalorder %s2734_s1, %s1716_s10  ;;  %p1720_p9 = scmp.lt.u32.totalorder %s1716_s10, %s2734_s1 }
  0x16   :  { %p1722_p10 = pnand %p1720_p9, %p1717_p8 }
  0x18   :  { %1725 = shalt.err (!%p1722_p10)
}
  0x19   :  { %s1726_s15 = scalar_lea.vmem %s1802_s21, 64  ;;  %p1731_p12 = scmp.lt.s32.totalorder %s1802_s21, %s1802_s21 }
  0x1a   :  { %p1727_p11 = scmp.ne.s32.totalorder %s1802_s21, %s1726_s15  ;;  %p1732_p13 = scmp.lt.s32.totalorder %s1726_s15, %s1726_s15 }
  0x1c   :  { %p1733_p0 = por %p1732_p13, %p1731_p12 }
  0x1e   :  { %p1734_p1 = pnand %p1733_p0, %p1727_p11 }
  0x20   :  { %1737 = shalt.err (!%p1734_p1)
}
  0x21   :  { %s1766_s2 = smov 32   ;;  %s1767_s16 = smov 2  }
  0x22   :  { %25 = dma.hbm_to_vmem [thread:$0]  %s2734_s1, 64, %s1802_s21, [#allocation3], %s1766_s2, %s1766_s2, %s1767_s16  }
  0x23   :  { %s1768_s19 = smov [#allocation6]   ;;  %s1738_s24 = scalar_lea.hbm %s2737_s4, 16 }
  0x24   :  { %s44_s20 = sshll.u32 %s1768_s19, 4  ;;  %p1739_p2 = scmp.ne.s32.totalorder %s2737_s4, %s1738_s24  ;;  %s45_s20 = int_to_ptr.vmem [resolvable:$true] %s44_s20 }
  0x25   :  { %p1742_p3 = scmp.lt.u32.totalorder %s1738_s24, %s2737_s4 }
  0x27   :  { %p1744_p4 = pnand %p1742_p3, %p1739_p2 }
  0x29   :  { %1747 = shalt.err (!%p1744_p4)
}
  0x2a   :  { %s1748_s29 = scalar_lea.vmem %s45_s20, 16  ;;  %s1752_s1 = scalar_lea.vmem %s45_s20, 32 }
  0x2b   :  { %p1749_p5 = scmp.ne.s32.totalorder %s45_s20, %s1748_s29  ;;  %p1753_p6 = scmp.lt.s32.totalorder %s45_s20, %s45_s20 }
  0x2c   :  { %p1754_p7 = scmp.lt.s32.totalorder %s1752_s1, %s1748_s29 }
  0x2e   :  { %p1755_p8 = por %p1754_p7, %p1753_p6 }
  0x30   :  { %p1756_p9 = pnand %p1755_p8, %p1749_p5 }
  0x32   :  { %1759 = shalt.err (!%p1756_p9)
}
  0x33   :  { %47 = dma.hbm_to_vmem [thread:$0]  %s2737_s4, 16, %s45_s20, [#allocation5]  }
  0x34   :  { %1760 = dma.done.wait [#allocation3], 64  }
  0x35   :  { %1761 = vsyncadd [#allocation3], 4294967232 }
  0x36   :  { %1762 = dma.done.wait [#allocation5], 32  }
  0x37   :  { %1763 = vsyncadd [#allocation5], 4294967264  ;;  %v1769_v0 = vmov 0   ;;  %v77_v1 = vld [vmem:[%s2733_s0 + $0xa0] sm:$0xff]  ;;  %v78_v3 = vld [vmem:[%s2733_s0 + $0xa8] sm:$0x3]  ;;  %v279_v41 = vlaneseq }
  0x38   :  { %1573 = vset.pattern.permute.xlu1 %v1769_v0  ;;  %1572 = vset.pattern.permute.xlu0 %v1769_v0  ;;  %v57_v2 = vld [vmem:[%s2733_s0] sm:$0xff]  ;;  %v58_v4 = vld [vmem:[%s2733_s0 + $0x8] sm:$0x3]  ;;  %v60_v5 = vld [vmem:[%s2733_s0 + $0x18] sm:$0x3]  ;;  %vm431_vm0 = vcmask 1046528  }
  0x39   :  { %191 = vperm.xlu1 %1573, %v77_v1   ;;  %101 = vperm.xlu0 %1572, %v57_v2   ;;  %v59_v6 = vld [vmem:[%s2733_s0 + $0x10] sm:$0xff]  ;;  %v80_v7 = vld [vmem:[%s2733_s0 + $0xb8] sm:$0x3]  ;;  %v62_v9 = vld [vmem:[%s2733_s0 + $0x28] sm:$0x3]  ;;  %v280_v42 = vshrl.u32 %v279_v41, 7 }
  0x3a   :  { %v79_v8 = vld [vmem:[%s2733_s0 + $0xb0] sm:$0xff]  ;;  %v61_v10 = vld [vmem:[%s2733_s0 + $0x20] sm:$0xff]  ;;  %v82_v11 = vld [vmem:[%s2733_s0 + $0xc8] sm:$0x3]  ;;  %s1771_s30 = smov 96   ;;  %vm1169_vm1 = vcmask 261120  }
  0x3b   :  { %v81_v12 = vld [vmem:[%s2733_s0 + $0xc0] sm:$0xff]  ;;  %v64_v13 = vld [vmem:[%s2733_s0 + $0x38] sm:$0x3]  ;;  %v63_v14 = vld [vmem:[%s2733_s0 + $0x30] sm:$0xff]  ;;  %v357_v43 = vsub.s32 1, %v280_v42  ;;  %v281_v46 = vsub.s32 0, %v280_v42 }
  0x3c   :  { %v84_v15 = vld [vmem:[%s2733_s0 + $0xd8] sm:$0x3]  ;;  %v83_v16 = vld [vmem:[%s2733_s0 + $0xd0] sm:$0xff]  ;;  %v66_v17 = vld [vmem:[%s2733_s0 + $0x48] sm:$0x3]  ;;  %vm1186_vm2 = vcmask 523264  }
  0x3d   :  { %196 = vperm.xlu1 %1573, %v78_v3   ;;  %106 = vperm.xlu0 %1572, %v58_v4   ;;  %v65_v18 = vld [vmem:[%s2733_s0 + $0x40] sm:$0xff]  ;;  %v86_v19 = vld [vmem:[%s2733_s0 + $0xe8] sm:$0x3]  ;;  %v68_v21 = vld [vmem:[%s2733_s0 + $0x58] sm:$0x3]  ;;  %vm1203_vm3 = vcmask 785408  }
  0x3e   :  { %v85_v20 = vld [vmem:[%s2733_s0 + $0xe0] sm:$0xff]  ;;  %v67_v22 = vld [vmem:[%s2733_s0 + $0x50] sm:$0xff]  ;;  %v88_v23 = vld [vmem:[%s2733_s0 + $0xf8] sm:$0x3] }
  0x3f   :  { %v87_v24 = vld [vmem:[%s2733_s0 + $0xf0] sm:$0xff]  ;;  %v70_v25 = vld [vmem:[%s2733_s0 + $0x68] sm:$0x3]  ;;  %v69_v26 = vld [vmem:[%s2733_s0 + $0x60] sm:$0xff] }
  0x40   :  { %v90_v27 = vld [vmem:[%s2733_s0 + $0x108] sm:$0x3]  ;;  %v89_v28 = vld [vmem:[%s2733_s0 + $0x100] sm:$0xff]  ;;  %v72_v29 = vld [vmem:[%s2733_s0 + $0x78] sm:$0x3] }
  0x41   :  { %116 = vperm.xlu1 %1573, %v60_v5   ;;  %111 = vperm.xlu0 %1572, %v59_v6   ;;  %v71_v30 = vld [vmem:[%s2733_s0 + $0x70] sm:$0xff]  ;;  %v92_v31 = vld [vmem:[%s2733_s0 + $0x118] sm:$0x3]  ;;  %v74_v33 = vld [vmem:[%s2733_s0 + $0x88] sm:$0x3] }
  0x42   :  { %v91_v32 = vld [vmem:[%s2733_s0 + $0x110] sm:$0xff]  ;;  %v73_v34 = vld [vmem:[%s2733_s0 + $0x80] sm:$0xff]  ;;  %v94_v35 = vld [vmem:[%s2733_s0 + $0x128] sm:$0x3] }
  0x43   :  { %v93_v36 = vld [vmem:[%s2733_s0 + $0x120] sm:$0xff]  ;;  %v76_v37 = vld [vmem:[%s2733_s0 + $0x98] sm:$0x3]  ;;  %v75_v38 = vld [vmem:[%s2733_s0 + $0x90] sm:$0xff] }
  0x44   :  { %v96_v39 = vld [vmem:[%s2733_s0 + $0x138] sm:$0x3]  ;;  %v95_v40 = vld [vmem:[%s2733_s0 + $0x130] sm:$0xff]  ;;  %v97_v44 = vld [vmem:[#allocation2] sm:$0x3]  ;;  %s1770_s0 = smov 64  }
  0x45   :  { %206 = vperm.xlu1 %1573, %v80_v7   ;;  %201 = vperm.xlu0 %1572, %v79_v8   ;;  %v1967_v45 = vrot.slane %v97_v44, %v357_v43  ;;  %v98_v51 = vld [vmem:[#allocation2 + $0x2] sm:$0x3]  ;;  %v1971_v52 = vrot.slane %v97_v44, %v281_v46 }
  0x46   :  { %v1975_v58 = vrot.slane %v98_v51, %v281_v46  ;;  %v1977_v59 = vrot.slane %v98_v51, %v357_v43 }
  0x49   :  { %126 = vperm.xlu1 %1573, %v62_v9   ;;  %121 = vperm.xlu0 %1572, %v61_v10  }
  0x4d   :  { %216 = vperm.xlu1 %1573, %v82_v11   ;;  %211 = vperm.xlu0 %1572, %v81_v12  }
  0x51   :  { %136 = vperm.xlu1 %1573, %v64_v13   ;;  %131 = vperm.xlu0 %1572, %v63_v14  }
  0x55   :  { %226 = vperm.xlu1 %1573, %v84_v15   ;;  %221 = vperm.xlu0 %1572, %v83_v16  }
  0x59   :  { %146 = vperm.xlu1 %1573, %v66_v17   ;;  %141 = vperm.xlu0 %1572, %v65_v18  }
  0x5d   :  { %236 = vperm.xlu1 %1573, %v86_v19   ;;  %231 = vperm.xlu0 %1572, %v85_v20  }
  0x61   :  { %156 = vperm.xlu1 %1573, %v68_v21   ;;  %151 = vperm.xlu0 %1572, %v67_v22  }
  0x65   :  { %246 = vperm.xlu1 %1573, %v88_v23   ;;  %241 = vperm.xlu0 %1572, %v87_v24  }
  0x69   :  { %166 = vperm.xlu1 %1573, %v70_v25   ;;  %161 = vperm.xlu0 %1572, %v69_v26  }
  0x6d   :  { %256 = vperm.xlu1 %1573, %v90_v27   ;;  %251 = vperm.xlu0 %1572, %v89_v28  }
  0x71   :  { %176 = vperm.xlu1 %1573, %v72_v29   ;;  %171 = vperm.xlu0 %1572, %v71_v30  }
  0x75   :  { %266 = vperm.xlu1 %1573, %v92_v31   ;;  %261 = vperm.xlu0 %1572, %v91_v32  }
  0x79   :  { %186 = vperm.xlu1 %1573, %v74_v33   ;;  %181 = vperm.xlu0 %1572, %v73_v34  }
  0x7d   :  { %276 = vperm.xlu1 %1573, %v94_v35   ;;  %271 = vperm.xlu0 %1572, %v93_v36  }
  0x81   :  { %565 = vperm.xlu1 %1573, %v76_v37   ;;  %560 = vperm.xlu0 %1572, %v75_v38  }
  0x85   :  { %575 = vperm.xlu1 %1573, %v96_v39   ;;  %570 = vperm.xlu0 %1572, %v95_v40  }
  0xb8   :  { %v192_v47 = vpop.permute.xlu1 %191  ;;  %v102_v48 = vpop.permute.xlu0 %101 }
  0xb9   :  { %v377_v49 = vmul.f32 %v1967_v45, %v192_v47  ;;  %v359_v50 = vmul.f32 %v1967_v45, %v102_v48  ;;  %v301_v0 = vmul.f32 %v1971_v52, %v192_v47  ;;  %v283_v1 = vmul.f32 %v1971_v52, %v102_v48 }
  0xbb   :  { %v459_v57 = vrot.slane %v377_v49, 1  ;;  %v432_v60 = vrot.slane %v359_v50, 1 }
  0xbc   :  { %v197_v53 = vpop.permute.xlu1 %196  ;;  %v107_v54 = vpop.permute.xlu0 %106 }
  0xbd   :  { %v378_v55 = vmul.f32 %v1967_v45, %v197_v53  ;;  %v360_v56 = vmul.f32 %v1967_v45, %v107_v54  ;;  %v284_v62 = vmul.f32 %v1971_v52, %v107_v54  ;;  %v302_v18 = vmul.f32 %v1971_v52, %v197_v53 }
  0xbf   :  { %v460_v61 = vrot.slane %v378_v55, 1  ;;  %v433_v63 = vrot.slane %v360_v56, 1 }
  0xc0   :  { %v117_v2 = vpop.permute.xlu1 %116  ;;  %v112_v3 = vpop.permute.xlu0 %111 }
  0xc1   :  { %v461_v4 = vsel %vm431_vm0, %v459_v57, %v460_v61  ;;  %v434_v5 = vsel %vm431_vm0, %v432_v60, %v433_v63  ;;  %v523_v6 = vadd.f32 %v433_v63, %v284_v62  ;;  %v362_v9 = vmul.f32 %v1967_v45, %v117_v2 }
  0xc2   :  { %v540_v7 = vadd.f32 %v461_v4, %v301_v0  ;;  %v522_v8 = vadd.f32 %v434_v5, %v283_v1  ;;  %v583_v10 = vmul.f32 %v1975_v58, %v117_v2  ;;  %v659_v11 = vmul.f32 %v1977_v59, %v117_v2 }
  0xc3   :  { %v286_v12 = vmul.f32 %v1971_v52, %v117_v2  ;;  %v436_v13 = vrot.slane %v362_v9, 1  ;;  %v582_v14 = vmul.f32 %v1975_v58, %v112_v3  ;;  %v658_v15 = vmul.f32 %v1977_v59, %v112_v3 }
  0xc4   :  { %v207_v16 = vpop.permute.xlu1 %206  ;;  %v202_v17 = vpop.permute.xlu0 %201  ;;  %v619_v19 = vadd.f32 %v583_v10, %v523_v6  ;;  %v731_v20 = vrot.slane %v659_v11, 1  ;;  %v541_v25 = vadd.f32 %v460_v61, %v302_v18  ;;  %v361_v34 = vmul.f32 %v1967_v45, %v112_v3 }
  0xc5   :  { %v525_v21 = vadd.f32 %v436_v13, %v286_v12  ;;  %v618_v22 = vadd.f32 %v582_v14, %v522_v8  ;;  %v730_v23 = vrot.slane %v658_v15, 1  ;;  %v380_v24 = vmul.f32 %v1967_v45, %v207_v16 }
  0xc6   :  { %v1992_v26 = vadd.f32 %v731_v20, %v619_v19  ;;  %v601_v27 = vmul.f32 %v1975_v58, %v207_v16  ;;  %v677_v28 = vmul.f32 %v1977_v59, %v207_v16  ;;  %v304_v30 = vmul.f32 %v1971_v52, %v207_v16 }
  0xc7   :  { %v732_v29 = vsel %vm431_vm0, %v730_v23, %v731_v20  ;;  %v463_v31 = vrot.slane %v380_v24, 1  ;;  %v600_v39 = vmul.f32 %v1975_v58, %v202_v17  ;;  %v676_v40 = vmul.f32 %v1977_v59, %v202_v17 }
  0xc8   :  { %v127_v32 = vpop.permute.xlu1 %126  ;;  %v122_v33 = vpop.permute.xlu0 %121  ;;  %v1999_v35 = vadd.f32 %v732_v29, %v618_v22  ;;  %v637_v36 = vadd.f32 %v601_v27, %v541_v25  ;;  %v758_v37 = vrot.slane %v677_v28, 1  ;;  %v435_v49 = vrot.slane %v361_v34, 1 }
  0xc9   :  { %v543_v38 = vadd.f32 %v463_v31, %v304_v30  ;;  %v585_v42 = vmul.f32 %v1975_v58, %v127_v32  ;;  %v636_v43 = vadd.f32 %v600_v39, %v540_v7  ;;  %v757_v44 = vrot.slane %v676_v40, 1  ;;  %v2036_v40 = vld [vmem:[#allocation4] ss:$0 sm:$0xff] }
  0xca   :  { %v2003_v41 = vadd.f32 %v758_v37, %v637_v36  ;;  %v661_v46 = vmul.f32 %v1977_v59, %v127_v32  ;;  %v379_v51 = vmul.f32 %v1967_v45, %v202_v17  ;;  %v364_v54 = vmul.f32 %v1967_v45, %v127_v32 }
  0xcb   :  { %v621_v50 = vadd.f32 %v585_v42, %v525_v21  ;;  %v759_v53 = vsel %vm431_vm0, %v757_v44, %v758_v37  ;;  %v363_v57 = vmul.f32 %v1967_v45, %v122_v33  ;;  %v285_v63 = vmul.f32 %v1971_v52, %v112_v3 }
  0xcc   :  { %v217_v47 = vpop.permute.xlu1 %216  ;;  %v212_v48 = vpop.permute.xlu0 %211  ;;  %v734_v55 = vrot.slane %v661_v46, 1  ;;  %v2010_v56 = vadd.f32 %v759_v53, %v636_v43  ;;  %v660_v0 = vmul.f32 %v1977_v59, %v122_v33  ;;  %v437_v4 = vsel %vm431_vm0, %v435_v49, %v436_v13 }
  0xcd   :  { %v603_v1 = vmul.f32 %v1975_v58, %v217_v47  ;;  %v679_v2 = vmul.f32 %v1977_v59, %v217_v47  ;;  %v462_v5 = vrot.slane %v379_v51, 1  ;;  %v439_v6 = vrot.slane %v364_v54, 1 }
  0xce   :  { %v823_v60 = vadd.f32 %v734_v55, %v621_v50  ;;  %v584_v7 = vmul.f32 %v1975_v58, %v122_v33  ;;  %v438_v8 = vrot.slane %v363_v57, 1  ;;  %v382_v9 = vmul.f32 %v1967_v45, %v217_v47 }
  0xcf   :  { %v639_v10 = vadd.f32 %v603_v1, %v543_v38  ;;  %v761_v11 = vrot.slane %v679_v2, 1  ;;  %v288_v12 = vmul.f32 %v1971_v52, %v127_v32  ;;  %v381_v3 = vmul.f32 %v1967_v45, %v212_v48 }
  0xd0   :  { %v137_v61 = vpop.permute.xlu1 %136  ;;  %v132_v62 = vpop.permute.xlu0 %131  ;;  %v524_v16 = vadd.f32 %v437_v4, %v285_v63  ;;  %v733_v18 = vrot.slane %v660_v0, 1  ;;  %v678_v13 = vmul.f32 %v1977_v59, %v212_v48  ;;  %v303_v20 = vmul.f32 %v1971_v52, %v202_v17 }
  0xd1   :  { %v841_v19 = vadd.f32 %v761_v11, %v639_v10  ;;  %v527_v21 = vadd.f32 %v439_v6, %v288_v12  ;;  %v587_v22 = vmul.f32 %v1975_v58, %v137_v61  ;;  %v464_v23 = vsel %vm431_vm0, %v462_v5, %v463_v31 }
  0xd2   :  { %v440_v24 = vsel %vm431_vm0, %v438_v8, %v439_v6  ;;  %v620_v25 = vadd.f32 %v584_v7, %v524_v16  ;;  %v466_v27 = vrot.slane %v382_v9, 1  ;;  %v465_v28 = vrot.slane %v381_v3, 1 }
  0xd3   :  { %v602_v29 = vmul.f32 %v1975_v58, %v212_v48  ;;  %v366_v30 = vmul.f32 %v1967_v45, %v137_v61  ;;  %v623_v32 = vadd.f32 %v587_v22, %v527_v21  ;;  %v287_v34 = vmul.f32 %v1971_v52, %v122_v33 }
  0xd4   :  { %v227_v14 = vpop.permute.xlu1 %226  ;;  %v222_v15 = vpop.permute.xlu0 %221  ;;  %v735_v36 = vsel %vm431_vm0, %v733_v18, %v734_v55  ;;  %v760_v17 = vrot.slane %v678_v13, 1  ;;  %v663_v37 = vmul.f32 %v1977_v59, %v137_v61  ;;  %v542_v39 = vadd.f32 %v464_v23, %v303_v20 }
  0xd5   :  { %v306_v42 = vmul.f32 %v1971_v52, %v217_v47  ;;  %v365_v43 = vmul.f32 %v1967_v45, %v132_v62  ;;  %v2041_v44 = vadd.f32 %v2036_v40, %v823_v60  ;;  %v526_v33 = vadd.f32 %v440_v24, %v287_v34 }
  0xd6   :  { %v305_v46 = vmul.f32 %v1971_v52, %v212_v48  ;;  %v662_v49 = vmul.f32 %v1977_v59, %v132_v62  ;;  %v822_v50 = vadd.f32 %v735_v36, %v620_v25  ;;  %v467_v51 = vsel %vm431_vm0, %v465_v28, %v466_v27 }
  0xd7   :  { %v638_v53 = vadd.f32 %v602_v29, %v542_v39  ;;  %v442_v54 = vrot.slane %v366_v30, 1  ;;  %v545_v55 = vadd.f32 %v466_v27, %v306_v42  ;;  %v762_v57 = vsel %vm431_vm0, %v760_v17, %v761_v11 }
  0xd8   :  { %v2032_v38 = vpop.permute.xlu1 %146  ;;  %v2034_v31 = vpop.permute.xlu0 %141  ;;  %v737_v63 = vrot.slane %v663_v37, 1  ;;  %v586_v47 = vmul.f32 %v1975_v58, %v132_v62  ;;  %v2049_v0 = vadd.f32 %v2036_v40, %v841_v19  ;;  %v290_v60 = vmul.f32 %v1971_v52, %v137_v61 }
  0xd9   :  { %v441_v1 = vrot.slane %v365_v43, 1  ;;  %v384_v48 = vmul.f32 %v1967_v45, %v227_v14  ;;  %v544_v2 = vadd.f32 %v467_v51, %v305_v46  ;;  %v289_v4 = vmul.f32 %v1971_v52, %v132_v62 }
  0xda   :  { %v736_v5 = vrot.slane %v662_v49, 1  ;;  %v383_v6 = vmul.f32 %v1967_v45, %v222_v15  ;;  %v840_v9 = vadd.f32 %v762_v57, %v638_v53  ;;  %v529_v10 = vadd.f32 %v442_v54, %v290_v60 }
  0xdb   :  { %v681_v11 = vmul.f32 %v1977_v59, %v227_v14  ;;  %v680_v12 = vmul.f32 %v1977_v59, %v222_v15  ;;  %v2061_v61 = vadd.f32 %v737_v63, %v623_v32  ;;  %v622_v3 = vadd.f32 %v586_v47, %v526_v33 }
  0xdc   :  { %v2055_v7 = vpop.permute.xlu1 %236  ;;  %v2057_v8 = vpop.permute.xlu0 %231  ;;  %v308_v16 = vmul.f32 %v1971_v52, %v227_v14  ;;  %v605_v62 = vmul.f32 %v1975_v58, %v227_v14  ;;  %v443_v18 = vsel %vm431_vm0, %v441_v1, %v442_v54  ;;  %v469_v19 = vrot.slane %v384_v48, 1 }
  0xdd   :  { %v307_v13 = vmul.f32 %v1971_v52, %v222_v15  ;;  %v604_v20 = vmul.f32 %v1975_v58, %v222_v15  ;;  %v738_v21 = vsel %vm431_vm0, %v736_v5, %v737_v63  ;;  %v468_v22 = vrot.slane %v383_v6, 1 }
  0xde   :  { %v368_v23 = vmul.f32 %v1967_v45, %v2032_v38  ;;  %v865_v24 = vadd.f32 %v2036_v40, %v822_v50  ;;  %v764_v25 = vrot.slane %v681_v11, 1  ;;  %v763_v27 = vrot.slane %v680_v12, 1 }
  0xdf   :  { %v589_v14 = vmul.f32 %v1975_v58, %v2032_v38  ;;  %v665_v28 = vmul.f32 %v1977_v59, %v2032_v38  ;;  %v528_v29 = vadd.f32 %v443_v18, %v289_v4  ;;  %v641_v30 = vadd.f32 %v605_v62, %v545_v55 }
  0xe0   :  { %v367_v15 = vmul.f32 %v1967_v45, %v2034_v31  ;;  %v883_v32 = vadd.f32 %v2036_v40, %v840_v9  ;;  %v2079_v34 = vpop.permute.xlu1 %156  ;;  %v2081_v36 = vpop.permute.xlu0 %151  ;;  %v824_v17 = vadd.f32 %v738_v21, %v622_v3  ;;  %v547_v37 = vadd.f32 %v469_v19, %v308_v16 }
  0xe1   :  { %v640_v39 = vadd.f32 %v604_v20, %v544_v2  ;;  %v664_v42 = vmul.f32 %v1977_v59, %v2034_v31  ;;  %v470_v43 = vsel %vm431_vm0, %v468_v22, %v469_v19  ;;  %v445_v33 = vrot.slane %v368_v23, 1 }
  0xe2   :  { %v2086_v46 = vmax.f32 %v865_v24, 0.0  ;;  %v2088_v49 = vmax.f32 %v883_v32, 0.0  ;;  %v765_v50 = vsel %vm431_vm0, %v763_v27, %v764_v25  ;;  %v625_v51 = vadd.f32 %v589_v14, %v529_v10 }
  0xe3   :  { %v740_v53 = vrot.slane %v665_v28, 1  ;;  %v588_v54 = vmul.f32 %v1975_v58, %v2034_v31  ;;  %v444_v55 = vrot.slane %v367_v15, 1  ;;  %v607_v63 = vmul.f32 %v1975_v58, %v2055_v7 }
  0xe4   :  { %v1574_v57 = vpack.i.bf16 %v2088_v49, %v2086_v46  ;;  %v683_v47 = vmul.f32 %v1977_v59, %v2055_v7  ;;  %v292_v60 = vmul.f32 %v1971_v52, %v2032_v38  ;;  %v739_v1 = vrot.slane %v664_v42, 1  ;;  %v2112_v38 = vpop.permute.xlu1 %246  ;;  %v2114_v10 = vpop.permute.xlu0 %241 }
  0xe5   :  { %v386_v48 = vmul.f32 %v1967_v45, %v2055_v7  ;;  %v385_v2 = vmul.f32 %v1967_v45, %v2057_v8  ;;  %v2105_v4 = vadd.f32 %v764_v25, %v641_v30  ;;  %v546_v5 = vadd.f32 %v470_v43, %v307_v13 }
  0xe6   :  { %v291_v6 = vmul.f32 %v1971_v52, %v2034_v31  ;;  %1575 = vrot.lane.b32.xlu0 %v1574_v57, %s1770_s0  ;;  %v682_v9 = vmul.f32 %v1977_v59, %v2057_v8  ;;  %v842_v11 = vadd.f32 %v765_v50, %v640_v39  ;;  %v531_v12 = vadd.f32 %v445_v33, %v292_v60 }
  0xe7   :  { %v827_v3 = vadd.f32 %v740_v53, %v625_v51  ;;  %v624_v16 = vadd.f32 %v588_v54, %v528_v29  ;;  %v446_v62 = vsel %vm431_vm0, %v444_v55, %v445_v33  ;;  %v643_v18 = vadd.f32 %v607_v63, %v547_v37 }
  0xe8   :  { %v767_v19 = vrot.slane %v683_v47, 1  ;;  %v606_v31 = vmul.f32 %v1975_v58, %v2057_v8  ;;  %v741_v13 = vsel %vm431_vm0, %v739_v1, %v740_v53  ;;  %v310_v20 = vmul.f32 %v1971_v52, %v2055_v7  ;;  %v167_v39 = vpop.permute.xlu1 %166  ;;  %v2135_v42 = vpop.permute.xlu0 %161 }
  0xe9   :  { %v472_v21 = vrot.slane %v386_v48, 1  ;;  %v471_v22 = vrot.slane %v385_v2, 1  ;;  %v766_v23 = vrot.slane %v682_v9, 1  ;;  %v370_v24 = vmul.f32 %v1967_v45, %v2079_v34 }
  0xea   :  { %v591_v25 = vmul.f32 %v1975_v58, %v2079_v34  ;;  %v667_v27 = vmul.f32 %v1977_v59, %v2079_v34  ;;  %v2129_v14 = vadd.f32 %v2036_v40, %v827_v3  ;;  %v369_v28 = vmul.f32 %v1967_v45, %v2081_v36 }
  0xeb   :  { %v867_v7 = vadd.f32 %v2036_v40, %v824_v17  ;;  %v885_v29 = vadd.f32 %v2036_v40, %v842_v11  ;;  %v530_v30 = vadd.f32 %v446_v62, %v291_v6  ;;  %v826_v15 = vadd.f32 %v741_v13, %v624_v16 }
  0xec   :  { %v845_v32 = vadd.f32 %v767_v19, %v643_v18  ;;  %v642_v37 = vadd.f32 %v606_v31, %v546_v5  ;;  %v473_v43 = vsel %vm431_vm0, %v471_v22, %v472_v21  ;;  %v666_v33 = vmul.f32 %v1977_v59, %v2081_v36  ;;  %v257_v62 = vpop.permute.xlu1 %256  ;;  %v2167_v18 = vpop.permute.xlu0 %251 }
  0xed   :  { %v2140_v50 = vmax.f32 %v867_v7, 0.0  ;;  %v2142_v51 = vmax.f32 %v885_v29, 0.0  ;;  %v768_v17 = vsel %vm431_vm0, %v766_v23, %v767_v19  ;;  %v448_v53 = vrot.slane %v370_v24, 1 }
  0xee   :  { %v627_v54 = vadd.f32 %v591_v25, %v531_v12  ;;  %v743_v55 = vrot.slane %v667_v27, 1  ;;  %v549_v57 = vadd.f32 %v472_v21, %v310_v20  ;;  %v309_v63 = vmul.f32 %v1971_v52, %v2057_v8 }
  0xef   :  { %v447_v47 = vrot.slane %v369_v28, 1  ;;  %v1579_v60 = vpack.i.bf16 %v2142_v51, %v2140_v50  ;;  %v2150_v1 = vadd.f32 %v2036_v40, %v845_v32  ;;  %v294_v48 = vmul.f32 %v1971_v52, %v2079_v34 }
  0xf0   :  { %v293_v2 = vmul.f32 %v1971_v52, %v2081_v36  ;;  %v590_v5 = vmul.f32 %v1975_v58, %v2081_v36  ;;  %v548_v6 = vadd.f32 %v473_v43, %v309_v63  ;;  %v844_v9 = vadd.f32 %v768_v17, %v642_v37  ;;  %v177_v63 = vpop.permute.xlu1 %176 }
  0xf1   :  { %v742_v11 = vrot.slane %v666_v33, 1  ;;  %1580 = vrot.lane.b32.xlu1 %v1579_v60, %s1770_s0  ;;  %v388_v8 = vmul.f32 %v1967_v45, %v2112_v38  ;;  %v533_v12 = vadd.f32 %v448_v53, %v294_v48  ;;  %v2161_v3 = vadd.f32 %v743_v55, %v627_v54 }
  0xf2   :  { %v685_v34 = vmul.f32 %v1977_v59, %v2112_v38  ;;  %v387_v16 = vmul.f32 %v1967_v45, %v2114_v10  ;;  %v449_v36 = vsel %vm431_vm0, %v447_v47, %v448_v53  ;;  %v684_v19 = vmul.f32 %v1977_v59, %v2114_v10  ;;  %v2190_v47 = vpop.permute.xlu0 %171 }
  0xf3   :  { %v593_v31 = vmul.f32 %v1975_v58, %v167_v39  ;;  %v669_v13 = vmul.f32 %v1977_v59, %v167_v39  ;;  %v626_v20 = vadd.f32 %v590_v5, %v530_v30  ;;  %v312_v21 = vmul.f32 %v1971_v52, %v2112_v38 }
  0xf4   :  { %v372_v22 = vmul.f32 %v1967_v45, %v167_v39  ;;  %v371_v23 = vmul.f32 %v1967_v45, %v2135_v42  ;;  %v744_v24 = vsel %vm431_vm0, %v742_v11, %v743_v55  ;;  %v475_v25 = vrot.slane %v388_v8, 1 }
  0xf5   :  { %v609_v27 = vmul.f32 %v1975_v58, %v2112_v38  ;;  %v668_v28 = vmul.f32 %v1977_v59, %v2135_v42  ;;  %v770_v7 = vrot.slane %v685_v34, 1  ;;  %v474_v29 = vrot.slane %v387_v16, 1 }
  0xf6   :  { %v608_v30 = vmul.f32 %v1975_v58, %v2114_v10  ;;  %v869_v32 = vadd.f32 %v2036_v40, %v826_v15  ;;  %v769_v37 = vrot.slane %v684_v19, 1  ;;  %v629_v43 = vadd.f32 %v593_v31, %v533_v12 }
  0xf7   :  { %v746_v33 = vrot.slane %v669_v13, 1  ;;  %v887_v17 = vadd.f32 %v2036_v40, %v844_v9  ;;  %v532_v53 = vadd.f32 %v449_v36, %v293_v2  ;;  %v451_v54 = vrot.slane %v372_v22, 1 }
  0xf8   :  { %v450_v55 = vrot.slane %v371_v23, 1  ;;  %v592_v38 = vmul.f32 %v1975_v58, %v2135_v42  ;;  %v311_v60 = vmul.f32 %v1971_v52, %v2114_v10  ;;  %v745_v48 = vrot.slane %v668_v28, 1  ;;  %v2218_v28 = vpop.permute.xlu0 %261 }
  0xf9   :  { %v2194_v5 = vmax.f32 %v869_v32, 0.0  ;;  %v2196_v15 = vmax.f32 %v887_v17, 0.0  ;;  %v828_v11 = vadd.f32 %v744_v24, %v626_v20  ;;  %v645_v8 = vadd.f32 %v609_v27, %v549_v57  ;;  %v2216_v27 = vpop.permute.xlu1 %266 }
  0xfa   :  { %v644_v9 = vadd.f32 %v608_v30, %v548_v6  ;;  %v296_v2 = vmul.f32 %v1971_v52, %v167_v39  ;;  %v476_v12 = vsel %vm431_vm0, %v474_v29, %v475_v25  ;;  %v771_v34 = vsel %vm431_vm0, %v769_v37, %v770_v7 }
  0xfb   :  { %v831_v16 = vadd.f32 %v746_v33, %v629_v43  ;;  %v1584_v36 = vpack.i.bf16 %v2196_v15, %v2194_v5  ;;  %v295_v10 = vmul.f32 %v1971_v52, %v2135_v42  ;;  %v452_v19 = vsel %vm431_vm0, %v450_v55, %v451_v54 }
  0xfc   :  { %v628_v31 = vadd.f32 %v592_v38, %v532_v53  ;;  %v390_v13 = vmul.f32 %v1967_v45, %v257_v62  ;;  %v747_v57 = vsel %vm431_vm0, %v745_v48, %v746_v33  ;;  %v687_v39 = vmul.f32 %v1977_v59, %v257_v62 }
  0xfd   :  { %1585 = vrot.lane.b32.xlu0 %v1584_v36, %s1770_s0  ;;  %v389_v6 = vmul.f32 %v1967_v45, %v2167_v18  ;;  %v686_v20 = vmul.f32 %v1977_v59, %v2167_v18  ;;  %v551_v22 = vadd.f32 %v475_v25, %v312_v21  ;;  %v2214_v23 = vadd.f32 %v770_v7, %v645_v8  ;;  %v2245_v36 = vpop.permute.xlu1 %186 }
  0xfe   :  { %v550_v42 = vadd.f32 %v476_v12, %v311_v60  ;;  %v846_v24 = vadd.f32 %v771_v34, %v644_v9  ;;  %v535_v29 = vadd.f32 %v451_v54, %v296_v2  ;;  %v2221_v30 = vadd.f32 %v2036_v40, %v831_v16 }
  0xff   :  { %v534_v32 = vadd.f32 %v452_v19, %v295_v10  ;;  %v611_v37 = vmul.f32 %v1975_v58, %v257_v62  ;;  %v830_v43 = vadd.f32 %v747_v57, %v628_v31  ;;  %v314_v33 = vmul.f32 %v1971_v52, %v257_v62 }
 0x100   :  { %v478_v17 = vrot.slane %v390_v13, 1  ;;  %v610_v21 = vmul.f32 %v1975_v58, %v2167_v18  ;;  %v773_v25 = vrot.slane %v687_v39, 1  ;;  %v477_v7 = vrot.slane %v389_v6, 1 }
 0x101   :  { %v772_v53 = vrot.slane %v686_v20, 1  ;;  %v374_v55 = vmul.f32 %v1967_v45, %v177_v63  ;;  %v313_v54 = vmul.f32 %v1971_v52, %v2167_v18  ;;  %v373_v38 = vmul.f32 %v1967_v45, %v2190_v47 }
 0x102   :  { %v871_v60 = vadd.f32 %v2036_v40, %v828_v11  ;;  %v889_v48 = vadd.f32 %v2036_v40, %v846_v24  ;;  %v647_v62 = vadd.f32 %v611_v37, %v551_v22  ;;  %v298_v8 = vmul.f32 %v1971_v52, %v177_v63  ;;  %v2247_v11 = vpop.permute.xlu0 %181 }
 0x103   :  { %v2236_v9 = vmul.f32 %v1977_v59, %v177_v63  ;;  %v670_v2 = vmul.f32 %v1977_v59, %v2190_v47  ;;  %v646_v12 = vadd.f32 %v610_v21, %v550_v42  ;;  %v595_v34 = vmul.f32 %v1975_v58, %v177_v63 }
 0x104   :  { %v2241_v18 = vmax.f32 %v871_v60, 0.0  ;;  %v2243_v16 = vmax.f32 %v889_v48, 0.0  ;;  %v479_v10 = vsel %vm431_vm0, %v477_v7, %v478_v17  ;;  %v774_v19 = vsel %vm431_vm0, %v772_v53, %v773_v25 }
 0x105   :  { %v454_v31 = vrot.slane %v374_v55, 1  ;;  %v2253_v13 = vmul.f32 %v1967_v45, %v2216_v27  ;;  %v453_v57 = vrot.slane %v373_v38, 1  ;;  %v594_v63 = vmul.f32 %v1975_v58, %v2190_v47 }
 0x106   :  { %v1589_v39 = vpack.i.bf16 %v2243_v16, %v2241_v18  ;;  %v2261_v6 = vmul.f32 %v1977_v59, %v2216_v27  ;;  %v2263_v20 = vadd.f32 %v478_v17, %v314_v33  ;;  %v749_v22 = vrot.slane %v2236_v9, 1 }
 0x107   :  { %v748_v42 = vrot.slane %v670_v2, 1  ;;  %v391_v24 = vmul.f32 %v1967_v45, %v2218_v28  ;;  %v849_v37 = vadd.f32 %v773_v25, %v647_v62  ;;  %v552_v21 = vadd.f32 %v479_v10, %v313_v54  ;;  %v2276_v54 = vpop.permute.xlu1 %276 }
 0x108   :  { %v631_v7 = vadd.f32 %v595_v34, %v535_v29  ;;  %1590 = vrot.lane.b32.xlu1 %v1589_v39, %s1770_s0  ;;  %v688_v53 = vmul.f32 %v1977_v59, %v2218_v28  ;;  %v848_v55 = vadd.f32 %v774_v19, %v646_v12  ;;  %v2740_v38 = vrot.slane %v2253_v13, 1  ;;  %v272_v29 = vpop.permute.xlu0 %271 }
 0x109   :  { %v480_v60 = vrot.slane %v391_v24, 1  ;;  %v612_v33 = vmul.f32 %v1975_v58, %v2218_v28  ;;  %v455_v17 = vsel %vm431_vm0, %v453_v57, %v454_v31  ;;  %v630_v48 = vadd.f32 %v594_v63, %v534_v32 }
 0x10a   :  { %v2739_v9 = vrot.slane %v2261_v6, 1  ;;  %v775_v25 = vrot.slane %v688_v53, 1  ;;  %v297_v62 = vmul.f32 %v1971_v52, %v2190_v47  ;;  %v750_v2 = vsel %vm431_vm0, %v748_v42, %v749_v22 }
 0x10b   :  { %v2283_v12 = vmul.f32 %v1967_v45, %v2245_v36  ;;  %v2287_v34 = vmul.f32 %v1977_v59, %v2245_v36  ;;  %v2290_v32 = vadd.f32 %v2036_v40, %v849_v37  ;;  %v2292_v10 = vadd.f32 %v454_v31, %v298_v8 }
 0x10c   :  { %v672_v19 = vmul.f32 %v1977_v59, %v2247_v11  ;;  %v873_v47 = vadd.f32 %v2036_v40, %v830_v43  ;;  %v536_v57 = vadd.f32 %v455_v17, %v297_v62  ;;  %v482_v63 = vsel %vm431_vm0, %v480_v60, %v2740_v38 }
 0x10d   :  { %2747 = vst [vmem:[#allocation9_spill] sm:$0xff] %v2283_v12  ;;  %v648_v39 = vadd.f32 %v612_v33, %v552_v21  ;;  %v375_v42 = vmul.f32 %v1967_v45, %v2247_v11  ;;  %v832_v24 = vadd.f32 %v750_v2, %v630_v48  ;;  %v315_v37 = vmul.f32 %v1971_v52, %v2218_v28 }
 0x10e   :  { %v777_v8 = vsel %vm431_vm0, %v775_v25, %v2739_v9  ;;  %v891_v31 = vadd.f32 %v2036_v40, %v848_v55  ;;  %v2745_v53 = vrot.slane %v2287_v34, 1  ;;  %v596_v21 = vmul.f32 %v1975_v58, %v2247_v11  ;;  %v2320_v25 = vpop.permute.xlu1 %565  ;;  %v561_v55 = vpop.permute.xlu0 %560 }
 0x10f   :  { %v2314_v60 = vmul.f32 %v1977_v59, %v2276_v54  ;;  %v554_v33 = vadd.f32 %v482_v63, %v315_v37  ;;  %v751_v17 = vrot.slane %v672_v19, 1  ;;  %v2316_v28 = vmax.f32 %v873_v47, 0.0 }
 0x110   :  { %v2318_v48 = vmax.f32 %v891_v31, 0.0  ;;  %v850_v62 = vadd.f32 %v777_v8, %v648_v39  ;;  %v456_v2 = vrot.slane %v375_v42, 1  ;;  %v2324_v9 = vmul.f32 %v1967_v45, %v2276_v54 }
 0x111   :  { %2748 = vst [vmem:[#allocation10_spill] sm:$0xff] %v2316_v28  ;;  %v393_v38 = vmul.f32 %v1967_v45, %v272_v29  ;;  %v614_v47 = vmul.f32 %v1975_v58, %v272_v29  ;;  %v690_v63 = vmul.f32 %v1977_v59, %v272_v29  ;;  %v2332_v37 = vadd.f32 %v749_v22, %v631_v7 }
 0x112   :  { %2749 = vst [vmem:[#allocation11_spill] sm:$0xff] %v2318_v48  ;;  %v1594_v43 = vpack.i.bf16 %v2318_v48, %v2316_v28  ;;  %v316_v39 = vmul.f32 %v1971_v52, %v2216_v27  ;;  %v632_v42 = vadd.f32 %v596_v21, %v536_v57  ;;  %v2338_v8 = vmul.f32 %v1977_v59, %v2320_v25 }
 0x113   :  { %2750 = vst [vmem:[#allocation12_spill] sm:$0xff] %v2332_v37  ;;  %v613_v45 = vmul.f32 %v1975_v58, %v2216_v27  ;;  %v753_v31 = vsel %vm431_vm0, %v751_v17, %v2745_v53  ;;  %v650_v19 = vadd.f32 %v614_v47, %v554_v33  ;;  %v778_v22 = vrot.slane %v690_v63, 1  ;;  %v2358_v47 = vpop.permute.xlu1 %575 }
 0x114   :  { %1595 = vrot.lane.b32.xlu0 %v1594_v43, %s1770_s0  ;;  %v299_v7 = vmul.f32 %v1971_v52, %v2247_v11  ;;  %v483_v21 = vrot.slane %v393_v38, 1  ;;  %v2751_v28 = vrot.slane %v2283_v12, 1  ;;  %v2752_v27 = vrot.slane %v2314_v60, 1  ;;  %v571_v11 = vpop.permute.xlu0 %570 }
 0x115   :  { %v674_v17 = vmul.f32 %v1977_v59, %v561_v55  ;;  %v875_v43 = vadd.f32 %v2036_v40, %v832_v24  ;;  %v893_v33 = vadd.f32 %v2036_v40, %v850_v62  ;;  %v834_v63 = vadd.f32 %v753_v31, %v632_v42 }
 0x116   :  { %v458_v48 = vsel %vm431_vm0, %v456_v2, %v2751_v28  ;;  %v780_v37 = vsel %vm431_vm0, %v778_v22, %v2752_v27  ;;  %v317_v38 = vmul.f32 %v1971_v52, %v272_v29  ;;  %v755_v53 = vrot.slane %v2338_v8, 1 }
 0x117   :  { %v598_v28 = vmul.f32 %v1975_v58, %v561_v55  ;;  %v852_v2 = vadd.f32 %v780_v37, %v650_v19  ;;  %v754_v57 = vrot.slane %v674_v17, 1  ;;  %v2363_v12 = vmax.f32 %v875_v43, 0.0 }
 0x118   :  { %v2365_v22 = vmax.f32 %v893_v33, 0.0  ;;  %v538_v27 = vadd.f32 %v458_v48, %v299_v7  ;;  %v2369_v24 = vmul.f32 %v1977_v59, %v2358_v47  ;;  %v2753_v62 = vrot.slane %v2324_v9, 1 }
 0x119   :  { %v616_v29 = vmul.f32 %v1975_v58, %v571_v11  ;;  %v2754_v31 = vrot.slane %v2253_v13, 1  ;;  %v649_v19 = vadd.f32 %v613_v45, %v2263_v20  ;;  %v756_v7 = vsel %vm431_vm0, %v754_v57, %v755_v53 }
 0x11a   :  { %v485_v42 = vsel %vm431_vm0, %v483_v21, %v2753_v62  ;;  %v1599_v37 = vpack.i.bf16 %v2365_v22, %v2363_v12  ;;  %v634_v48 = vadd.f32 %v598_v28, %v538_v27  ;;  %v782_v43 = vrot.slane %v2369_v24, 1  ;;  %v1222_v24 = vld [vmem:[%s2736_s3 + $0x10] sm:$0xff] }
 0x11b   :  { %v555_v55 = vadd.f32 %v2754_v31, %v316_v39  ;;  %v556_v17 = vadd.f32 %v485_v42, %v317_v38  ;;  %v692_v21 = vmul.f32 %v1977_v59, %v571_v11  ;;  %v877_v13 = vadd.f32 %v2036_v40, %v834_v63 }
 0x11c   :  { %1600 = vrot.lane.b32.xlu1 %v1599_v37, %s1770_s0  ;;  %v895_v20 = vadd.f32 %v2036_v40, %v852_v2  ;;  %v2390_v39 = vadd.f32 %v2036_v40, %v1999_v35  ;;  %v2394_v45 = vmul.f32 %v1971_v52, %v2245_v36  ;;  %v597_v57 = vmul.f32 %v1975_v58, %v2245_v36 }
 0x11d   :  { %v652_v33 = vadd.f32 %v616_v29, %v556_v17  ;;  %v781_v38 = vrot.slane %v692_v21, 1  ;;  %v864_v59 = vadd.f32 %v2036_v40, %v1992_v26  ;;  %v2400_v11 = vmax.f32 %v877_v13, 0.0 }
 0x11e   :  { %v2402_v63 = vmax.f32 %v895_v20, 0.0  ;;  %v2406_v28 = vadd.f32 %v2036_v40, %v2010_v56  ;;  %v882_v35 = vadd.f32 %v2036_v40, %v2003_v41  ;;  %v836_v2 = vadd.f32 %v756_v7, %v634_v48 }
 0x11f   :  { %v783_v36 = vsel %vm431_vm0, %v781_v38, %v782_v43  ;;  %v899_v27 = vmax.f32 %v2390_v39, 0.0  ;;  %v900_v62 = vmax.f32 %v864_v59, 0.0  ;;  %v2755_v56 = vrot.slane %v2261_v6, 1 }
 0x120   :  { %v854_v26 = vadd.f32 %v783_v36, %v652_v33  ;;  %v1604_v42 = vpack.i.bf16 %v2402_v63, %v2400_v11  ;;  %v917_v29 = vmax.f32 %v2406_v28, 0.0  ;;  %v918_v31 = vmax.f32 %v882_v35, 0.0 }
 0x121   :  { %v2419_v37 = vadd.f32 %v2755_v56, %v649_v19  ;;  %v967_v41 = vrot.slane %v899_v27, 1  ;;  %v968_v17 = vrot.slane %v900_v62, 1  ;;  %v902_v48 = vmax.f32 %v2041_v44, 0.0 }
 0x122   :  { %1605 = vrot.lane.b32.xlu0 %v1604_v42, %s1770_s0  ;;  %v991_v7 = vrot.slane %v917_v29, 1  ;;  %v992_v21 = vrot.slane %v918_v31, 1  ;;  %v920_v33 = vmax.f32 %v2049_v0, 0.0  ;;  %v970_v13 = vrot.slane %v2086_v46, 1 }
 0x123   :  { %v615_v6 = vmul.f32 %v1975_v58, %v2276_v54  ;;  %v969_v19 = vsel %vm431_vm0, %v967_v41, %v968_v17  ;;  %v971_v20 = vrot.slane %v902_v48, 1  ;;  %v994_v38 = vrot.slane %v2088_v49, 1 }
 0x124   :  { %v993_v44 = vsel %vm431_vm0, %v991_v7, %v992_v21  ;;  %v995_v59 = vrot.slane %v920_v33, 1  ;;  %v2435_v35 = vadd.f32 %v2036_v40, %v836_v2  ;;  %v2438_v36 = vadd.f32 %v2036_v40, %v854_v26 }
 0x125   :  { %v1614_v0 = vpack.i.bf16 %v993_v44, %v969_v19  ;;  %v972_v62 = vsel %vm431_vm0, %v970_v13, %v971_v20  ;;  %v868_v42 = vadd.f32 %v2036_v40, %v2061_v61  ;;  %v886_v31 = vadd.f32 %v2036_v40, %v2105_v4 }
 0x126   :  { %v996_v56 = vsel %vm431_vm0, %v994_v38, %v995_v59  ;;  %v915_v41 = vmax.f32 %v2435_v35, 0.0  ;;  %v933_v17 = vmax.f32 %v2438_v36, 0.0  ;;  %v973_v2 = vrot.slane %v2140_v50, 1  ;;  %v1231_v35 = vld [vmem:[%s2736_s3 + $0x58] sm:$0xff] }
 0x127   :  { %1615 = vrot.lane.b32.xlu0 %v1614_v0, %s1766_s2  ;;  %v1624_v26 = vpack.i.bf16 %v996_v56, %v972_v62  ;;  %v904_v48 = vmax.f32 %v868_v42, 0.0  ;;  %v922_v7 = vmax.f32 %v886_v31, 0.0  ;;  %v997_v21 = vrot.slane %v2142_v51, 1 }
 0x128   :  { %v633_v61 = vadd.f32 %v597_v57, %v2292_v10  ;;  %v651_v33 = vadd.f32 %v615_v6, %v555_v55  ;;  %v1609_v4 = vpack.i.bf16 %v933_v17, %v915_v41  ;;  %v906_v20 = vmax.f32 %v2129_v14, 0.0 }
 0x129   :  { %v974_v13 = vrot.slane %v904_v48, 1  ;;  %v998_v19 = vrot.slane %v922_v7, 1  ;;  %v924_v38 = vmax.f32 %v2150_v1, 0.0  ;;  %v976_v44 = vrot.slane %v2194_v5, 1 }
 0x12a   :  { %1610 = vrot.lane.b32.xlu1 %v1609_v4, %s1770_s0  ;;  %v1000_v59 = vrot.slane %v2196_v15, 1  ;;  %v872_v10 = vadd.f32 %v2036_v40, %v2161_v3  ;;  %v890_v55 = vadd.f32 %v2036_v40, %v2214_v23  ;;  %v977_v1 = vrot.slane %v906_v20, 1 }
 0x12b   :  { %1625 = vrot.lane.b32.xlu0 %v1624_v26, %s1771_s30  ;;  %v975_v57 = vsel %vm431_vm0, %v973_v2, %v974_v13  ;;  %v999_v14 = vsel %vm431_vm0, %v997_v21, %v998_v19  ;;  %v1001_v6 = vrot.slane %v924_v38, 1  ;;  %v2756_v31 = vrot.slane %v2287_v34, 1  ;;  %v2760_v19 = vld [vmem:[#allocation9_spill] sm:$0xff] }
 0x12c   :  { %v1634_v0 = vpack.i.bf16 %v999_v14, %v975_v57  ;;  %v908_v62 = vmax.f32 %v872_v10, 0.0  ;;  %v926_v42 = vmax.f32 %v890_v55, 0.0  ;;  %v318_v3 = vmul.f32 %v1971_v52, %v2276_v54  ;;  %v2762_v10 = vld [vmem:[#allocation11_spill] sm:$0xff] }
 0x12d   :  { %v835_v56 = vadd.f32 %v2756_v31, %v633_v61  ;;  %v2757_v23 = vrot.slane %v2314_v60, 1  ;;  %v617_v7 = vmul.f32 %v1975_v58, %v2358_v47  ;;  %v599_v2 = vmul.f32 %v1975_v58, %v2320_v25  ;;  %v2759_v25 = vld [vmem:[#allocation12_spill] sm:$0xff] }
 0x12e   :  { %1620 = vrot.lane.b32.xlu1 %v1624_v26, %s1766_s2  ;;  %v1002_v21 = vsel %vm431_vm0, %v1000_v59, %v1001_v6  ;;  %v1003_v4 = vrot.slane %v2243_v16, 1  ;;  %v1004_v34 = vrot.slane %v926_v42, 1  ;;  %v2758_v61 = vrot.slane %v2324_v9, 1  ;;  %v2763_v6 = vld [vmem:[#allocation10_spill] sm:$0xff] }
 0x12f   :  { %v853_v48 = vadd.f32 %v2757_v23, %v651_v33  ;;  %1635 = vrot.lane.b32.xlu0 %v1634_v0, %s1766_s2  ;;  %v978_v52 = vsel %vm431_vm0, %v976_v44, %v977_v1  ;;  %v979_v54 = vrot.slane %v2241_v18, 1  ;;  %v928_v60 = vmax.f32 %v2290_v32, 0.0 }
 0x130   :  { %v557_v13 = vadd.f32 %v2758_v61, %v318_v3  ;;  %v980_v47 = vrot.slane %v908_v62, 1  ;;  %v910_v58 = vmax.f32 %v2221_v30, 0.0  ;;  %v876_v26 = vadd.f32 %v2036_v40, %v2759_v25  ;;  %v1220_v3 = vld [vmem:[%s2736_s3] sm:$0xff] }
 0x131   :  { %v894_v33 = vadd.f32 %v2036_v40, %v2419_v37  ;;  %v896_v9 = vadd.f32 %v2036_v40, %v853_v48  ;;  %v2761_v20 = vrot.slane %v2760_v19, 1  ;;  %v1644_v59 = vpack.i.bf16 %v1002_v21, %v978_v52  ;;  %v1224_v25 = vld [vmem:[%s2736_s3 + $0x20] sm:$0xff] }
 0x132   :  { %v653_v44 = vadd.f32 %v617_v7, %v557_v13  ;;  %1630 = vrot.lane.b32.xlu1 %v1634_v0, %s1771_s30  ;;  %v1005_v32 = vsel %vm431_vm0, %v1003_v4, %v1004_v34  ;;  %v1006_v30 = vrot.slane %v2762_v10, 1  ;;  %v1007_v55 = vrot.slane %v928_v60, 1 }
 0x133   :  { %v539_v38 = vadd.f32 %v2761_v20, %v2394_v45  ;;  %v930_v57 = vmax.f32 %v894_v33, 0.0  ;;  %v878_v14 = vadd.f32 %v2036_v40, %v835_v56  ;;  %1645 = vrot.lane.b32.xlu0 %v1644_v59, %s1771_s30  ;;  %v981_v37 = vsel %vm431_vm0, %v979_v54, %v980_v47  ;;  %v1221_v56 = vld [vmem:[%s2736_s3 + $0x8] sm:$0xff] }
 0x134   :  { %v982_v62 = vrot.slane %v2763_v6, 1  ;;  %v983_v45 = vrot.slane %v910_v58, 1  ;;  %v912_v42 = vmax.f32 %v876_v26, 0.0  ;;  %v855_v0 = vadd.f32 %v782_v43, %v653_v44  ;;  %v1223_v43 = vld [vmem:[%s2736_s3 + $0x18] sm:$0xff]  ;;  %v1225_v26 = vld [vmem:[%s2736_s3 + $0x28] sm:$0xff] }
 0x135   :  { %v635_v1 = vadd.f32 %v599_v2, %v539_v38  ;;  %v1654_v31 = vpack.i.bf16 %v1005_v32, %v981_v37  ;;  %v1008_v23 = vsel %vm431_vm0, %v1006_v30, %v1007_v55  ;;  %v1009_v48 = vrot.slane %v2365_v22, 1  ;;  %v1227_v30 = vld [vmem:[%s2736_s3 + $0x38] sm:$0xff] }
 0x136   :  { %1640 = vrot.lane.b32.xlu1 %v1644_v59, %s1766_s2  ;;  %v1010_v7 = vrot.slane %v930_v57, 1  ;;  %v932_v2 = vmax.f32 %v896_v9, 0.0  ;;  %v985_v4 = vrot.slane %v2363_v12, 1  ;;  %v984_v34 = vsel %vm431_vm0, %v982_v62, %v983_v45  ;;  %v1228_v45 = vld [vmem:[%s2736_s3 + $0x40] sm:$0xff] }
 0x137   :  { %v837_v21 = vadd.f32 %v755_v53, %v635_v1  ;;  %1655 = vrot.lane.b32.xlu0 %v1654_v31, %s1766_s2  ;;  %v986_v61 = vrot.slane %v912_v42, 1  ;;  %v914_v13 = vmax.f32 %v878_v14, 0.0  ;;  %v1516_v52 = vpack.c.bf16 %v1221_v56, %v1220_v3  ;;  %v1229_v42 = vld [vmem:[%s2736_s3 + $0x48] sm:$0xff]  ;;  %v1230_v3 = vld [vmem:[%s2736_s3 + $0x50] sm:$0xff] }
 0x138   :  { %v898_v54 = vadd.f32 %v2036_v40, %v855_v0  ;;  %v1664_v60 = vpack.i.bf16 %v1008_v23, %v984_v34  ;;  %v1520_v47 = vpack.c.bf16 %v1223_v43, %v1222_v24  ;;  %v1011_v58 = vsel %vm431_vm0, %v1009_v48, %v1010_v7  ;;  %v1232_v48 = vld [vmem:[%s2736_s3 + $0x60] sm:$0xff]  ;;  %v1233_v7 = vld [vmem:[%s2736_s3 + $0x68] sm:$0xff]  ;;  %v1234_v24 = vld [vmem:[%s2736_s3 + $0x70] sm:$0xff] }
 0x139   :  { %v1012_v8 = vrot.slane %v2402_v63, 1  ;;  %v1013_v53 = vrot.slane %v932_v2, 1  ;;  %1517 = vmatprep.subr.bf16.mxu0 %v1516_v52  ;;  %v880_v33 = vadd.f32 %v2036_v40, %v837_v21  ;;  %1548 = vmatprep.subr.bf16.mxu1 %v1516_v52  ;;  %v987_v9 = vsel %vm431_vm0, %v985_v4, %v986_v61  ;;  %v1226_v40 = vld [vmem:[%s2736_s3 + $0x30] sm:$0xff]  ;;  %v1235_v43 = vld [vmem:[%s2736_s3 + $0x78] sm:$0xff] }
 0x13a   :  { %1650 = vrot.lane.b32.xlu1 %v1654_v31, %s1771_s30  ;;  %v988_v19 = vrot.slane %v2400_v11, 1  ;;  %v989_v20 = vrot.slane %v914_v13, 1  ;;  %1519 = vmatpush3.bf16.msra.mxu0 %v1516_v52  ;;  %v934_v38 = vmax.f32 %v898_v54, 0.0  ;;  %v1674_v44 = vpack.i.bf16 %v1011_v58, %v987_v9 }
 0x13b   :  { %1665 = vrot.lane.b32.xlu0 %v1664_v60, %s1771_s30  ;;  %1556 = vmatpush3.bf16.msra.mxu1 %v1516_v52  ;;  %v1524_v59 = vpack.c.bf16 %v1225_v26, %v1224_v25  ;;  %v1014_v32 = vsel %vm431_vm0, %v1012_v8, %v1013_v53  ;;  %v916_v55 = vmax.f32 %v880_v33, 0.0  ;;  %v1118_v1 = vrot.slane %v933_v17, 1 }
 0x13c   :  { %1521 = vmatprep.subr.bf16.mxu0 %v1520_v47  ;;  %1549 = vmatprep.subr.bf16.mxu1 %v1520_v47  ;;  %v990_v57 = vsel %vm431_vm0, %v988_v19, %v989_v20  ;;  %v1119_v14 = vrot.slane %v934_v38, 1  ;;  %v1528_v62 = vpack.c.bf16 %v1227_v30, %v1226_v40  ;;  %v1115_v31 = vrot.slane %v915_v41, 1 }
 0x13d   :  { %v1684_v37 = vpack.i.bf16 %v1014_v32, %v990_v57  ;;  %v1116_v0 = vrot.slane %v916_v55, 1  ;;  %v1532_v17 = vpack.c.bf16 %v1229_v42, %v1228_v45  ;;  %v1536_v23 = vpack.c.bf16 %v1231_v35, %v1230_v3 }
 0x13e   :  { %1660 = vrot.lane.b32.xlu1 %v1664_v60, %s1766_s2  ;;  %1523 = vmatpush3.bf16.msra.mxu0 %v1520_v47  ;;  %v1120_v36 = vsel %vm431_vm0, %v1118_v1, %v1119_v14  ;;  %v1540_v2 = vpack.c.bf16 %v1233_v7, %v1232_v48  ;;  %v1544_v21 = vpack.c.bf16 %v1235_v43, %v1234_v24 }
 0x13f   :  { %1675 = vrot.lane.b32.xlu0 %v1674_v44, %s1766_s2  ;;  %1557 = vmatpush3.bf16.msra.mxu1 %v1520_v47  ;;  %v1117_v41 = vsel %vm431_vm0, %v1115_v31, %v1116_v0 }
 0x140   :  { %1525 = vmatprep.subr.bf16.mxu0 %v1524_v59  ;;  %1550 = vmatprep.subr.bf16.mxu1 %v1524_v59  ;;  %v1689_v56 = vpack.i.bf16 %v1120_v36, %v1117_v41 }
 0x142   :  { %1670 = vrot.lane.b32.xlu1 %v1674_v44, %s1771_s30  ;;  %1527 = vmatpush3.bf16.msra.mxu0 %v1524_v59 }
 0x143   :  { %1685 = vrot.lane.b32.xlu0 %v1684_v37, %s1771_s30  ;;  %1558 = vmatpush3.bf16.msra.mxu1 %v1524_v59 }
 0x144   :  { %1529 = vmatprep.subr.bf16.mxu0 %v1528_v62  ;;  %1551 = vmatprep.subr.bf16.mxu1 %v1528_v62 }
 0x146   :  { %1680 = vrot.lane.b32.xlu1 %v1684_v37, %s1766_s2  ;;  %1531 = vmatpush3.bf16.msra.mxu0 %v1528_v62 }
 0x147   :  { %1559 = vmatpush3.bf16.msra.mxu1 %v1528_v62  ;;  %1533 = vmatprep.subr.bf16.mxu0 %v1532_v17 }
 0x148   :  { %1552 = vmatprep.subr.bf16.mxu1 %v1532_v17 }
 0x14a   :  { %1690 = vrot.lane.b32.xlu1 %v1689_v56, %s1771_s30  ;;  %1535 = vmatpush3.bf16.msra.mxu0 %v1532_v17 }
 0x14b   :  { %1560 = vmatpush3.bf16.msra.mxu1 %v1532_v17  ;;  %1537 = vmatprep.subr.bf16.mxu0 %v1536_v23 }
 0x14c   :  { %1553 = vmatprep.subr.bf16.mxu1 %v1536_v23 }
 0x14e   :  { %1539 = vmatpush3.bf16.msra.mxu0 %v1536_v23 }
 0x14f   :  { %1561 = vmatpush3.bf16.msra.mxu1 %v1536_v23  ;;  %1541 = vmatprep.subr.bf16.mxu0 %v1540_v2 }
 0x150   :  { %1554 = vmatprep.subr.bf16.mxu1 %v1540_v2 }
 0x152   :  { %1543 = vmatpush3.bf16.msra.mxu0 %v1540_v2 }
 0x153   :  { %1562 = vmatpush3.bf16.msra.mxu1 %v1540_v2  ;;  %1545 = vmatprep.subr.bf16.mxu0 %v1544_v21 }
 0x154   :  { %1555 = vmatprep.subr.bf16.mxu1 %v1544_v21 }
 0x156   :  { %1547 = vmatpush3.bf16.msra.mxu0 %v1544_v21 }
 0x157   :  { %1563 = vmatpush3.bf16.msra.mxu1 %v1544_v21 }
 0x158   :  { %v1576_v4 = vpop.permute.xlu0 %1575 }
 0x159   :  { %v1578_v33 = vunpack.i.h.bf16 %v1576_v4  ;;  %v1577_v9 = vunpack.i.l.bf16 %v1576_v4 }
 0x163   :  { %v1581_v61 = vpop.permute.xlu1 %1580 }
 0x164   :  { %v1583_v1 = vunpack.i.h.bf16 %v1581_v61  ;;  %v1582_v37 = vunpack.i.l.bf16 %v1581_v61 }
 0x16f   :  { %v1586_v34 = vpop.permute.xlu0 %1585 }
 0x170   :  { %v1588_v0 = vunpack.i.h.bf16 %v1586_v34  ;;  %v1587_v31 = vunpack.i.l.bf16 %v1586_v34 }
 0x17a   :  { %v2585_v52 = vpop.permute.xlu1 %1590 }
 0x186   :  { %v2583_v13 = vpop.permute.xlu0 %1595 }
 0x18e   :  { %v2589_v60 = vpop.permute.xlu1 %1600 }
 0x194   :  { %v2587_v54 = vpop.permute.xlu0 %1605 }
 0x199   :  { %v1616_v47 = vpop.permute.xlu0 %1615 }
 0x19a   :  { %v1618_v58 = vunpack.i.h.bf16 %v1616_v47  ;;  %v1617_v8 = vunpack.i.l.bf16 %v1616_v47 }
 0x19c   :  { %v2591_v53 = vpop.permute.xlu1 %1610  ;;  %v1170_v25 = vsel %vm1169_vm1, %v899_v27, %v1617_v8  ;;  %v1178_v26 = vsel %vm1169_vm1, %v917_v29, %v1618_v58  ;;  %v1593_v58 = vunpack.i.h.bf16 %v2585_v52  ;;  %v1592_v8 = vunpack.i.l.bf16 %v2585_v52 }
 0x19d   :  { %v1626_v19 = vpop.permute.xlu0 %1625  ;;  %v1187_v44 = vsel %vm1186_vm2, %v1170_v25, %v1577_v9  ;;  %v1195_v59 = vsel %vm1186_vm2, %v1178_v26, %v1578_v33  ;;  %v1598_v9 = vunpack.i.h.bf16 %v2583_v13 }
 0x19e   :  { %v1628_v20 = vunpack.i.h.bf16 %v1626_v19  ;;  %v1627_v38 = vunpack.i.l.bf16 %v1626_v19  ;;  %v1597_v19 = vunpack.i.l.bf16 %v2583_v13 }
 0x1a0   :  { %v1621_v32 = vpop.permute.xlu1 %1620  ;;  %v1204_v39 = vsel %vm1203_vm3, %v1187_v44, %v1627_v38  ;;  %v1212_v27 = vsel %vm1203_vm3, %v1195_v59, %v1628_v20 }
 0x1a1   :  { %v1623_v40 = vunpack.i.h.bf16 %v1621_v32  ;;  %v1622_v30 = vunpack.i.l.bf16 %v1621_v32  ;;  %v1636_v28 = vpop.permute.xlu0 %1635  ;;  %1492 = vmatprep.mubr.f32.mxu0 %v1204_v39  ;;  %1504 = vmatprep.mubr.f32.mxu1 %v1212_v27 }
 0x1a2   :  { %v1638_v29 = vunpack.i.h.bf16 %v1636_v28  ;;  %v1637_v55 = vunpack.i.l.bf16 %v1636_v28 }
 0x1a3   :  { %v1171_v57 = vsel %vm1169_vm1, %v2086_v46, %v1622_v30  ;;  %v1179_v14 = vsel %vm1169_vm1, %v2088_v49, %v1623_v40 }
 0x1a4   :  { %v1631_v62 = vpop.permute.xlu1 %1630  ;;  %v1172_v45 = vsel %vm1169_vm1, %v2140_v50, %v1637_v55  ;;  %v1180_v42 = vsel %vm1169_vm1, %v2142_v51, %v1638_v29  ;;  %v1188_v46 = vsel %vm1186_vm2, %v1171_v57, %v1582_v37  ;;  %v1196_v49 = vsel %vm1186_vm2, %v1179_v14, %v1583_v1 }
 0x1a5   :  { %v1633_v36 = vunpack.i.h.bf16 %v1631_v62  ;;  %v1632_v17 = vunpack.i.l.bf16 %v1631_v62  ;;  %v1646_v3 = vpop.permute.xlu0 %1645  ;;  %v1189_v50 = vsel %vm1186_vm2, %v1172_v45, %v1587_v31  ;;  %v1197_v48 = vsel %vm1186_vm2, %v1180_v42, %v1588_v0 }
 0x1a6   :  { %v1648_v35 = vunpack.i.h.bf16 %v1646_v3  ;;  %v1647_v41 = vunpack.i.l.bf16 %v1646_v3  ;;  %v1603_v37 = vunpack.i.h.bf16 %v2589_v60  ;;  %v1602_v62 = vunpack.i.l.bf16 %v2589_v60 }
 0x1a7   :  { %v1205_v56 = vsel %vm1203_vm3, %v1188_v46, %v1632_v17  ;;  %v1213_v23 = vsel %vm1203_vm3, %v1196_v49, %v1633_v36  ;;  %v1608_v31 = vunpack.i.h.bf16 %v2587_v54  ;;  %v1607_v36 = vunpack.i.l.bf16 %v2587_v54 }
 0x1a8   :  { %v1641_v51 = vpop.permute.xlu1 %1640  ;;  %1493 = vmatmul.mubr.f32.vlgmr.msra.gmra.mrb[0].mxu0 %v1205_v56  ;;  %1505 = vmatmul.mubr.f32.vlgmr.msra.gmra.mrb[0].mxu1 %v1213_v23  ;;  %v1206_v7 = vsel %vm1203_vm3, %v1189_v50, %v1647_v41  ;;  %v1214_v2 = vsel %vm1203_vm3, %v1197_v48, %v1648_v35 }
 0x1a9   :  { %v1643_v24 = vunpack.i.h.bf16 %v1641_v51  ;;  %v1642_v43 = vunpack.i.l.bf16 %v1641_v51  ;;  %v1656_v21 = vpop.permute.xlu0 %1655  ;;  %1495 = vmatprep.mubr.f32.mxu0 %v1206_v7  ;;  %1507 = vmatprep.mubr.f32.mxu1 %v1214_v2  ;;  %v1613_v2 = vunpack.i.h.bf16 %v2591_v53 }
 0x1aa   :  { %v1658_v4 = vunpack.i.h.bf16 %v1656_v21  ;;  %v1657_v34 = vunpack.i.l.bf16 %v1656_v21 }
 0x1ab   :  { %v1173_v61 = vsel %vm1169_vm1, %v2194_v5, %v1642_v43  ;;  %v1181_v47 = vsel %vm1169_vm1, %v2196_v15, %v1643_v24  ;;  %v1612_v24 = vunpack.i.l.bf16 %v2591_v53 }
 0x1ac   :  { %v1651_v25 = vpop.permute.xlu1 %1650  ;;  %v1174_v26 = vsel %vm1169_vm1, %v2241_v18, %v1657_v34  ;;  %v1182_v33 = vsel %vm1169_vm1, %v2243_v16, %v1658_v4  ;;  %v1190_v59 = vsel %vm1186_vm2, %v1173_v61, %v1592_v8  ;;  %v1198_v52 = vsel %vm1186_vm2, %v1181_v47, %v1593_v58 }
 0x1ad   :  { %v1653_v20 = vunpack.i.h.bf16 %v1651_v25  ;;  %v1652_v5 = vunpack.i.l.bf16 %v1651_v25  ;;  %v1666_v38 = vpop.permute.xlu0 %1665  ;;  %v1191_v39 = vsel %vm1186_vm2, %v1174_v26, %v1597_v19  ;;  %v1199_v16 = vsel %vm1186_vm2, %v1182_v33, %v1598_v9 }
 0x1ae   :  { %v1668_v44 = vunpack.i.h.bf16 %v1666_v38  ;;  %v1667_v15 = vunpack.i.l.bf16 %v1666_v38 }
 0x1af   :  { %v1207_v32 = vsel %vm1203_vm3, %v1190_v59, %v1652_v5  ;;  %v1215_v18 = vsel %vm1203_vm3, %v1198_v52, %v1653_v20 }
 0x1b0   :  { %v1661_v27 = vpop.permute.xlu1 %1660  ;;  %1496 = vmatmul.mubr.f32.gmra.mrb[2].mxu0 %v1207_v32  ;;  %1508 = vmatmul.mubr.f32.gmra.mrb[2].mxu1 %v1215_v18  ;;  %v1208_v13 = vsel %vm1203_vm3, %v1191_v39, %v1667_v15  ;;  %v1216_v40 = vsel %vm1203_vm3, %v1199_v16, %v1668_v44 }
 0x1b1   :  { %v1663_v30 = vunpack.i.h.bf16 %v1661_v27  ;;  %v1662_v28 = vunpack.i.l.bf16 %v1661_v27  ;;  %v1676_v29 = vpop.permute.xlu0 %1675  ;;  %1498 = vmatprep.mubr.f32.mxu0 %v1208_v13  ;;  %1510 = vmatprep.mubr.f32.mxu1 %v1216_v40 }
 0x1b2   :  { %v1678_v55 = vunpack.i.h.bf16 %v1676_v29  ;;  %v1677_v57 = vunpack.i.l.bf16 %v1676_v29 }
 0x1b3   :  { %v1175_v14 = vsel %vm1169_vm1, %v2763_v6, %v1662_v28  ;;  %v1183_v1 = vsel %vm1169_vm1, %v2762_v10, %v1663_v30 }
 0x1b4   :  { %v1671_v45 = vpop.permute.xlu1 %1670  ;;  %v1176_v42 = vsel %vm1169_vm1, %v2363_v12, %v1677_v57  ;;  %v1184_v0 = vsel %vm1169_vm1, %v2365_v22, %v1678_v55  ;;  %v1192_v41 = vsel %vm1186_vm2, %v1175_v14, %v1602_v62  ;;  %v1200_v60 = vsel %vm1186_vm2, %v1183_v1, %v1603_v37 }
 0x1b5   :  { %v1673_v17 = vunpack.i.h.bf16 %v1671_v45  ;;  %v1672_v6 = vunpack.i.l.bf16 %v1671_v45  ;;  %v1686_v3 = vpop.permute.xlu0 %1685  ;;  %v1193_v49 = vsel %vm1186_vm2, %v1176_v42, %v1607_v36  ;;  %v1201_v22 = vsel %vm1186_vm2, %v1184_v0, %v1608_v31 }
 0x1b6   :  { %v1688_v35 = vunpack.i.h.bf16 %v1686_v3  ;;  %v1687_v10 = vunpack.i.l.bf16 %v1686_v3 }
 0x1b7   :  { %v1209_v46 = vsel %vm1203_vm3, %v1192_v41, %v1672_v6  ;;  %v1217_v12 = vsel %vm1203_vm3, %v1200_v60, %v1673_v17 }
 0x1b8   :  { %v1681_v56 = vpop.permute.xlu1 %1680  ;;  %1499 = vmatmul.mubr.f32.gmra.mrb[4].mxu0 %v1209_v46  ;;  %1511 = vmatmul.mubr.f32.gmra.mrb[4].mxu1 %v1217_v12  ;;  %v1210_v54 = vsel %vm1203_vm3, %v1193_v49, %v1687_v10  ;;  %v1218_v23 = vsel %vm1203_vm3, %v1201_v22, %v1688_v35 }
 0x1b9   :  { %v1683_v50 = vunpack.i.h.bf16 %v1681_v56  ;;  %v1682_v48 = vunpack.i.l.bf16 %v1681_v56  ;;  %1501 = vmatprep.mubr.f32.mxu0 %v1210_v54  ;;  %1513 = vmatprep.mubr.f32.mxu1 %v1218_v23 }
 0x1bb   :  { %v1177_v51 = vsel %vm1169_vm1, %v2400_v11, %v1682_v48  ;;  %v1185_v7 = vsel %vm1169_vm1, %v2402_v63, %v1683_v50  ;;  %v1427_v11 = vld [vmem:[#allocation6] ss:$0 sm:$0xff] }
 0x1bc   :  { %v1691_v43 = vpop.permute.xlu1 %1690  ;;  %v1194_v34 = vsel %vm1186_vm2, %v1177_v51, %v1612_v24  ;;  %v1202_v61 = vsel %vm1186_vm2, %v1185_v7, %v1613_v2 }
 0x1bd   :  { %v1693_v21 = vunpack.i.h.bf16 %v1691_v43  ;;  %v1692_v4 = vunpack.i.l.bf16 %v1691_v43 }
 0x1bf   :  { %v1211_v47 = vsel %vm1203_vm3, %v1194_v34, %v1692_v4  ;;  %v1219_v58 = vsel %vm1203_vm3, %v1202_v61, %v1693_v21 }
 0x1c0   :  { %1502 = vmatmul.mubr.f32.gmra.mrb[6].mxu0 %v1211_v47  ;;  %1514 = vmatmul.mubr.f32.gmra.mrb[6].mxu1 %v1219_v58 }
 0x27b   :  { %v1494_v8 = vpop.f32.mrb[0].mxu0  ;;  %v1506_v63 = vpop.f32.mrb[0].mxu1 }
 0x27c   :  { %v1315_v25 = vadd.f32 %v1494_v8, %v1427_v11  ;;  %v1355_v26 = vadd.f32 %v1506_v63, %v1427_v11  ;;  %v1309_v33 = vpop.f32.mrb[1].mxu0  ;;  %v1349_v53 = vpop.f32.mrb[1].mxu1 }
 0x27d   :  { %v1310_v9 = vadd.f32 %v1427_v11, %v1309_v33  ;;  %v1350_v19 = vadd.f32 %v1427_v11, %v1349_v53 }
 0x27e   :  { %v1389_v20 = vmax.f32 %v1315_v25, 0.0  ;;  %v1397_v5 = vmax.f32 %v1355_v26, 0.0 }
 0x27f   :  { %v1388_v38 = vmax.f32 %v1310_v9, 0.0  ;;  %v1396_v44 = vmax.f32 %v1350_v19, 0.0 }
 0x280   :  { %1405 = vst.msk [vmem:[%s2738_s5 + $0x8] sm:$0xff] %vm1186_vm2, %v1389_v20  ;;  %1413 = vst.msk [vmem:[%s2738_s5 + $0x48] sm:$0xff] %vm1186_vm2, %v1397_v5 }
 0x281   :  { %1404 = vst.msk [vmem:[%s2738_s5] sm:$0xff] %vm1186_vm2, %v1388_v38  ;;  %1412 = vst.msk [vmem:[%s2738_s5 + $0x40] sm:$0xff] %vm1186_vm2, %v1396_v44 }
 0x283   :  { %v1497_v15 = vpop.f32.mrb[2].mxu0  ;;  %v1509_v59 = vpop.f32.mrb[2].mxu1 }
 0x284   :  { %v1325_v52 = vadd.f32 %v1497_v15, %v1427_v11  ;;  %v1365_v32 = vadd.f32 %v1509_v59, %v1427_v11  ;;  %v1319_v18 = vpop.f32.mrb[3].mxu0  ;;  %v1359_v39 = vpop.f32.mrb[3].mxu1 }
 0x285   :  { %v1320_v16 = vadd.f32 %v1427_v11, %v1319_v18  ;;  %v1360_v27 = vadd.f32 %v1427_v11, %v1359_v39 }
 0x286   :  { %v1391_v13 = vmax.f32 %v1325_v52, 0.0  ;;  %v1399_v40 = vmax.f32 %v1365_v32, 0.0 }
 0x287   :  { %v1390_v30 = vmax.f32 %v1320_v16, 0.0  ;;  %v1398_v28 = vmax.f32 %v1360_v27, 0.0 }
 0x288   :  { %1407 = vst.msk [vmem:[%s2738_s5 + $0x18] sm:$0xff] %vm1186_vm2, %v1391_v13  ;;  %1415 = vst.msk [vmem:[%s2738_s5 + $0x58] sm:$0xff] %vm1186_vm2, %v1399_v40 }
 0x289   :  { %1406 = vst.msk [vmem:[%s2738_s5 + $0x10] sm:$0xff] %vm1186_vm2, %v1390_v30  ;;  %1414 = vst.msk [vmem:[%s2738_s5 + $0x50] sm:$0xff] %vm1186_vm2, %v1398_v28 }
 0x28b   :  { %v1500_v29 = vpop.f32.mrb[4].mxu0  ;;  %v1512_v55 = vpop.f32.mrb[4].mxu1 }
 0x28c   :  { %v1335_v57 = vadd.f32 %v1500_v29, %v1427_v11  ;;  %v1375_v14 = vadd.f32 %v1512_v55, %v1427_v11  ;;  %v1329_v1 = vpop.f32.mrb[5].mxu0  ;;  %v1369_v37 = vpop.f32.mrb[5].mxu1 }
 0x28d   :  { %v1330_v62 = vadd.f32 %v1427_v11, %v1329_v1  ;;  %v1370_v45 = vadd.f32 %v1427_v11, %v1369_v37 }
 0x28e   :  { %v1393_v42 = vmax.f32 %v1335_v57, 0.0  ;;  %v1401_v0 = vmax.f32 %v1375_v14, 0.0 }
 0x28f   :  { %v1392_v31 = vmax.f32 %v1330_v62, 0.0  ;;  %v1400_v36 = vmax.f32 %v1370_v45, 0.0 }
 0x290   :  { %1409 = vst.msk [vmem:[%s2738_s5 + $0x28] sm:$0xff] %vm1186_vm2, %v1393_v42  ;;  %1417 = vst.msk [vmem:[%s2738_s5 + $0x68] sm:$0xff] %vm1186_vm2, %v1401_v0 }
 0x291   :  { %1408 = vst.msk [vmem:[%s2738_s5 + $0x20] sm:$0xff] %vm1186_vm2, %v1392_v31  ;;  %1416 = vst.msk [vmem:[%s2738_s5 + $0x60] sm:$0xff] %vm1186_vm2, %v1400_v36 }
 0x293   :  { %v1503_v17 = vpop.f32.mrb[6].mxu0  ;;  %v1515_v6 = vpop.f32.mrb[6].mxu1 }
 0x294   :  { %v1345_v3 = vadd.f32 %v1503_v17, %v1427_v11  ;;  %v1385_v35 = vadd.f32 %v1515_v6, %v1427_v11  ;;  %v1339_v10 = vpop.f32.mrb[7].mxu0  ;;  %v1379_v41 = vpop.f32.mrb[7].mxu1 }
 0x295   :  { %v1340_v60 = vadd.f32 %v1427_v11, %v1339_v10  ;;  %v1380_v46 = vadd.f32 %v1427_v11, %v1379_v41 }
 0x296   :  { %v1395_v12 = vmax.f32 %v1345_v3, 0.0  ;;  %v1403_v49 = vmax.f32 %v1385_v35, 0.0 }
 0x297   :  { %v1394_v22 = vmax.f32 %v1340_v60, 0.0  ;;  %v1402_v56 = vmax.f32 %v1380_v46, 0.0 }
 0x298   :  { %1411 = vst.msk [vmem:[%s2738_s5 + $0x38] sm:$0xff] %vm1186_vm2, %v1395_v12  ;;  %1419 = vst.msk [vmem:[%s2738_s5 + $0x78] sm:$0xff] %vm1186_vm2, %v1403_v49 }
 0x299   :  { %1410 = vst.msk [vmem:[%s2738_s5 + $0x30] sm:$0xff] %vm1186_vm2, %v1394_v22  ;;  %1418 = vst.msk [vmem:[%s2738_s5 + $0x70] sm:$0xff] %vm1186_vm2, %v1402_v56 }
 0x29a   :  { %1424 = vsyncpa [#allocation3], 1 }
 0x29b   :  { %1425 = vsyncpa [#allocation5], 1 }

// kernel: model_forward.5
= control target key start
LH: loop header
LB: loop body
LE: loop exit
PB: predicated region body
PF: predicated region fallthrough
CT: control target
= control target key end

     0   :  { %v5326_v36 = vmov 1983009808   ;;  %v27_v38 = vlaneseq  ;;  %s6995_s0 = inlined_call_operand.vmem [shape: f32[2,2048], index: 0, kind: input, shape index: {}]   ;;  %s6996_s1 = inlined_call_operand.vmem [shape: bf16[2048,512], index: 1, kind: input, shape index: {}]   ;;  %s6997_s2 = inlined_call_operand.vmem [shape: f32[1,512], index: 2, kind: input, shape index: {}]   ;;  %s6998_s3 = inlined_call_operand.hbm [shape: f32[2,512], index: 3, kind: output, shape index: {}]  }
   0x1   :  { %v4520_v0 = vld [vmem:[%s6996_s1 + $0x4] ss:$16 sps:$4 sm:$0xff]   ;;  %v4522_v1 = vld [vmem:[%s6996_s1 + $0xc] ss:$16 sps:$4 sm:$0xff]   ;;  %v4524_v2 = vld [vmem:[%s6996_s1] ss:$16 sps:$4 sm:$0xff]   ;;  %v25_v37 = vunpack.c.l.s4 %v5326_v36 }
   0x2   :  { %3217 = vmatprep.subr.bf16.mxu0 %v4520_v0  ;;  %v4525_v3 = vld [vmem:[%s6996_s1 + $0x8] ss:$16 sps:$4 sm:$0xff]   ;;  %3545 = vmatprep.subr.bf16.mxu1 %v4522_v1  ;;  %v4526_v4 = vld [vmem:[%s6996_s1 + $0x24] ss:$16 sps:$4 sm:$0xff]   ;;  %v4528_v5 = vld [vmem:[%s6996_s1 + $0x2c] ss:$16 sps:$4 sm:$0xff]  }
   0x3   :  { %3218 = vmatpush1.bf16.msra.mxu0 %v4524_v2  ;;  %3546 = vmatpush1.bf16.msra.mxu1 %v4525_v3  ;;  %v4530_v6 = vld [vmem:[%s6996_s1 + $0x20] ss:$16 sps:$4 sm:$0xff]   ;;  %v4531_v7 = vld [vmem:[%s6996_s1 + $0x28] ss:$16 sps:$4 sm:$0xff]   ;;  %v4532_v8 = vld [vmem:[%s6996_s1 + $0x44] ss:$16 sps:$4 sm:$0xff]   ;;  %v26_v42 = vunpack.c.0.s8 %v25_v37 }
   0x4   :  { %3219 = vmatprep.subr.bf16.mxu0 %v4526_v4  ;;  %3547 = vmatprep.subr.bf16.mxu1 %v4528_v5  ;;  %v4534_v9 = vld [vmem:[%s6996_s1 + $0x4c] ss:$16 sps:$4 sm:$0xff]   ;;  %v4536_v10 = vld [vmem:[%s6996_s1 + $0x40] ss:$16 sps:$4 sm:$0xff]   ;;  %v4537_v11 = vld [vmem:[%s6996_s1 + $0x48] ss:$16 sps:$4 sm:$0xff]  }
   0x5   :  { %v4538_v12 = vld [vmem:[%s6996_s1 + $0x64] ss:$16 sps:$4 sm:$0xff]   ;;  %v4540_v13 = vld [vmem:[%s6996_s1 + $0x6c] ss:$16 sps:$4 sm:$0xff]   ;;  %v4542_v14 = vld [vmem:[%s6996_s1 + $0x60] ss:$16 sps:$4 sm:$0xff]  }
   0x6   :  { %v4543_v15 = vld [vmem:[%s6996_s1 + $0x68] ss:$16 sps:$4 sm:$0xff]   ;;  %v4544_v16 = vld [vmem:[%s6996_s1 + $0x84] ss:$16 sps:$4 sm:$0xff]   ;;  %v4546_v17 = vld [vmem:[%s6996_s1 + $0x8c] ss:$16 sps:$4 sm:$0xff]  }
   0x7   :  { %3220 = vmatpush1.bf16.msra.mxu0 %v4530_v6  ;;  %3548 = vmatpush1.bf16.msra.mxu1 %v4531_v7  ;;  %v4548_v18 = vld [vmem:[%s6996_s1 + $0x80] ss:$16 sps:$4 sm:$0xff]   ;;  %v4549_v19 = vld [vmem:[%s6996_s1 + $0x88] ss:$16 sps:$4 sm:$0xff]   ;;  %v4550_v20 = vld [vmem:[%s6996_s1 + $0xa4] ss:$16 sps:$4 sm:$0xff]  }
   0x8   :  { %3221 = vmatprep.subr.bf16.mxu0 %v4532_v8  ;;  %3549 = vmatprep.subr.bf16.mxu1 %v4534_v9  ;;  %v4552_v21 = vld [vmem:[%s6996_s1 + $0xac] ss:$16 sps:$4 sm:$0xff]   ;;  %v4554_v22 = vld [vmem:[%s6996_s1 + $0xa0] ss:$16 sps:$4 sm:$0xff]   ;;  %v4555_v23 = vld [vmem:[%s6996_s1 + $0xa8] ss:$16 sps:$4 sm:$0xff]  }
   0x9   :  { %v4556_v24 = vld [vmem:[%s6996_s1 + $0xc4] ss:$16 sps:$4 sm:$0xff]   ;;  %v4558_v25 = vld [vmem:[%s6996_s1 + $0xcc] ss:$16 sps:$4 sm:$0xff]   ;;  %v4560_v26 = vld [vmem:[%s6996_s1 + $0xc0] ss:$16 sps:$4 sm:$0xff]  }
   0xa   :  { %v4561_v27 = vld [vmem:[%s6996_s1 + $0xc8] ss:$16 sps:$4 sm:$0xff]   ;;  %v4562_v28 = vld [vmem:[%s6996_s1 + $0xe4] ss:$16 sps:$4 sm:$0xff]   ;;  %v4564_v29 = vld [vmem:[%s6996_s1 + $0xec] ss:$16 sps:$4 sm:$0xff]  }
   0xb   :  { %3222 = vmatpush1.bf16.msra.mxu0 %v4536_v10  ;;  %3550 = vmatpush1.bf16.msra.mxu1 %v4537_v11  ;;  %v4566_v30 = vld [vmem:[%s6996_s1 + $0xe0] ss:$16 sps:$4 sm:$0xff]   ;;  %v4567_v31 = vld [vmem:[%s6996_s1 + $0xe8] ss:$16 sps:$4 sm:$0xff]   ;;  %v4568_v32 = vld [vmem:[%s6996_s1 + $0x104] ss:$16 sps:$4 sm:$0xff]  }
   0xc   :  { %3223 = vmatprep.subr.bf16.mxu0 %v4538_v12  ;;  %3551 = vmatprep.subr.bf16.mxu1 %v4540_v13  ;;  %v4570_v33 = vld [vmem:[%s6996_s1 + $0x10c] ss:$16 sps:$4 sm:$0xff]   ;;  %v4572_v34 = vld [vmem:[%s6996_s1 + $0x100] ss:$16 sps:$4 sm:$0xff]   ;;  %v4573_v35 = vld [vmem:[%s6996_s1 + $0x108] ss:$16 sps:$4 sm:$0xff]  }
   0xd   :  { %v4574_v39 = vld [vmem:[%s6996_s1 + $0x124] ss:$16 sps:$4 sm:$0xff]   ;;  %v4576_v40 = vld [vmem:[%s6996_s1 + $0x12c] ss:$16 sps:$4 sm:$0xff]   ;;  %v4578_v41 = vld [vmem:[%s6996_s1 + $0x120] ss:$16 sps:$4 sm:$0xff]  }
   0xe   :  { %v5465_v43 = vshrl.u32 %v27_v38, 7  ;;  %v4579_v44 = vld [vmem:[%s6996_s1 + $0x128] ss:$16 sps:$4 sm:$0xff]   ;;  %v4580_v45 = vld [vmem:[%s6996_s1 + $0x144] ss:$16 sps:$4 sm:$0xff]  }
   0xf   :  { %3224 = vmatpush1.bf16.msra.mxu0 %v4542_v14  ;;  %3552 = vmatpush1.bf16.msra.mxu1 %v4543_v15  ;;  %v4582_v46 = vld [vmem:[%s6996_s1 + $0x14c] ss:$16 sps:$4 sm:$0xff]   ;;  %v4584_v47 = vld [vmem:[%s6996_s1 + $0x140] ss:$16 sps:$4 sm:$0xff]   ;;  %v4585_v48 = vld [vmem:[%s6996_s1 + $0x148] ss:$16 sps:$4 sm:$0xff]  }
  0x10   :  { %3225 = vmatprep.subr.bf16.mxu0 %v4544_v16  ;;  %3553 = vmatprep.subr.bf16.mxu1 %v4546_v17  ;;  %v5483_v49 = vsub.s32 %v26_v42, %v5465_v43  ;;  %v4586_v50 = vld [vmem:[%s6996_s1 + $0x164] ss:$16 sps:$4 sm:$0xff]   ;;  %v4588_v51 = vld [vmem:[%s6996_s1 + $0x16c] ss:$16 sps:$4 sm:$0xff]   ;;  %v4590_v53 = vld [vmem:[%s6996_s1 + $0x160] ss:$16 sps:$4 sm:$0xff]  }
  0x11   :  { %v15_v52 = vld [vmem:[%s6995_s0] sm:$0xff]  ;;  %v4591_v55 = vld [vmem:[%s6996_s1 + $0x168] ss:$16 sps:$4 sm:$0xff]   ;;  %v4594_v57 = vld [vmem:[%s6996_s1 + $0x18c] ss:$16 sps:$4 sm:$0xff]  }
  0x12   :  { %v30_v54 = vrot.slane %v15_v52, %v5483_v49  ;;  %v4592_v56 = vld [vmem:[%s6996_s1 + $0x184] ss:$16 sps:$4 sm:$0xff]   ;;  %v4596_v59 = vld [vmem:[%s6996_s1 + $0x180] ss:$16 sps:$4 sm:$0xff]   ;;  %v4597_v61 = vld [vmem:[%s6996_s1 + $0x188] ss:$16 sps:$4 sm:$0xff]   ;;  %v23_v4 = vcombine.high %v15_v52, %v15_v52 }
  0x13   :  { %3226 = vmatpush1.bf16.msra.mxu0 %v4548_v18  ;;  %3554 = vmatpush1.bf16.msra.mxu1 %v4549_v19  ;;  %v4598_v62 = vld [vmem:[%s6996_s1 + $0x1a4] ss:$16 sps:$4 sm:$0xff]   ;;  %v4600_v63 = vld [vmem:[%s6996_s1 + $0x1ac] ss:$16 sps:$4 sm:$0xff]   ;;  %v4602_v0 = vld [vmem:[%s6996_s1 + $0x1a0] ss:$16 sps:$4 sm:$0xff]  }
  0x14   :  { %3227 = vmatprep.subr.bf16.mxu0 %v4550_v20  ;;  %3555 = vmatprep.subr.bf16.mxu1 %v4552_v21  ;;  %v38_v58 = vcombine.high %v30_v54, %v30_v54  ;;  %v4603_v1 = vld [vmem:[%s6996_s1 + $0x1a8] ss:$16 sps:$4 sm:$0xff]   ;;  %v4604_v2 = vld [vmem:[%s6996_s1 + $0x1c4] ss:$16 sps:$4 sm:$0xff]   ;;  %v4606_v3 = vld [vmem:[%s6996_s1 + $0x1cc] ss:$16 sps:$4 sm:$0xff]   ;;  %v5544_v9 = vrot.slane %v23_v4, %v5483_v49  ;;  %v107_v16 = vpack.c.bf16 %v30_v54, %v30_v54 }
  0x15   :  { %v4608_v5 = vld [vmem:[%s6996_s1 + $0x1c0] ss:$16 sps:$4 sm:$0xff]   ;;  %v4609_v6 = vld [vmem:[%s6996_s1 + $0x1c8] ss:$16 sps:$4 sm:$0xff]   ;;  %v4610_v7 = vld [vmem:[%s6996_s1 + $0x1e4] ss:$16 sps:$4 sm:$0xff]  }
  0x16   :  { %v108_v60 = vpack.c.bf16 %v38_v58, %v38_v58  ;;  %v4612_v8 = vld [vmem:[%s6996_s1 + $0x1ec] ss:$16 sps:$4 sm:$0xff]   ;;  %v4614_v10 = vld [vmem:[%s6996_s1 + $0x1e0] ss:$16 sps:$4 sm:$0xff]   ;;  %v4615_v11 = vld [vmem:[%s6996_s1 + $0x1e8] ss:$16 sps:$4 sm:$0xff]   ;;  %v39_v14 = vcombine.high %v5544_v9, %v5544_v9 }
  0x17   :  { %3228 = vmatpush1.bf16.msra.mxu0 %v4554_v22  ;;  %3556 = vmatpush1.bf16.msra.mxu1 %v4555_v23  ;;  %v4619_v12 = vld [vmem:[%s6996_s1 + $0x204] ss:$16 sps:$4 sm:$0xff]   ;;  %v4622_v13 = vld [vmem:[%s6996_s1 + $0x20c] ss:$16 sps:$4 sm:$0xff]   ;;  %v4617_v15 = vld [vmem:[%s6996_s1 + $0x200] ss:$16 sps:$4 sm:$0xff]  }
  0x18   :  { %3229 = vmatprep.subr.bf16.mxu0 %v4556_v24  ;;  %3557 = vmatprep.subr.bf16.mxu1 %v4558_v25  ;;  %v4620_v17 = vld [vmem:[%s6996_s1 + $0x208] ss:$16 sps:$4 sm:$0xff]   ;;  %v4625_v18 = vld [vmem:[%s6996_s1 + $0x224] ss:$16 sps:$4 sm:$0xff]   ;;  %v4628_v19 = vld [vmem:[%s6996_s1 + $0x22c] ss:$16 sps:$4 sm:$0xff]   ;;  %v110_v20 = vpack.c.bf16 %v39_v14, %v39_v14 }
  0x19   :  { %3249 = vmatprep.mubr.bf16.mxu0 %v108_v60  ;;  %3577 = vmatprep.mubr.bf16.mxu1 %v108_v60  ;;  %v4623_v21 = vld [vmem:[%s6996_s1 + $0x220] ss:$16 sps:$4 sm:$0xff]   ;;  %v4626_v22 = vld [vmem:[%s6996_s1 + $0x228] ss:$16 sps:$4 sm:$0xff]   ;;  %v4631_v23 = vld [vmem:[%s6996_s1 + $0x244] ss:$16 sps:$4 sm:$0xff]  }
  0x1a   :  { %v4634_v24 = vld [vmem:[%s6996_s1 + $0x24c] ss:$16 sps:$4 sm:$0xff]   ;;  %v4629_v25 = vld [vmem:[%s6996_s1 + $0x240] ss:$16 sps:$4 sm:$0xff]   ;;  %v4650_v38 = vld [vmem:[%s6996_s1 + $0x2a8] ss:$16 sps:$4 sm:$0xff]  }
  0x1b   :  { %3230 = vmatpush1.bf16.msra.mxu0 %v4560_v26  ;;  %3558 = vmatpush1.bf16.msra.mxu1 %v4561_v27  ;;  %v4632_v26 = vld [vmem:[%s6996_s1 + $0x248] ss:$16 sps:$4 sm:$0xff]   ;;  %v4637_v27 = vld [vmem:[%s6996_s1 + $0x264] ss:$16 sps:$4 sm:$0xff]   ;;  %v4652_v36 = vld [vmem:[%s6996_s1 + $0x2ac] ss:$16 sps:$4 sm:$0xff]  }
  0x1c   :  { %3231 = vmatprep.subr.bf16.mxu0 %v4562_v28  ;;  %3559 = vmatprep.subr.bf16.mxu1 %v4564_v29  ;;  %v4640_v28 = vld [vmem:[%s6996_s1 + $0x26c] ss:$16 sps:$4 sm:$0xff]   ;;  %v4635_v29 = vld [vmem:[%s6996_s1 + $0x260] ss:$16 sps:$4 sm:$0xff]   ;;  %v4656_v42 = vld [vmem:[%s6996_s1 + $0x2c8] ss:$16 sps:$4 sm:$0xff]  }
  0x1d   :  { %v4647_v37 = vld [vmem:[%s6996_s1 + $0x2a0] ss:$16 sps:$4 sm:$0xff]   ;;  %v4668_v52 = vld [vmem:[%s6996_s1 + $0x308] ss:$16 sps:$4 sm:$0xff]   ;;  %v4676_v54 = vld [vmem:[%s6996_s1 + $0x32c] ss:$16 sps:$4 sm:$0xff]  }
  0x1e   :  { %v4682_v58 = vld [vmem:[%s6996_s1 + $0x34c] ss:$16 sps:$4 sm:$0xff]   ;;  %v4680_v60 = vld [vmem:[%s6996_s1 + $0x348] ss:$16 sps:$4 sm:$0xff]   ;;  %v4709_v14 = vld [vmem:[%s6996_s1 + $0x3e4] ss:$16 sps:$4 sm:$0xff]  }
  0x1f   :  { %3232 = vmatpush1.bf16.msra.mxu0 %v4566_v30  ;;  %3560 = vmatpush1.bf16.msra.mxu1 %v4567_v31  ;;  %v4638_v30 = vld [vmem:[%s6996_s1 + $0x268] ss:$16 sps:$4 sm:$0xff]   ;;  %v4643_v31 = vld [vmem:[%s6996_s1 + $0x284] ss:$16 sps:$4 sm:$0xff]  }
  0x20   :  { %3233 = vmatprep.subr.bf16.mxu0 %v4568_v32  ;;  %3561 = vmatprep.subr.bf16.mxu1 %v4570_v33  ;;  %v4646_v32 = vld [vmem:[%s6996_s1 + $0x28c] ss:$16 sps:$4 sm:$0xff]   ;;  %v4641_v33 = vld [vmem:[%s6996_s1 + $0x280] ss:$16 sps:$4 sm:$0xff]   ;;  %v4692_v4 = vld [vmem:[%s6996_s1 + $0x388] ss:$16 sps:$4 sm:$0xff]  }
  0x23   :  { %3234 = vmatpush1.bf16.msra.mxu0 %v4572_v34  ;;  %3562 = vmatpush1.bf16.msra.mxu1 %v4573_v35  ;;  %v4644_v34 = vld [vmem:[%s6996_s1 + $0x288] ss:$16 sps:$4 sm:$0xff]   ;;  %v4649_v35 = vld [vmem:[%s6996_s1 + $0x2a4] ss:$16 sps:$4 sm:$0xff]  }
  0x24   :  { %3235 = vmatprep.subr.bf16.mxu0 %v4574_v39  ;;  %3563 = vmatprep.subr.bf16.mxu1 %v4576_v40  ;;  %v4655_v39 = vld [vmem:[%s6996_s1 + $0x2c4] ss:$16 sps:$4 sm:$0xff]   ;;  %v4658_v40 = vld [vmem:[%s6996_s1 + $0x2cc] ss:$16 sps:$4 sm:$0xff]  }
  0x27   :  { %3236 = vmatpush1.bf16.msra.mxu0 %v4578_v41  ;;  %3564 = vmatpush1.bf16.msra.mxu1 %v4579_v44  ;;  %v4653_v41 = vld [vmem:[%s6996_s1 + $0x2c0] ss:$16 sps:$4 sm:$0xff]   ;;  %v4661_v44 = vld [vmem:[%s6996_s1 + $0x2e4] ss:$16 sps:$4 sm:$0xff]  }
  0x28   :  { %3237 = vmatprep.subr.bf16.mxu0 %v4580_v45  ;;  %3565 = vmatprep.subr.bf16.mxu1 %v4582_v46  ;;  %v4664_v45 = vld [vmem:[%s6996_s1 + $0x2ec] ss:$16 sps:$4 sm:$0xff]   ;;  %v4659_v46 = vld [vmem:[%s6996_s1 + $0x2e0] ss:$16 sps:$4 sm:$0xff]  }
  0x2b   :  { %3238 = vmatpush1.bf16.msra.mxu0 %v4584_v47  ;;  %3566 = vmatpush1.bf16.msra.mxu1 %v4585_v48  ;;  %v4662_v47 = vld [vmem:[%s6996_s1 + $0x2e8] ss:$16 sps:$4 sm:$0xff]   ;;  %v4667_v48 = vld [vmem:[%s6996_s1 + $0x304] ss:$16 sps:$4 sm:$0xff]  }
  0x2c   :  { %3239 = vmatprep.subr.bf16.mxu0 %v4586_v50  ;;  %3567 = vmatprep.subr.bf16.mxu1 %v4588_v51  ;;  %v4670_v50 = vld [vmem:[%s6996_s1 + $0x30c] ss:$16 sps:$4 sm:$0xff]   ;;  %v4665_v51 = vld [vmem:[%s6996_s1 + $0x300] ss:$16 sps:$4 sm:$0xff]  }
  0x2f   :  { %3240 = vmatpush1.bf16.msra.mxu0 %v4590_v53  ;;  %3568 = vmatpush1.bf16.msra.mxu1 %v4591_v55  ;;  %v4673_v53 = vld [vmem:[%s6996_s1 + $0x324] ss:$16 sps:$4 sm:$0xff]   ;;  %v4671_v55 = vld [vmem:[%s6996_s1 + $0x320] ss:$16 sps:$4 sm:$0xff]  }
  0x30   :  { %3241 = vmatprep.subr.bf16.mxu0 %v4592_v56  ;;  %3569 = vmatprep.subr.bf16.mxu1 %v4594_v57  ;;  %v4674_v56 = vld [vmem:[%s6996_s1 + $0x328] ss:$16 sps:$4 sm:$0xff]   ;;  %v4679_v57 = vld [vmem:[%s6996_s1 + $0x344] ss:$16 sps:$4 sm:$0xff]  }
  0x33   :  { %3242 = vmatpush1.bf16.msra.mxu0 %v4596_v59  ;;  %3570 = vmatpush1.bf16.msra.mxu1 %v4597_v61  ;;  %v4677_v59 = vld [vmem:[%s6996_s1 + $0x340] ss:$16 sps:$4 sm:$0xff]   ;;  %v4685_v61 = vld [vmem:[%s6996_s1 + $0x364] ss:$16 sps:$4 sm:$0xff]  }
  0x34   :  { %3243 = vmatprep.subr.bf16.mxu0 %v4598_v62  ;;  %3571 = vmatprep.subr.bf16.mxu1 %v4600_v63  ;;  %v4688_v62 = vld [vmem:[%s6996_s1 + $0x36c] ss:$16 sps:$4 sm:$0xff]   ;;  %v4683_v63 = vld [vmem:[%s6996_s1 + $0x360] ss:$16 sps:$4 sm:$0xff]  }
  0x37   :  { %3244 = vmatpush1.bf16.msra.mxu0 %v4602_v0  ;;  %3572 = vmatpush1.bf16.msra.mxu1 %v4603_v1  ;;  %v4686_v0 = vld [vmem:[%s6996_s1 + $0x368] ss:$16 sps:$4 sm:$0xff]   ;;  %v4691_v1 = vld [vmem:[%s6996_s1 + $0x384] ss:$16 sps:$4 sm:$0xff]  }
  0x38   :  { %3245 = vmatprep.subr.bf16.mxu0 %v4604_v2  ;;  %3573 = vmatprep.subr.bf16.mxu1 %v4606_v3  ;;  %v4694_v2 = vld [vmem:[%s6996_s1 + $0x38c] ss:$16 sps:$4 sm:$0xff]   ;;  %v4689_v3 = vld [vmem:[%s6996_s1 + $0x380] ss:$16 sps:$4 sm:$0xff]  }
  0x3b   :  { %3246 = vmatpush1.bf16.msra.mxu0 %v4608_v5  ;;  %3574 = vmatpush1.bf16.msra.mxu1 %v4609_v6  ;;  %v4697_v5 = vld [vmem:[%s6996_s1 + $0x3a4] ss:$16 sps:$4 sm:$0xff]   ;;  %v4700_v6 = vld [vmem:[%s6996_s1 + $0x3ac] ss:$16 sps:$4 sm:$0xff]  }
  0x3c   :  { %3247 = vmatprep.subr.bf16.mxu0 %v4610_v7  ;;  %3575 = vmatprep.subr.bf16.mxu1 %v4612_v8  ;;  %v4695_v7 = vld [vmem:[%s6996_s1 + $0x3a0] ss:$16 sps:$4 sm:$0xff]   ;;  %v4698_v8 = vld [vmem:[%s6996_s1 + $0x3a8] ss:$16 sps:$4 sm:$0xff]  }
  0x3f   :  { %3248 = vmatpush1.bf16.msra.mxu0 %v4614_v10  ;;  %3576 = vmatpush1.bf16.msra.mxu1 %v4615_v11  ;;  %v4703_v10 = vld [vmem:[%s6996_s1 + $0x3c4] ss:$16 sps:$4 sm:$0xff]   ;;  %v4706_v11 = vld [vmem:[%s6996_s1 + $0x3cc] ss:$16 sps:$4 sm:$0xff]  }
  0x40   :  { %3258 = vmatprep.subr.bf16.mxu0 %v4619_v12  ;;  %3586 = vmatprep.subr.bf16.mxu1 %v4622_v13  ;;  %v4701_v12 = vld [vmem:[%s6996_s1 + $0x3c0] ss:$16 sps:$4 sm:$0xff]   ;;  %v4704_v13 = vld [vmem:[%s6996_s1 + $0x3c8] ss:$16 sps:$4 sm:$0xff]  }
  0x42   :  { %3250 = vmatmul.mubr.bf16.vlgmr.msra.gmra.mrb[0].mxu0 %v107_v16  ;;  %3578 = vmatmul.mubr.bf16.vlgmr.msra.gmra.mrb[0].mxu1 %v107_v16  ;;  %v4707_v16 = vld [vmem:[%s6996_s1 + $0x3e0] ss:$16 sps:$4 sm:$0xff]  }
  0x43   :  { %3259 = vmatpush1.bf16.msra.mxu0 %v4617_v15  ;;  %3587 = vmatpush1.bf16.msra.mxu1 %v4620_v17  ;;  %v4712_v15 = vld [vmem:[%s6996_s1 + $0x3ec] ss:$16 sps:$4 sm:$0xff]   ;;  %v4710_v17 = vld [vmem:[%s6996_s1 + $0x3e8] ss:$16 sps:$4 sm:$0xff]  }
  0x44   :  { %3260 = vmatprep.subr.bf16.mxu0 %v4625_v18  ;;  %3588 = vmatprep.subr.bf16.mxu1 %v4628_v19  ;;  %v4715_v18 = vld [vmem:[%s6996_s1 + $0x404] ss:$16 sps:$4 sm:$0xff]   ;;  %v4718_v19 = vld [vmem:[%s6996_s1 + $0x40c] ss:$16 sps:$4 sm:$0xff]  }
  0x45   :  { %3290 = vmatprep.mubr.bf16.mxu0 %v110_v20  ;;  %3618 = vmatprep.mubr.bf16.mxu1 %v110_v20  ;;  %v4713_v20 = vld [vmem:[%s6996_s1 + $0x400] ss:$16 sps:$4 sm:$0xff]  }
  0x47   :  { %3261 = vmatpush1.bf16.msra.mxu0 %v4623_v21  ;;  %3589 = vmatpush1.bf16.msra.mxu1 %v4626_v22  ;;  %v109_v21 = vpack.c.bf16 %v5544_v9, %v5544_v9  ;;  %v4716_v22 = vld [vmem:[%s6996_s1 + $0x408] ss:$16 sps:$4 sm:$0xff]   ;;  %v4724_v9 = vld [vmem:[%s6996_s1 + $0x42c] ss:$16 sps:$4 sm:$0xff]  }
  0x48   :  { %3262 = vmatprep.subr.bf16.mxu0 %v4631_v23  ;;  %3590 = vmatprep.subr.bf16.mxu1 %v4634_v24  ;;  %v5763_v23 = vld [vmem:[%s6995_s0 + $0x8] sm:$0xff]  ;;  %v4721_v24 = vld [vmem:[%s6996_s1 + $0x424] ss:$16 sps:$4 sm:$0xff]  }
  0x4b   :  { %3263 = vmatpush1.bf16.msra.mxu0 %v4629_v25  ;;  %3591 = vmatpush1.bf16.msra.mxu1 %v4632_v26  ;;  %v5773_v25 = vrot.slane %v5763_v23, %v5483_v49 }
  0x4c   :  { %3264 = vmatprep.subr.bf16.mxu0 %v4637_v27  ;;  %3592 = vmatprep.subr.bf16.mxu1 %v4640_v28  ;;  %v4719_v27 = vld [vmem:[%s6996_s1 + $0x420] ss:$16 sps:$4 sm:$0xff]   ;;  %v4722_v28 = vld [vmem:[%s6996_s1 + $0x428] ss:$16 sps:$4 sm:$0xff]  }
  0x4d   :  { %v55_v26 = vcombine.high %v5773_v25, %v5773_v25 }
  0x4f   :  { %3265 = vmatpush1.bf16.msra.mxu0 %v4635_v29  ;;  %3593 = vmatpush1.bf16.msra.mxu1 %v4638_v30  ;;  %v4727_v29 = vld [vmem:[%s6996_s1 + $0x444] ss:$16 sps:$4 sm:$0xff]   ;;  %v4730_v30 = vld [vmem:[%s6996_s1 + $0x44c] ss:$16 sps:$4 sm:$0xff]  }
  0x50   :  { %3266 = vmatprep.subr.bf16.mxu0 %v4643_v31  ;;  %3594 = vmatprep.subr.bf16.mxu1 %v4646_v32  ;;  %v112_v31 = vpack.c.bf16 %v55_v26, %v55_v26  ;;  %v4725_v32 = vld [vmem:[%s6996_s1 + $0x440] ss:$16 sps:$4 sm:$0xff]   ;;  %v4806_v26 = vld [vmem:[%s6996_s1 + $0x5e8] ss:$16 sps:$4 sm:$0xff]  }
  0x53   :  { %3267 = vmatpush1.bf16.msra.mxu0 %v4641_v33  ;;  %3595 = vmatpush1.bf16.msra.mxu1 %v4644_v34  ;;  %v4728_v33 = vld [vmem:[%s6996_s1 + $0x448] ss:$16 sps:$4 sm:$0xff]   ;;  %v4733_v34 = vld [vmem:[%s6996_s1 + $0x464] ss:$16 sps:$4 sm:$0xff]  }
  0x54   :  { %3268 = vmatprep.subr.bf16.mxu0 %v4649_v35  ;;  %3596 = vmatprep.subr.bf16.mxu1 %v4652_v36  ;;  %v4736_v35 = vld [vmem:[%s6996_s1 + $0x46c] ss:$16 sps:$4 sm:$0xff]   ;;  %v4731_v36 = vld [vmem:[%s6996_s1 + $0x460] ss:$16 sps:$4 sm:$0xff]  }
  0x57   :  { %3269 = vmatpush1.bf16.msra.mxu0 %v4647_v37  ;;  %3597 = vmatpush1.bf16.msra.mxu1 %v4650_v38  ;;  %v4734_v37 = vld [vmem:[%s6996_s1 + $0x468] ss:$16 sps:$4 sm:$0xff]   ;;  %v4739_v38 = vld [vmem:[%s6996_s1 + $0x484] ss:$16 sps:$4 sm:$0xff]  }
  0x58   :  { %3270 = vmatprep.subr.bf16.mxu0 %v4655_v39  ;;  %3598 = vmatprep.subr.bf16.mxu1 %v4658_v40  ;;  %v4742_v39 = vld [vmem:[%s6996_s1 + $0x48c] ss:$16 sps:$4 sm:$0xff]   ;;  %v4737_v40 = vld [vmem:[%s6996_s1 + $0x480] ss:$16 sps:$4 sm:$0xff]  }
  0x5b   :  { %3271 = vmatpush1.bf16.msra.mxu0 %v4653_v41  ;;  %3599 = vmatpush1.bf16.msra.mxu1 %v4656_v42  ;;  %v4740_v41 = vld [vmem:[%s6996_s1 + $0x488] ss:$16 sps:$4 sm:$0xff]   ;;  %v4745_v42 = vld [vmem:[%s6996_s1 + $0x4a4] ss:$16 sps:$4 sm:$0xff]  }
  0x5c   :  { %3272 = vmatprep.subr.bf16.mxu0 %v4661_v44  ;;  %3600 = vmatprep.subr.bf16.mxu1 %v4664_v45  ;;  %v4748_v44 = vld [vmem:[%s6996_s1 + $0x4ac] ss:$16 sps:$4 sm:$0xff]   ;;  %v4743_v45 = vld [vmem:[%s6996_s1 + $0x4a0] ss:$16 sps:$4 sm:$0xff]  }
  0x5f   :  { %3273 = vmatpush1.bf16.msra.mxu0 %v4659_v46  ;;  %3601 = vmatpush1.bf16.msra.mxu1 %v4662_v47  ;;  %v4746_v46 = vld [vmem:[%s6996_s1 + $0x4a8] ss:$16 sps:$4 sm:$0xff]   ;;  %v4751_v47 = vld [vmem:[%s6996_s1 + $0x4c4] ss:$16 sps:$4 sm:$0xff]  }
  0x60   :  { %3274 = vmatprep.subr.bf16.mxu0 %v4667_v48  ;;  %3602 = vmatprep.subr.bf16.mxu1 %v4670_v50  ;;  %v4754_v48 = vld [vmem:[%s6996_s1 + $0x4cc] ss:$16 sps:$4 sm:$0xff]   ;;  %v4749_v50 = vld [vmem:[%s6996_s1 + $0x4c0] ss:$16 sps:$4 sm:$0xff]  }
  0x63   :  { %3275 = vmatpush1.bf16.msra.mxu0 %v4665_v51  ;;  %3603 = vmatpush1.bf16.msra.mxu1 %v4668_v52  ;;  %v4752_v51 = vld [vmem:[%s6996_s1 + $0x4c8] ss:$16 sps:$4 sm:$0xff]   ;;  %v4757_v52 = vld [vmem:[%s6996_s1 + $0x4e4] ss:$16 sps:$4 sm:$0xff]  }
  0x64   :  { %3276 = vmatprep.subr.bf16.mxu0 %v4673_v53  ;;  %3604 = vmatprep.subr.bf16.mxu1 %v4676_v54  ;;  %v4760_v53 = vld [vmem:[%s6996_s1 + $0x4ec] ss:$16 sps:$4 sm:$0xff]   ;;  %v4755_v54 = vld [vmem:[%s6996_s1 + $0x4e0] ss:$16 sps:$4 sm:$0xff]  }
  0x67   :  { %3277 = vmatpush1.bf16.msra.mxu0 %v4671_v55  ;;  %3605 = vmatpush1.bf16.msra.mxu1 %v4674_v56  ;;  %v4758_v55 = vld [vmem:[%s6996_s1 + $0x4e8] ss:$16 sps:$4 sm:$0xff]   ;;  %v4763_v56 = vld [vmem:[%s6996_s1 + $0x504] ss:$16 sps:$4 sm:$0xff]  }
  0x68   :  { %3278 = vmatprep.subr.bf16.mxu0 %v4679_v57  ;;  %3606 = vmatprep.subr.bf16.mxu1 %v4682_v58  ;;  %v4766_v57 = vld [vmem:[%s6996_s1 + $0x50c] ss:$16 sps:$4 sm:$0xff]   ;;  %v4761_v58 = vld [vmem:[%s6996_s1 + $0x500] ss:$16 sps:$4 sm:$0xff]  }
  0x6b   :  { %3279 = vmatpush1.bf16.msra.mxu0 %v4677_v59  ;;  %3607 = vmatpush1.bf16.msra.mxu1 %v4680_v60  ;;  %v4764_v59 = vld [vmem:[%s6996_s1 + $0x508] ss:$16 sps:$4 sm:$0xff]   ;;  %v4769_v60 = vld [vmem:[%s6996_s1 + $0x524] ss:$16 sps:$4 sm:$0xff]  }
  0x6c   :  { %3280 = vmatprep.subr.bf16.mxu0 %v4685_v61  ;;  %3608 = vmatprep.subr.bf16.mxu1 %v4688_v62  ;;  %v4772_v61 = vld [vmem:[%s6996_s1 + $0x52c] ss:$16 sps:$4 sm:$0xff]   ;;  %v4767_v62 = vld [vmem:[%s6996_s1 + $0x520] ss:$16 sps:$4 sm:$0xff]  }
  0x6f   :  { %3281 = vmatpush1.bf16.msra.mxu0 %v4683_v63  ;;  %3609 = vmatpush1.bf16.msra.mxu1 %v4686_v0  ;;  %v4770_v63 = vld [vmem:[%s6996_s1 + $0x528] ss:$16 sps:$4 sm:$0xff]   ;;  %v4775_v0 = vld [vmem:[%s6996_s1 + $0x544] ss:$16 sps:$4 sm:$0xff]  }
  0x70   :  { %3282 = vmatprep.subr.bf16.mxu0 %v4691_v1  ;;  %3610 = vmatprep.subr.bf16.mxu1 %v4694_v2  ;;  %v4778_v1 = vld [vmem:[%s6996_s1 + $0x54c] ss:$16 sps:$4 sm:$0xff]   ;;  %v4773_v2 = vld [vmem:[%s6996_s1 + $0x540] ss:$16 sps:$4 sm:$0xff]  }
  0x73   :  { %3283 = vmatpush1.bf16.msra.mxu0 %v4689_v3  ;;  %3611 = vmatpush1.bf16.msra.mxu1 %v4692_v4  ;;  %v4776_v3 = vld [vmem:[%s6996_s1 + $0x548] ss:$16 sps:$4 sm:$0xff]   ;;  %v4781_v4 = vld [vmem:[%s6996_s1 + $0x564] ss:$16 sps:$4 sm:$0xff]  }
  0x74   :  { %3284 = vmatprep.subr.bf16.mxu0 %v4697_v5  ;;  %3612 = vmatprep.subr.bf16.mxu1 %v4700_v6  ;;  %v4784_v5 = vld [vmem:[%s6996_s1 + $0x56c] ss:$16 sps:$4 sm:$0xff]   ;;  %v4779_v6 = vld [vmem:[%s6996_s1 + $0x560] ss:$16 sps:$4 sm:$0xff]  }
  0x77   :  { %3285 = vmatpush1.bf16.msra.mxu0 %v4695_v7  ;;  %3613 = vmatpush1.bf16.msra.mxu1 %v4698_v8  ;;  %v4782_v7 = vld [vmem:[%s6996_s1 + $0x568] ss:$16 sps:$4 sm:$0xff]   ;;  %v4787_v8 = vld [vmem:[%s6996_s1 + $0x584] ss:$16 sps:$4 sm:$0xff]  }
  0x78   :  { %3286 = vmatprep.subr.bf16.mxu0 %v4703_v10  ;;  %3614 = vmatprep.subr.bf16.mxu1 %v4706_v11  ;;  %v4790_v10 = vld [vmem:[%s6996_s1 + $0x58c] ss:$16 sps:$4 sm:$0xff]   ;;  %v4785_v11 = vld [vmem:[%s6996_s1 + $0x580] ss:$16 sps:$4 sm:$0xff]  }
  0x7b   :  { %3287 = vmatpush1.bf16.msra.mxu0 %v4701_v12  ;;  %3615 = vmatpush1.bf16.msra.mxu1 %v4704_v13  ;;  %v4788_v12 = vld [vmem:[%s6996_s1 + $0x588] ss:$16 sps:$4 sm:$0xff]   ;;  %v4793_v13 = vld [vmem:[%s6996_s1 + $0x5a4] ss:$16 sps:$4 sm:$0xff]  }
  0x7c   :  { %3288 = vmatprep.subr.bf16.mxu0 %v4709_v14  ;;  %3616 = vmatprep.subr.bf16.mxu1 %v4712_v15  ;;  %v4796_v14 = vld [vmem:[%s6996_s1 + $0x5ac] ss:$16 sps:$4 sm:$0xff]   ;;  %v4791_v15 = vld [vmem:[%s6996_s1 + $0x5a0] ss:$16 sps:$4 sm:$0xff]  }
  0x7f   :  { %3289 = vmatpush1.bf16.msra.mxu0 %v4707_v16  ;;  %3617 = vmatpush1.bf16.msra.mxu1 %v4710_v17  ;;  %v4794_v16 = vld [vmem:[%s6996_s1 + $0x5a8] ss:$16 sps:$4 sm:$0xff]   ;;  %v4799_v17 = vld [vmem:[%s6996_s1 + $0x5c4] ss:$16 sps:$4 sm:$0xff]  }
  0x80   :  { %3299 = vmatprep.subr.bf16.mxu0 %v4715_v18  ;;  %3627 = vmatprep.subr.bf16.mxu1 %v4718_v19  ;;  %v4802_v18 = vld [vmem:[%s6996_s1 + $0x5cc] ss:$16 sps:$4 sm:$0xff]   ;;  %v40_v19 = vcombine.high %v5763_v23, %v5763_v23 }
  0x81   :  { %v4808_v23 = vld [vmem:[%s6996_s1 + $0x5ec] ss:$16 sps:$4 sm:$0xff]  }
  0x82   :  { %3291 = vmatmul.mubr.bf16.vlgmr.msra.gmra.mrb[0].mxu0 %v109_v21  ;;  %3619 = vmatmul.mubr.bf16.vlgmr.msra.gmra.mrb[0].mxu1 %v109_v21  ;;  %v4800_v21 = vld [vmem:[%s6996_s1 + $0x5c8] ss:$16 sps:$4 sm:$0xff]  }
  0x83   :  { %3300 = vmatpush1.bf16.msra.mxu0 %v4713_v20  ;;  %3628 = vmatpush1.bf16.msra.mxu1 %v4716_v22  ;;  %v4797_v20 = vld [vmem:[%s6996_s1 + $0x5c0] ss:$16 sps:$4 sm:$0xff]   ;;  %v4805_v22 = vld [vmem:[%s6996_s1 + $0x5e4] ss:$16 sps:$4 sm:$0xff]  }
  0x84   :  { %3301 = vmatprep.subr.bf16.mxu0 %v4721_v24  ;;  %3629 = vmatprep.subr.bf16.mxu1 %v4724_v9  ;;  %v5948_v24 = vrot.slane %v40_v19, %v5483_v49  ;;  %v4803_v9 = vld [vmem:[%s6996_s1 + $0x5e0] ss:$16 sps:$4 sm:$0xff]   ;;  %v4884_v19 = vld [vmem:[%s6996_s1 + $0x788] ss:$16 sps:$4 sm:$0xff]  }
  0x85   :  { %3331 = vmatprep.mubr.bf16.mxu0 %v112_v31  ;;  %3659 = vmatprep.mubr.bf16.mxu1 %v112_v31  ;;  %v4809_v31 = vld [vmem:[%s6996_s1 + $0x600] ss:$16 sps:$4 sm:$0xff]  }
  0x87   :  { %3302 = vmatpush1.bf16.msra.mxu0 %v4719_v27  ;;  %3630 = vmatpush1.bf16.msra.mxu1 %v4722_v28  ;;  %v4811_v27 = vld [vmem:[%s6996_s1 + $0x604] ss:$16 sps:$4 sm:$0xff]   ;;  %v4814_v28 = vld [vmem:[%s6996_s1 + $0x60c] ss:$16 sps:$4 sm:$0xff]  }
  0x88   :  { %3303 = vmatprep.subr.bf16.mxu0 %v4727_v29  ;;  %3631 = vmatprep.subr.bf16.mxu1 %v4730_v30  ;;  %v56_v29 = vcombine.high %v5948_v24, %v5948_v24  ;;  %v111_v30 = vpack.c.bf16 %v5773_v25, %v5773_v25  ;;  %v4820_v25 = vld [vmem:[%s6996_s1 + $0x62c] ss:$16 sps:$4 sm:$0xff]  }
  0x8b   :  { %3304 = vmatpush1.bf16.msra.mxu0 %v4725_v32  ;;  %3632 = vmatpush1.bf16.msra.mxu1 %v4728_v33  ;;  %v4812_v32 = vld [vmem:[%s6996_s1 + $0x608] ss:$16 sps:$4 sm:$0xff]   ;;  %v4817_v33 = vld [vmem:[%s6996_s1 + $0x624] ss:$16 sps:$4 sm:$0xff]  }
  0x8c   :  { %3305 = vmatprep.subr.bf16.mxu0 %v4733_v34  ;;  %3633 = vmatprep.subr.bf16.mxu1 %v4736_v35  ;;  %v114_v34 = vpack.c.bf16 %v56_v29, %v56_v29  ;;  %v4815_v35 = vld [vmem:[%s6996_s1 + $0x620] ss:$16 sps:$4 sm:$0xff]   ;;  %v4896_v29 = vld [vmem:[%s6996_s1 + $0x7c8] ss:$16 sps:$4 sm:$0xff]  }
  0x8f   :  { %3306 = vmatpush1.bf16.msra.mxu0 %v4731_v36  ;;  %3634 = vmatpush1.bf16.msra.mxu1 %v4734_v37  ;;  %v4818_v36 = vld [vmem:[%s6996_s1 + $0x628] ss:$16 sps:$4 sm:$0xff]   ;;  %v4823_v37 = vld [vmem:[%s6996_s1 + $0x644] ss:$16 sps:$4 sm:$0xff]  }
  0x90   :  { %3307 = vmatprep.subr.bf16.mxu0 %v4739_v38  ;;  %3635 = vmatprep.subr.bf16.mxu1 %v4742_v39  ;;  %v4826_v38 = vld [vmem:[%s6996_s1 + $0x64c] ss:$16 sps:$4 sm:$0xff]   ;;  %v4821_v39 = vld [vmem:[%s6996_s1 + $0x640] ss:$16 sps:$4 sm:$0xff]  }
  0x93   :  { %3308 = vmatpush1.bf16.msra.mxu0 %v4737_v40  ;;  %3636 = vmatpush1.bf16.msra.mxu1 %v4740_v41  ;;  %v4824_v40 = vld [vmem:[%s6996_s1 + $0x648] ss:$16 sps:$4 sm:$0xff]   ;;  %v4829_v41 = vld [vmem:[%s6996_s1 + $0x664] ss:$16 sps:$4 sm:$0xff]  }
  0x94   :  { %3309 = vmatprep.subr.bf16.mxu0 %v4745_v42  ;;  %3637 = vmatprep.subr.bf16.mxu1 %v4748_v44  ;;  %v4832_v42 = vld [vmem:[%s6996_s1 + $0x66c] ss:$16 sps:$4 sm:$0xff]   ;;  %v4827_v44 = vld [vmem:[%s6996_s1 + $0x660] ss:$16 sps:$4 sm:$0xff]  }
  0x97   :  { %3310 = vmatpush1.bf16.msra.mxu0 %v4743_v45  ;;  %3638 = vmatpush1.bf16.msra.mxu1 %v4746_v46  ;;  %v4830_v45 = vld [vmem:[%s6996_s1 + $0x668] ss:$16 sps:$4 sm:$0xff]   ;;  %v4835_v46 = vld [vmem:[%s6996_s1 + $0x684] ss:$16 sps:$4 sm:$0xff]  }
  0x98   :  { %3311 = vmatprep.subr.bf16.mxu0 %v4751_v47  ;;  %3639 = vmatprep.subr.bf16.mxu1 %v4754_v48  ;;  %v4838_v47 = vld [vmem:[%s6996_s1 + $0x68c] ss:$16 sps:$4 sm:$0xff]   ;;  %v4833_v48 = vld [vmem:[%s6996_s1 + $0x680] ss:$16 sps:$4 sm:$0xff]  }
  0x9b   :  { %3312 = vmatpush1.bf16.msra.mxu0 %v4749_v50  ;;  %3640 = vmatpush1.bf16.msra.mxu1 %v4752_v51  ;;  %v4836_v50 = vld [vmem:[%s6996_s1 + $0x688] ss:$16 sps:$4 sm:$0xff]   ;;  %v4841_v51 = vld [vmem:[%s6996_s1 + $0x6a4] ss:$16 sps:$4 sm:$0xff]  }
  0x9c   :  { %3313 = vmatprep.subr.bf16.mxu0 %v4757_v52  ;;  %3641 = vmatprep.subr.bf16.mxu1 %v4760_v53  ;;  %v4844_v52 = vld [vmem:[%s6996_s1 + $0x6ac] ss:$16 sps:$4 sm:$0xff]   ;;  %v4839_v53 = vld [vmem:[%s6996_s1 + $0x6a0] ss:$16 sps:$4 sm:$0xff]  }
  0x9f   :  { %3314 = vmatpush1.bf16.msra.mxu0 %v4755_v54  ;;  %3642 = vmatpush1.bf16.msra.mxu1 %v4758_v55  ;;  %v4842_v54 = vld [vmem:[%s6996_s1 + $0x6a8] ss:$16 sps:$4 sm:$0xff]   ;;  %v4847_v55 = vld [vmem:[%s6996_s1 + $0x6c4] ss:$16 sps:$4 sm:$0xff]  }
  0xa0   :  { %3315 = vmatprep.subr.bf16.mxu0 %v4763_v56  ;;  %3643 = vmatprep.subr.bf16.mxu1 %v4766_v57  ;;  %v4850_v56 = vld [vmem:[%s6996_s1 + $0x6cc] ss:$16 sps:$4 sm:$0xff]   ;;  %v4845_v57 = vld [vmem:[%s6996_s1 + $0x6c0] ss:$16 sps:$4 sm:$0xff]  }
  0xa3   :  { %3316 = vmatpush1.bf16.msra.mxu0 %v4761_v58  ;;  %3644 = vmatpush1.bf16.msra.mxu1 %v4764_v59  ;;  %v4848_v58 = vld [vmem:[%s6996_s1 + $0x6c8] ss:$16 sps:$4 sm:$0xff]   ;;  %v4853_v59 = vld [vmem:[%s6996_s1 + $0x6e4] ss:$16 sps:$4 sm:$0xff]  }
  0xa4   :  { %3317 = vmatprep.subr.bf16.mxu0 %v4769_v60  ;;  %3645 = vmatprep.subr.bf16.mxu1 %v4772_v61  ;;  %v4856_v60 = vld [vmem:[%s6996_s1 + $0x6ec] ss:$16 sps:$4 sm:$0xff]   ;;  %v4851_v61 = vld [vmem:[%s6996_s1 + $0x6e0] ss:$16 sps:$4 sm:$0xff]  }
  0xa7   :  { %3318 = vmatpush1.bf16.msra.mxu0 %v4767_v62  ;;  %3646 = vmatpush1.bf16.msra.mxu1 %v4770_v63  ;;  %v4854_v62 = vld [vmem:[%s6996_s1 + $0x6e8] ss:$16 sps:$4 sm:$0xff]   ;;  %v4859_v63 = vld [vmem:[%s6996_s1 + $0x704] ss:$16 sps:$4 sm:$0xff]  }
  0xa8   :  { %3319 = vmatprep.subr.bf16.mxu0 %v4775_v0  ;;  %3647 = vmatprep.subr.bf16.mxu1 %v4778_v1  ;;  %v4862_v0 = vld [vmem:[%s6996_s1 + $0x70c] ss:$16 sps:$4 sm:$0xff]   ;;  %v4857_v1 = vld [vmem:[%s6996_s1 + $0x700] ss:$16 sps:$4 sm:$0xff]  }
  0xab   :  { %3320 = vmatpush1.bf16.msra.mxu0 %v4773_v2  ;;  %3648 = vmatpush1.bf16.msra.mxu1 %v4776_v3  ;;  %v4860_v2 = vld [vmem:[%s6996_s1 + $0x708] ss:$16 sps:$4 sm:$0xff]   ;;  %v4865_v3 = vld [vmem:[%s6996_s1 + $0x724] ss:$16 sps:$4 sm:$0xff]  }
  0xac   :  { %3321 = vmatprep.subr.bf16.mxu0 %v4781_v4  ;;  %3649 = vmatprep.subr.bf16.mxu1 %v4784_v5  ;;  %v4868_v4 = vld [vmem:[%s6996_s1 + $0x72c] ss:$16 sps:$4 sm:$0xff]   ;;  %v4863_v5 = vld [vmem:[%s6996_s1 + $0x720] ss:$16 sps:$4 sm:$0xff]  }
  0xaf   :  { %3322 = vmatpush1.bf16.msra.mxu0 %v4779_v6  ;;  %3650 = vmatpush1.bf16.msra.mxu1 %v4782_v7  ;;  %v4866_v6 = vld [vmem:[%s6996_s1 + $0x728] ss:$16 sps:$4 sm:$0xff]   ;;  %v4871_v7 = vld [vmem:[%s6996_s1 + $0x744] ss:$16 sps:$4 sm:$0xff]  }
  0xb0   :  { %3323 = vmatprep.subr.bf16.mxu0 %v4787_v8  ;;  %3651 = vmatprep.subr.bf16.mxu1 %v4790_v10  ;;  %v4874_v8 = vld [vmem:[%s6996_s1 + $0x74c] ss:$16 sps:$4 sm:$0xff]   ;;  %v4869_v10 = vld [vmem:[%s6996_s1 + $0x740] ss:$16 sps:$4 sm:$0xff]  }
  0xb3   :  { %3324 = vmatpush1.bf16.msra.mxu0 %v4785_v11  ;;  %3652 = vmatpush1.bf16.msra.mxu1 %v4788_v12  ;;  %v4872_v11 = vld [vmem:[%s6996_s1 + $0x748] ss:$16 sps:$4 sm:$0xff]   ;;  %v4877_v12 = vld [vmem:[%s6996_s1 + $0x764] ss:$16 sps:$4 sm:$0xff]  }
  0xb4   :  { %3325 = vmatprep.subr.bf16.mxu0 %v4793_v13  ;;  %3653 = vmatprep.subr.bf16.mxu1 %v4796_v14  ;;  %v4880_v13 = vld [vmem:[%s6996_s1 + $0x76c] ss:$16 sps:$4 sm:$0xff]   ;;  %v4875_v14 = vld [vmem:[%s6996_s1 + $0x760] ss:$16 sps:$4 sm:$0xff]  }
  0xb7   :  { %3326 = vmatpush1.bf16.msra.mxu0 %v4791_v15  ;;  %3654 = vmatpush1.bf16.msra.mxu1 %v4794_v16  ;;  %v4878_v15 = vld [vmem:[%s6996_s1 + $0x768] ss:$16 sps:$4 sm:$0xff]   ;;  %v4883_v16 = vld [vmem:[%s6996_s1 + $0x784] ss:$16 sps:$4 sm:$0xff]  }
  0xb8   :  { %3327 = vmatprep.subr.bf16.mxu0 %v4799_v17  ;;  %3655 = vmatprep.subr.bf16.mxu1 %v4802_v18  ;;  %v4886_v17 = vld [vmem:[%s6996_s1 + $0x78c] ss:$16 sps:$4 sm:$0xff]   ;;  %v4881_v18 = vld [vmem:[%s6996_s1 + $0x780] ss:$16 sps:$4 sm:$0xff]  }
  0xbb   :  { %3328 = vmatpush1.bf16.msra.mxu0 %v4797_v20  ;;  %3656 = vmatpush1.bf16.msra.mxu1 %v4800_v21  ;;  %v4889_v20 = vld [vmem:[%s6996_s1 + $0x7a4] ss:$16 sps:$4 sm:$0xff]   ;;  %v4892_v21 = vld [vmem:[%s6996_s1 + $0x7ac] ss:$16 sps:$4 sm:$0xff]  }
  0xbc   :  { %3329 = vmatprep.subr.bf16.mxu0 %v4805_v22  ;;  %3657 = vmatprep.subr.bf16.mxu1 %v4808_v23  ;;  %v4887_v22 = vld [vmem:[%s6996_s1 + $0x7a0] ss:$16 sps:$4 sm:$0xff]   ;;  %v4890_v23 = vld [vmem:[%s6996_s1 + $0x7a8] ss:$16 sps:$4 sm:$0xff]  }
  0xbf   :  { %3330 = vmatpush1.bf16.msra.mxu0 %v4803_v9  ;;  %3658 = vmatpush1.bf16.msra.mxu1 %v4806_v26  ;;  %v4895_v9 = vld [vmem:[%s6996_s1 + $0x7c4] ss:$16 sps:$4 sm:$0xff]   ;;  %v4898_v26 = vld [vmem:[%s6996_s1 + $0x7cc] ss:$16 sps:$4 sm:$0xff]  }
  0xc0   :  { %3340 = vmatprep.subr.bf16.mxu0 %v4811_v27  ;;  %3668 = vmatprep.subr.bf16.mxu1 %v4814_v28  ;;  %v4893_v27 = vld [vmem:[%s6996_s1 + $0x7c0] ss:$16 sps:$4 sm:$0xff]  }
  0xc1   :  { %v6140_v28 = vld [vmem:[%s6995_s0 + $0x10] sm:$0xff] }
  0xc2   :  { %3332 = vmatmul.mubr.bf16.vlgmr.msra.gmra.mrb[0].mxu0 %v111_v30  ;;  %3660 = vmatmul.mubr.bf16.vlgmr.msra.gmra.mrb[0].mxu1 %v111_v30  ;;  %v4901_v30 = vld [vmem:[%s6996_s1 + $0x7e4] ss:$16 sps:$4 sm:$0xff]  }
  0xc3   :  { %3341 = vmatpush1.bf16.msra.mxu0 %v4809_v31  ;;  %3669 = vmatpush1.bf16.msra.mxu1 %v4812_v32  ;;  %v4904_v31 = vld [vmem:[%s6996_s1 + $0x7ec] ss:$16 sps:$4 sm:$0xff]   ;;  %v6153_v32 = vrot.slane %v6140_v28, %v5483_v49 }
  0xc4   :  { %3342 = vmatprep.subr.bf16.mxu0 %v4817_v33  ;;  %3670 = vmatprep.subr.bf16.mxu1 %v4820_v25  ;;  %v4899_v33 = vld [vmem:[%s6996_s1 + $0x7e0] ss:$16 sps:$4 sm:$0xff]   ;;  %v4902_v25 = vld [vmem:[%s6996_s1 + $0x7e8] ss:$16 sps:$4 sm:$0xff]  }
  0xc5   :  { %3372 = vmatprep.mubr.bf16.mxu0 %v114_v34  ;;  %3700 = vmatprep.mubr.bf16.mxu1 %v114_v34  ;;  %v4908_v34 = vld [vmem:[%s6996_s1 + $0x804] ss:$16 sps:$4 sm:$0xff]  }
  0xc7   :  { %3343 = vmatpush1.bf16.msra.mxu0 %v4815_v35  ;;  %3671 = vmatpush1.bf16.msra.mxu1 %v4818_v36  ;;  %v4911_v35 = vld [vmem:[%s6996_s1 + $0x80c] ss:$16 sps:$4 sm:$0xff]   ;;  %v72_v36 = vcombine.high %v6153_v32, %v6153_v32 }
  0xc8   :  { %3344 = vmatprep.subr.bf16.mxu0 %v4823_v37  ;;  %3672 = vmatprep.subr.bf16.mxu1 %v4826_v38  ;;  %v4906_v37 = vld [vmem:[%s6996_s1 + $0x800] ss:$16 sps:$4 sm:$0xff]   ;;  %v113_v38 = vpack.c.bf16 %v5948_v24, %v5948_v24 }
  0xc9   :  { %v4912_v24 = vld [vmem:[%s6996_s1 + $0x820] ss:$16 sps:$4 sm:$0xff]  }
  0xcb   :  { %3345 = vmatpush1.bf16.msra.mxu0 %v4821_v39  ;;  %3673 = vmatpush1.bf16.msra.mxu1 %v4824_v40  ;;  %v4909_v39 = vld [vmem:[%s6996_s1 + $0x808] ss:$16 sps:$4 sm:$0xff]   ;;  %v4914_v40 = vld [vmem:[%s6996_s1 + $0x824] ss:$16 sps:$4 sm:$0xff]  }
  0xcc   :  { %3346 = vmatprep.subr.bf16.mxu0 %v4829_v41  ;;  %3674 = vmatprep.subr.bf16.mxu1 %v4832_v42  ;;  %v4917_v41 = vld [vmem:[%s6996_s1 + $0x82c] ss:$16 sps:$4 sm:$0xff]   ;;  %v116_v42 = vpack.c.bf16 %v72_v36, %v72_v36  ;;  %v4990_v36 = vld [vmem:[%s6996_s1 + $0x9c0] ss:$16 sps:$4 sm:$0xff]  }
  0xcf   :  { %3347 = vmatpush1.bf16.msra.mxu0 %v4827_v44  ;;  %3675 = vmatpush1.bf16.msra.mxu1 %v4830_v45  ;;  %v4915_v44 = vld [vmem:[%s6996_s1 + $0x828] ss:$16 sps:$4 sm:$0xff]   ;;  %v4920_v45 = vld [vmem:[%s6996_s1 + $0x844] ss:$16 sps:$4 sm:$0xff]  }
  0xd0   :  { %3348 = vmatprep.subr.bf16.mxu0 %v4835_v46  ;;  %3676 = vmatprep.subr.bf16.mxu1 %v4838_v47  ;;  %v4923_v46 = vld [vmem:[%s6996_s1 + $0x84c] ss:$16 sps:$4 sm:$0xff]   ;;  %v4918_v47 = vld [vmem:[%s6996_s1 + $0x840] ss:$16 sps:$4 sm:$0xff]  }
  0xd3   :  { %3349 = vmatpush1.bf16.msra.mxu0 %v4833_v48  ;;  %3677 = vmatpush1.bf16.msra.mxu1 %v4836_v50  ;;  %v4921_v48 = vld [vmem:[%s6996_s1 + $0x848] ss:$16 sps:$4 sm:$0xff]   ;;  %v4926_v50 = vld [vmem:[%s6996_s1 + $0x864] ss:$16 sps:$4 sm:$0xff]  }
  0xd4   :  { %3350 = vmatprep.subr.bf16.mxu0 %v4841_v51  ;;  %3678 = vmatprep.subr.bf16.mxu1 %v4844_v52  ;;  %v4929_v51 = vld [vmem:[%s6996_s1 + $0x86c] ss:$16 sps:$4 sm:$0xff]   ;;  %v4924_v52 = vld [vmem:[%s6996_s1 + $0x860] ss:$16 sps:$4 sm:$0xff]  }
  0xd7   :  { %3351 = vmatpush1.bf16.msra.mxu0 %v4839_v53  ;;  %3679 = vmatpush1.bf16.msra.mxu1 %v4842_v54  ;;  %v4927_v53 = vld [vmem:[%s6996_s1 + $0x868] ss:$16 sps:$4 sm:$0xff]   ;;  %v4932_v54 = vld [vmem:[%s6996_s1 + $0x884] ss:$16 sps:$4 sm:$0xff]  }
  0xd8   :  { %3352 = vmatprep.subr.bf16.mxu0 %v4847_v55  ;;  %3680 = vmatprep.subr.bf16.mxu1 %v4850_v56  ;;  %v4935_v55 = vld [vmem:[%s6996_s1 + $0x88c] ss:$16 sps:$4 sm:$0xff]   ;;  %v4930_v56 = vld [vmem:[%s6996_s1 + $0x880] ss:$16 sps:$4 sm:$0xff]  }
  0xdb   :  { %3353 = vmatpush1.bf16.msra.mxu0 %v4845_v57  ;;  %3681 = vmatpush1.bf16.msra.mxu1 %v4848_v58  ;;  %v4933_v57 = vld [vmem:[%s6996_s1 + $0x888] ss:$16 sps:$4 sm:$0xff]   ;;  %v4938_v58 = vld [vmem:[%s6996_s1 + $0x8a4] ss:$16 sps:$4 sm:$0xff]  }
  0xdc   :  { %3354 = vmatprep.subr.bf16.mxu0 %v4853_v59  ;;  %3682 = vmatprep.subr.bf16.mxu1 %v4856_v60  ;;  %v4941_v59 = vld [vmem:[%s6996_s1 + $0x8ac] ss:$16 sps:$4 sm:$0xff]   ;;  %v4936_v60 = vld [vmem:[%s6996_s1 + $0x8a0] ss:$16 sps:$4 sm:$0xff]  }
  0xdf   :  { %3355 = vmatpush1.bf16.msra.mxu0 %v4851_v61  ;;  %3683 = vmatpush1.bf16.msra.mxu1 %v4854_v62  ;;  %v4939_v61 = vld [vmem:[%s6996_s1 + $0x8a8] ss:$16 sps:$4 sm:$0xff]   ;;  %v4944_v62 = vld [vmem:[%s6996_s1 + $0x8c4] ss:$16 sps:$4 sm:$0xff]  }
  0xe0   :  { %3356 = vmatprep.subr.bf16.mxu0 %v4859_v63  ;;  %3684 = vmatprep.subr.bf16.mxu1 %v4862_v0  ;;  %v4947_v63 = vld [vmem:[%s6996_s1 + $0x8cc] ss:$16 sps:$4 sm:$0xff]   ;;  %v4942_v0 = vld [vmem:[%s6996_s1 + $0x8c0] ss:$16 sps:$4 sm:$0xff]  }
  0xe3   :  { %3357 = vmatpush1.bf16.msra.mxu0 %v4857_v1  ;;  %3685 = vmatpush1.bf16.msra.mxu1 %v4860_v2  ;;  %v4945_v1 = vld [vmem:[%s6996_s1 + $0x8c8] ss:$16 sps:$4 sm:$0xff]   ;;  %v4950_v2 = vld [vmem:[%s6996_s1 + $0x8e4] ss:$16 sps:$4 sm:$0xff]  }
  0xe4   :  { %3358 = vmatprep.subr.bf16.mxu0 %v4865_v3  ;;  %3686 = vmatprep.subr.bf16.mxu1 %v4868_v4  ;;  %v4953_v3 = vld [vmem:[%s6996_s1 + $0x8ec] ss:$16 sps:$4 sm:$0xff]   ;;  %v4948_v4 = vld [vmem:[%s6996_s1 + $0x8e0] ss:$16 sps:$4 sm:$0xff]  }
  0xe7   :  { %3359 = vmatpush1.bf16.msra.mxu0 %v4863_v5  ;;  %3687 = vmatpush1.bf16.msra.mxu1 %v4866_v6  ;;  %v4951_v5 = vld [vmem:[%s6996_s1 + $0x8e8] ss:$16 sps:$4 sm:$0xff]   ;;  %v4956_v6 = vld [vmem:[%s6996_s1 + $0x904] ss:$16 sps:$4 sm:$0xff]  }
  0xe8   :  { %3360 = vmatprep.subr.bf16.mxu0 %v4871_v7  ;;  %3688 = vmatprep.subr.bf16.mxu1 %v4874_v8  ;;  %v4959_v7 = vld [vmem:[%s6996_s1 + $0x90c] ss:$16 sps:$4 sm:$0xff]   ;;  %v4954_v8 = vld [vmem:[%s6996_s1 + $0x900] ss:$16 sps:$4 sm:$0xff]  }
  0xeb   :  { %3361 = vmatpush1.bf16.msra.mxu0 %v4869_v10  ;;  %3689 = vmatpush1.bf16.msra.mxu1 %v4872_v11  ;;  %v4957_v10 = vld [vmem:[%s6996_s1 + $0x908] ss:$16 sps:$4 sm:$0xff]   ;;  %v4962_v11 = vld [vmem:[%s6996_s1 + $0x924] ss:$16 sps:$4 sm:$0xff]  }
  0xec   :  { %3362 = vmatprep.subr.bf16.mxu0 %v4877_v12  ;;  %3690 = vmatprep.subr.bf16.mxu1 %v4880_v13  ;;  %v4965_v12 = vld [vmem:[%s6996_s1 + $0x92c] ss:$16 sps:$4 sm:$0xff]   ;;  %v4960_v13 = vld [vmem:[%s6996_s1 + $0x920] ss:$16 sps:$4 sm:$0xff]  }
  0xef   :  { %3363 = vmatpush1.bf16.msra.mxu0 %v4875_v14  ;;  %3691 = vmatpush1.bf16.msra.mxu1 %v4878_v15  ;;  %v4963_v14 = vld [vmem:[%s6996_s1 + $0x928] ss:$16 sps:$4 sm:$0xff]   ;;  %v4968_v15 = vld [vmem:[%s6996_s1 + $0x944] ss:$16 sps:$4 sm:$0xff]  }
  0xf0   :  { %3364 = vmatprep.subr.bf16.mxu0 %v4883_v16  ;;  %3692 = vmatprep.subr.bf16.mxu1 %v4886_v17  ;;  %v4971_v16 = vld [vmem:[%s6996_s1 + $0x94c] ss:$16 sps:$4 sm:$0xff]   ;;  %v4966_v17 = vld [vmem:[%s6996_s1 + $0x940] ss:$16 sps:$4 sm:$0xff]  }
  0xf3   :  { %3365 = vmatpush1.bf16.msra.mxu0 %v4881_v18  ;;  %3693 = vmatpush1.bf16.msra.mxu1 %v4884_v19  ;;  %v4969_v18 = vld [vmem:[%s6996_s1 + $0x948] ss:$16 sps:$4 sm:$0xff]   ;;  %v4974_v19 = vld [vmem:[%s6996_s1 + $0x964] ss:$16 sps:$4 sm:$0xff]  }
  0xf4   :  { %3366 = vmatprep.subr.bf16.mxu0 %v4889_v20  ;;  %3694 = vmatprep.subr.bf16.mxu1 %v4892_v21  ;;  %v4977_v20 = vld [vmem:[%s6996_s1 + $0x96c] ss:$16 sps:$4 sm:$0xff]   ;;  %v4972_v21 = vld [vmem:[%s6996_s1 + $0x960] ss:$16 sps:$4 sm:$0xff]  }
  0xf7   :  { %3367 = vmatpush1.bf16.msra.mxu0 %v4887_v22  ;;  %3695 = vmatpush1.bf16.msra.mxu1 %v4890_v23  ;;  %v4975_v22 = vld [vmem:[%s6996_s1 + $0x968] ss:$16 sps:$4 sm:$0xff]   ;;  %v4980_v23 = vld [vmem:[%s6996_s1 + $0x984] ss:$16 sps:$4 sm:$0xff]  }
  0xf8   :  { %3368 = vmatprep.subr.bf16.mxu0 %v4895_v9  ;;  %3696 = vmatprep.subr.bf16.mxu1 %v4898_v26  ;;  %v4983_v9 = vld [vmem:[%s6996_s1 + $0x98c] ss:$16 sps:$4 sm:$0xff]   ;;  %v4978_v26 = vld [vmem:[%s6996_s1 + $0x980] ss:$16 sps:$4 sm:$0xff]  }
  0xfb   :  { %3369 = vmatpush1.bf16.msra.mxu0 %v4893_v27  ;;  %3697 = vmatpush1.bf16.msra.mxu1 %v4896_v29  ;;  %v4981_v27 = vld [vmem:[%s6996_s1 + $0x988] ss:$16 sps:$4 sm:$0xff]   ;;  %v4986_v29 = vld [vmem:[%s6996_s1 + $0x9a4] ss:$16 sps:$4 sm:$0xff]  }
  0xfc   :  { %3370 = vmatprep.subr.bf16.mxu0 %v4901_v30  ;;  %3698 = vmatprep.subr.bf16.mxu1 %v4904_v31  ;;  %v4989_v30 = vld [vmem:[%s6996_s1 + $0x9ac] ss:$16 sps:$4 sm:$0xff]   ;;  %v4984_v31 = vld [vmem:[%s6996_s1 + $0x9a0] ss:$16 sps:$4 sm:$0xff]  }
  0xff   :  { %3371 = vmatpush1.bf16.msra.mxu0 %v4899_v33  ;;  %3699 = vmatpush1.bf16.msra.mxu1 %v4902_v25  ;;  %v4987_v33 = vld [vmem:[%s6996_s1 + $0x9a8] ss:$16 sps:$4 sm:$0xff]   ;;  %v4992_v25 = vld [vmem:[%s6996_s1 + $0x9c4] ss:$16 sps:$4 sm:$0xff]  }
 0x100   :  { %3381 = vmatprep.subr.bf16.mxu0 %v4908_v34  ;;  %3709 = vmatprep.subr.bf16.mxu1 %v4911_v35  ;;  %v4995_v34 = vld [vmem:[%s6996_s1 + $0x9cc] ss:$16 sps:$4 sm:$0xff]   ;;  %v57_v35 = vcombine.high %v6140_v28, %v6140_v28 }
 0x101   :  { %v5001_v28 = vld [vmem:[%s6996_s1 + $0x9ec] ss:$16 sps:$4 sm:$0xff]  }
 0x102   :  { %3373 = vmatmul.mubr.bf16.vlgmr.msra.gmra.mrb[0].mxu0 %v113_v38  ;;  %3701 = vmatmul.mubr.bf16.vlgmr.msra.gmra.mrb[0].mxu1 %v113_v38  ;;  %v4998_v38 = vld [vmem:[%s6996_s1 + $0x9e4] ss:$16 sps:$4 sm:$0xff]  }
 0x103   :  { %3382 = vmatpush1.bf16.msra.mxu0 %v4906_v37  ;;  %3710 = vmatpush1.bf16.msra.mxu1 %v4909_v39  ;;  %v4993_v37 = vld [vmem:[%s6996_s1 + $0x9c8] ss:$16 sps:$4 sm:$0xff]   ;;  %v6354_v39 = vrot.slane %v57_v35, %v5483_v49 }
 0x104   :  { %3383 = vmatprep.subr.bf16.mxu0 %v4914_v40  ;;  %3711 = vmatprep.subr.bf16.mxu1 %v4917_v41  ;;  %v4996_v40 = vld [vmem:[%s6996_s1 + $0x9e0] ss:$16 sps:$4 sm:$0xff]   ;;  %v4999_v41 = vld [vmem:[%s6996_s1 + $0x9e8] ss:$16 sps:$4 sm:$0xff]  }
 0x105   :  { %3413 = vmatprep.mubr.bf16.mxu0 %v116_v42  ;;  %3741 = vmatprep.mubr.bf16.mxu1 %v116_v42  ;;  %v5004_v42 = vld [vmem:[%s6996_s1 + $0xa04] ss:$16 sps:$4 sm:$0xff]  }
 0x107   :  { %3384 = vmatpush1.bf16.msra.mxu0 %v4912_v24  ;;  %3712 = vmatpush1.bf16.msra.mxu1 %v4915_v44  ;;  %v5007_v24 = vld [vmem:[%s6996_s1 + $0xa0c] ss:$16 sps:$4 sm:$0xff]   ;;  %v73_v44 = vcombine.high %v6354_v39, %v6354_v39 }
 0x108   :  { %3385 = vmatprep.subr.bf16.mxu0 %v4920_v45  ;;  %3713 = vmatprep.subr.bf16.mxu1 %v4923_v46  ;;  %v115_v45 = vpack.c.bf16 %v6153_v32, %v6153_v32  ;;  %v5002_v46 = vld [vmem:[%s6996_s1 + $0xa00] ss:$16 sps:$4 sm:$0xff]   ;;  %v5013_v32 = vld [vmem:[%s6996_s1 + $0xa2c] ss:$16 sps:$4 sm:$0xff]  }
 0x10b   :  { %3386 = vmatpush1.bf16.msra.mxu0 %v4918_v47  ;;  %3714 = vmatpush1.bf16.msra.mxu1 %v4921_v48  ;;  %v5005_v47 = vld [vmem:[%s6996_s1 + $0xa08] ss:$16 sps:$4 sm:$0xff]   ;;  %v5010_v48 = vld [vmem:[%s6996_s1 + $0xa24] ss:$16 sps:$4 sm:$0xff]  }
 0x10c   :  { %3387 = vmatprep.subr.bf16.mxu0 %v4926_v50  ;;  %3715 = vmatprep.subr.bf16.mxu1 %v4929_v51  ;;  %v118_v50 = vpack.c.bf16 %v73_v44, %v73_v44 }
 0x10f   :  { %3388 = vmatpush1.bf16.msra.mxu0 %v4924_v52  ;;  %3716 = vmatpush1.bf16.msra.mxu1 %v4927_v53 }
 0x110   :  { %3389 = vmatprep.subr.bf16.mxu0 %v4932_v54  ;;  %3717 = vmatprep.subr.bf16.mxu1 %v4935_v55 }
 0x113   :  { %3390 = vmatpush1.bf16.msra.mxu0 %v4930_v56  ;;  %3718 = vmatpush1.bf16.msra.mxu1 %v4933_v57 }
 0x114   :  { %3391 = vmatprep.subr.bf16.mxu0 %v4938_v58  ;;  %3719 = vmatprep.subr.bf16.mxu1 %v4941_v59 }
 0x117   :  { %3392 = vmatpush1.bf16.msra.mxu0 %v4936_v60  ;;  %3720 = vmatpush1.bf16.msra.mxu1 %v4939_v61 }
 0x118   :  { %3393 = vmatprep.subr.bf16.mxu0 %v4944_v62  ;;  %3721 = vmatprep.subr.bf16.mxu1 %v4947_v63 }
 0x11b   :  { %3394 = vmatpush1.bf16.msra.mxu0 %v4942_v0  ;;  %3722 = vmatpush1.bf16.msra.mxu1 %v4945_v1 }
 0x11c   :  { %3395 = vmatprep.subr.bf16.mxu0 %v4950_v2  ;;  %3723 = vmatprep.subr.bf16.mxu1 %v4953_v3 }
 0x11f   :  { %3396 = vmatpush1.bf16.msra.mxu0 %v4948_v4  ;;  %3724 = vmatpush1.bf16.msra.mxu1 %v4951_v5 }
 0x120   :  { %3397 = vmatprep.subr.bf16.mxu0 %v4956_v6  ;;  %3725 = vmatprep.subr.bf16.mxu1 %v4959_v7 }
 0x123   :  { %3398 = vmatpush1.bf16.msra.mxu0 %v4954_v8  ;;  %3726 = vmatpush1.bf16.msra.mxu1 %v4957_v10 }
 0x124   :  { %3399 = vmatprep.subr.bf16.mxu0 %v4962_v11  ;;  %3727 = vmatprep.subr.bf16.mxu1 %v4965_v12 }
 0x127   :  { %3400 = vmatpush1.bf16.msra.mxu0 %v4960_v13  ;;  %3728 = vmatpush1.bf16.msra.mxu1 %v4963_v14 }
 0x128   :  { %3401 = vmatprep.subr.bf16.mxu0 %v4968_v15  ;;  %3729 = vmatprep.subr.bf16.mxu1 %v4971_v16 }
 0x12b   :  { %3402 = vmatpush1.bf16.msra.mxu0 %v4966_v17  ;;  %3730 = vmatpush1.bf16.msra.mxu1 %v4969_v18 }
 0x12c   :  { %3403 = vmatprep.subr.bf16.mxu0 %v4974_v19  ;;  %3731 = vmatprep.subr.bf16.mxu1 %v4977_v20 }
 0x12f   :  { %3404 = vmatpush1.bf16.msra.mxu0 %v4972_v21  ;;  %3732 = vmatpush1.bf16.msra.mxu1 %v4975_v22 }
 0x130   :  { %3405 = vmatprep.subr.bf16.mxu0 %v4980_v23  ;;  %3733 = vmatprep.subr.bf16.mxu1 %v4983_v9 }
 0x133   :  { %3406 = vmatpush1.bf16.msra.mxu0 %v4978_v26  ;;  %3734 = vmatpush1.bf16.msra.mxu1 %v4981_v27 }
 0x134   :  { %3407 = vmatprep.subr.bf16.mxu0 %v4986_v29  ;;  %3735 = vmatprep.subr.bf16.mxu1 %v4989_v30 }
 0x137   :  { %3408 = vmatpush1.bf16.msra.mxu0 %v4984_v31  ;;  %3736 = vmatpush1.bf16.msra.mxu1 %v4987_v33 }
 0x138   :  { %3409 = vmatprep.subr.bf16.mxu0 %v4992_v25  ;;  %3737 = vmatprep.subr.bf16.mxu1 %v4995_v34 }
 0x13b   :  { %3410 = vmatpush1.bf16.msra.mxu0 %v4990_v36  ;;  %3738 = vmatpush1.bf16.msra.mxu1 %v4993_v37 }
 0x13c   :  { %3411 = vmatprep.subr.bf16.mxu0 %v4998_v38  ;;  %3739 = vmatprep.subr.bf16.mxu1 %v5001_v28 }
 0x13f   :  { %3412 = vmatpush1.bf16.msra.mxu0 %v4996_v40  ;;  %3740 = vmatpush1.bf16.msra.mxu1 %v4999_v41 }
 0x140   :  { %3422 = vmatprep.subr.bf16.mxu0 %v5004_v42  ;;  %3750 = vmatprep.subr.bf16.mxu1 %v5007_v24 }
 0x141   :  { %8 = vsyncpa [#allocation3], 0  ;;  %v5008_v51 = vld [vmem:[%s6996_s1 + $0xa20] ss:$16 sps:$4 sm:$0xff]   ;;  %v5011_v52 = vld [vmem:[%s6996_s1 + $0xa28] ss:$16 sps:$4 sm:$0xff]  }
 0x142   :  { %3414 = vmatmul.mubr.bf16.vlgmr.msra.gmra.mrb[0].mxu0 %v115_v45  ;;  %3742 = vmatmul.mubr.bf16.vlgmr.msra.gmra.mrb[0].mxu1 %v115_v45  ;;  %v5016_v53 = vld [vmem:[%s6996_s1 + $0xa44] ss:$16 sps:$4 sm:$0xff]   ;;  %v5019_v54 = vld [vmem:[%s6996_s1 + $0xa4c] ss:$16 sps:$4 sm:$0xff]   ;;  %v5014_v55 = vld [vmem:[%s6996_s1 + $0xa40] ss:$16 sps:$4 sm:$0xff]  }
 0x143   :  { %3423 = vmatpush1.bf16.msra.mxu0 %v5002_v46  ;;  %3751 = vmatpush1.bf16.msra.mxu1 %v5005_v47  ;;  %v5017_v56 = vld [vmem:[%s6996_s1 + $0xa48] ss:$16 sps:$4 sm:$0xff]   ;;  %v5022_v57 = vld [vmem:[%s6996_s1 + $0xa64] ss:$16 sps:$4 sm:$0xff]   ;;  %v5025_v58 = vld [vmem:[%s6996_s1 + $0xa6c] ss:$16 sps:$4 sm:$0xff]  }
 0x144   :  { %3424 = vmatprep.subr.bf16.mxu0 %v5010_v48  ;;  %3752 = vmatprep.subr.bf16.mxu1 %v5013_v32  ;;  %v5020_v59 = vld [vmem:[%s6996_s1 + $0xa60] ss:$16 sps:$4 sm:$0xff]   ;;  %v5023_v60 = vld [vmem:[%s6996_s1 + $0xa68] ss:$16 sps:$4 sm:$0xff]   ;;  %v5028_v61 = vld [vmem:[%s6996_s1 + $0xa84] ss:$16 sps:$4 sm:$0xff]  }
 0x145   :  { %3454 = vmatprep.mubr.bf16.mxu0 %v118_v50  ;;  %3782 = vmatprep.mubr.bf16.mxu1 %v118_v50  ;;  %v5031_v62 = vld [vmem:[%s6996_s1 + $0xa8c] ss:$16 sps:$4 sm:$0xff]   ;;  %v5026_v63 = vld [vmem:[%s6996_s1 + $0xa80] ss:$16 sps:$4 sm:$0xff]   ;;  %v5029_v0 = vld [vmem:[%s6996_s1 + $0xa88] ss:$16 sps:$4 sm:$0xff]  }
 0x146   :  { %v5034_v1 = vld [vmem:[%s6996_s1 + $0xaa4] ss:$16 sps:$4 sm:$0xff]   ;;  %v5037_v2 = vld [vmem:[%s6996_s1 + $0xaac] ss:$16 sps:$4 sm:$0xff]   ;;  %v5032_v3 = vld [vmem:[%s6996_s1 + $0xaa0] ss:$16 sps:$4 sm:$0xff]  }
 0x147   :  { %3425 = vmatpush1.bf16.msra.mxu0 %v5008_v51  ;;  %3753 = vmatpush1.bf16.msra.mxu1 %v5011_v52  ;;  %v5035_v4 = vld [vmem:[%s6996_s1 + $0xaa8] ss:$16 sps:$4 sm:$0xff]   ;;  %v5040_v5 = vld [vmem:[%s6996_s1 + $0xac4] ss:$16 sps:$4 sm:$0xff]   ;;  %v5043_v6 = vld [vmem:[%s6996_s1 + $0xacc] ss:$16 sps:$4 sm:$0xff]  }
 0x148   :  { %3426 = vmatprep.subr.bf16.mxu0 %v5016_v53  ;;  %3754 = vmatprep.subr.bf16.mxu1 %v5019_v54  ;;  %v5038_v7 = vld [vmem:[%s6996_s1 + $0xac0] ss:$16 sps:$4 sm:$0xff]   ;;  %v5041_v8 = vld [vmem:[%s6996_s1 + $0xac8] ss:$16 sps:$4 sm:$0xff]   ;;  %v5046_v10 = vld [vmem:[%s6996_s1 + $0xae4] ss:$16 sps:$4 sm:$0xff]   ;;  %v117_v53 = vpack.c.bf16 %v6354_v39, %v6354_v39 }
 0x149   :  { %v5049_v11 = vld [vmem:[%s6996_s1 + $0xaec] ss:$16 sps:$4 sm:$0xff]   ;;  %v5044_v12 = vld [vmem:[%s6996_s1 + $0xae0] ss:$16 sps:$4 sm:$0xff]   ;;  %v5047_v13 = vld [vmem:[%s6996_s1 + $0xae8] ss:$16 sps:$4 sm:$0xff]  }
 0x14a   :  { %v5052_v14 = vld [vmem:[%s6996_s1 + $0xb04] ss:$16 sps:$4 sm:$0xff]   ;;  %v5055_v15 = vld [vmem:[%s6996_s1 + $0xb0c] ss:$16 sps:$4 sm:$0xff]   ;;  %v5050_v16 = vld [vmem:[%s6996_s1 + $0xb00] ss:$16 sps:$4 sm:$0xff]  }
 0x14b   :  { %3427 = vmatpush1.bf16.msra.mxu0 %v5014_v55  ;;  %3755 = vmatpush1.bf16.msra.mxu1 %v5017_v56  ;;  %v5053_v17 = vld [vmem:[%s6996_s1 + $0xb08] ss:$16 sps:$4 sm:$0xff]   ;;  %v5058_v18 = vld [vmem:[%s6996_s1 + $0xb24] ss:$16 sps:$4 sm:$0xff]   ;;  %v5061_v19 = vld [vmem:[%s6996_s1 + $0xb2c] ss:$16 sps:$4 sm:$0xff]  }
 0x14c   :  { %3428 = vmatprep.subr.bf16.mxu0 %v5022_v57  ;;  %3756 = vmatprep.subr.bf16.mxu1 %v5025_v58  ;;  %v5056_v20 = vld [vmem:[%s6996_s1 + $0xb20] ss:$16 sps:$4 sm:$0xff]   ;;  %v5059_v21 = vld [vmem:[%s6996_s1 + $0xb28] ss:$16 sps:$4 sm:$0xff]   ;;  %v5064_v22 = vld [vmem:[%s6996_s1 + $0xb44] ss:$16 sps:$4 sm:$0xff]  }
 0x14d   :  { %v5067_v23 = vld [vmem:[%s6996_s1 + $0xb4c] ss:$16 sps:$4 sm:$0xff]   ;;  %v5062_v9 = vld [vmem:[%s6996_s1 + $0xb40] ss:$16 sps:$4 sm:$0xff]   ;;  %v5065_v26 = vld [vmem:[%s6996_s1 + $0xb48] ss:$16 sps:$4 sm:$0xff]  }
 0x14e   :  { %v5070_v27 = vld [vmem:[%s6996_s1 + $0xb64] ss:$16 sps:$4 sm:$0xff]   ;;  %v5073_v29 = vld [vmem:[%s6996_s1 + $0xb6c] ss:$16 sps:$4 sm:$0xff]   ;;  %v5068_v30 = vld [vmem:[%s6996_s1 + $0xb60] ss:$16 sps:$4 sm:$0xff]  }
 0x14f   :  { %3429 = vmatpush1.bf16.msra.mxu0 %v5020_v59  ;;  %3757 = vmatpush1.bf16.msra.mxu1 %v5023_v60  ;;  %v5071_v31 = vld [vmem:[%s6996_s1 + $0xb68] ss:$16 sps:$4 sm:$0xff]   ;;  %v5076_v33 = vld [vmem:[%s6996_s1 + $0xb84] ss:$16 sps:$4 sm:$0xff]   ;;  %v5079_v25 = vld [vmem:[%s6996_s1 + $0xb8c] ss:$16 sps:$4 sm:$0xff]  }
 0x150   :  { %3430 = vmatprep.subr.bf16.mxu0 %v5028_v61  ;;  %3758 = vmatprep.subr.bf16.mxu1 %v5031_v62  ;;  %v5074_v34 = vld [vmem:[%s6996_s1 + $0xb80] ss:$16 sps:$4 sm:$0xff]   ;;  %v5077_v35 = vld [vmem:[%s6996_s1 + $0xb88] ss:$16 sps:$4 sm:$0xff]   ;;  %v5082_v36 = vld [vmem:[%s6996_s1 + $0xba4] ss:$16 sps:$4 sm:$0xff]  }
 0x151   :  { %v5085_v37 = vld [vmem:[%s6996_s1 + $0xbac] ss:$16 sps:$4 sm:$0xff]   ;;  %v5080_v38 = vld [vmem:[%s6996_s1 + $0xba0] ss:$16 sps:$4 sm:$0xff]   ;;  %v5083_v28 = vld [vmem:[%s6996_s1 + $0xba8] ss:$16 sps:$4 sm:$0xff]  }
 0x152   :  { %v5088_v40 = vld [vmem:[%s6996_s1 + $0xbc4] ss:$16 sps:$4 sm:$0xff]   ;;  %v5091_v41 = vld [vmem:[%s6996_s1 + $0xbcc] ss:$16 sps:$4 sm:$0xff]   ;;  %v5086_v24 = vld [vmem:[%s6996_s1 + $0xbc0] ss:$16 sps:$4 sm:$0xff]  }
 0x153   :  { %3431 = vmatpush1.bf16.msra.mxu0 %v5026_v63  ;;  %3759 = vmatpush1.bf16.msra.mxu1 %v5029_v0  ;;  %v6543_v42 = vld [vmem:[%s6995_s0 + $0x18] sm:$0xff]  ;;  %v5094_v45 = vld [vmem:[%s6996_s1 + $0xbe4] ss:$16 sps:$4 sm:$0xff]   ;;  %v5092_v48 = vld [vmem:[%s6996_s1 + $0xbe0] ss:$16 sps:$4 sm:$0xff]   ;;  %vm3873_vm0 = vcmask 1041408  }
 0x154   :  { %3432 = vmatprep.subr.bf16.mxu0 %v5034_v1  ;;  %3760 = vmatprep.subr.bf16.mxu1 %v5037_v2  ;;  %v5089_v44 = vld [vmem:[%s6996_s1 + $0xbc8] ss:$16 sps:$4 sm:$0xff]   ;;  %v5097_v46 = vld [vmem:[%s6996_s1 + $0xbec] ss:$16 sps:$4 sm:$0xff]   ;;  %v6559_v47 = vrot.slane %v6543_v42, %v5483_v49  ;;  %v5101_v50 = vld [vmem:[%s6996_s1 + $0xc04] ss:$16 sps:$4 sm:$0xff]  }
 0x155   :  { %v5095_v32 = vld [vmem:[%s6996_s1 + $0xbe8] ss:$16 sps:$4 sm:$0xff]   ;;  %v5104_v51 = vld [vmem:[%s6996_s1 + $0xc0c] ss:$16 sps:$4 sm:$0xff]   ;;  %v5099_v54 = vld [vmem:[%s6996_s1 + $0xc00] ss:$16 sps:$4 sm:$0xff]  }
 0x156   :  { %v89_v52 = vcombine.high %v6559_v47, %v6559_v47  ;;  %v5102_v55 = vld [vmem:[%s6996_s1 + $0xc08] ss:$16 sps:$4 sm:$0xff]   ;;  %v5107_v56 = vld [vmem:[%s6996_s1 + $0xc24] ss:$16 sps:$4 sm:$0xff]   ;;  %v5110_v39 = vld [vmem:[%s6996_s1 + $0xc2c] ss:$16 sps:$4 sm:$0xff]  }
 0x157   :  { %3433 = vmatpush1.bf16.msra.mxu0 %v5032_v3  ;;  %3761 = vmatpush1.bf16.msra.mxu1 %v5035_v4  ;;  %v5105_v58 = vld [vmem:[%s6996_s1 + $0xc20] ss:$16 sps:$4 sm:$0xff]   ;;  %v5108_v59 = vld [vmem:[%s6996_s1 + $0xc28] ss:$16 sps:$4 sm:$0xff]   ;;  %v5113_v60 = vld [vmem:[%s6996_s1 + $0xc44] ss:$16 sps:$4 sm:$0xff]  }
 0x158   :  { %3434 = vmatprep.subr.bf16.mxu0 %v5040_v5  ;;  %3762 = vmatprep.subr.bf16.mxu1 %v5043_v6  ;;  %v120_v57 = vpack.c.bf16 %v89_v52, %v89_v52  ;;  %v5116_v61 = vld [vmem:[%s6996_s1 + $0xc4c] ss:$16 sps:$4 sm:$0xff]   ;;  %v5111_v62 = vld [vmem:[%s6996_s1 + $0xc40] ss:$16 sps:$4 sm:$0xff]   ;;  %v5114_v63 = vld [vmem:[%s6996_s1 + $0xc48] ss:$16 sps:$4 sm:$0xff]  }
 0x159   :  { %v5119_v0 = vld [vmem:[%s6996_s1 + $0xc64] ss:$16 sps:$4 sm:$0xff]   ;;  %v5122_v1 = vld [vmem:[%s6996_s1 + $0xc6c] ss:$16 sps:$4 sm:$0xff]   ;;  %v5117_v2 = vld [vmem:[%s6996_s1 + $0xc60] ss:$16 sps:$4 sm:$0xff]  }
 0x15a   :  { %v5120_v3 = vld [vmem:[%s6996_s1 + $0xc68] ss:$16 sps:$4 sm:$0xff]   ;;  %v5125_v4 = vld [vmem:[%s6996_s1 + $0xc84] ss:$16 sps:$4 sm:$0xff]   ;;  %v5128_v5 = vld [vmem:[%s6996_s1 + $0xc8c] ss:$16 sps:$4 sm:$0xff]  }
 0x15b   :  { %3435 = vmatpush1.bf16.msra.mxu0 %v5038_v7  ;;  %3763 = vmatpush1.bf16.msra.mxu1 %v5041_v8  ;;  %v5123_v6 = vld [vmem:[%s6996_s1 + $0xc80] ss:$16 sps:$4 sm:$0xff]   ;;  %v5126_v7 = vld [vmem:[%s6996_s1 + $0xc88] ss:$16 sps:$4 sm:$0xff]   ;;  %v5131_v8 = vld [vmem:[%s6996_s1 + $0xca4] ss:$16 sps:$4 sm:$0xff]  }
 0x15c   :  { %3436 = vmatprep.subr.bf16.mxu0 %v5046_v10  ;;  %3764 = vmatprep.subr.bf16.mxu1 %v5049_v11  ;;  %v5134_v10 = vld [vmem:[%s6996_s1 + $0xcac] ss:$16 sps:$4 sm:$0xff]   ;;  %v5129_v11 = vld [vmem:[%s6996_s1 + $0xca0] ss:$16 sps:$4 sm:$0xff]  }
 0x15d   :  { %v5183_v52 = vld [vmem:[%s6996_s1 + $0xdc0] ss:$16 sps:$4 sm:$0xff]  }
 0x15f   :  { %3437 = vmatpush1.bf16.msra.mxu0 %v5044_v12  ;;  %3765 = vmatpush1.bf16.msra.mxu1 %v5047_v13  ;;  %v5132_v12 = vld [vmem:[%s6996_s1 + $0xca8] ss:$16 sps:$4 sm:$0xff]   ;;  %v5137_v13 = vld [vmem:[%s6996_s1 + $0xcc4] ss:$16 sps:$4 sm:$0xff]  }
 0x160   :  { %3438 = vmatprep.subr.bf16.mxu0 %v5052_v14  ;;  %3766 = vmatprep.subr.bf16.mxu1 %v5055_v15  ;;  %v5140_v14 = vld [vmem:[%s6996_s1 + $0xccc] ss:$16 sps:$4 sm:$0xff]   ;;  %v5135_v15 = vld [vmem:[%s6996_s1 + $0xcc0] ss:$16 sps:$4 sm:$0xff]  }
 0x163   :  { %3439 = vmatpush1.bf16.msra.mxu0 %v5050_v16  ;;  %3767 = vmatpush1.bf16.msra.mxu1 %v5053_v17  ;;  %v5138_v16 = vld [vmem:[%s6996_s1 + $0xcc8] ss:$16 sps:$4 sm:$0xff]   ;;  %v5143_v17 = vld [vmem:[%s6996_s1 + $0xce4] ss:$16 sps:$4 sm:$0xff]  }
 0x164   :  { %3440 = vmatprep.subr.bf16.mxu0 %v5058_v18  ;;  %3768 = vmatprep.subr.bf16.mxu1 %v5061_v19  ;;  %v5146_v18 = vld [vmem:[%s6996_s1 + $0xcec] ss:$16 sps:$4 sm:$0xff]   ;;  %v5141_v19 = vld [vmem:[%s6996_s1 + $0xce0] ss:$16 sps:$4 sm:$0xff]  }
 0x167   :  { %3441 = vmatpush1.bf16.msra.mxu0 %v5056_v20  ;;  %3769 = vmatpush1.bf16.msra.mxu1 %v5059_v21  ;;  %v5144_v20 = vld [vmem:[%s6996_s1 + $0xce8] ss:$16 sps:$4 sm:$0xff]   ;;  %v5149_v21 = vld [vmem:[%s6996_s1 + $0xd04] ss:$16 sps:$4 sm:$0xff]  }
 0x168   :  { %3442 = vmatprep.subr.bf16.mxu0 %v5064_v22  ;;  %3770 = vmatprep.subr.bf16.mxu1 %v5067_v23  ;;  %v5152_v22 = vld [vmem:[%s6996_s1 + $0xd0c] ss:$16 sps:$4 sm:$0xff]   ;;  %v5147_v23 = vld [vmem:[%s6996_s1 + $0xd00] ss:$16 sps:$4 sm:$0xff]  }
 0x16b   :  { %3443 = vmatpush1.bf16.msra.mxu0 %v5062_v9  ;;  %3771 = vmatpush1.bf16.msra.mxu1 %v5065_v26  ;;  %v5150_v9 = vld [vmem:[%s6996_s1 + $0xd08] ss:$16 sps:$4 sm:$0xff]   ;;  %v5155_v26 = vld [vmem:[%s6996_s1 + $0xd24] ss:$16 sps:$4 sm:$0xff]  }
 0x16c   :  { %3444 = vmatprep.subr.bf16.mxu0 %v5070_v27  ;;  %3772 = vmatprep.subr.bf16.mxu1 %v5073_v29  ;;  %v5158_v27 = vld [vmem:[%s6996_s1 + $0xd2c] ss:$16 sps:$4 sm:$0xff]   ;;  %v5153_v29 = vld [vmem:[%s6996_s1 + $0xd20] ss:$16 sps:$4 sm:$0xff]  }
 0x16f   :  { %3445 = vmatpush1.bf16.msra.mxu0 %v5068_v30  ;;  %3773 = vmatpush1.bf16.msra.mxu1 %v5071_v31  ;;  %v5156_v30 = vld [vmem:[%s6996_s1 + $0xd28] ss:$16 sps:$4 sm:$0xff]   ;;  %v5161_v31 = vld [vmem:[%s6996_s1 + $0xd44] ss:$16 sps:$4 sm:$0xff]  }
 0x170   :  { %3446 = vmatprep.subr.bf16.mxu0 %v5076_v33  ;;  %3774 = vmatprep.subr.bf16.mxu1 %v5079_v25  ;;  %v5164_v33 = vld [vmem:[%s6996_s1 + $0xd4c] ss:$16 sps:$4 sm:$0xff]   ;;  %v5159_v25 = vld [vmem:[%s6996_s1 + $0xd40] ss:$16 sps:$4 sm:$0xff]  }
 0x173   :  { %3447 = vmatpush1.bf16.msra.mxu0 %v5074_v34  ;;  %3775 = vmatpush1.bf16.msra.mxu1 %v5077_v35  ;;  %v5162_v34 = vld [vmem:[%s6996_s1 + $0xd48] ss:$16 sps:$4 sm:$0xff]   ;;  %v5167_v35 = vld [vmem:[%s6996_s1 + $0xd64] ss:$16 sps:$4 sm:$0xff]  }
 0x174   :  { %3448 = vmatprep.subr.bf16.mxu0 %v5082_v36  ;;  %3776 = vmatprep.subr.bf16.mxu1 %v5085_v37  ;;  %v5170_v36 = vld [vmem:[%s6996_s1 + $0xd6c] ss:$16 sps:$4 sm:$0xff]   ;;  %v5165_v37 = vld [vmem:[%s6996_s1 + $0xd60] ss:$16 sps:$4 sm:$0xff]  }
 0x177   :  { %3449 = vmatpush1.bf16.msra.mxu0 %v5080_v38  ;;  %3777 = vmatpush1.bf16.msra.mxu1 %v5083_v28  ;;  %v5168_v38 = vld [vmem:[%s6996_s1 + $0xd68] ss:$16 sps:$4 sm:$0xff]   ;;  %v5173_v28 = vld [vmem:[%s6996_s1 + $0xd84] ss:$16 sps:$4 sm:$0xff]  }
 0x178   :  { %3450 = vmatprep.subr.bf16.mxu0 %v5088_v40  ;;  %3778 = vmatprep.subr.bf16.mxu1 %v5091_v41  ;;  %v5176_v40 = vld [vmem:[%s6996_s1 + $0xd8c] ss:$16 sps:$4 sm:$0xff]   ;;  %v5171_v41 = vld [vmem:[%s6996_s1 + $0xd80] ss:$16 sps:$4 sm:$0xff]  }
 0x17b   :  { %3451 = vmatpush1.bf16.msra.mxu0 %v5086_v24  ;;  %3779 = vmatpush1.bf16.msra.mxu1 %v5089_v44  ;;  %v5174_v24 = vld [vmem:[%s6996_s1 + $0xd88] ss:$16 sps:$4 sm:$0xff]   ;;  %v5179_v44 = vld [vmem:[%s6996_s1 + $0xda4] ss:$16 sps:$4 sm:$0xff]  }
 0x17c   :  { %3452 = vmatprep.subr.bf16.mxu0 %v5094_v45  ;;  %3780 = vmatprep.subr.bf16.mxu1 %v5097_v46  ;;  %v5182_v45 = vld [vmem:[%s6996_s1 + $0xdac] ss:$16 sps:$4 sm:$0xff]   ;;  %v5177_v46 = vld [vmem:[%s6996_s1 + $0xda0] ss:$16 sps:$4 sm:$0xff]  }
 0x17f   :  { %3453 = vmatpush1.bf16.msra.mxu0 %v5092_v48  ;;  %3781 = vmatpush1.bf16.msra.mxu1 %v5095_v32  ;;  %v5180_v48 = vld [vmem:[%s6996_s1 + $0xda8] ss:$16 sps:$4 sm:$0xff]   ;;  %v5185_v32 = vld [vmem:[%s6996_s1 + $0xdc4] ss:$16 sps:$4 sm:$0xff]  }
 0x180   :  { %3463 = vmatprep.subr.bf16.mxu0 %v5101_v50  ;;  %3791 = vmatprep.subr.bf16.mxu1 %v5104_v51  ;;  %v5188_v50 = vld [vmem:[%s6996_s1 + $0xdcc] ss:$16 sps:$4 sm:$0xff]   ;;  %v74_v51 = vcombine.high %v6543_v42, %v6543_v42 }
 0x181   :  { %v5194_v42 = vld [vmem:[%s6996_s1 + $0xdec] ss:$16 sps:$4 sm:$0xff]  }
 0x182   :  { %3455 = vmatmul.mubr.bf16.vlgmr.msra.gmra.mrb[0].mxu0 %v117_v53  ;;  %3783 = vmatmul.mubr.bf16.vlgmr.msra.gmra.mrb[0].mxu1 %v117_v53  ;;  %v5186_v53 = vld [vmem:[%s6996_s1 + $0xdc8] ss:$16 sps:$4 sm:$0xff]  }
 0x183   :  { %3464 = vmatpush1.bf16.msra.mxu0 %v5099_v54  ;;  %3792 = vmatpush1.bf16.msra.mxu1 %v5102_v55  ;;  %v5191_v54 = vld [vmem:[%s6996_s1 + $0xde4] ss:$16 sps:$4 sm:$0xff]   ;;  %v6760_v55 = vrot.slane %v74_v51, %v5483_v49  ;;  %v5270_v51 = vld [vmem:[%s6996_s1 + $0xf88] ss:$16 sps:$4 sm:$0xff]  }
 0x184   :  { %3465 = vmatprep.subr.bf16.mxu0 %v5107_v56  ;;  %3793 = vmatprep.subr.bf16.mxu1 %v5110_v39  ;;  %v5189_v56 = vld [vmem:[%s6996_s1 + $0xde0] ss:$16 sps:$4 sm:$0xff]   ;;  %v5192_v39 = vld [vmem:[%s6996_s1 + $0xde8] ss:$16 sps:$4 sm:$0xff]  }
 0x185   :  { %3495 = vmatprep.mubr.bf16.mxu0 %v120_v57  ;;  %3823 = vmatprep.mubr.bf16.mxu1 %v120_v57  ;;  %v5197_v57 = vld [vmem:[%s6996_s1 + $0xe04] ss:$16 sps:$4 sm:$0xff]  }
 0x187   :  { %3466 = vmatpush1.bf16.msra.mxu0 %v5105_v58  ;;  %3794 = vmatpush1.bf16.msra.mxu1 %v5108_v59  ;;  %v5200_v58 = vld [vmem:[%s6996_s1 + $0xe0c] ss:$16 sps:$4 sm:$0xff]   ;;  %v90_v59 = vcombine.high %v6760_v55, %v6760_v55 }
 0x188   :  { %3467 = vmatprep.subr.bf16.mxu0 %v5113_v60  ;;  %3795 = vmatprep.subr.bf16.mxu1 %v5116_v61  ;;  %v119_v60 = vpack.c.bf16 %v6559_v47, %v6559_v47  ;;  %v5195_v61 = vld [vmem:[%s6996_s1 + $0xe00] ss:$16 sps:$4 sm:$0xff]   ;;  %v5206_v47 = vld [vmem:[%s6996_s1 + $0xe2c] ss:$16 sps:$4 sm:$0xff]  }
 0x18b   :  { %3468 = vmatpush1.bf16.msra.mxu0 %v5111_v62  ;;  %3796 = vmatpush1.bf16.msra.mxu1 %v5114_v63  ;;  %v5198_v62 = vld [vmem:[%s6996_s1 + $0xe08] ss:$16 sps:$4 sm:$0xff]   ;;  %v5203_v63 = vld [vmem:[%s6996_s1 + $0xe24] ss:$16 sps:$4 sm:$0xff]  }
 0x18c   :  { %3469 = vmatprep.subr.bf16.mxu0 %v5119_v0  ;;  %3797 = vmatprep.subr.bf16.mxu1 %v5122_v1  ;;  %v122_v0 = vpack.c.bf16 %v90_v59, %v90_v59  ;;  %v5201_v1 = vld [vmem:[%s6996_s1 + $0xe20] ss:$16 sps:$4 sm:$0xff]   ;;  %v5287_v59 = vld [vmem:[%s6996_s1 + $0xfe4] ss:$16 sps:$4 sm:$0xff]  }
 0x18f   :  { %3470 = vmatpush1.bf16.msra.mxu0 %v5117_v2  ;;  %3798 = vmatpush1.bf16.msra.mxu1 %v5120_v3  ;;  %v5204_v2 = vld [vmem:[%s6996_s1 + $0xe28] ss:$16 sps:$4 sm:$0xff]   ;;  %v5209_v3 = vld [vmem:[%s6996_s1 + $0xe44] ss:$16 sps:$4 sm:$0xff]  }
 0x190   :  { %3471 = vmatprep.subr.bf16.mxu0 %v5125_v4  ;;  %3799 = vmatprep.subr.bf16.mxu1 %v5128_v5  ;;  %v5212_v4 = vld [vmem:[%s6996_s1 + $0xe4c] ss:$16 sps:$4 sm:$0xff]   ;;  %v5207_v5 = vld [vmem:[%s6996_s1 + $0xe40] ss:$16 sps:$4 sm:$0xff]  }
 0x193   :  { %3472 = vmatpush1.bf16.msra.mxu0 %v5123_v6  ;;  %3800 = vmatpush1.bf16.msra.mxu1 %v5126_v7  ;;  %v5210_v6 = vld [vmem:[%s6996_s1 + $0xe48] ss:$16 sps:$4 sm:$0xff]   ;;  %v5215_v7 = vld [vmem:[%s6996_s1 + $0xe64] ss:$16 sps:$4 sm:$0xff]  }
 0x194   :  { %3473 = vmatprep.subr.bf16.mxu0 %v5131_v8  ;;  %3801 = vmatprep.subr.bf16.mxu1 %v5134_v10  ;;  %v5218_v8 = vld [vmem:[%s6996_s1 + $0xe6c] ss:$16 sps:$4 sm:$0xff]   ;;  %v5213_v10 = vld [vmem:[%s6996_s1 + $0xe60] ss:$16 sps:$4 sm:$0xff]  }
 0x197   :  { %3474 = vmatpush1.bf16.msra.mxu0 %v5129_v11  ;;  %3802 = vmatpush1.bf16.msra.mxu1 %v5132_v12  ;;  %v5216_v11 = vld [vmem:[%s6996_s1 + $0xe68] ss:$16 sps:$4 sm:$0xff]   ;;  %v5221_v12 = vld [vmem:[%s6996_s1 + $0xe84] ss:$16 sps:$4 sm:$0xff]  }
 0x198   :  { %3475 = vmatprep.subr.bf16.mxu0 %v5137_v13  ;;  %3803 = vmatprep.subr.bf16.mxu1 %v5140_v14  ;;  %v5224_v13 = vld [vmem:[%s6996_s1 + $0xe8c] ss:$16 sps:$4 sm:$0xff]   ;;  %v5219_v14 = vld [vmem:[%s6996_s1 + $0xe80] ss:$16 sps:$4 sm:$0xff]  }
 0x19b   :  { %3476 = vmatpush1.bf16.msra.mxu0 %v5135_v15  ;;  %3804 = vmatpush1.bf16.msra.mxu1 %v5138_v16  ;;  %v5222_v15 = vld [vmem:[%s6996_s1 + $0xe88] ss:$16 sps:$4 sm:$0xff]   ;;  %v5227_v16 = vld [vmem:[%s6996_s1 + $0xea4] ss:$16 sps:$4 sm:$0xff]  }
 0x19c   :  { %3477 = vmatprep.subr.bf16.mxu0 %v5143_v17  ;;  %3805 = vmatprep.subr.bf16.mxu1 %v5146_v18  ;;  %v5230_v17 = vld [vmem:[%s6996_s1 + $0xeac] ss:$16 sps:$4 sm:$0xff]   ;;  %v5225_v18 = vld [vmem:[%s6996_s1 + $0xea0] ss:$16 sps:$4 sm:$0xff]  }
 0x19f   :  { %3478 = vmatpush1.bf16.msra.mxu0 %v5141_v19  ;;  %3806 = vmatpush1.bf16.msra.mxu1 %v5144_v20  ;;  %v5228_v19 = vld [vmem:[%s6996_s1 + $0xea8] ss:$16 sps:$4 sm:$0xff]   ;;  %v5233_v20 = vld [vmem:[%s6996_s1 + $0xec4] ss:$16 sps:$4 sm:$0xff]  }
 0x1a0   :  { %3479 = vmatprep.subr.bf16.mxu0 %v5149_v21  ;;  %3807 = vmatprep.subr.bf16.mxu1 %v5152_v22  ;;  %v5236_v21 = vld [vmem:[%s6996_s1 + $0xecc] ss:$16 sps:$4 sm:$0xff]   ;;  %v5231_v22 = vld [vmem:[%s6996_s1 + $0xec0] ss:$16 sps:$4 sm:$0xff]  }
 0x1a3   :  { %3480 = vmatpush1.bf16.msra.mxu0 %v5147_v23  ;;  %3808 = vmatpush1.bf16.msra.mxu1 %v5150_v9  ;;  %v5234_v23 = vld [vmem:[%s6996_s1 + $0xec8] ss:$16 sps:$4 sm:$0xff]   ;;  %v5239_v9 = vld [vmem:[%s6996_s1 + $0xee4] ss:$16 sps:$4 sm:$0xff]  }
 0x1a4   :  { %3481 = vmatprep.subr.bf16.mxu0 %v5155_v26  ;;  %3809 = vmatprep.subr.bf16.mxu1 %v5158_v27  ;;  %v5242_v26 = vld [vmem:[%s6996_s1 + $0xeec] ss:$16 sps:$4 sm:$0xff]   ;;  %v5237_v27 = vld [vmem:[%s6996_s1 + $0xee0] ss:$16 sps:$4 sm:$0xff]  }
 0x1a7   :  { %3482 = vmatpush1.bf16.msra.mxu0 %v5153_v29  ;;  %3810 = vmatpush1.bf16.msra.mxu1 %v5156_v30  ;;  %v5240_v29 = vld [vmem:[%s6996_s1 + $0xee8] ss:$16 sps:$4 sm:$0xff]   ;;  %v5245_v30 = vld [vmem:[%s6996_s1 + $0xf04] ss:$16 sps:$4 sm:$0xff]  }
 0x1a8   :  { %3483 = vmatprep.subr.bf16.mxu0 %v5161_v31  ;;  %3811 = vmatprep.subr.bf16.mxu1 %v5164_v33  ;;  %v5248_v31 = vld [vmem:[%s6996_s1 + $0xf0c] ss:$16 sps:$4 sm:$0xff]   ;;  %v5243_v33 = vld [vmem:[%s6996_s1 + $0xf00] ss:$16 sps:$4 sm:$0xff]  }
 0x1ab   :  { %3484 = vmatpush1.bf16.msra.mxu0 %v5159_v25  ;;  %3812 = vmatpush1.bf16.msra.mxu1 %v5162_v34  ;;  %v5246_v25 = vld [vmem:[%s6996_s1 + $0xf08] ss:$16 sps:$4 sm:$0xff]   ;;  %v5251_v34 = vld [vmem:[%s6996_s1 + $0xf24] ss:$16 sps:$4 sm:$0xff]  }
 0x1ac   :  { %3485 = vmatprep.subr.bf16.mxu0 %v5167_v35  ;;  %3813 = vmatprep.subr.bf16.mxu1 %v5170_v36  ;;  %v5254_v35 = vld [vmem:[%s6996_s1 + $0xf2c] ss:$16 sps:$4 sm:$0xff]   ;;  %v5249_v36 = vld [vmem:[%s6996_s1 + $0xf20] ss:$16 sps:$4 sm:$0xff]  }
 0x1af   :  { %3486 = vmatpush1.bf16.msra.mxu0 %v5165_v37  ;;  %3814 = vmatpush1.bf16.msra.mxu1 %v5168_v38  ;;  %v5252_v37 = vld [vmem:[%s6996_s1 + $0xf28] ss:$16 sps:$4 sm:$0xff]   ;;  %v5257_v38 = vld [vmem:[%s6996_s1 + $0xf44] ss:$16 sps:$4 sm:$0xff]  }
 0x1b0   :  { %3487 = vmatprep.subr.bf16.mxu0 %v5173_v28  ;;  %3815 = vmatprep.subr.bf16.mxu1 %v5176_v40  ;;  %v5260_v28 = vld [vmem:[%s6996_s1 + $0xf4c] ss:$16 sps:$4 sm:$0xff]   ;;  %v5255_v40 = vld [vmem:[%s6996_s1 + $0xf40] ss:$16 sps:$4 sm:$0xff]  }
 0x1b3   :  { %3488 = vmatpush1.bf16.msra.mxu0 %v5171_v41  ;;  %3816 = vmatpush1.bf16.msra.mxu1 %v5174_v24  ;;  %v5258_v41 = vld [vmem:[%s6996_s1 + $0xf48] ss:$16 sps:$4 sm:$0xff]   ;;  %v5263_v24 = vld [vmem:[%s6996_s1 + $0xf64] ss:$16 sps:$4 sm:$0xff]  }
 0x1b4   :  { %3489 = vmatprep.subr.bf16.mxu0 %v5179_v44  ;;  %3817 = vmatprep.subr.bf16.mxu1 %v5182_v45  ;;  %v5266_v44 = vld [vmem:[%s6996_s1 + $0xf6c] ss:$16 sps:$4 sm:$0xff]   ;;  %v5261_v45 = vld [vmem:[%s6996_s1 + $0xf60] ss:$16 sps:$4 sm:$0xff]  }
 0x1b7   :  { %3490 = vmatpush1.bf16.msra.mxu0 %v5177_v46  ;;  %3818 = vmatpush1.bf16.msra.mxu1 %v5180_v48  ;;  %v5264_v46 = vld [vmem:[%s6996_s1 + $0xf68] ss:$16 sps:$4 sm:$0xff]   ;;  %v5269_v48 = vld [vmem:[%s6996_s1 + $0xf84] ss:$16 sps:$4 sm:$0xff]  }
 0x1b8   :  { %3491 = vmatprep.subr.bf16.mxu0 %v5185_v32  ;;  %3819 = vmatprep.subr.bf16.mxu1 %v5188_v50  ;;  %v5272_v32 = vld [vmem:[%s6996_s1 + $0xf8c] ss:$16 sps:$4 sm:$0xff]   ;;  %v5267_v50 = vld [vmem:[%s6996_s1 + $0xf80] ss:$16 sps:$4 sm:$0xff]  }
 0x1bb   :  { %3492 = vmatpush1.bf16.msra.mxu0 %v5183_v52  ;;  %3820 = vmatpush1.bf16.msra.mxu1 %v5186_v53  ;;  %v5275_v52 = vld [vmem:[%s6996_s1 + $0xfa4] ss:$16 sps:$4 sm:$0xff]   ;;  %v5278_v53 = vld [vmem:[%s6996_s1 + $0xfac] ss:$16 sps:$4 sm:$0xff]  }
 0x1bc   :  { %3493 = vmatprep.subr.bf16.mxu0 %v5191_v54  ;;  %3821 = vmatprep.subr.bf16.mxu1 %v5194_v42  ;;  %v5273_v54 = vld [vmem:[%s6996_s1 + $0xfa0] ss:$16 sps:$4 sm:$0xff]   ;;  %v5276_v42 = vld [vmem:[%s6996_s1 + $0xfa8] ss:$16 sps:$4 sm:$0xff]  }
 0x1bf   :  { %3494 = vmatpush1.bf16.msra.mxu0 %v5189_v56  ;;  %3822 = vmatpush1.bf16.msra.mxu1 %v5192_v39  ;;  %v5281_v56 = vld [vmem:[%s6996_s1 + $0xfc4] ss:$16 sps:$4 sm:$0xff]   ;;  %v5284_v39 = vld [vmem:[%s6996_s1 + $0xfcc] ss:$16 sps:$4 sm:$0xff]  }
 0x1c0   :  { %3504 = vmatprep.subr.bf16.mxu0 %v5197_v57  ;;  %3832 = vmatprep.subr.bf16.mxu1 %v5200_v58  ;;  %v5279_v57 = vld [vmem:[%s6996_s1 + $0xfc0] ss:$16 sps:$4 sm:$0xff]   ;;  %v5282_v58 = vld [vmem:[%s6996_s1 + $0xfc8] ss:$16 sps:$4 sm:$0xff]  }
 0x1c2   :  { %3496 = vmatmul.mubr.bf16.vlgmr.msra.gmra.mrb[0].mxu0 %v119_v60  ;;  %3824 = vmatmul.mubr.bf16.vlgmr.msra.gmra.mrb[0].mxu1 %v119_v60  ;;  %v5290_v60 = vld [vmem:[%s6996_s1 + $0xfec] ss:$16 sps:$4 sm:$0xff]  }
 0x1c3   :  { %3505 = vmatpush1.bf16.msra.mxu0 %v5195_v61  ;;  %3833 = vmatpush1.bf16.msra.mxu1 %v5198_v62  ;;  %v5285_v61 = vld [vmem:[%s6996_s1 + $0xfe0] ss:$16 sps:$4 sm:$0xff]   ;;  %v5288_v62 = vld [vmem:[%s6996_s1 + $0xfe8] ss:$16 sps:$4 sm:$0xff]   ;;  %s5327_s1 = smov [#allocation2]  }
 0x1c4   :  { %3506 = vmatprep.subr.bf16.mxu0 %v5203_v63  ;;  %3834 = vmatprep.subr.bf16.mxu1 %v5206_v47  ;;  %v121_v63 = vpack.c.bf16 %v6760_v55, %v6760_v55  ;;  %v639_v47 = vsub.s32 0, %v5465_v43 }
 0x1c5   :  { %3536 = vmatprep.mubr.bf16.mxu0 %v122_v0  ;;  %3864 = vmatprep.mubr.bf16.mxu1 %v122_v0  ;;  %v647_v0 = vsub.s32 2, %v5465_v43 }
 0x1c7   :  { %3507 = vmatpush1.bf16.msra.mxu0 %v5201_v1  ;;  %3835 = vmatpush1.bf16.msra.mxu1 %v5204_v2  ;;  %v635_v1 = vld [vmem:[%s6997_s2] sm:$0xf]  ;;  %v643_v2 = vsub.s32 1, %v5465_v43  ;;  %s3938_s2 = sshll.u32 %s5327_s1, 4  ;;  %s3939_s2 = int_to_ptr.vmem [resolvable:$true] %s3938_s2 }
 0x1c8   :  { %3508 = vmatprep.subr.bf16.mxu0 %v5209_v3  ;;  %3836 = vmatprep.subr.bf16.mxu1 %v5212_v4  ;;  %v651_v3 = vsub.s32 3, %v5465_v43  ;;  %v640_v4 = vrot.slane %v635_v1, %v639_v47  ;;  %s5302_s10 = scalar_lea.vmem %s3939_s2, 128  ;;  %p5307_p1 = scmp.lt.s32.totalorder %s3939_s2, %s3939_s2 }
 0x1c9   :  { %p5303_p0 = scmp.ne.s32.totalorder %s3939_s2, %s5302_s10  ;;  %p5308_p2 = scmp.lt.s32.totalorder %s5302_s10, %s5302_s10 }
 0x1ca   :  { %v652_v55 = vrot.slane %v635_v1, %v651_v3 }
 0x1cb   :  { %3509 = vmatpush1.bf16.msra.mxu0 %v5207_v5  ;;  %3837 = vmatpush1.bf16.msra.mxu1 %v5210_v6  ;;  %v648_v5 = vrot.slane %v635_v1, %v647_v0  ;;  %v644_v6 = vrot.slane %v635_v1, %v643_v2  ;;  %p5309_p3 = por %p5308_p2, %p5307_p1 }
 0x1cc   :  { %3510 = vmatprep.subr.bf16.mxu0 %v5215_v7  ;;  %3838 = vmatprep.subr.bf16.mxu1 %v5218_v8 }
 0x1cd   :  { %p5310_p4 = pnand %p5309_p3, %p5303_p0 }
 0x1cf   :  { %3511 = vmatpush1.bf16.msra.mxu0 %v5213_v10  ;;  %3839 = vmatpush1.bf16.msra.mxu1 %v5216_v11 }
 0x1d0   :  { %3512 = vmatprep.subr.bf16.mxu0 %v5221_v12  ;;  %3840 = vmatprep.subr.bf16.mxu1 %v5224_v13 }
 0x1d3   :  { %3513 = vmatpush1.bf16.msra.mxu0 %v5219_v14  ;;  %3841 = vmatpush1.bf16.msra.mxu1 %v5222_v15 }
 0x1d4   :  { %3514 = vmatprep.subr.bf16.mxu0 %v5227_v16  ;;  %3842 = vmatprep.subr.bf16.mxu1 %v5230_v17 }
 0x1d7   :  { %3515 = vmatpush1.bf16.msra.mxu0 %v5225_v18  ;;  %3843 = vmatpush1.bf16.msra.mxu1 %v5228_v19 }
 0x1d8   :  { %3516 = vmatprep.subr.bf16.mxu0 %v5233_v20  ;;  %3844 = vmatprep.subr.bf16.mxu1 %v5236_v21 }
 0x1db   :  { %3517 = vmatpush1.bf16.msra.mxu0 %v5231_v22  ;;  %3845 = vmatpush1.bf16.msra.mxu1 %v5234_v23 }
 0x1dc   :  { %3518 = vmatprep.subr.bf16.mxu0 %v5239_v9  ;;  %3846 = vmatprep.subr.bf16.mxu1 %v5242_v26 }
 0x1df   :  { %3519 = vmatpush1.bf16.msra.mxu0 %v5237_v27  ;;  %3847 = vmatpush1.bf16.msra.mxu1 %v5240_v29 }
 0x1e0   :  { %3520 = vmatprep.subr.bf16.mxu0 %v5245_v30  ;;  %3848 = vmatprep.subr.bf16.mxu1 %v5248_v31 }
 0x1e3   :  { %3521 = vmatpush1.bf16.msra.mxu0 %v5243_v33  ;;  %3849 = vmatpush1.bf16.msra.mxu1 %v5246_v25 }
 0x1e4   :  { %3522 = vmatprep.subr.bf16.mxu0 %v5251_v34  ;;  %3850 = vmatprep.subr.bf16.mxu1 %v5254_v35 }
 0x1e7   :  { %3523 = vmatpush1.bf16.msra.mxu0 %v5249_v36  ;;  %3851 = vmatpush1.bf16.msra.mxu1 %v5252_v37 }
 0x1e8   :  { %3524 = vmatprep.subr.bf16.mxu0 %v5257_v38  ;;  %3852 = vmatprep.subr.bf16.mxu1 %v5260_v28 }
 0x1eb   :  { %3525 = vmatpush1.bf16.msra.mxu0 %v5255_v40  ;;  %3853 = vmatpush1.bf16.msra.mxu1 %v5258_v41 }
 0x1ec   :  { %3526 = vmatprep.subr.bf16.mxu0 %v5263_v24  ;;  %3854 = vmatprep.subr.bf16.mxu1 %v5266_v44 }
 0x1ef   :  { %3527 = vmatpush1.bf16.msra.mxu0 %v5261_v45  ;;  %3855 = vmatpush1.bf16.msra.mxu1 %v5264_v46 }
 0x1f0   :  { %3528 = vmatprep.subr.bf16.mxu0 %v5269_v48  ;;  %3856 = vmatprep.subr.bf16.mxu1 %v5272_v32 }
 0x1f3   :  { %3529 = vmatpush1.bf16.msra.mxu0 %v5267_v50  ;;  %3857 = vmatpush1.bf16.msra.mxu1 %v5270_v51 }
 0x1f4   :  { %3530 = vmatprep.subr.bf16.mxu0 %v5275_v52  ;;  %3858 = vmatprep.subr.bf16.mxu1 %v5278_v53 }
 0x1f7   :  { %3531 = vmatpush1.bf16.msra.mxu0 %v5273_v54  ;;  %3859 = vmatpush1.bf16.msra.mxu1 %v5276_v42 }
 0x1f8   :  { %3532 = vmatprep.subr.bf16.mxu0 %v5281_v56  ;;  %3860 = vmatprep.subr.bf16.mxu1 %v5284_v39 }
 0x1fb   :  { %3533 = vmatpush1.bf16.msra.mxu0 %v5279_v57  ;;  %3861 = vmatpush1.bf16.msra.mxu1 %v5282_v58 }
 0x1fc   :  { %3534 = vmatprep.subr.bf16.mxu0 %v5287_v59  ;;  %3862 = vmatprep.subr.bf16.mxu1 %v5290_v60 }
 0x1ff   :  { %3535 = vmatpush1.bf16.msra.mxu0 %v5285_v61  ;;  %3863 = vmatpush1.bf16.msra.mxu1 %v5288_v62 }
 0x202   :  { %3537 = vmatmul.mubr.bf16.vlgmr.msra.gmra.mrb[0].mxu0 %v121_v63  ;;  %3865 = vmatmul.mubr.bf16.vlgmr.msra.gmra.mrb[0].mxu1 %v121_v63 }
 0x2d5   :  { %v3538_v7 = vpop.f32.mrb[0].mxu0  ;;  %v3866_v8 = vpop.f32.mrb[0].mxu1 }
 0x2d6   :  { %v4458_v10 = vadd.f32 %v3538_v7, %v640_v4  ;;  %v4460_v11 = vadd.f32 %v3866_v8, %v648_v5  ;;  %v3540_v12 = vpop.f32.mrb[1].mxu0  ;;  %v3868_v13 = vpop.f32.mrb[1].mxu1 }
 0x2d7   :  { %v4459_v14 = vadd.f32 %v3540_v12, %v644_v6  ;;  %v4461_v15 = vadd.f32 %v3868_v13, %v652_v55  ;;  %v3542_v16 = vpop.f32.mrb[2].mxu0  ;;  %v3870_v17 = vpop.f32.mrb[2].mxu1 }
 0x2d8   :  { %v3874_v18 = vsel %vm3873_vm0, %v4458_v10, -inf  ;;  %v3876_v19 = vsel %vm3873_vm0, %v4460_v11, -inf  ;;  %v3543_v43 = vpop.f32.mrb[3].mxu0  ;;  %v3871_v20 = vpop.f32.mrb[3].mxu1 }
 0x2d9   :  { %v3875_v21 = vsel %vm3873_vm0, %v4459_v14, -inf  ;;  %v3877_v22 = vsel %vm3873_vm0, %v4461_v15, -inf }
 0x2da   :  { %v3878_v23 = vmax.f32 %v3874_v18, %v3875_v21  ;;  %v3879_v9 = vmax.f32 %v3876_v19, %v3877_v22 }
 0x2dc   :  { %v3880_v26 = vmax.f32 %v3878_v23, %v3879_v9 }
 0x2de   :  { %3881 = vmax.xlane.f32.xlu0 %v3880_v26 }
 0x36b   :  { %v3882_v27 = vpop.xlane.xlu0 %3881 }
 0x36c   :  { %v3883_v29 = vsub.f32 %v4458_v10, %v3882_v27  ;;  %v3884_v30 = vsub.f32 %v4459_v14, %v3882_v27  ;;  %v3885_v31 = vsub.f32 %v4460_v11, %v3882_v27  ;;  %v3886_v33 = vsub.f32 %v4461_v15, %v3882_v27 }
 0x36e   :  { %v3887_v25 = vmul.f32 1.442695, %v3883_v29  ;;  %v3889_v34 = vmul.f32 1.442695, %v3884_v30  ;;  %v3891_v35 = vmul.f32 1.442695, %v3885_v31 }
 0x36f   :  { %v3893_v36 = vmul.f32 1.442695, %v3886_v33 }
 0x370   :  { %5292 = vpow2.f32 %v3887_v25 }
 0x371   :  { %5294 = vpow2.f32 %v3889_v34 }
 0x372   :  { %5296 = vpow2.f32 %v3891_v35 }
 0x373   :  { %5298 = vpow2.f32 %v3893_v36 }
 0x37a   :  { %v5293_v37 = vpop.eup %5292 }
 0x37b   :  { %v5295_v38 = vpop.eup %5294  ;;  %v3895_v28 = vsel %vm3873_vm0, %v5293_v37, 0.0 }
 0x37c   :  { %v5297_v40 = vpop.eup %5296  ;;  %v3896_v41 = vsel %vm3873_vm0, %v5295_v38, 0.0 }
 0x37d   :  { %v5299_v24 = vpop.eup %5298  ;;  %v3897_v44 = vadd.f32 %v3896_v41, %v3895_v28  ;;  %v3898_v45 = vsel %vm3873_vm0, %v5297_v40, 0.0 }
 0x37e   :  { %v3900_v48 = vsel %vm3873_vm0, %v5299_v24, 0.0 }
 0x37f   :  { %v3899_v46 = vadd.f32 %v3898_v45, %v3897_v44 }
 0x381   :  { %v3901_v32 = vadd.f32 %v3900_v48, %v3899_v46 }
 0x383   :  { %3902 = vadd.xlane.f32.xlu0 %v3901_v32 }
 0x410   :  { %v3903_v50 = vpop.xlane.xlu0 %3902 }
 0x411   :  { %5300 = vrcp.f32 %v3903_v50 }
 0x41b   :  { %v5301_v51 = vpop.eup %5300 }
 0x41c   :  { %v3905_v52 = vmul.f32 %v5301_v51, %v5293_v37  ;;  %v3906_v53 = vmul.f32 %v5301_v51, %v5295_v38  ;;  %v3907_v54 = vmul.f32 %v5301_v51, %v5297_v40  ;;  %v3908_v42 = vmul.f32 %v5301_v51, %v5299_v24 }
 0x41e   :  { %v3913_v56 = vcombine.low %v3905_v52, %v3906_v53  ;;  %v3914_v39 = vcombine.low %v3907_v54, %v3908_v42 }
 0x420   :  { %v3921_v57 = vrot.slane %v3913_v56, %v5483_v49  ;;  %v3928_v58 = vrot.slane %v3914_v39, %v5483_v49 }
 0x422   :  { %v3929_v59 = vcombine.low %v3921_v57, %v3928_v58 }
 0x424   :  { %3931 = vst [vmem:[#allocation2] sm:$0xff] %v3929_v59 }
 0x425   :  { %5313 = shalt.err (!%p5310_p4)
}
 0x426   :  { %s5314_s13 = scalar_lea.hbm %s6998_s3, 128 }
 0x427   :  { %p5315_p5 = scmp.ne.s32.totalorder %s6998_s3, %s5314_s13  ;;  %p5318_p6 = scmp.lt.u32.totalorder %s5314_s13, %s6998_s3 }
 0x429   :  { %p5320_p7 = pnand %p5318_p6, %p5315_p5 }
 0x42b   :  { %5323 = shalt.err (!%p5320_p7)
}
 0x42c   :  { %3941 = dma.vmem_to_hbm [thread:$0]  %s3939_s2, 128, %s6998_s3, [#allocation3]  }
 0x42d   :  { %5324 = dma.done.wait [#allocation3], 128  }
 0x42e   :  { %5325 = vsyncadd [#allocation3], 4294967168 }
 0x42f   :  { %3945 = vsyncpa [#allocation3], 1 }

// kernel: model_forward.4
= control target key start
LH: loop header
LB: loop body
LE: loop exit
PB: predicated region body
PF: predicated region fallthrough
CT: control target
= control target key end

     0   :  { %s11049_s0 = inlined_call_operand.vmem [shape: f32[2,4096], index: 0, kind: input, shape index: {}]   ;;  %s11050_s1 = inlined_call_operand.hbm [shape: bf16[4096,2048], index: 1, kind: input, shape index: {}]   ;;  %s11051_s2 = inlined_call_operand.hbm [shape: f32[1,2048], index: 2, kind: input, shape index: {}]   ;;  %s11052_s3 = inlined_call_operand.vmem [shape: f32[2,2048], index: 3, kind: output, shape index: {}]  }
   0x1   :  { %11058 = sst [smem:[#allocation10_spill]] %s11050_s1 }
   0x2   :  { %8 = vsyncpa [#allocation4], 0 }
   0x3   :  { %10 = vsyncpa [#allocation4 + $0x1], 0 }
   0x4   :  { %11 = vsyncpa [#allocation6], 0 }
   0x5   :  { %13 = vsyncpa [#allocation6 + $0x1], 0  ;;  %s9544_s12 = smov 0   ;;  %s9546_s13 = smov 0  }
   0x6   :  { %s9548_s14 = smov 0   ;;  %s9550_s15 = smov 0  }
   0x7   :  { %s9552_s16 = smov 0   ;;  %s9554_s17 = smov 0  }
   0x8   :  { %s9556_s18 = smov 0   ;;  %s9558_s19 = smov 0  }
   0x9   :  { %s9560_s20 = smov 0   ;;  %s9562_s21 = smov 0  }
   0xa   :  { %s9564_s22 = smov 0  }
   0xb LB: > { %s28_s23 = sadd.s32 1, %s9507_s20  ;;  %s66_s24 = sadd.s32 1, %s9495_s17  ;;  %s9515_s22 = sphi %s9564_s22, %s19_s22   ;;  %s9511_s21 = sphi %s9562_s21, %s11084_s21   ;;  %s9507_s20 = sphi %s9560_s20, %s11083_s20   ;;  %s9503_s19 = sphi %s9558_s19, %s11082_s19   ;;  %s9499_s18 = sphi %s9556_s18, %s11081_s18   ;;  %s9495_s17 = sphi %s9554_s17, %s11080_s17   ;;  %s9491_s16 = sphi %s9552_s16, %s11079_s16   ;;  %s9487_s15 = sphi %s9550_s15, %s11078_s15   ;;  %s9483_s14 = sphi %s9548_s14, %s11077_s14   ;;  %s9479_s13 = sphi %s9546_s13, %s11076_s13   ;;  %s9475_s12 = sphi %s9544_s12, %s11075_s12  }
   0xc   : > { %p9601_p0 = scmp.ge.s32.totalorder %s28_s23, 2  ;;  %p73_p1 = scmp.ne.s32.totalorder %s9495_s17, %s9491_s16 }
   0xd   : > { %p11054_p2 = scmp.eq.s32.totalorder %s9515_s22, 0  ;;  %p11053_p4 = scmp.lt.s32.totalorder %s9515_s22, 4 }
   0xe   : > { %s11086_s23 = smov (%p9601_p0, %s28_s23), 0  ;;  %s164_s27 = sand.u32 1, %s9495_s17  }
   0xf   : > { %p75_p3 = por %p11054_p2, %p73_p1  ;;  %s61_s26 = ssub.s32 %s9507_s20, %s11086_s23 }
  0x10   : > { %s8095_s28 = sshll.u32 %s164_s27, 13  ;;  %s8097_s29 = sshll.u32 %s9511_s21, 3 }
  0x11   : > { %s9138_s30 = sshll.u32 %s9507_s20, 12  ;;  %s168_s4 = scalar_lea.vmem [#allocation3], %s8095_s28 }
  0x12   : > { %s178_s5 = sshll.u32 %s168_s4, 4  ;;  %s175_s6 = sadd.s32 %s9138_s30, %s8097_s29  ;;  %s9620_s5 = int_to_ptr.vmem [resolvable:$true] %s178_s5 }
  0x13   : > { %s8099_s7 = sshll.u32 %s175_s6, 6  ;;  %p9624_p5 = pnand %p11053_p4, %p75_p3 }
  0x14   : > { %s11061_s1 = sld [smem:[#allocation10_spill]]  ;;  %s9634_s28 = scalar_lea.sflag [#allocation4], %s164_s27 }
  0x15   : > { %p9363_p8 = pneg %p9624_p5 }
  0x1a   : > { %s9631_s11 = scalar_lea.hbm %s11061_s1, %s8099_s7  ;;  %s9366_s6 = scalar_lea.hbm %s11061_s1, 524288 }
  0x1b   : > { %s9361_s29 = scalar_lea.hbm %s9631_s11, 131072  ;;  %p9367_p11 = scmp.lt.u32.totalorder %s9631_s11, %s11061_s1 }
  0x1c   : > { %p9362_p7 = scmp.ne.s32.totalorder %s9631_s11, %s9361_s29  ;;  %p9368_p12 = scmp.lt.u32.totalorder %s9366_s6, %s9361_s29 }
  0x1d   : > { %p9370_p1 = scmp.lt.u32.totalorder %s9361_s29, %s9631_s11 }
  0x1e   : > { %p9364_p9 = pnand %p9363_p8, %p9362_p7  ;;  %p9369_p13 = por %p9368_p12, %p9367_p11 }
  0x20   : > { %p9365_p10 = pneg %p9364_p9  ;;  %p9371_p3 = por %p9370_p1, %p9369_p13 }
  0x22   : > { %p9372_p4 = pnand %p9371_p3, %p9365_p10 }
  0x24   : > { %9375 = shalt.err (!%p9372_p4)
}
  0x25   : > { %s9376_s27 = scalar_lea.vmem %s9620_s5, 131072  ;;  %s9517_s10 = smov [#allocation3]  }
  0x26   : > { %p9377_p7 = scmp.ne.s32.totalorder %s9620_s5, %s9376_s27  ;;  %s9381_s30 = sshll.u32 %s9517_s10, 4  ;;  %s9382_s30 = int_to_ptr.vmem [resolvable:$false] %s9381_s30 }
  0x27   : > { %s9383_s4 = scalar_lea.vmem %s9382_s30, 262144  ;;  %p9384_p6 = scmp.lt.s32.totalorder %s9620_s5, %s9382_s30 }
  0x28   : > { %p9379_p9 = pnand %p9377_p7, %p9363_p8  ;;  %p9385_p11 = scmp.lt.s32.totalorder %s9383_s4, %s9376_s27 }
  0x2a   : > { %p9380_p2 = pneg %p9379_p9  ;;  %p9386_p12 = por %p9385_p11, %p9384_p6 }
  0x2c   : > { %p9387_p13 = pnand %p9386_p12, %p9380_p2 }
  0x2e   : > { %9390 = shalt.err (!%p9387_p13)
}
  0x2f   : > { %s9518_s29 = smov 1024   ;;  %s9519_s6 = smov 512  }
  0x30   : > { %s9520_s7 = smov 32   ;;  %p205_p2 = scmp.lt.s32.totalorder %s9515_s22, 5 }
  0x31   : > { %9259 = dma.hbm_to_vmem [thread:$0]  (!%p9624_p5), %s9631_s11, 131072, %s9620_s5, %s9634_s28, %s9518_s29, %s9519_s6, %s9520_s7  }
  0x32   : > { %p11062_p4 = scmp.ge.s32.totalorder %s9515_s22, 1  ;;  %s8091_s27 = sadd.s32 4294967295, %s9515_s22  }
  0x33   : > { %s31_s10 = sadd.s32 1, %s9511_s21  ;;  %p79_p8 = scmp.ne.s32.totalorder %s9491_s16, %s9487_s15 }
  0x34   : > { %p9665_p6 = pnand %p11062_p4, %p205_p2  ;;  %s11088_s10 = smov (!%p9601_p0, %s31_s10), %s9511_s21 }
  0x35   : > { %p9676_p10 = scmp.eq.s32.totalorder %s8091_s27, 0  ;;  %p33_p5 = scmp.ge.s32.totalorder %s11088_s10, 2 }
  0x36   : > { %s92_s5 = sadd.s32 1, %s9483_s14  ;;  %p99_p3 = scmp.ne.s32.totalorder %s9483_s14, %s9479_s13 }
  0x37   : > { %p9683_p1 = por %p9676_p10, %p79_p8  ;;  %s11090_s10 = smov (%p33_p5, %s11088_s10), 0 }
  0x38   : > { %11066 = sst [smem:[#allocation9_spill]] %s11090_s10  ;;  %p11067_p0 = scmp.eq.s32.totalorder %s9515_s22, 0 }
  0x39   : > { %s11065_s11 = scalar_select %p9683_p1, 1, 0 }
  0x3a   : > { %p9693_p7 = por %p99_p3, %p11067_p0  ;;  %p105_p9 = scmp.ne.s32.totalorder %s9479_s13, %s9475_s12 }
  0x3b   : > { %s62_s25 = ssub.s32 %s9511_s21, %s11090_s10  ;;  %s188_s28 = sand.u32 1, %s9483_s14  }
  0x3c   : > { %s63_s30 = sor.u32 %s62_s25, %s61_s26  ;;  %p90_p11 = scmp.eq.s32.totalorder %s62_s25, 0 }
  0x3d   : > { %p64_p12 = scmp.eq.s32.totalorder %s63_s30, 0  ;;  %p9707_p13 = por %p105_p9, %p9676_p10 }
  0x3e   : > { %s9712_s29 = scalar_select %p90_p11, %s9483_s14, %s92_s5  }
  0x3f   : > { %s11069_s4 = scalar_select %p9707_p13, 1, 0 }
  0x40   : > { %s9717_s6 = scalar_select %p64_p12, %s9495_s17, %s66_s24  }
  0x41   : > { %s8100_s7 = sshll.u32 %s188_s28, 3  ;;  %s9139_s27 = sshll.u32 %s9511_s21, 7 }
  0x42   : > { %s9723_s10 = scalar_lea.hbm %s11051_s2, %s9139_s27  ;;  %s192_s26 = scalar_lea.vmem [#allocation5], %s8100_s7 }
  0x43   : > { %s200_s8 = sshll.u32 %s192_s26, 4  ;;  %p11070_p2 = scmp.lt.s32.totalorder %s9515_s22, 4  ;;  %s9725_s8 = int_to_ptr.vmem [resolvable:$true] %s200_s8 }
  0x44   : > { %s189_s5 = scalar_lea.sflag [#allocation6], %s188_s28  ;;  %s9391_s1 = scalar_lea.hbm %s9723_s10, 128 }
  0x45   : > { %p9731_p4 = pnand %p11070_p2, %p9693_p7  ;;  %p9392_p8 = scmp.ne.s32.totalorder %s9723_s10, %s9391_s1 }
  0x46   : > { %s9396_s15 = scalar_lea.hbm %s11051_s2, 256  ;;  %p9397_p0 = scmp.lt.u32.totalorder %s9723_s10, %s11051_s2 }
  0x47   : > { %p9393_p10 = pneg %p9731_p4  ;;  %p9398_p7 = scmp.lt.u32.totalorder %s9396_s15, %s9391_s1 }
  0x48   : > { %p9400_p11 = scmp.lt.u32.totalorder %s9391_s1, %s9723_s10 }
  0x49   : > { %p9394_p5 = pnand %p9393_p10, %p9392_p8  ;;  %p9399_p9 = por %p9398_p7, %p9397_p0 }
  0x4b   : > { %p9395_p3 = pneg %p9394_p5  ;;  %p9401_p12 = por %p9400_p11, %p9399_p9 }
  0x4d   : > { %p9402_p2 = pnand %p9401_p12, %p9395_p3 }
  0x4f   : > { %9405 = shalt.err (!%p9402_p2)
}
  0x50   : > { %s9406_s28 = scalar_lea.vmem %s9725_s8, 128  ;;  %s9521_s12 = smov [#allocation5]  }
  0x51   : > { %p9407_p8 = scmp.ne.s32.totalorder %s9725_s8, %s9406_s28  ;;  %s9411_s26 = sshll.u32 %s9521_s12, 4  ;;  %s9412_s26 = int_to_ptr.vmem [resolvable:$false] %s9411_s26 }
  0x52   : > { %s9413_s25 = scalar_lea.vmem %s9412_s26, 256  ;;  %p9414_p1 = scmp.lt.s32.totalorder %s9725_s8, %s9412_s26 }
  0x53   : > { %p9409_p5 = pnand %p9407_p8, %p9393_p10  ;;  %p9415_p0 = scmp.lt.s32.totalorder %s9413_s25, %s9406_s28 }
  0x55   : > { %p9410_p13 = pneg %p9409_p5  ;;  %p9416_p7 = por %p9415_p0, %p9414_p1 }
  0x57   : > { %p9417_p9 = pnand %p9416_p7, %p9410_p13 }
  0x59   : > { %9420 = shalt.err (!%p9417_p9)
}
  0x5a   : > { %9262 = dma.hbm_to_vmem [thread:$0]  (!%p9731_p4), %s9723_s10, 128, %s9725_s8, %s189_s5  }
  0x5b   : > { %209 = sbr.rel (%p9665_p6) target bundleno = 1378 (0x562), region = 32  ;;  %s211_s1 = sand.u32 (!%p9665_p6), 1, %s9491_s16  }
  0x5c   : > { %s8104_s30 = sshll.u32 (!%p9665_p6), %s211_s1, 13  ;;  %s212_s15 = scalar_lea.sflag (!%p9665_p6), [#allocation4], %s211_s1 }
  0x5d   : > { %s9763_s7 = scalar_lea.vmem (!%p9665_p6), [#allocation3], %s8104_s30  ;;  %p11072_p10 = scmp.ne.s32.totalorder (!%p9665_p6), %s11065_s11, 0 }
  0x62   : > { %9466 = dma.done.wait (%p11072_p10), %s212_s15, 131072  }
  0x63   : > { %9468 = vsyncadd (%p11072_p10), %s212_s15, 4294836224  ;;  %s220_s24 = sand.u32 1, %s9479_s13   ;;  %p11073_p6 = scmp.ne.s32.totalorder %s11069_s4, 0 }
  0x64   : > { %s9770_s27 = sshll.u32 %s220_s24, 3  ;;  %s221_s9 = scalar_lea.sflag [#allocation6], %s220_s24 }
  0x65   : > { %s224_s10 = scalar_lea.vmem [#allocation5], %s9770_s27 }
  0x66   : > { %9470 = dma.done.wait (%p11073_p6), %s221_s9, 128  }
  0x67   : > { %9472 = vsyncadd (%p11073_p6), %s221_s9, 4294967168  ;;  %s8106_s8 = sshll.u32 %s9499_s18, 4  ;;  %s8108_s5 = sshll.u32 %s9503_s19, 3 }
  0x68   : > { %p258_p1 = scmp.lt.s32.totalorder %s8106_s8, 31  ;;  %p267_p13 = scmp.lt.s32.totalorder %s8108_s5, 15 }
  0x69   : > { %p8110_p4 = scmp.ne.s32.totalorder %s9499_s18, 0 }
  0x6a   : > { %s11092_s8 = smov (!%p258_p1, %s8106_s8), 31  ;;  %s11094_s5 = smov (!%p267_p13, %s8108_s5), 15 }
  0x6b   : > { %s8107_s11 = sshll.u32 %s11092_s8, 1  ;;  %s8109_s25 = sshll.u32 %s11094_s5, 1  ;;  %v9522_v0 = vmov (!%p8110_p4), 0.0  }
  0x6c   : > { %s9782_s26 = scalar_lea.vmem %s11049_s0, %s8107_s11  ;;  %s9787_s4 = scalar_lea.vmem %s11052_s3, %s8109_s25  ;;  %276 = vst [vmem:[#allocation2] sm:$0xff] (!%p8110_p4), %v9522_v0  ;;  %277 = vst [vmem:[#allocation2 + $0x8] sm:$0xff] (!%p8110_p4), %v9522_v0 }
  0x6d   : > { %275 = sbr.rel (%p8110_p4) target bundleno = 116 (0x74), region = 44 }
  0x74 PF: > { %v388_v1 = vld [vmem:[%s9763_s7] sm:$0xff]  ;;  %v389_v3 = vld [vmem:[%s9763_s7 + $0x8] sm:$0xff]  ;;  %v9523_v33 = vmov 1983009808   ;;  %v292_v35 = vlaneseq  ;;  %v9824_v60 = vld [vmem:[%s9782_s26] sm:$0xff]  ;;  %p9135_p3 = scmp.ne.s32.totalorder %s9499_s18, 1 }
  0x75   : > { %v392_v2 = vld [vmem:[%s9763_s7 + $0x20] sm:$0xff]  ;;  %v393_v5 = vld [vmem:[%s9763_s7 + $0x28] sm:$0xff]  ;;  %v290_v34 = vunpack.c.l.s4 %v9523_v33 }
  0x76   : > { %v8112_v4 = vcombine.high %v388_v1, %v392_v2  ;;  %v8111_v6 = vcombine.low %v388_v1, %v392_v2  ;;  %v396_v7 = vld [vmem:[%s9763_s7 + $0x40] sm:$0xff]  ;;  %v8114_v9 = vcombine.high %v389_v3, %v393_v5  ;;  %v8113_v10 = vcombine.low %v389_v3, %v393_v5  ;;  %v397_v12 = vld [vmem:[%s9763_s7 + $0x48] sm:$0xff] }
  0x77   : > { %v400_v8 = vld [vmem:[%s9763_s7 + $0x60] sm:$0xff]  ;;  %v401_v13 = vld [vmem:[%s9763_s7 + $0x68] sm:$0xff]  ;;  %v291_v44 = vunpack.c.0.s8 %v290_v34  ;;  %v9812_v45 = vshrl.u32 %v292_v35, 7 }
  0x78   : > { %v8120_v11 = vcombine.high %v396_v7, %v400_v8  ;;  %v404_v14 = vld [vmem:[%s9763_s7 + $0x80] sm:$0xff]  ;;  %6532 = vmatprep.subr.bf16.mxu0 %v8112_v4  ;;  %v8122_v15 = vcombine.high %v397_v12, %v401_v13  ;;  %v405_v17 = vld [vmem:[%s9763_s7 + $0x88] sm:$0xff]  ;;  %6860 = vmatprep.subr.bf16.mxu1 %v8114_v9  ;;  %v8119_v19 = vcombine.low %v396_v7, %v400_v8 }
  0x79   : > { %v408_v16 = vld [vmem:[%s9763_s7 + $0xa0] sm:$0xff]  ;;  %v409_v18 = vld [vmem:[%s9763_s7 + $0xa8] sm:$0xff]  ;;  %6533 = vmatpush1.bf16.msra.mxu0 %v8111_v6  ;;  %6861 = vmatpush1.bf16.msra.mxu1 %v8113_v10  ;;  %v8121_v20 = vcombine.low %v397_v12, %v401_v13  ;;  %v9819_v54 = vsub.s32 %v291_v44, %v9812_v45 }
  0x7a   : > { %6534 = vmatprep.subr.bf16.mxu0 %v8120_v11  ;;  %v8128_v21 = vcombine.high %v404_v14, %v408_v16  ;;  %6862 = vmatprep.subr.bf16.mxu1 %v8122_v15  ;;  %v8130_v22 = vcombine.high %v405_v17, %v409_v18  ;;  %v412_v23 = vld [vmem:[%s9763_s7 + $0xc0] sm:$0xff]  ;;  %v413_v25 = vld [vmem:[%s9763_s7 + $0xc8] sm:$0xff]  ;;  %v8127_v27 = vcombine.low %v404_v14, %v408_v16 }
  0x7b   : > { %v416_v24 = vld [vmem:[%s9763_s7 + $0xe0] sm:$0xff]  ;;  %v417_v26 = vld [vmem:[%s9763_s7 + $0xe8] sm:$0xff]  ;;  %v8129_v28 = vcombine.low %v405_v17, %v409_v18  ;;  %v9830_v0 = vrot.slane %v9824_v60, %v9819_v54 }
  0x7c   : > { %v8136_v29 = vcombine.high %v412_v23, %v416_v24  ;;  %v8138_v30 = vcombine.high %v413_v25, %v417_v26  ;;  %v420_v31 = vld [vmem:[%s9763_s7 + $0x100] sm:$0xff]  ;;  %v421_v36 = vld [vmem:[%s9763_s7 + $0x108] sm:$0xff]  ;;  %v8135_v38 = vcombine.low %v412_v23, %v416_v24  ;;  %v8137_v39 = vcombine.low %v413_v25, %v417_v26 }
  0x7d   : > { %6535 = vmatpush1.bf16.msra.mxu0 %v8119_v19  ;;  %6863 = vmatpush1.bf16.msra.mxu1 %v8121_v20  ;;  %v424_v32 = vld [vmem:[%s9763_s7 + $0x120] sm:$0xff]  ;;  %v425_v37 = vld [vmem:[%s9763_s7 + $0x128] sm:$0xff]  ;;  %v303_v4 = vcombine.high %v9830_v0, %v9830_v0 }
  0x7e   : > { %6536 = vmatprep.subr.bf16.mxu0 %v8128_v21  ;;  %6864 = vmatprep.subr.bf16.mxu1 %v8130_v22  ;;  %v8144_v40 = vcombine.high %v420_v31, %v424_v32  ;;  %v8146_v41 = vcombine.high %v421_v36, %v425_v37  ;;  %v428_v42 = vld [vmem:[%s9763_s7 + $0x140] sm:$0xff]  ;;  %v429_v46 = vld [vmem:[%s9763_s7 + $0x148] sm:$0xff]  ;;  %v8143_v48 = vcombine.low %v420_v31, %v424_v32 }
  0x7f   : > { %v432_v43 = vld [vmem:[%s9763_s7 + $0x160] sm:$0xff]  ;;  %v433_v47 = vld [vmem:[%s9763_s7 + $0x168] sm:$0xff]  ;;  %v8145_v49 = vcombine.low %v421_v36, %v425_v37  ;;  %v9838_v10 = vpack.c.bf16 %v303_v4, %v303_v4 }
  0x80   : > { %v8152_v50 = vcombine.high %v428_v42, %v432_v43  ;;  %v8154_v51 = vcombine.high %v429_v46, %v433_v47  ;;  %v436_v52 = vld [vmem:[%s9763_s7 + $0x180] sm:$0xff]  ;;  %v437_v55 = vld [vmem:[%s9763_s7 + $0x188] sm:$0xff]  ;;  %v8151_v57 = vcombine.low %v428_v42, %v432_v43  ;;  %v8153_v58 = vcombine.low %v429_v46, %v433_v47 }
  0x81   : > { %6537 = vmatpush1.bf16.msra.mxu0 %v8127_v27  ;;  %6865 = vmatpush1.bf16.msra.mxu1 %v8129_v28  ;;  %v440_v53 = vld [vmem:[%s9763_s7 + $0x1a0] sm:$0xff]  ;;  %v441_v56 = vld [vmem:[%s9763_s7 + $0x1a8] sm:$0xff] }
  0x82   : > { %6538 = vmatprep.subr.bf16.mxu0 %v8136_v29  ;;  %6866 = vmatprep.subr.bf16.mxu1 %v8138_v30  ;;  %v8160_v59 = vcombine.high %v436_v52, %v440_v53  ;;  %v8162_v61 = vcombine.high %v437_v55, %v441_v56  ;;  %v444_v62 = vld [vmem:[%s9763_s7 + $0x1c0] sm:$0xff]  ;;  %v445_v1 = vld [vmem:[%s9763_s7 + $0x1c8] sm:$0xff]  ;;  %v8159_v3 = vcombine.low %v436_v52, %v440_v53 }
  0x83   : > { %v448_v63 = vld [vmem:[%s9763_s7 + $0x1e0] sm:$0xff]  ;;  %v449_v2 = vld [vmem:[%s9763_s7 + $0x1e8] sm:$0xff]  ;;  %v8161_v5 = vcombine.low %v437_v55, %v441_v56  ;;  %6564 = vmatprep.mubr.bf16.mxu0 %v9838_v10  ;;  %6892 = vmatprep.mubr.bf16.mxu1 %v9838_v10 }
  0x84   : > { %v8168_v6 = vcombine.high %v444_v62, %v448_v63  ;;  %v8170_v7 = vcombine.high %v445_v1, %v449_v2  ;;  %v452_v8 = vld [vmem:[%s9763_s7 + $0x200] sm:$0xff]  ;;  %v453_v11 = vld [vmem:[%s9763_s7 + $0x208] sm:$0xff]  ;;  %v8167_v13 = vcombine.low %v444_v62, %v448_v63  ;;  %v8169_v14 = vcombine.low %v445_v1, %v449_v2 }
  0x85   : > { %6539 = vmatpush1.bf16.msra.mxu0 %v8135_v38  ;;  %6867 = vmatpush1.bf16.msra.mxu1 %v8137_v39  ;;  %v456_v9 = vld [vmem:[%s9763_s7 + $0x220] sm:$0xff]  ;;  %v457_v12 = vld [vmem:[%s9763_s7 + $0x228] sm:$0xff] }
  0x86   : > { %6540 = vmatprep.subr.bf16.mxu0 %v8144_v40  ;;  %6868 = vmatprep.subr.bf16.mxu1 %v8146_v41  ;;  %v8176_v15 = vcombine.high %v452_v8, %v456_v9  ;;  %v8178_v16 = vcombine.high %v453_v11, %v457_v12  ;;  %v460_v17 = vld [vmem:[%s9763_s7 + $0x240] sm:$0xff]  ;;  %v461_v19 = vld [vmem:[%s9763_s7 + $0x248] sm:$0xff]  ;;  %v8175_v21 = vcombine.low %v452_v8, %v456_v9 }
  0x87   : > { %v464_v18 = vld [vmem:[%s9763_s7 + $0x260] sm:$0xff]  ;;  %v465_v20 = vld [vmem:[%s9763_s7 + $0x268] sm:$0xff]  ;;  %v8177_v22 = vcombine.low %v453_v11, %v457_v12 }
  0x88   : > { %v8184_v23 = vcombine.high %v460_v17, %v464_v18  ;;  %v8186_v24 = vcombine.high %v461_v19, %v465_v20  ;;  %v468_v25 = vld [vmem:[%s9763_s7 + $0x280] sm:$0xff]  ;;  %v469_v27 = vld [vmem:[%s9763_s7 + $0x288] sm:$0xff]  ;;  %v8183_v29 = vcombine.low %v460_v17, %v464_v18  ;;  %v8185_v30 = vcombine.low %v461_v19, %v465_v20 }
  0x89   : > { %6541 = vmatpush1.bf16.msra.mxu0 %v8143_v48  ;;  %6869 = vmatpush1.bf16.msra.mxu1 %v8145_v49  ;;  %v472_v26 = vld [vmem:[%s9763_s7 + $0x2a0] sm:$0xff]  ;;  %v473_v28 = vld [vmem:[%s9763_s7 + $0x2a8] sm:$0xff] }
  0x8a   : > { %6542 = vmatprep.subr.bf16.mxu0 %v8152_v50  ;;  %6870 = vmatprep.subr.bf16.mxu1 %v8154_v51  ;;  %v8192_v31 = vcombine.high %v468_v25, %v472_v26  ;;  %v8194_v32 = vcombine.high %v469_v27, %v473_v28  ;;  %v476_v33 = vld [vmem:[%s9763_s7 + $0x2c0] sm:$0xff]  ;;  %v477_v35 = vld [vmem:[%s9763_s7 + $0x2c8] sm:$0xff]  ;;  %v8191_v37 = vcombine.low %v468_v25, %v472_v26 }
  0x8b   : > { %v480_v34 = vld [vmem:[%s9763_s7 + $0x2e0] sm:$0xff]  ;;  %v481_v36 = vld [vmem:[%s9763_s7 + $0x2e8] sm:$0xff]  ;;  %v8193_v38 = vcombine.low %v469_v27, %v473_v28  ;;  %v9887_v26 = vpack.c.bf16 %v9830_v0, %v9830_v0 }
  0x8c   : > { %v8200_v39 = vcombine.high %v476_v33, %v480_v34  ;;  %v8202_v40 = vcombine.high %v477_v35, %v481_v36  ;;  %v484_v41 = vld [vmem:[%s9763_s7 + $0x300] sm:$0xff]  ;;  %v485_v43 = vld [vmem:[%s9763_s7 + $0x308] sm:$0xff]  ;;  %v8199_v46 = vcombine.low %v476_v33, %v480_v34  ;;  %v8201_v47 = vcombine.low %v477_v35, %v481_v36 }
  0x8d   : > { %6543 = vmatpush1.bf16.msra.mxu0 %v8151_v57  ;;  %6871 = vmatpush1.bf16.msra.mxu1 %v8153_v58  ;;  %v488_v42 = vld [vmem:[%s9763_s7 + $0x320] sm:$0xff]  ;;  %v489_v44 = vld [vmem:[%s9763_s7 + $0x328] sm:$0xff] }
  0x8e   : > { %6544 = vmatprep.subr.bf16.mxu0 %v8160_v59  ;;  %6872 = vmatprep.subr.bf16.mxu1 %v8162_v61  ;;  %v8208_v48 = vcombine.high %v484_v41, %v488_v42  ;;  %v8210_v49 = vcombine.high %v485_v43, %v489_v44  ;;  %v492_v50 = vld [vmem:[%s9763_s7 + $0x340] sm:$0xff]  ;;  %v493_v52 = vld [vmem:[%s9763_s7 + $0x348] sm:$0xff]  ;;  %v8207_v55 = vcombine.low %v484_v41, %v488_v42 }
  0x8f   : > { %v496_v51 = vld [vmem:[%s9763_s7 + $0x360] sm:$0xff]  ;;  %v497_v53 = vld [vmem:[%s9763_s7 + $0x368] sm:$0xff]  ;;  %v8209_v56 = vcombine.low %v485_v43, %v489_v44 }
  0x90   : > { %v8216_v57 = vcombine.high %v492_v50, %v496_v51  ;;  %v8218_v58 = vcombine.high %v493_v52, %v497_v53  ;;  %v500_v59 = vld [vmem:[%s9763_s7 + $0x380] sm:$0xff]  ;;  %v501_v62 = vld [vmem:[%s9763_s7 + $0x388] sm:$0xff]  ;;  %v8215_v1 = vcombine.low %v492_v50, %v496_v51  ;;  %v8217_v2 = vcombine.low %v493_v52, %v497_v53 }
  0x91   : > { %6545 = vmatpush1.bf16.msra.mxu0 %v8159_v3  ;;  %6873 = vmatpush1.bf16.msra.mxu1 %v8161_v5  ;;  %v504_v61 = vld [vmem:[%s9763_s7 + $0x3a0] sm:$0xff]  ;;  %v505_v63 = vld [vmem:[%s9763_s7 + $0x3a8] sm:$0xff] }
  0x92   : > { %6546 = vmatprep.subr.bf16.mxu0 %v8168_v6  ;;  %6874 = vmatprep.subr.bf16.mxu1 %v8170_v7  ;;  %v8224_v3 = vcombine.high %v500_v59, %v504_v61  ;;  %v8226_v4 = vcombine.high %v501_v62, %v505_v63  ;;  %v508_v5 = vld [vmem:[%s9763_s7 + $0x3c0] sm:$0xff]  ;;  %v288_v7 = vcombine.high %v9824_v60, %v9824_v60  ;;  %v509_v8 = vld [vmem:[%s9763_s7 + $0x3c8] sm:$0xff] }
  0x93   : > { %v512_v6 = vld [vmem:[%s9763_s7 + $0x3e0] sm:$0xff]  ;;  %v513_v9 = vld [vmem:[%s9763_s7 + $0x3e8] sm:$0xff]  ;;  %v8223_v11 = vcombine.low %v500_v59, %v504_v61  ;;  %v8225_v12 = vcombine.low %v501_v62, %v505_v63 }
  0x94   : > { %v9877_v17 = vrot.slane %v288_v7, %v9819_v54  ;;  %v517_v60 = vld [vmem:[%s9763_s7 + $0x408] sm:$0xff]  ;;  %v8231_v19 = vcombine.low %v508_v5, %v512_v6  ;;  %v8233_v20 = vcombine.low %v509_v8, %v513_v9  ;;  %v532_v33 = vld [vmem:[%s9763_s7 + $0x480] sm:$0xff] }
  0x95   : > { %6547 = vmatpush1.bf16.msra.mxu0 %v8167_v13  ;;  %6875 = vmatpush1.bf16.msra.mxu1 %v8169_v14  ;;  %v8232_v13 = vcombine.high %v508_v5, %v512_v6  ;;  %v8234_v14 = vcombine.high %v509_v8, %v513_v9  ;;  %v521_v18 = vld [vmem:[%s9763_s7 + $0x428] sm:$0xff]  ;;  %v536_v34 = vld [vmem:[%s9763_s7 + $0x4a0] sm:$0xff] }
  0x96   : > { %6548 = vmatprep.subr.bf16.mxu0 %v8176_v15  ;;  %6876 = vmatprep.subr.bf16.mxu1 %v8178_v16  ;;  %v516_v15 = vld [vmem:[%s9763_s7 + $0x400] sm:$0xff]  ;;  %v304_v25 = vcombine.high %v9877_v17, %v9877_v17  ;;  %v525_v27 = vld [vmem:[%s9763_s7 + $0x448] sm:$0xff] }
  0x97   : > { %v520_v16 = vld [vmem:[%s9763_s7 + $0x420] sm:$0xff]  ;;  %v529_v28 = vld [vmem:[%s9763_s7 + $0x468] sm:$0xff] }
  0x98   : > { %v9893_v35 = vpack.c.bf16 %v304_v25, %v304_v25  ;;  %v533_v0 = vld [vmem:[%s9763_s7 + $0x488] sm:$0xff]  ;;  %v540_v41 = vld [vmem:[%s9763_s7 + $0x4c0] sm:$0xff] }
  0x99   : > { %6549 = vmatpush1.bf16.msra.mxu0 %v8175_v21  ;;  %6877 = vmatpush1.bf16.msra.mxu1 %v8177_v22  ;;  %v8240_v21 = vcombine.high %v516_v15, %v520_v16  ;;  %v8242_v22 = vcombine.high %v517_v60, %v521_v18  ;;  %v537_v36 = vld [vmem:[%s9763_s7 + $0x4a8] sm:$0xff]  ;;  %v544_v42 = vld [vmem:[%s9763_s7 + $0x4e0] sm:$0xff] }
  0x9a   : > { %6550 = vmatprep.subr.bf16.mxu0 %v8184_v23  ;;  %6878 = vmatprep.subr.bf16.mxu1 %v8186_v24  ;;  %v524_v23 = vld [vmem:[%s9763_s7 + $0x440] sm:$0xff]  ;;  %v541_v43 = vld [vmem:[%s9763_s7 + $0x4c8] sm:$0xff] }
  0x9b   : > { %v528_v24 = vld [vmem:[%s9763_s7 + $0x460] sm:$0xff]  ;;  %v545_v44 = vld [vmem:[%s9763_s7 + $0x4e8] sm:$0xff] }
  0x9c   : > { %v548_v50 = vld [vmem:[%s9763_s7 + $0x500] sm:$0xff]  ;;  %v549_v52 = vld [vmem:[%s9763_s7 + $0x508] sm:$0xff] }
  0x9d   : > { %6551 = vmatpush1.bf16.msra.mxu0 %v8183_v29  ;;  %6879 = vmatpush1.bf16.msra.mxu1 %v8185_v30  ;;  %v8239_v29 = vcombine.low %v516_v15, %v520_v16  ;;  %v8241_v30 = vcombine.low %v517_v60, %v521_v18  ;;  %v552_v51 = vld [vmem:[%s9763_s7 + $0x520] sm:$0xff]  ;;  %v553_v53 = vld [vmem:[%s9763_s7 + $0x528] sm:$0xff] }
  0x9e   : > { %6552 = vmatprep.subr.bf16.mxu0 %v8192_v31  ;;  %6880 = vmatprep.subr.bf16.mxu1 %v8194_v32  ;;  %v8248_v31 = vcombine.high %v524_v23, %v528_v24  ;;  %v8250_v32 = vcombine.high %v525_v27, %v529_v28  ;;  %v556_v59 = vld [vmem:[%s9763_s7 + $0x540] sm:$0xff]  ;;  %v557_v62 = vld [vmem:[%s9763_s7 + $0x548] sm:$0xff] }
  0x9f   : > { %v560_v61 = vld [vmem:[%s9763_s7 + $0x560] sm:$0xff]  ;;  %v561_v63 = vld [vmem:[%s9763_s7 + $0x568] sm:$0xff] }
  0xa0   : > { %v564_v5 = vld [vmem:[%s9763_s7 + $0x580] sm:$0xff]  ;;  %v565_v7 = vld [vmem:[%s9763_s7 + $0x588] sm:$0xff]  ;;  %v8279_v9 = vcombine.low %v556_v59, %v560_v61 }
  0xa1   : > { %6553 = vmatpush1.bf16.msra.mxu0 %v8191_v37  ;;  %6881 = vmatpush1.bf16.msra.mxu1 %v8193_v38  ;;  %v8247_v37 = vcombine.low %v524_v23, %v528_v24  ;;  %v8249_v38 = vcombine.low %v525_v27, %v529_v28  ;;  %v568_v6 = vld [vmem:[%s9763_s7 + $0x5a0] sm:$0xff]  ;;  %v569_v8 = vld [vmem:[%s9763_s7 + $0x5a8] sm:$0xff] }
  0xa2   : > { %6554 = vmatprep.subr.bf16.mxu0 %v8200_v39  ;;  %6882 = vmatprep.subr.bf16.mxu1 %v8202_v40  ;;  %v8256_v39 = vcombine.high %v532_v33, %v536_v34  ;;  %v8258_v40 = vcombine.high %v533_v0, %v537_v36  ;;  %v576_v15 = vld [vmem:[%s9763_s7 + $0x5e0] sm:$0xff]  ;;  %v573_v16 = vld [vmem:[%s9763_s7 + $0x5c8] sm:$0xff]  ;;  %v8287_v18 = vcombine.low %v564_v5, %v568_v6 }
  0xa3   : > { %v577_v60 = vld [vmem:[%s9763_s7 + $0x5e8] sm:$0xff]  ;;  %v584_v23 = vld [vmem:[%s9763_s7 + $0x620] sm:$0xff] }
  0xa4   : > { %v581_v24 = vld [vmem:[%s9763_s7 + $0x608] sm:$0xff]  ;;  %v8297_v28 = vcombine.low %v573_v16, %v577_v60 }
  0xa5   : > { %6555 = vmatpush1.bf16.msra.mxu0 %v8199_v46  ;;  %6883 = vmatpush1.bf16.msra.mxu1 %v8201_v47  ;;  %v8255_v46 = vcombine.low %v532_v33, %v536_v34  ;;  %v8257_v47 = vcombine.low %v533_v0, %v537_v36  ;;  %v585_v25 = vld [vmem:[%s9763_s7 + $0x628] sm:$0xff] }
  0xa6   : > { %6556 = vmatprep.subr.bf16.mxu0 %v8208_v48  ;;  %6884 = vmatprep.subr.bf16.mxu1 %v8210_v49  ;;  %v8264_v48 = vcombine.high %v540_v41, %v544_v42  ;;  %v8266_v49 = vcombine.high %v541_v43, %v545_v44  ;;  %v589_v33 = vld [vmem:[%s9763_s7 + $0x648] sm:$0xff]  ;;  %v8305_v36 = vcombine.low %v581_v24, %v585_v25 }
  0xa7   : > { %v593_v34 = vld [vmem:[%s9763_s7 + $0x668] sm:$0xff] }
  0xa9   : > { %6557 = vmatpush1.bf16.msra.mxu0 %v8207_v55  ;;  %6885 = vmatpush1.bf16.msra.mxu1 %v8209_v56  ;;  %v8263_v55 = vcombine.low %v540_v41, %v544_v42  ;;  %v8265_v56 = vcombine.low %v541_v43, %v545_v44  ;;  %v597_v41 = vld [vmem:[%s9763_s7 + $0x688] sm:$0xff]  ;;  %v8313_v44 = vcombine.low %v589_v33, %v593_v34 }
  0xaa   : > { %6558 = vmatprep.subr.bf16.mxu0 %v8216_v57  ;;  %6886 = vmatprep.subr.bf16.mxu1 %v8218_v58  ;;  %v8272_v57 = vcombine.high %v548_v50, %v552_v51  ;;  %v8274_v58 = vcombine.high %v549_v52, %v553_v53  ;;  %v601_v42 = vld [vmem:[%s9763_s7 + $0x6a8] sm:$0xff] }
  0xad   : > { %6559 = vmatpush1.bf16.msra.mxu0 %v8215_v1  ;;  %6887 = vmatpush1.bf16.msra.mxu1 %v8217_v2  ;;  %v8271_v1 = vcombine.low %v548_v50, %v552_v51  ;;  %v8273_v2 = vcombine.low %v549_v52, %v553_v53  ;;  %v605_v50 = vld [vmem:[%s9763_s7 + $0x6c8] sm:$0xff]  ;;  %v8321_v53 = vcombine.low %v597_v41, %v601_v42 }
  0xae   : > { %6560 = vmatprep.subr.bf16.mxu0 %v8224_v3  ;;  %6888 = vmatprep.subr.bf16.mxu1 %v8226_v4  ;;  %v8280_v3 = vcombine.high %v556_v59, %v560_v61  ;;  %v8282_v4 = vcombine.high %v557_v62, %v561_v63  ;;  %v609_v51 = vld [vmem:[%s9763_s7 + $0x6e8] sm:$0xff] }
  0xaf   : > { %v613_v59 = vld [vmem:[%s9763_s7 + $0x708] sm:$0xff] }
  0xb0   : > { %v617_v61 = vld [vmem:[%s9763_s7 + $0x728] sm:$0xff] }
  0xb1   : > { %6561 = vmatpush1.bf16.msra.mxu0 %v8223_v11  ;;  %6889 = vmatpush1.bf16.msra.mxu1 %v8225_v12  ;;  %v8281_v11 = vcombine.low %v557_v62, %v561_v63  ;;  %v8288_v12 = vcombine.high %v564_v5, %v568_v6  ;;  %v8329_v63 = vcombine.low %v605_v50, %v609_v51  ;;  %v621_v5 = vld [vmem:[%s9763_s7 + $0x748] sm:$0xff] }
  0xb2   : > { %6562 = vmatprep.subr.bf16.mxu0 %v8232_v13  ;;  %6890 = vmatprep.subr.bf16.mxu1 %v8234_v14  ;;  %v8290_v13 = vcombine.high %v565_v7, %v569_v8  ;;  %v572_v14 = vld [vmem:[%s9763_s7 + $0x5c0] sm:$0xff]  ;;  %v625_v6 = vld [vmem:[%s9763_s7 + $0x768] sm:$0xff] }
  0xb3   : > { %v8295_v27 = vcombine.low %v572_v14, %v576_v15 }
  0xb5   : > { %6563 = vmatpush1.bf16.msra.mxu0 %v8231_v19  ;;  %6891 = vmatpush1.bf16.msra.mxu1 %v8233_v20  ;;  %v8289_v19 = vcombine.low %v565_v7, %v569_v8  ;;  %v8296_v20 = vcombine.high %v572_v14, %v576_v15  ;;  %v8337_v8 = vcombine.low %v613_v59, %v617_v61  ;;  %v629_v14 = vld [vmem:[%s9763_s7 + $0x788] sm:$0xff] }
  0xb6   : > { %6573 = vmatprep.subr.bf16.mxu0 %v8240_v21  ;;  %6901 = vmatprep.subr.bf16.mxu1 %v8242_v22  ;;  %v8298_v21 = vcombine.high %v573_v16, %v577_v60  ;;  %v580_v22 = vld [vmem:[%s9763_s7 + $0x600] sm:$0xff]  ;;  %v633_v15 = vld [vmem:[%s9763_s7 + $0x7a8] sm:$0xff]  ;;  %v8345_v60 = vcombine.low %v621_v5, %v625_v6 }
  0xb7   : > { %v8303_v0 = vcombine.low %v580_v22, %v584_v23 }
  0xb8   : > { %6565 = vmatmul.mubr.bf16.vlgmr.msra.gmra.mrb[0].mxu0 %v9887_v26  ;;  %6893 = vmatmul.mubr.bf16.vlgmr.msra.gmra.mrb[0].mxu1 %v9887_v26 }
  0xb9   : > { %6574 = vmatpush1.bf16.msra.mxu0 %v8239_v29  ;;  %6902 = vmatpush1.bf16.msra.mxu1 %v8241_v30  ;;  %v8304_v29 = vcombine.high %v580_v22, %v584_v23  ;;  %v8306_v30 = vcombine.high %v581_v24, %v585_v25  ;;  %v637_v22 = vld [vmem:[%s9763_s7 + $0x7c8] sm:$0xff]  ;;  %v9954_v24 = vld [vmem:[%s9782_s26 + $0x8] sm:$0xff] }
  0xba   : > { %6575 = vmatprep.subr.bf16.mxu0 %v8248_v31  ;;  %6903 = vmatprep.subr.bf16.mxu1 %v8250_v32  ;;  %v588_v31 = vld [vmem:[%s9763_s7 + $0x640] sm:$0xff]  ;;  %v641_v23 = vld [vmem:[%s9763_s7 + $0x7e8] sm:$0xff] }
  0xbb   : > { %6605 = vmatprep.mubr.bf16.mxu0 %v9893_v35  ;;  %6933 = vmatprep.mubr.bf16.mxu1 %v9893_v35  ;;  %v592_v32 = vld [vmem:[%s9763_s7 + $0x660] sm:$0xff] }
  0xbc   : > { %v8311_v43 = vcombine.low %v588_v31, %v592_v32 }
  0xbd   : > { %6576 = vmatpush1.bf16.msra.mxu0 %v8247_v37  ;;  %6904 = vmatpush1.bf16.msra.mxu1 %v8249_v38  ;;  %v8312_v37 = vcombine.high %v588_v31, %v592_v32  ;;  %v8314_v38 = vcombine.high %v589_v33, %v593_v34  ;;  %v648_v31 = vld [vmem:[%s9763_s7 + $0x820] sm:$0xff]  ;;  %v9960_v32 = vrot.slane %v9954_v24, %v9819_v54  ;;  %v645_v33 = vld [vmem:[%s9763_s7 + $0x808] sm:$0xff] }
  0xbe   : > { %6577 = vmatprep.subr.bf16.mxu0 %v8256_v39  ;;  %6905 = vmatprep.subr.bf16.mxu1 %v8258_v40  ;;  %v596_v39 = vld [vmem:[%s9763_s7 + $0x680] sm:$0xff]  ;;  %v649_v34 = vld [vmem:[%s9763_s7 + $0x828] sm:$0xff] }
  0xbf   : > { %v600_v40 = vld [vmem:[%s9763_s7 + $0x6a0] sm:$0xff] }
  0xc0   : > { %v8319_v52 = vcombine.low %v596_v39, %v600_v40 }
  0xc1   : > { %6578 = vmatpush1.bf16.msra.mxu0 %v8255_v46  ;;  %6906 = vmatpush1.bf16.msra.mxu1 %v8257_v47  ;;  %v8320_v46 = vcombine.high %v596_v39, %v600_v40  ;;  %v8322_v47 = vcombine.high %v597_v41, %v601_v42  ;;  %v652_v39 = vld [vmem:[%s9763_s7 + $0x840] sm:$0xff]  ;;  %v320_v41 = vcombine.high %v9960_v32, %v9960_v32 }
  0xc2   : > { %6579 = vmatprep.subr.bf16.mxu0 %v8264_v48  ;;  %6907 = vmatprep.subr.bf16.mxu1 %v8266_v49  ;;  %v604_v48 = vld [vmem:[%s9763_s7 + $0x6c0] sm:$0xff]  ;;  %v9970_v42 = vpack.c.bf16 %v9877_v17, %v9877_v17  ;;  %v661_v17 = vld [vmem:[%s9763_s7 + $0x888] sm:$0xff] }
  0xc3   : > { %v608_v49 = vld [vmem:[%s9763_s7 + $0x6e0] sm:$0xff] }
  0xc4   : > { %v8327_v62 = vcombine.low %v604_v48, %v608_v49  ;;  %v656_v40 = vld [vmem:[%s9763_s7 + $0x860] sm:$0xff] }
  0xc5   : > { %6580 = vmatpush1.bf16.msra.mxu0 %v8263_v55  ;;  %6908 = vmatpush1.bf16.msra.mxu1 %v8265_v56  ;;  %v8328_v55 = vcombine.high %v604_v48, %v608_v49  ;;  %v8330_v56 = vcombine.high %v605_v50, %v609_v51  ;;  %v8376_v48 = vcombine.high %v652_v39, %v656_v40  ;;  %v660_v50 = vld [vmem:[%s9763_s7 + $0x880] sm:$0xff] }
  0xc6   : > { %6581 = vmatprep.subr.bf16.mxu0 %v8272_v57  ;;  %6909 = vmatprep.subr.bf16.mxu1 %v8274_v58  ;;  %v612_v57 = vld [vmem:[%s9763_s7 + $0x700] sm:$0xff] }
  0xc7   : > { %v616_v58 = vld [vmem:[%s9763_s7 + $0x720] sm:$0xff] }
  0xc8   : > { %v8335_v7 = vcombine.low %v612_v57, %v616_v58  ;;  %v664_v51 = vld [vmem:[%s9763_s7 + $0x8a0] sm:$0xff] }
  0xc9   : > { %6582 = vmatpush1.bf16.msra.mxu0 %v8271_v1  ;;  %6910 = vmatpush1.bf16.msra.mxu1 %v8273_v2  ;;  %v8336_v1 = vcombine.high %v612_v57, %v616_v58  ;;  %v8338_v2 = vcombine.high %v613_v59, %v617_v61  ;;  %v8384_v57 = vcombine.high %v660_v50, %v664_v51  ;;  %v668_v59 = vld [vmem:[%s9763_s7 + $0x8c0] sm:$0xff] }
  0xca   : > { %6583 = vmatprep.subr.bf16.mxu0 %v8280_v3  ;;  %6911 = vmatprep.subr.bf16.mxu1 %v8282_v4  ;;  %v620_v3 = vld [vmem:[%s9763_s7 + $0x740] sm:$0xff] }
  0xcb   : > { %v624_v4 = vld [vmem:[%s9763_s7 + $0x760] sm:$0xff] }
  0xcc   : > { %v8343_v16 = vcombine.low %v620_v3, %v624_v4  ;;  %v672_v61 = vld [vmem:[%s9763_s7 + $0x8e0] sm:$0xff] }
  0xcd   : > { %6584 = vmatpush1.bf16.msra.mxu0 %v8279_v9  ;;  %6912 = vmatpush1.bf16.msra.mxu1 %v8281_v11  ;;  %v8344_v9 = vcombine.high %v620_v3, %v624_v4  ;;  %v8346_v11 = vcombine.high %v621_v5, %v625_v6  ;;  %v8392_v3 = vcombine.high %v668_v59, %v672_v61  ;;  %v676_v5 = vld [vmem:[%s9763_s7 + $0x900] sm:$0xff] }
  0xce   : > { %6585 = vmatprep.subr.bf16.mxu0 %v8288_v12  ;;  %6913 = vmatprep.subr.bf16.mxu1 %v8290_v13  ;;  %v628_v12 = vld [vmem:[%s9763_s7 + $0x780] sm:$0xff] }
  0xcf   : > { %v632_v13 = vld [vmem:[%s9763_s7 + $0x7a0] sm:$0xff] }
  0xd0   : > { %v8351_v25 = vcombine.low %v628_v12, %v632_v13  ;;  %v680_v6 = vld [vmem:[%s9763_s7 + $0x920] sm:$0xff] }
  0xd1   : > { %6586 = vmatpush1.bf16.msra.mxu0 %v8287_v18  ;;  %6914 = vmatpush1.bf16.msra.mxu1 %v8289_v19  ;;  %v8352_v18 = vcombine.high %v628_v12, %v632_v13  ;;  %v8354_v19 = vcombine.high %v629_v14, %v633_v15  ;;  %v8400_v12 = vcombine.high %v676_v5, %v680_v6 }
  0xd2   : > { %6587 = vmatprep.subr.bf16.mxu0 %v8296_v20  ;;  %6915 = vmatprep.subr.bf16.mxu1 %v8298_v21  ;;  %v636_v20 = vld [vmem:[%s9763_s7 + $0x7c0] sm:$0xff] }
  0xd3   : > { %v640_v21 = vld [vmem:[%s9763_s7 + $0x7e0] sm:$0xff] }
  0xd5   : > { %6588 = vmatpush1.bf16.msra.mxu0 %v8295_v27  ;;  %6916 = vmatpush1.bf16.msra.mxu1 %v8297_v28  ;;  %v8353_v27 = vcombine.low %v629_v14, %v633_v15  ;;  %v8360_v28 = vcombine.high %v636_v20, %v640_v21  ;;  %v684_v14 = vld [vmem:[%s9763_s7 + $0x940] sm:$0xff] }
  0xd6   : > { %6589 = vmatprep.subr.bf16.mxu0 %v8304_v29  ;;  %6917 = vmatprep.subr.bf16.mxu1 %v8306_v30  ;;  %v8362_v29 = vcombine.high %v637_v22, %v641_v23  ;;  %v644_v30 = vld [vmem:[%s9763_s7 + $0x800] sm:$0xff] }
  0xd7   : > { %v688_v15 = vld [vmem:[%s9763_s7 + $0x960] sm:$0xff] }
  0xd9   : > { %6590 = vmatpush1.bf16.msra.mxu0 %v8303_v0  ;;  %6918 = vmatpush1.bf16.msra.mxu1 %v8305_v36  ;;  %v8359_v0 = vcombine.low %v636_v20, %v640_v21  ;;  %v8361_v36 = vcombine.low %v637_v22, %v641_v23  ;;  %v8408_v20 = vcombine.high %v684_v14, %v688_v15  ;;  %v692_v22 = vld [vmem:[%s9763_s7 + $0x980] sm:$0xff] }
  0xda   : > { %6591 = vmatprep.subr.bf16.mxu0 %v8312_v37  ;;  %6919 = vmatprep.subr.bf16.mxu1 %v8314_v38  ;;  %v8368_v37 = vcombine.high %v644_v30, %v648_v31  ;;  %v8370_v38 = vcombine.high %v645_v33, %v649_v34  ;;  %v696_v23 = vld [vmem:[%s9763_s7 + $0x9a0] sm:$0xff] }
  0xdd   : > { %6592 = vmatpush1.bf16.msra.mxu0 %v8311_v43  ;;  %6920 = vmatpush1.bf16.msra.mxu1 %v8313_v44  ;;  %v653_v43 = vld [vmem:[%s9763_s7 + $0x848] sm:$0xff] }
  0xde   : > { %6593 = vmatprep.subr.bf16.mxu0 %v8320_v46  ;;  %6921 = vmatprep.subr.bf16.mxu1 %v8322_v47  ;;  %v657_v44 = vld [vmem:[%s9763_s7 + $0x868] sm:$0xff]  ;;  %v8367_v46 = vcombine.low %v644_v30, %v648_v31  ;;  %v8369_v47 = vcombine.low %v645_v33, %v649_v34  ;;  %v8416_v30 = vcombine.high %v692_v22, %v696_v23  ;;  %v700_v33 = vld [vmem:[%s9763_s7 + $0x9c0] sm:$0xff] }
  0xdf   : > { %v8378_v49 = vcombine.high %v653_v43, %v657_v44  ;;  %v704_v34 = vld [vmem:[%s9763_s7 + $0x9e0] sm:$0xff] }
  0xe1   : > { %6594 = vmatpush1.bf16.msra.mxu0 %v8319_v52  ;;  %6922 = vmatpush1.bf16.msra.mxu1 %v8321_v53  ;;  %v9976_v52 = vpack.c.bf16 %v320_v41, %v320_v41  ;;  %v665_v53 = vld [vmem:[%s9763_s7 + $0x8a8] sm:$0xff]  ;;  %v708_v41 = vld [vmem:[%s9763_s7 + $0xa00] sm:$0xff] }
  0xe2   : > { %6595 = vmatprep.subr.bf16.mxu0 %v8328_v55  ;;  %6923 = vmatprep.subr.bf16.mxu1 %v8330_v56  ;;  %v8375_v55 = vcombine.low %v652_v39, %v656_v40  ;;  %v8377_v56 = vcombine.low %v653_v43, %v657_v44  ;;  %v8386_v58 = vcombine.high %v661_v17, %v665_v53  ;;  %v712_v43 = vld [vmem:[%s9763_s7 + $0xa20] sm:$0xff]  ;;  %v709_v44 = vld [vmem:[%s9763_s7 + $0xa08] sm:$0xff] }
  0xe3   : > { %v8424_v39 = vcombine.high %v700_v33, %v704_v34 }
  0xe5   : > { %6596 = vmatpush1.bf16.msra.mxu0 %v8327_v62  ;;  %6924 = vmatpush1.bf16.msra.mxu1 %v8329_v63  ;;  %v669_v62 = vld [vmem:[%s9763_s7 + $0x8c8] sm:$0xff] }
  0xe6   : > { %6597 = vmatprep.subr.bf16.mxu0 %v8336_v1  ;;  %6925 = vmatprep.subr.bf16.mxu1 %v8338_v2  ;;  %v673_v63 = vld [vmem:[%s9763_s7 + $0x8e8] sm:$0xff]  ;;  %v8383_v1 = vcombine.low %v660_v50, %v664_v51  ;;  %v8385_v2 = vcombine.low %v661_v17, %v665_v53  ;;  %v716_v51 = vld [vmem:[%s9763_s7 + $0xa40] sm:$0xff] }
  0xe7   : > { %v8394_v4 = vcombine.high %v669_v62, %v673_v63  ;;  %v720_v17 = vld [vmem:[%s9763_s7 + $0xa60] sm:$0xff]  ;;  %v717_v53 = vld [vmem:[%s9763_s7 + $0xa48] sm:$0xff] }
  0xe9   : > { %6598 = vmatpush1.bf16.msra.mxu0 %v8335_v7  ;;  %6926 = vmatpush1.bf16.msra.mxu1 %v8337_v8  ;;  %v677_v7 = vld [vmem:[%s9763_s7 + $0x908] sm:$0xff] }
  0xea   : > { %6599 = vmatprep.subr.bf16.mxu0 %v8344_v9  ;;  %6927 = vmatprep.subr.bf16.mxu1 %v8346_v11  ;;  %v681_v8 = vld [vmem:[%s9763_s7 + $0x928] sm:$0xff]  ;;  %v8391_v9 = vcombine.low %v668_v59, %v672_v61  ;;  %v8393_v11 = vcombine.low %v669_v62, %v673_v63  ;;  %v724_v61 = vld [vmem:[%s9763_s7 + $0xa80] sm:$0xff] }
  0xeb   : > { %v8402_v13 = vcombine.high %v677_v7, %v681_v8  ;;  %v728_v62 = vld [vmem:[%s9763_s7 + $0xaa0] sm:$0xff]  ;;  %v725_v63 = vld [vmem:[%s9763_s7 + $0xa88] sm:$0xff] }
  0xed   : > { %6600 = vmatpush1.bf16.msra.mxu0 %v8343_v16  ;;  %6928 = vmatpush1.bf16.msra.mxu1 %v8345_v60  ;;  %v685_v16 = vld [vmem:[%s9763_s7 + $0x948] sm:$0xff] }
  0xee   : > { %6601 = vmatprep.subr.bf16.mxu0 %v8352_v18  ;;  %6929 = vmatprep.subr.bf16.mxu1 %v8354_v19  ;;  %v689_v60 = vld [vmem:[%s9763_s7 + $0x968] sm:$0xff]  ;;  %v8399_v18 = vcombine.low %v676_v5, %v680_v6  ;;  %v8401_v19 = vcombine.low %v677_v7, %v681_v8  ;;  %v732_v6 = vld [vmem:[%s9763_s7 + $0xac0] sm:$0xff] }
  0xef   : > { %v8410_v21 = vcombine.high %v685_v16, %v689_v60  ;;  %v736_v7 = vld [vmem:[%s9763_s7 + $0xae0] sm:$0xff]  ;;  %v733_v8 = vld [vmem:[%s9763_s7 + $0xac8] sm:$0xff] }
  0xf1   : > { %6602 = vmatpush1.bf16.msra.mxu0 %v8351_v25  ;;  %6930 = vmatpush1.bf16.msra.mxu1 %v8353_v27  ;;  %v693_v25 = vld [vmem:[%s9763_s7 + $0x988] sm:$0xff] }
  0xf2   : > { %6603 = vmatprep.subr.bf16.mxu0 %v8360_v28  ;;  %6931 = vmatprep.subr.bf16.mxu1 %v8362_v29  ;;  %v697_v27 = vld [vmem:[%s9763_s7 + $0x9a8] sm:$0xff]  ;;  %v8407_v28 = vcombine.low %v684_v14, %v688_v15  ;;  %v8409_v29 = vcombine.low %v685_v16, %v689_v60  ;;  %v740_v15 = vld [vmem:[%s9763_s7 + $0xb00] sm:$0xff] }
  0xf3   : > { %v8418_v31 = vcombine.high %v693_v25, %v697_v27  ;;  %v744_v16 = vld [vmem:[%s9763_s7 + $0xb20] sm:$0xff]  ;;  %v741_v60 = vld [vmem:[%s9763_s7 + $0xb08] sm:$0xff] }
  0xf5   : > { %6604 = vmatpush1.bf16.msra.mxu0 %v8359_v0  ;;  %6932 = vmatpush1.bf16.msra.mxu1 %v8361_v36  ;;  %v701_v0 = vld [vmem:[%s9763_s7 + $0x9c8] sm:$0xff] }
  0xf6   : > { %6614 = vmatprep.subr.bf16.mxu0 %v8368_v37  ;;  %6942 = vmatprep.subr.bf16.mxu1 %v8370_v38  ;;  %v705_v36 = vld [vmem:[%s9763_s7 + $0x9e8] sm:$0xff]  ;;  %v8415_v37 = vcombine.low %v692_v22, %v696_v23  ;;  %v8417_v38 = vcombine.low %v693_v25, %v697_v27  ;;  %v748_v23 = vld [vmem:[%s9763_s7 + $0xb40] sm:$0xff] }
  0xf7   : > { %v8426_v40 = vcombine.high %v701_v0, %v705_v36  ;;  %v752_v25 = vld [vmem:[%s9763_s7 + $0xb60] sm:$0xff]  ;;  %v749_v27 = vld [vmem:[%s9763_s7 + $0xb48] sm:$0xff] }
  0xf8   : > { %6606 = vmatmul.mubr.bf16.vlgmr.msra.gmra.mrb[0].mxu0 %v9970_v42  ;;  %6934 = vmatmul.mubr.bf16.vlgmr.msra.gmra.mrb[0].mxu1 %v9970_v42 }
  0xf9   : > { %6615 = vmatpush1.bf16.msra.mxu0 %v8367_v46  ;;  %6943 = vmatpush1.bf16.msra.mxu1 %v8369_v47  ;;  %v713_v46 = vld [vmem:[%s9763_s7 + $0xa28] sm:$0xff]  ;;  %v8423_v47 = vcombine.low %v700_v33, %v704_v34  ;;  %v756_v34 = vld [vmem:[%s9763_s7 + $0xb80] sm:$0xff] }
  0xfa   : > { %6616 = vmatprep.subr.bf16.mxu0 %v8376_v48  ;;  %6944 = vmatprep.subr.bf16.mxu1 %v8378_v49  ;;  %v8425_v48 = vcombine.low %v701_v0, %v705_v36  ;;  %v8432_v49 = vcombine.high %v708_v41, %v712_v43  ;;  %v8434_v50 = vcombine.high %v709_v44, %v713_v46  ;;  %v760_v0 = vld [vmem:[%s9763_s7 + $0xba0] sm:$0xff]  ;;  %v757_v36 = vld [vmem:[%s9763_s7 + $0xb88] sm:$0xff] }
  0xfb   : > { %6646 = vmatprep.mubr.bf16.mxu0 %v9976_v52  ;;  %6974 = vmatprep.mubr.bf16.mxu1 %v9976_v52 }
  0xfd   : > { %6617 = vmatpush1.bf16.msra.mxu0 %v8375_v55  ;;  %6945 = vmatpush1.bf16.msra.mxu1 %v8377_v56  ;;  %v721_v55 = vld [vmem:[%s9763_s7 + $0xa68] sm:$0xff]  ;;  %v8431_v56 = vcombine.low %v708_v41, %v712_v43  ;;  %v764_v43 = vld [vmem:[%s9763_s7 + $0xbc0] sm:$0xff] }
  0xfe   : > { %6618 = vmatprep.subr.bf16.mxu0 %v8384_v57  ;;  %6946 = vmatprep.subr.bf16.mxu1 %v8386_v58  ;;  %v8433_v57 = vcombine.low %v709_v44, %v713_v46  ;;  %v8440_v58 = vcombine.high %v716_v51, %v720_v17  ;;  %v8442_v59 = vcombine.high %v717_v53, %v721_v55  ;;  %v768_v44 = vld [vmem:[%s9763_s7 + $0xbe0] sm:$0xff] }
  0xff   : > { %v305_v46 = vcombine.high %v9954_v24, %v9954_v24  ;;  %v773_v24 = vld [vmem:[%s9763_s7 + $0xc08] sm:$0xff] }
 0x101   : > { %6619 = vmatpush1.bf16.msra.mxu0 %v8383_v1  ;;  %6947 = vmatpush1.bf16.msra.mxu1 %v8385_v2  ;;  %v729_v1 = vld [vmem:[%s9763_s7 + $0xaa8] sm:$0xff]  ;;  %v8439_v2 = vcombine.low %v716_v51, %v720_v17  ;;  %v8488_v51 = vcombine.high %v764_v43, %v768_v44 }
 0x102   : > { %6620 = vmatprep.subr.bf16.mxu0 %v8392_v3  ;;  %6948 = vmatprep.subr.bf16.mxu1 %v8394_v4  ;;  %v8441_v3 = vcombine.low %v717_v53, %v721_v55  ;;  %v8448_v4 = vcombine.high %v724_v61, %v728_v62  ;;  %v8450_v5 = vcombine.high %v725_v63, %v729_v1  ;;  %v772_v53 = vld [vmem:[%s9763_s7 + $0xc00] sm:$0xff] }
 0x103   : > { %v776_v55 = vld [vmem:[%s9763_s7 + $0xc20] sm:$0xff] }
 0x105   : > { %6621 = vmatpush1.bf16.msra.mxu0 %v8391_v9  ;;  %6949 = vmatpush1.bf16.msra.mxu1 %v8393_v11  ;;  %v737_v9 = vld [vmem:[%s9763_s7 + $0xae8] sm:$0xff]  ;;  %v8447_v11 = vcombine.low %v724_v61, %v728_v62  ;;  %v8496_v61 = vcombine.high %v772_v53, %v776_v55 }
 0x106   : > { %6622 = vmatprep.subr.bf16.mxu0 %v8400_v12  ;;  %6950 = vmatprep.subr.bf16.mxu1 %v8402_v13  ;;  %v8449_v12 = vcombine.low %v725_v63, %v729_v1  ;;  %v8456_v13 = vcombine.high %v732_v6, %v736_v7  ;;  %v8458_v14 = vcombine.high %v733_v8, %v737_v9  ;;  %v780_v63 = vld [vmem:[%s9763_s7 + $0xc40] sm:$0xff] }
 0x107   : > { %v784_v1 = vld [vmem:[%s9763_s7 + $0xc60] sm:$0xff] }
 0x109   : > { %6623 = vmatpush1.bf16.msra.mxu0 %v8399_v18  ;;  %6951 = vmatpush1.bf16.msra.mxu1 %v8401_v19  ;;  %v745_v18 = vld [vmem:[%s9763_s7 + $0xb28] sm:$0xff]  ;;  %v8455_v19 = vcombine.low %v732_v6, %v736_v7  ;;  %v8495_v6 = vcombine.low %v772_v53, %v776_v55 }
 0x10a   : > { %6624 = vmatprep.subr.bf16.mxu0 %v8408_v20  ;;  %6952 = vmatprep.subr.bf16.mxu1 %v8410_v21  ;;  %v8457_v20 = vcombine.low %v733_v8, %v737_v9  ;;  %v8464_v21 = vcombine.high %v740_v15, %v744_v16  ;;  %v8466_v22 = vcombine.high %v741_v60, %v745_v18 }
 0x10b   : > { %v8504_v8 = vcombine.high %v780_v63, %v784_v1 }
 0x10d   : > { %6625 = vmatpush1.bf16.msra.mxu0 %v8407_v28  ;;  %6953 = vmatpush1.bf16.msra.mxu1 %v8409_v29  ;;  %v753_v28 = vld [vmem:[%s9763_s7 + $0xb68] sm:$0xff]  ;;  %v8463_v29 = vcombine.low %v740_v15, %v744_v16  ;;  %v8503_v15 = vcombine.low %v780_v63, %v784_v1 }
 0x10e   : > { %6626 = vmatprep.subr.bf16.mxu0 %v8416_v30  ;;  %6954 = vmatprep.subr.bf16.mxu1 %v8418_v31  ;;  %v8465_v30 = vcombine.low %v741_v60, %v745_v18  ;;  %v8472_v31 = vcombine.high %v748_v23, %v752_v25  ;;  %v8474_v33 = vcombine.high %v749_v27, %v753_v28 }
 0x111   : > { %6627 = vmatpush1.bf16.msra.mxu0 %v8415_v37  ;;  %6955 = vmatpush1.bf16.msra.mxu1 %v8417_v38  ;;  %v761_v37 = vld [vmem:[%s9763_s7 + $0xba8] sm:$0xff]  ;;  %v8471_v38 = vcombine.low %v748_v23, %v752_v25 }
 0x112   : > { %6628 = vmatprep.subr.bf16.mxu0 %v8424_v39  ;;  %6956 = vmatprep.subr.bf16.mxu1 %v8426_v40  ;;  %v8473_v39 = vcombine.low %v749_v27, %v753_v28  ;;  %v8480_v40 = vcombine.high %v756_v34, %v760_v0  ;;  %v8482_v41 = vcombine.high %v757_v36, %v761_v37 }
 0x115   : > { %6629 = vmatpush1.bf16.msra.mxu0 %v8423_v47  ;;  %6957 = vmatpush1.bf16.msra.mxu1 %v8425_v48  ;;  %v765_v47 = vld [vmem:[%s9763_s7 + $0xbc8] sm:$0xff] }
 0x116   : > { %6630 = vmatprep.subr.bf16.mxu0 %v8432_v49  ;;  %6958 = vmatprep.subr.bf16.mxu1 %v8434_v50  ;;  %v769_v48 = vld [vmem:[%s9763_s7 + $0xbe8] sm:$0xff]  ;;  %v8479_v49 = vcombine.low %v756_v34, %v760_v0  ;;  %v8481_v50 = vcombine.low %v757_v36, %v761_v37 }
 0x117   : > { %v8490_v17 = vcombine.high %v765_v47, %v769_v48 }
 0x119   : > { %6631 = vmatpush1.bf16.msra.mxu0 %v8431_v56  ;;  %6959 = vmatpush1.bf16.msra.mxu1 %v8433_v57  ;;  %v10041_v56 = vrot.slane %v305_v46, %v9819_v54  ;;  %v777_v57 = vld [vmem:[%s9763_s7 + $0xc28] sm:$0xff] }
 0x11a   : > { %6632 = vmatprep.subr.bf16.mxu0 %v8440_v58  ;;  %6960 = vmatprep.subr.bf16.mxu1 %v8442_v59  ;;  %v8487_v58 = vcombine.low %v764_v43, %v768_v44  ;;  %v8489_v59 = vcombine.low %v765_v47, %v769_v48  ;;  %v8498_v62 = vcombine.high %v773_v24, %v777_v57  ;;  %v820_v48 = vld [vmem:[%s9763_s7 + $0xd80] sm:$0xff] }
 0x11b   : > { %v8497_v7 = vcombine.low %v773_v24, %v777_v57  ;;  %v828_v57 = vld [vmem:[%s9763_s7 + $0xdc0] sm:$0xff] }
 0x11d   : > { %6633 = vmatpush1.bf16.msra.mxu0 %v8439_v2  ;;  %6961 = vmatpush1.bf16.msra.mxu1 %v8441_v3  ;;  %v321_v2 = vcombine.high %v10041_v56, %v10041_v56  ;;  %v10051_v3 = vpack.c.bf16 %v9960_v32, %v9960_v32  ;;  %v789_v32 = vld [vmem:[%s9763_s7 + $0xc88] sm:$0xff] }
 0x11e   : > { %6634 = vmatprep.subr.bf16.mxu0 %v8448_v4  ;;  %6962 = vmatprep.subr.bf16.mxu1 %v8450_v5  ;;  %v781_v4 = vld [vmem:[%s9763_s7 + $0xc48] sm:$0xff] }
 0x11f   : > { %v785_v5 = vld [vmem:[%s9763_s7 + $0xc68] sm:$0xff] }
 0x120   : > { %v8506_v9 = vcombine.high %v781_v4, %v785_v5  ;;  %v8505_v16 = vcombine.low %v781_v4, %v785_v5  ;;  %v836_v4 = vld [vmem:[%s9763_s7 + $0xe00] sm:$0xff] }
 0x121   : > { %6635 = vmatpush1.bf16.msra.mxu0 %v8447_v11  ;;  %6963 = vmatpush1.bf16.msra.mxu1 %v8449_v12  ;;  %v788_v11 = vld [vmem:[%s9763_s7 + $0xc80] sm:$0xff] }
 0x122   : > { %6636 = vmatprep.subr.bf16.mxu0 %v8456_v13  ;;  %6964 = vmatprep.subr.bf16.mxu1 %v8458_v14  ;;  %v792_v12 = vld [vmem:[%s9763_s7 + $0xca0] sm:$0xff]  ;;  %v10057_v13 = vpack.c.bf16 %v321_v2, %v321_v2  ;;  %v793_v14 = vld [vmem:[%s9763_s7 + $0xca8] sm:$0xff] }
 0x123   : > { %v8512_v60 = vcombine.high %v788_v11, %v792_v12  ;;  %v8514_v18 = vcombine.high %v789_v32, %v793_v14  ;;  %v8511_v23 = vcombine.low %v788_v11, %v792_v12  ;;  %v8513_v25 = vcombine.low %v789_v32, %v793_v14  ;;  %v840_v5 = vld [vmem:[%s9763_s7 + $0xe20] sm:$0xff] }
 0x124   : > { %v8560_v11 = vcombine.high %v836_v4, %v840_v5  ;;  %v844_v32 = vld [vmem:[%s9763_s7 + $0xe40] sm:$0xff] }
 0x125   : > { %6637 = vmatpush1.bf16.msra.mxu0 %v8455_v19  ;;  %6965 = vmatpush1.bf16.msra.mxu1 %v8457_v20  ;;  %v796_v19 = vld [vmem:[%s9763_s7 + $0xcc0] sm:$0xff] }
 0x126   : > { %6638 = vmatprep.subr.bf16.mxu0 %v8464_v21  ;;  %6966 = vmatprep.subr.bf16.mxu1 %v8466_v22  ;;  %v800_v20 = vld [vmem:[%s9763_s7 + $0xce0] sm:$0xff]  ;;  %v797_v21 = vld [vmem:[%s9763_s7 + $0xcc8] sm:$0xff] }
 0x127   : > { %v801_v22 = vld [vmem:[%s9763_s7 + $0xce8] sm:$0xff]  ;;  %v8520_v27 = vcombine.high %v796_v19, %v800_v20  ;;  %v8519_v34 = vcombine.low %v796_v19, %v800_v20  ;;  %v848_v14 = vld [vmem:[%s9763_s7 + $0xe60] sm:$0xff] }
 0x128   : > { %v8522_v28 = vcombine.high %v797_v21, %v801_v22  ;;  %v8521_v0 = vcombine.low %v797_v21, %v801_v22  ;;  %v8568_v19 = vcombine.high %v844_v32, %v848_v14  ;;  %v852_v21 = vld [vmem:[%s9763_s7 + $0xe80] sm:$0xff] }
 0x129   : > { %6639 = vmatpush1.bf16.msra.mxu0 %v8463_v29  ;;  %6967 = vmatpush1.bf16.msra.mxu1 %v8465_v30  ;;  %v804_v29 = vld [vmem:[%s9763_s7 + $0xd00] sm:$0xff] }
 0x12a   : > { %6640 = vmatprep.subr.bf16.mxu0 %v8472_v31  ;;  %6968 = vmatprep.subr.bf16.mxu1 %v8474_v33  ;;  %v808_v30 = vld [vmem:[%s9763_s7 + $0xd20] sm:$0xff]  ;;  %v805_v31 = vld [vmem:[%s9763_s7 + $0xd08] sm:$0xff] }
 0x12b   : > { %v809_v33 = vld [vmem:[%s9763_s7 + $0xd28] sm:$0xff]  ;;  %v8528_v36 = vcombine.high %v804_v29, %v808_v30  ;;  %v8527_v43 = vcombine.low %v804_v29, %v808_v30  ;;  %v856_v22 = vld [vmem:[%s9763_s7 + $0xea0] sm:$0xff] }
 0x12c   : > { %v8530_v37 = vcombine.high %v805_v31, %v809_v33  ;;  %v8529_v44 = vcombine.low %v805_v31, %v809_v33  ;;  %v8576_v29 = vcombine.high %v852_v21, %v856_v22  ;;  %v860_v31 = vld [vmem:[%s9763_s7 + $0xec0] sm:$0xff] }
 0x12d   : > { %6641 = vmatpush1.bf16.msra.mxu0 %v8471_v38  ;;  %6969 = vmatpush1.bf16.msra.mxu1 %v8473_v39  ;;  %v812_v38 = vld [vmem:[%s9763_s7 + $0xd40] sm:$0xff] }
 0x12e   : > { %6642 = vmatprep.subr.bf16.mxu0 %v8480_v40  ;;  %6970 = vmatprep.subr.bf16.mxu1 %v8482_v41  ;;  %v816_v39 = vld [vmem:[%s9763_s7 + $0xd60] sm:$0xff]  ;;  %v813_v40 = vld [vmem:[%s9763_s7 + $0xd48] sm:$0xff] }
 0x12f   : > { %v817_v41 = vld [vmem:[%s9763_s7 + $0xd68] sm:$0xff]  ;;  %v8536_v46 = vcombine.high %v812_v38, %v816_v39  ;;  %v864_v33 = vld [vmem:[%s9763_s7 + $0xee0] sm:$0xff] }
 0x130   : > { %v8538_v47 = vcombine.high %v813_v40, %v817_v41  ;;  %v8537_v53 = vcombine.low %v813_v40, %v817_v41  ;;  %v868_v40 = vld [vmem:[%s9763_s7 + $0xf00] sm:$0xff] }
 0x131   : > { %6643 = vmatpush1.bf16.msra.mxu0 %v8479_v49  ;;  %6971 = vmatpush1.bf16.msra.mxu1 %v8481_v50  ;;  %v824_v49 = vld [vmem:[%s9763_s7 + $0xda0] sm:$0xff]  ;;  %v821_v50 = vld [vmem:[%s9763_s7 + $0xd88] sm:$0xff] }
 0x132   : > { %6644 = vmatprep.subr.bf16.mxu0 %v8488_v51  ;;  %6972 = vmatprep.subr.bf16.mxu1 %v8490_v17  ;;  %v825_v51 = vld [vmem:[%s9763_s7 + $0xda8] sm:$0xff]  ;;  %v8535_v17 = vcombine.low %v812_v38, %v816_v39  ;;  %v8544_v55 = vcombine.high %v820_v48, %v824_v49  ;;  %v8584_v38 = vcombine.high %v860_v31, %v864_v33  ;;  %v872_v41 = vld [vmem:[%s9763_s7 + $0xf20] sm:$0xff] }
 0x133   : > { %v8546_v24 = vcombine.high %v821_v50, %v825_v51  ;;  %v8545_v63 = vcombine.low %v821_v50, %v825_v51  ;;  %v876_v50 = vld [vmem:[%s9763_s7 + $0xf40] sm:$0xff] }
 0x134   : > { %v880_v51 = vld [vmem:[%s9763_s7 + $0xf60] sm:$0xff] }
 0x135   : > { %6645 = vmatpush1.bf16.msra.mxu0 %v8487_v58  ;;  %6973 = vmatpush1.bf16.msra.mxu1 %v8489_v59  ;;  %v832_v58 = vld [vmem:[%s9763_s7 + $0xde0] sm:$0xff]  ;;  %v829_v59 = vld [vmem:[%s9763_s7 + $0xdc8] sm:$0xff] }
 0x136   : > { %6655 = vmatprep.subr.bf16.mxu0 %v8496_v61  ;;  %6983 = vmatprep.subr.bf16.mxu1 %v8498_v62  ;;  %v833_v61 = vld [vmem:[%s9763_s7 + $0xde8] sm:$0xff]  ;;  %v8543_v62 = vcombine.low %v820_v48, %v824_v49  ;;  %v8552_v1 = vcombine.high %v828_v57, %v832_v58  ;;  %v8592_v48 = vcombine.high %v868_v40, %v872_v41 }
 0x137   : > { %v8554_v2 = vcombine.high %v829_v59, %v833_v61 }
 0x138   : > { %6647 = vmatmul.mubr.bf16.vlgmr.msra.gmra.mrb[0].mxu0 %v10051_v3  ;;  %6975 = vmatmul.mubr.bf16.vlgmr.msra.gmra.mrb[0].mxu1 %v10051_v3 }
 0x139   : > { %6656 = vmatpush1.bf16.msra.mxu0 %v8495_v6  ;;  %6984 = vmatpush1.bf16.msra.mxu1 %v8497_v7  ;;  %v837_v6 = vld [vmem:[%s9763_s7 + $0xe08] sm:$0xff] }
 0x13a   : > { %6657 = vmatprep.subr.bf16.mxu0 %v8504_v8  ;;  %6985 = vmatprep.subr.bf16.mxu1 %v8506_v9  ;;  %v841_v7 = vld [vmem:[%s9763_s7 + $0xe28] sm:$0xff]  ;;  %v8551_v8 = vcombine.low %v828_v57, %v832_v58  ;;  %v8553_v9 = vcombine.low %v829_v59, %v833_v61  ;;  %v8600_v57 = vcombine.high %v876_v50, %v880_v51  ;;  %v884_v59 = vld [vmem:[%s9763_s7 + $0xf80] sm:$0xff] }
 0x13b   : > { %6687 = vmatprep.mubr.bf16.mxu0 %v10057_v13  ;;  %7015 = vmatprep.mubr.bf16.mxu1 %v10057_v13  ;;  %v8562_v12 = vcombine.high %v837_v6, %v841_v7  ;;  %v888_v61 = vld [vmem:[%s9763_s7 + $0xfa0] sm:$0xff] }
 0x13d   : > { %6658 = vmatpush1.bf16.msra.mxu0 %v8503_v15  ;;  %6986 = vmatpush1.bf16.msra.mxu1 %v8505_v16  ;;  %v845_v15 = vld [vmem:[%s9763_s7 + $0xe48] sm:$0xff] }
 0x13e   : > { %6659 = vmatprep.subr.bf16.mxu0 %v8512_v60  ;;  %6987 = vmatprep.subr.bf16.mxu1 %v8514_v18  ;;  %v849_v16 = vld [vmem:[%s9763_s7 + $0xe68] sm:$0xff]  ;;  %v8559_v60 = vcombine.low %v836_v4, %v840_v5  ;;  %v8561_v18 = vcombine.low %v837_v6, %v841_v7  ;;  %v8608_v4 = vcombine.high %v884_v59, %v888_v61  ;;  %v892_v6 = vld [vmem:[%s9763_s7 + $0xfc0] sm:$0xff] }
 0x13f   : > { %v8570_v20 = vcombine.high %v845_v15, %v849_v16  ;;  %v896_v7 = vld [vmem:[%s9763_s7 + $0xfe0] sm:$0xff] }
 0x141   : > { %6660 = vmatpush1.bf16.msra.mxu0 %v8511_v23  ;;  %6988 = vmatpush1.bf16.msra.mxu1 %v8513_v25  ;;  %v853_v23 = vld [vmem:[%s9763_s7 + $0xe88] sm:$0xff] }
 0x142   : > { %6661 = vmatprep.subr.bf16.mxu0 %v8520_v27  ;;  %6989 = vmatprep.subr.bf16.mxu1 %v8522_v28  ;;  %v857_v25 = vld [vmem:[%s9763_s7 + $0xea8] sm:$0xff]  ;;  %v8567_v27 = vcombine.low %v844_v32, %v848_v14  ;;  %v8569_v28 = vcombine.low %v845_v15, %v849_v16  ;;  %v8616_v14 = vcombine.high %v892_v6, %v896_v7  ;;  %v900_v16 = vld [vmem:[%s9763_s7 + $0x1000] sm:$0xff] }
 0x143   : > { %v8578_v30 = vcombine.high %v853_v23, %v857_v25 }
 0x145   : > { %6662 = vmatpush1.bf16.msra.mxu0 %v8519_v34  ;;  %6990 = vmatpush1.bf16.msra.mxu1 %v8521_v0  ;;  %v861_v34 = vld [vmem:[%s9763_s7 + $0xec8] sm:$0xff] }
 0x146   : > { %6663 = vmatprep.subr.bf16.mxu0 %v8528_v36  ;;  %6991 = vmatprep.subr.bf16.mxu1 %v8530_v37  ;;  %v865_v0 = vld [vmem:[%s9763_s7 + $0xee8] sm:$0xff]  ;;  %v8575_v36 = vcombine.low %v852_v21, %v856_v22  ;;  %v8577_v37 = vcombine.low %v853_v23, %v857_v25  ;;  %v8615_v21 = vcombine.low %v892_v6, %v896_v7 }
 0x147   : > { %v8586_v39 = vcombine.high %v861_v34, %v865_v0  ;;  %v941_v6 = vld [vmem:[%s9763_s7 + $0x1148] sm:$0xff] }
 0x148   : > { %v945_v7 = vld [vmem:[%s9763_s7 + $0x1168] sm:$0xff] }
 0x149   : > { %6664 = vmatpush1.bf16.msra.mxu0 %v8527_v43  ;;  %6992 = vmatpush1.bf16.msra.mxu1 %v8529_v44  ;;  %v869_v43 = vld [vmem:[%s9763_s7 + $0xf08] sm:$0xff] }
 0x14a   : > { %6665 = vmatprep.subr.bf16.mxu0 %v8536_v46  ;;  %6993 = vmatprep.subr.bf16.mxu1 %v8538_v47  ;;  %v873_v44 = vld [vmem:[%s9763_s7 + $0xf28] sm:$0xff]  ;;  %v8583_v46 = vcombine.low %v860_v31, %v864_v33  ;;  %v8585_v47 = vcombine.low %v861_v34, %v865_v0 }
 0x14b   : > { %v8594_v49 = vcombine.high %v869_v43, %v873_v44  ;;  %v909_v31 = vld [vmem:[%s9763_s7 + $0x1048] sm:$0xff] }
 0x14c   : > { %v913_v33 = vld [vmem:[%s9763_s7 + $0x1068] sm:$0xff] }
 0x14d   : > { %6666 = vmatpush1.bf16.msra.mxu0 %v8535_v17  ;;  %6994 = vmatpush1.bf16.msra.mxu1 %v8537_v53  ;;  %v877_v17 = vld [vmem:[%s9763_s7 + $0xf48] sm:$0xff] }
 0x14e   : > { %6667 = vmatprep.subr.bf16.mxu0 %v8544_v55  ;;  %6995 = vmatprep.subr.bf16.mxu1 %v8546_v24  ;;  %v881_v53 = vld [vmem:[%s9763_s7 + $0xf68] sm:$0xff]  ;;  %v8591_v55 = vcombine.low %v868_v40, %v872_v41  ;;  %v8593_v24 = vcombine.low %v869_v43, %v873_v44  ;;  %v8633_v44 = vcombine.low %v909_v31, %v913_v33 }
 0x14f   : > { %v8602_v58 = vcombine.high %v877_v17, %v881_v53  ;;  %v921_v41 = vld [vmem:[%s9763_s7 + $0x10a8] sm:$0xff] }
 0x151   : > { %6668 = vmatpush1.bf16.msra.mxu0 %v8543_v62  ;;  %6996 = vmatpush1.bf16.msra.mxu1 %v8545_v63  ;;  %v885_v62 = vld [vmem:[%s9763_s7 + $0xf88] sm:$0xff] }
 0x152   : > { %6669 = vmatprep.subr.bf16.mxu0 %v8552_v1  ;;  %6997 = vmatprep.subr.bf16.mxu1 %v8554_v2  ;;  %v889_v63 = vld [vmem:[%s9763_s7 + $0xfa8] sm:$0xff]  ;;  %v8599_v1 = vcombine.low %v876_v50, %v880_v51  ;;  %v8601_v2 = vcombine.low %v877_v17, %v881_v53 }
 0x153   : > { %v8610_v5 = vcombine.high %v885_v62, %v889_v63  ;;  %v8609_v32 = vcombine.low %v885_v62, %v889_v63  ;;  %v925_v50 = vld [vmem:[%s9763_s7 + $0x10c8] sm:$0xff] }
 0x154   : > { %v929_v51 = vld [vmem:[%s9763_s7 + $0x10e8] sm:$0xff] }
 0x155   : > { %6670 = vmatpush1.bf16.msra.mxu0 %v8551_v8  ;;  %6998 = vmatpush1.bf16.msra.mxu1 %v8553_v9  ;;  %v893_v8 = vld [vmem:[%s9763_s7 + $0xfc8] sm:$0xff]  ;;  %v8649_v63 = vcombine.low %v925_v50, %v929_v51 }
 0x156   : > { %6671 = vmatprep.subr.bf16.mxu0 %v8560_v11  ;;  %6999 = vmatprep.subr.bf16.mxu1 %v8562_v12  ;;  %v897_v9 = vld [vmem:[%s9763_s7 + $0xfe8] sm:$0xff]  ;;  %v10118_v11 = vld [vmem:[%s9782_s26 + $0x10] sm:$0xff]  ;;  %v8607_v12 = vcombine.low %v884_v59, %v888_v61 }
 0x157   : > { %v8618_v15 = vcombine.high %v893_v8, %v897_v9  ;;  %v8617_v22 = vcombine.low %v893_v8, %v897_v9  ;;  %v933_v59 = vld [vmem:[%s9763_s7 + $0x1108] sm:$0xff] }
 0x158   : > { %v937_v61 = vld [vmem:[%s9763_s7 + $0x1128] sm:$0xff] }
 0x159   : > { %6672 = vmatpush1.bf16.msra.mxu0 %v8559_v60  ;;  %7000 = vmatpush1.bf16.msra.mxu1 %v8561_v18  ;;  %v904_v60 = vld [vmem:[%s9763_s7 + $0x1020] sm:$0xff]  ;;  %v10124_v18 = vrot.slane %v10118_v11, %v9819_v54  ;;  %v8657_v9 = vcombine.low %v933_v59, %v937_v61 }
 0x15a   : > { %6673 = vmatprep.subr.bf16.mxu0 %v8568_v19  ;;  %7001 = vmatprep.subr.bf16.mxu1 %v8570_v20  ;;  %v901_v19 = vld [vmem:[%s9763_s7 + $0x1008] sm:$0xff]  ;;  %v8624_v23 = vcombine.high %v900_v16, %v904_v60  ;;  %v8623_v34 = vcombine.low %v900_v16, %v904_v60 }
 0x15b   : > { %v905_v20 = vld [vmem:[%s9763_s7 + $0x1028] sm:$0xff] }
 0x15c   : > { %v8626_v25 = vcombine.high %v901_v19, %v905_v20  ;;  %v8625_v0 = vcombine.low %v901_v19, %v905_v20  ;;  %v949_v16 = vld [vmem:[%s9763_s7 + $0x1188] sm:$0xff]  ;;  %v8665_v20 = vcombine.low %v941_v6, %v945_v7 }
 0x15d   : > { %6674 = vmatpush1.bf16.msra.mxu0 %v8567_v27  ;;  %7002 = vmatpush1.bf16.msra.mxu1 %v8569_v28  ;;  %v908_v27 = vld [vmem:[%s9763_s7 + $0x1040] sm:$0xff]  ;;  %v953_v60 = vld [vmem:[%s9763_s7 + $0x11a8] sm:$0xff] }
 0x15e   : > { %6675 = vmatprep.subr.bf16.mxu0 %v8576_v29  ;;  %7003 = vmatprep.subr.bf16.mxu1 %v8578_v30  ;;  %v912_v28 = vld [vmem:[%s9763_s7 + $0x1060] sm:$0xff]  ;;  %v337_v29 = vcombine.high %v10124_v18, %v10124_v18  ;;  %v10134_v30 = vpack.c.bf16 %v10041_v56, %v10041_v56  ;;  %v917_v56 = vld [vmem:[%s9763_s7 + $0x1088] sm:$0xff] }
 0x15f   : > { %v8631_v43 = vcombine.low %v908_v27, %v912_v28  ;;  %v8641_v53 = vcombine.low %v917_v56, %v921_v41 }
 0x160   : > { %v10140_v40 = vpack.c.bf16 %v337_v29, %v337_v29 }
 0x161   : > { %6676 = vmatpush1.bf16.msra.mxu0 %v8575_v36  ;;  %7004 = vmatpush1.bf16.msra.mxu1 %v8577_v37  ;;  %v8632_v36 = vcombine.high %v908_v27, %v912_v28  ;;  %v8634_v37 = vcombine.high %v909_v31, %v913_v33  ;;  %v957_v27 = vld [vmem:[%s9763_s7 + $0x11c8] sm:$0xff]  ;;  %v8673_v31 = vcombine.low %v949_v16, %v953_v60 }
 0x162   : > { %6677 = vmatprep.subr.bf16.mxu0 %v8584_v38  ;;  %7005 = vmatprep.subr.bf16.mxu1 %v8586_v39  ;;  %v916_v38 = vld [vmem:[%s9763_s7 + $0x1080] sm:$0xff]  ;;  %v961_v28 = vld [vmem:[%s9763_s7 + $0x11e8] sm:$0xff] }
 0x163   : > { %v920_v39 = vld [vmem:[%s9763_s7 + $0x10a0] sm:$0xff] }
 0x164   : > { %v8639_v17 = vcombine.low %v916_v38, %v920_v39 }
 0x165   : > { %6678 = vmatpush1.bf16.msra.mxu0 %v8583_v46  ;;  %7006 = vmatpush1.bf16.msra.mxu1 %v8585_v47  ;;  %v8640_v46 = vcombine.high %v916_v38, %v920_v39  ;;  %v8642_v47 = vcombine.high %v917_v56, %v921_v41  ;;  %v969_v38 = vld [vmem:[%s9763_s7 + $0x1228] sm:$0xff]  ;;  %v8681_v56 = vcombine.low %v957_v27, %v961_v28 }
 0x166   : > { %6679 = vmatprep.subr.bf16.mxu0 %v8592_v48  ;;  %7007 = vmatprep.subr.bf16.mxu1 %v8594_v49  ;;  %v924_v48 = vld [vmem:[%s9763_s7 + $0x10c0] sm:$0xff] }
 0x167   : > { %v928_v49 = vld [vmem:[%s9763_s7 + $0x10e0] sm:$0xff] }
 0x168   : > { %v8647_v62 = vcombine.low %v924_v48, %v928_v49 }
 0x169   : > { %6680 = vmatpush1.bf16.msra.mxu0 %v8591_v55  ;;  %7008 = vmatpush1.bf16.msra.mxu1 %v8593_v24  ;;  %v8648_v55 = vcombine.high %v924_v48, %v928_v49  ;;  %v8650_v24 = vcombine.high %v925_v50, %v929_v51  ;;  %v977_v48 = vld [vmem:[%s9763_s7 + $0x1268] sm:$0xff] }
 0x16a   : > { %6681 = vmatprep.subr.bf16.mxu0 %v8600_v57  ;;  %7009 = vmatprep.subr.bf16.mxu1 %v8602_v58  ;;  %v932_v57 = vld [vmem:[%s9763_s7 + $0x1100] sm:$0xff] }
 0x16b   : > { %v936_v58 = vld [vmem:[%s9763_s7 + $0x1120] sm:$0xff] }
 0x16c   : > { %v8655_v8 = vcombine.low %v932_v57, %v936_v58 }
 0x16d   : > { %6682 = vmatpush1.bf16.msra.mxu0 %v8599_v1  ;;  %7010 = vmatpush1.bf16.msra.mxu1 %v8601_v2  ;;  %v8656_v1 = vcombine.high %v932_v57, %v936_v58  ;;  %v8658_v2 = vcombine.high %v933_v59, %v937_v61  ;;  %v985_v57 = vld [vmem:[%s9763_s7 + $0x12a8] sm:$0xff] }
 0x16e   : > { %6683 = vmatprep.subr.bf16.mxu0 %v8608_v4  ;;  %7011 = vmatprep.subr.bf16.mxu1 %v8610_v5  ;;  %v940_v4 = vld [vmem:[%s9763_s7 + $0x1140] sm:$0xff] }
 0x16f   : > { %v944_v5 = vld [vmem:[%s9763_s7 + $0x1160] sm:$0xff] }
 0x170   : > { %v8663_v19 = vcombine.low %v940_v4, %v944_v5 }
 0x171   : > { %6684 = vmatpush1.bf16.msra.mxu0 %v8607_v12  ;;  %7012 = vmatpush1.bf16.msra.mxu1 %v8609_v32  ;;  %v8664_v12 = vcombine.high %v940_v4, %v944_v5  ;;  %v8666_v32 = vcombine.high %v941_v6, %v945_v7  ;;  %v993_v4 = vld [vmem:[%s9763_s7 + $0x12e8] sm:$0xff] }
 0x172   : > { %6685 = vmatprep.subr.bf16.mxu0 %v8616_v14  ;;  %7013 = vmatprep.subr.bf16.mxu1 %v8618_v15  ;;  %v948_v14 = vld [vmem:[%s9763_s7 + $0x1180] sm:$0xff] }
 0x173   : > { %v952_v15 = vld [vmem:[%s9763_s7 + $0x11a0] sm:$0xff] }
 0x174   : > { %v8671_v29 = vcombine.low %v948_v14, %v952_v15 }
 0x175   : > { %6686 = vmatpush1.bf16.msra.mxu0 %v8615_v21  ;;  %7014 = vmatpush1.bf16.msra.mxu1 %v8617_v22  ;;  %v8672_v21 = vcombine.high %v948_v14, %v952_v15  ;;  %v8674_v22 = vcombine.high %v949_v16, %v953_v60  ;;  %v1001_v14 = vld [vmem:[%s9763_s7 + $0x1328] sm:$0xff] }
 0x176   : > { %6696 = vmatprep.subr.bf16.mxu0 %v8624_v23  ;;  %7024 = vmatprep.subr.bf16.mxu1 %v8626_v25  ;;  %v956_v23 = vld [vmem:[%s9763_s7 + $0x11c0] sm:$0xff] }
 0x177   : > { %v960_v25 = vld [vmem:[%s9763_s7 + $0x11e0] sm:$0xff] }
 0x178   : > { %6688 = vmatmul.mubr.bf16.vlgmr.msra.gmra.mrb[0].mxu0 %v10134_v30  ;;  %7016 = vmatmul.mubr.bf16.vlgmr.msra.gmra.mrb[0].mxu1 %v10134_v30  ;;  %v8680_v33 = vcombine.high %v956_v23, %v960_v25  ;;  %v8679_v39 = vcombine.low %v956_v23, %v960_v25  ;;  %v1009_v23 = vld [vmem:[%s9763_s7 + $0x1368] sm:$0xff] }
 0x179   : > { %6697 = vmatpush1.bf16.msra.mxu0 %v8623_v34  ;;  %7025 = vmatpush1.bf16.msra.mxu1 %v8625_v0  ;;  %v8682_v34 = vcombine.high %v957_v27, %v961_v28  ;;  %v964_v0 = vld [vmem:[%s9763_s7 + $0x1200] sm:$0xff] }
 0x17a   : > { %6698 = vmatprep.subr.bf16.mxu0 %v8632_v36  ;;  %7026 = vmatprep.subr.bf16.mxu1 %v8634_v37  ;;  %v968_v36 = vld [vmem:[%s9763_s7 + $0x1220] sm:$0xff]  ;;  %v965_v37 = vld [vmem:[%s9763_s7 + $0x1208] sm:$0xff] }
 0x17b   : > { %6728 = vmatprep.mubr.bf16.mxu0 %v10140_v40  ;;  %7056 = vmatprep.mubr.bf16.mxu1 %v10140_v40  ;;  %v8688_v41 = vcombine.high %v964_v0, %v968_v36  ;;  %v8687_v49 = vcombine.low %v964_v0, %v968_v36  ;;  %v8689_v50 = vcombine.low %v965_v37, %v969_v38  ;;  %v1017_v0 = vld [vmem:[%s9763_s7 + $0x13a8] sm:$0xff] }
 0x17d   : > { %6699 = vmatpush1.bf16.msra.mxu0 %v8631_v43  ;;  %7027 = vmatpush1.bf16.msra.mxu1 %v8633_v44  ;;  %v8690_v43 = vcombine.high %v965_v37, %v969_v38  ;;  %v972_v44 = vld [vmem:[%s9763_s7 + $0x1240] sm:$0xff] }
 0x17e   : > { %6700 = vmatprep.subr.bf16.mxu0 %v8640_v46  ;;  %7028 = vmatprep.subr.bf16.mxu1 %v8642_v47  ;;  %v976_v46 = vld [vmem:[%s9763_s7 + $0x1260] sm:$0xff]  ;;  %v973_v47 = vld [vmem:[%s9763_s7 + $0x1248] sm:$0xff] }
 0x17f   : > { %v8696_v51 = vcombine.high %v972_v44, %v976_v46  ;;  %v8695_v58 = vcombine.low %v972_v44, %v976_v46  ;;  %v8697_v59 = vcombine.low %v973_v47, %v977_v48  ;;  %v1021_v44 = vld [vmem:[%s9763_s7 + $0x13c8] sm:$0xff] }
 0x180   : > { %v1025_v46 = vld [vmem:[%s9763_s7 + $0x13e8] sm:$0xff] }
 0x181   : > { %6701 = vmatpush1.bf16.msra.mxu0 %v8639_v17  ;;  %7029 = vmatpush1.bf16.msra.mxu1 %v8641_v53  ;;  %v8698_v17 = vcombine.high %v973_v47, %v977_v48  ;;  %v980_v53 = vld [vmem:[%s9763_s7 + $0x1280] sm:$0xff] }
 0x182   : > { %6702 = vmatprep.subr.bf16.mxu0 %v8648_v55  ;;  %7030 = vmatprep.subr.bf16.mxu1 %v8650_v24  ;;  %v984_v55 = vld [vmem:[%s9763_s7 + $0x12a0] sm:$0xff]  ;;  %v981_v24 = vld [vmem:[%s9763_s7 + $0x1288] sm:$0xff] }
 0x183   : > { %v8704_v61 = vcombine.high %v980_v53, %v984_v55  ;;  %v8703_v5 = vcombine.low %v980_v53, %v984_v55  ;;  %v8705_v6 = vcombine.low %v981_v24, %v985_v57  ;;  %v1033_v55 = vld [vmem:[%s9763_s7 + $0x1428] sm:$0xff] }
 0x185   : > { %6703 = vmatpush1.bf16.msra.mxu0 %v8647_v62  ;;  %7031 = vmatpush1.bf16.msra.mxu1 %v8649_v63  ;;  %v8706_v62 = vcombine.high %v981_v24, %v985_v57  ;;  %v988_v63 = vld [vmem:[%s9763_s7 + $0x12c0] sm:$0xff]  ;;  %v8745_v57 = vcombine.low %v1021_v44, %v1025_v46 }
 0x186   : > { %6704 = vmatprep.subr.bf16.mxu0 %v8656_v1  ;;  %7032 = vmatprep.subr.bf16.mxu1 %v8658_v2  ;;  %v992_v1 = vld [vmem:[%s9763_s7 + $0x12e0] sm:$0xff]  ;;  %v989_v2 = vld [vmem:[%s9763_s7 + $0x12c8] sm:$0xff] }
 0x187   : > { %v8712_v7 = vcombine.high %v988_v63, %v992_v1  ;;  %v8711_v15 = vcombine.low %v988_v63, %v992_v1  ;;  %v8713_v16 = vcombine.low %v989_v2, %v993_v4  ;;  %v10215_v1 = vpack.c.bf16 %v10124_v18, %v10124_v18  ;;  %v1045_v18 = vld [vmem:[%s9763_s7 + $0x1488] sm:$0xff] }
 0x189   : > { %6705 = vmatpush1.bf16.msra.mxu0 %v8655_v8  ;;  %7033 = vmatpush1.bf16.msra.mxu1 %v8657_v9  ;;  %v8714_v8 = vcombine.high %v989_v2, %v993_v4  ;;  %v996_v9 = vld [vmem:[%s9763_s7 + $0x1300] sm:$0xff]  ;;  %v1037_v2 = vld [vmem:[%s9763_s7 + $0x1448] sm:$0xff] }
 0x18a   : > { %6706 = vmatprep.subr.bf16.mxu0 %v8664_v12  ;;  %7034 = vmatprep.subr.bf16.mxu1 %v8666_v32  ;;  %v1000_v12 = vld [vmem:[%s9763_s7 + $0x1320] sm:$0xff]  ;;  %v997_v32 = vld [vmem:[%s9763_s7 + $0x1308] sm:$0xff] }
 0x18b   : > { %v8720_v60 = vcombine.high %v996_v9, %v1000_v12  ;;  %v8719_v25 = vcombine.low %v996_v9, %v1000_v12  ;;  %v8721_v27 = vcombine.low %v997_v32, %v1001_v14  ;;  %v1041_v4 = vld [vmem:[%s9763_s7 + $0x1468] sm:$0xff]  ;;  %v1044_v9 = vld [vmem:[%s9763_s7 + $0x1480] sm:$0xff] }
 0x18c   : > { %v1048_v12 = vld [vmem:[%s9763_s7 + $0x14a0] sm:$0xff] }
 0x18d   : > { %6707 = vmatpush1.bf16.msra.mxu0 %v8663_v19  ;;  %7035 = vmatpush1.bf16.msra.mxu1 %v8665_v20  ;;  %v8722_v19 = vcombine.high %v997_v32, %v1001_v14  ;;  %v1004_v20 = vld [vmem:[%s9763_s7 + $0x1340] sm:$0xff]  ;;  %v1049_v14 = vld [vmem:[%s9763_s7 + $0x14a8] sm:$0xff] }
 0x18e   : > { %6708 = vmatprep.subr.bf16.mxu0 %v8672_v21  ;;  %7036 = vmatprep.subr.bf16.mxu1 %v8674_v22  ;;  %v1008_v21 = vld [vmem:[%s9763_s7 + $0x1360] sm:$0xff]  ;;  %v1005_v22 = vld [vmem:[%s9763_s7 + $0x1348] sm:$0xff] }
 0x18f   : > { %v8728_v28 = vcombine.high %v1004_v20, %v1008_v21  ;;  %v8727_v36 = vcombine.low %v1004_v20, %v1008_v21  ;;  %v8729_v37 = vcombine.low %v1005_v22, %v1009_v23  ;;  %v1052_v20 = vld [vmem:[%s9763_s7 + $0x14c0] sm:$0xff] }
 0x190   : > { %v1056_v21 = vld [vmem:[%s9763_s7 + $0x14e0] sm:$0xff] }
 0x191   : > { %6709 = vmatpush1.bf16.msra.mxu0 %v8671_v29  ;;  %7037 = vmatpush1.bf16.msra.mxu1 %v8673_v31  ;;  %v8730_v29 = vcombine.high %v1005_v22, %v1009_v23  ;;  %v1012_v31 = vld [vmem:[%s9763_s7 + $0x1380] sm:$0xff]  ;;  %v1053_v22 = vld [vmem:[%s9763_s7 + $0x14c8] sm:$0xff] }
 0x192   : > { %6710 = vmatprep.subr.bf16.mxu0 %v8680_v33  ;;  %7038 = vmatprep.subr.bf16.mxu1 %v8682_v34  ;;  %v1016_v33 = vld [vmem:[%s9763_s7 + $0x13a0] sm:$0xff]  ;;  %v1013_v34 = vld [vmem:[%s9763_s7 + $0x1388] sm:$0xff] }
 0x193   : > { %v8736_v38 = vcombine.high %v1012_v31, %v1016_v33  ;;  %v8735_v47 = vcombine.low %v1012_v31, %v1016_v33  ;;  %v8737_v48 = vcombine.low %v1013_v34, %v1017_v0  ;;  %v1057_v23 = vld [vmem:[%s9763_s7 + $0x14e8] sm:$0xff]  ;;  %v1060_v31 = vld [vmem:[%s9763_s7 + $0x1500] sm:$0xff] }
 0x194   : > { %v1064_v33 = vld [vmem:[%s9763_s7 + $0x1520] sm:$0xff] }
 0x195   : > { %6711 = vmatpush1.bf16.msra.mxu0 %v8679_v39  ;;  %7039 = vmatpush1.bf16.msra.mxu1 %v8681_v56  ;;  %v8738_v39 = vcombine.high %v1013_v34, %v1017_v0  ;;  %v1020_v56 = vld [vmem:[%s9763_s7 + $0x13c0] sm:$0xff]  ;;  %v1061_v34 = vld [vmem:[%s9763_s7 + $0x1508] sm:$0xff] }
 0x196   : > { %6712 = vmatprep.subr.bf16.mxu0 %v8688_v41  ;;  %7040 = vmatprep.subr.bf16.mxu1 %v8690_v43  ;;  %v1024_v41 = vld [vmem:[%s9763_s7 + $0x13e0] sm:$0xff]  ;;  %v322_v43 = vcombine.high %v10118_v11, %v10118_v11  ;;  %v1029_v11 = vld [vmem:[%s9763_s7 + $0x1408] sm:$0xff] }
 0x197   : > { %v8743_v24 = vcombine.low %v1020_v56, %v1024_v41  ;;  %v1065_v0 = vld [vmem:[%s9763_s7 + $0x1528] sm:$0xff] }
 0x198   : > { %v10205_v53 = vrot.slane %v322_v43, %v9819_v54  ;;  %v1069_v43 = vld [vmem:[%s9763_s7 + $0x1548] sm:$0xff] }
 0x199   : > { %6713 = vmatpush1.bf16.msra.mxu0 %v8687_v49  ;;  %7041 = vmatpush1.bf16.msra.mxu1 %v8689_v50  ;;  %v8744_v49 = vcombine.high %v1020_v56, %v1024_v41  ;;  %v8746_v50 = vcombine.high %v1021_v44, %v1025_v46  ;;  %v1068_v56 = vld [vmem:[%s9763_s7 + $0x1540] sm:$0xff]  ;;  %v1073_v44 = vld [vmem:[%s9763_s7 + $0x1568] sm:$0xff]  ;;  %v8783_v46 = vcombine.low %v1060_v31, %v1064_v33 }
 0x19a   : > { %6714 = vmatprep.subr.bf16.mxu0 %v8696_v51  ;;  %7042 = vmatprep.subr.bf16.mxu1 %v8698_v17  ;;  %v1028_v51 = vld [vmem:[%s9763_s7 + $0x1400] sm:$0xff]  ;;  %v338_v63 = vcombine.high %v10205_v53, %v10205_v53 }
 0x19b   : > { %v1032_v17 = vld [vmem:[%s9763_s7 + $0x1420] sm:$0xff] }
 0x19c   : > { %v10221_v32 = vpack.c.bf16 %v338_v63, %v338_v63  ;;  %v1072_v41 = vld [vmem:[%s9763_s7 + $0x1560] sm:$0xff]  ;;  %v1089_v63 = vld [vmem:[%s9763_s7 + $0x15e8] sm:$0xff] }
 0x19d   : > { %6715 = vmatpush1.bf16.msra.mxu0 %v8695_v58  ;;  %7043 = vmatpush1.bf16.msra.mxu1 %v8697_v59  ;;  %v8752_v58 = vcombine.high %v1028_v51, %v1032_v17  ;;  %v8754_v59 = vcombine.high %v1029_v11, %v1033_v55 }
 0x19e   : > { %6716 = vmatprep.subr.bf16.mxu0 %v8704_v61  ;;  %7044 = vmatprep.subr.bf16.mxu1 %v8706_v62  ;;  %v1036_v61 = vld [vmem:[%s9763_s7 + $0x1440] sm:$0xff] }
 0x19f   : > { %v1040_v62 = vld [vmem:[%s9763_s7 + $0x1460] sm:$0xff] }
 0x1a1   : > { %6717 = vmatpush1.bf16.msra.mxu0 %v8703_v5  ;;  %7045 = vmatpush1.bf16.msra.mxu1 %v8705_v6  ;;  %v8751_v5 = vcombine.low %v1028_v51, %v1032_v17  ;;  %v8753_v6 = vcombine.low %v1029_v11, %v1033_v55  ;;  %v1080_v51 = vld [vmem:[%s9763_s7 + $0x15a0] sm:$0xff]  ;;  %v1077_v17 = vld [vmem:[%s9763_s7 + $0x1588] sm:$0xff]  ;;  %v8791_v55 = vcombine.low %v1068_v56, %v1072_v41 }
 0x1a2   : > { %6718 = vmatprep.subr.bf16.mxu0 %v8712_v7  ;;  %7046 = vmatprep.subr.bf16.mxu1 %v8714_v8  ;;  %v8760_v7 = vcombine.high %v1036_v61, %v1040_v62  ;;  %v8762_v8 = vcombine.high %v1037_v2, %v1041_v4  ;;  %v1081_v11 = vld [vmem:[%s9763_s7 + $0x15a8] sm:$0xff] }
 0x1a5   : > { %6719 = vmatpush1.bf16.msra.mxu0 %v8711_v15  ;;  %7047 = vmatpush1.bf16.msra.mxu1 %v8713_v16  ;;  %v8759_v15 = vcombine.low %v1036_v61, %v1040_v62  ;;  %v8761_v16 = vcombine.low %v1037_v2, %v1041_v4  ;;  %v1088_v61 = vld [vmem:[%s9763_s7 + $0x15e0] sm:$0xff]  ;;  %v1085_v62 = vld [vmem:[%s9763_s7 + $0x15c8] sm:$0xff]  ;;  %v8801_v4 = vcombine.low %v1077_v17, %v1081_v11 }
 0x1a6   : > { %6720 = vmatprep.subr.bf16.mxu0 %v8720_v60  ;;  %7048 = vmatprep.subr.bf16.mxu1 %v8722_v19  ;;  %v8768_v60 = vcombine.high %v1044_v9, %v1048_v12  ;;  %v8770_v19 = vcombine.high %v1045_v18, %v1049_v14 }
 0x1a9   : > { %6721 = vmatpush1.bf16.msra.mxu0 %v8719_v25  ;;  %7049 = vmatpush1.bf16.msra.mxu1 %v8721_v27  ;;  %v8767_v25 = vcombine.low %v1044_v9, %v1048_v12  ;;  %v8769_v27 = vcombine.low %v1045_v18, %v1049_v14  ;;  %v1093_v9 = vld [vmem:[%s9763_s7 + $0x1608] sm:$0xff]  ;;  %v8809_v14 = vcombine.low %v1085_v62, %v1089_v63 }
 0x1aa   : > { %6722 = vmatprep.subr.bf16.mxu0 %v8728_v28  ;;  %7050 = vmatprep.subr.bf16.mxu1 %v8730_v29  ;;  %v8776_v28 = vcombine.high %v1052_v20, %v1056_v21  ;;  %v8778_v29 = vcombine.high %v1053_v22, %v1057_v23  ;;  %v1097_v12 = vld [vmem:[%s9763_s7 + $0x1628] sm:$0xff] }
 0x1ad   : > { %6723 = vmatpush1.bf16.msra.mxu0 %v8727_v36  ;;  %7051 = vmatpush1.bf16.msra.mxu1 %v8729_v37  ;;  %v8775_v36 = vcombine.low %v1052_v20, %v1056_v21  ;;  %v8777_v37 = vcombine.low %v1053_v22, %v1057_v23  ;;  %v1101_v20 = vld [vmem:[%s9763_s7 + $0x1648] sm:$0xff]  ;;  %v8817_v23 = vcombine.low %v1093_v9, %v1097_v12 }
 0x1ae   : > { %6724 = vmatprep.subr.bf16.mxu0 %v8736_v38  ;;  %7052 = vmatprep.subr.bf16.mxu1 %v8738_v39  ;;  %v8784_v38 = vcombine.high %v1060_v31, %v1064_v33  ;;  %v8786_v39 = vcombine.high %v1061_v34, %v1065_v0  ;;  %v1105_v21 = vld [vmem:[%s9763_s7 + $0x1668] sm:$0xff] }
 0x1af   : > { %v1109_v31 = vld [vmem:[%s9763_s7 + $0x1688] sm:$0xff] }
 0x1b0   : > { %v1113_v33 = vld [vmem:[%s9763_s7 + $0x16a8] sm:$0xff] }
 0x1b1   : > { %6725 = vmatpush1.bf16.msra.mxu0 %v8735_v47  ;;  %7053 = vmatpush1.bf16.msra.mxu1 %v8737_v48  ;;  %v8785_v47 = vcombine.low %v1061_v34, %v1065_v0  ;;  %v8792_v48 = vcombine.high %v1068_v56, %v1072_v41  ;;  %v8825_v0 = vcombine.low %v1101_v20, %v1105_v21  ;;  %v1117_v56 = vld [vmem:[%s9763_s7 + $0x16c8] sm:$0xff] }
 0x1b2   : > { %6726 = vmatprep.subr.bf16.mxu0 %v8744_v49  ;;  %7054 = vmatprep.subr.bf16.mxu1 %v8746_v50  ;;  %v8794_v49 = vcombine.high %v1069_v43, %v1073_v44  ;;  %v1076_v50 = vld [vmem:[%s9763_s7 + $0x1580] sm:$0xff]  ;;  %v1121_v41 = vld [vmem:[%s9763_s7 + $0x16e8] sm:$0xff] }
 0x1b3   : > { %v8799_v2 = vcombine.low %v1076_v50, %v1080_v51 }
 0x1b5   : > { %6727 = vmatpush1.bf16.msra.mxu0 %v8743_v24  ;;  %7055 = vmatpush1.bf16.msra.mxu1 %v8745_v57  ;;  %v8793_v24 = vcombine.low %v1069_v43, %v1073_v44  ;;  %v8800_v57 = vcombine.high %v1076_v50, %v1080_v51  ;;  %v8833_v44 = vcombine.low %v1109_v31, %v1113_v33  ;;  %v1125_v50 = vld [vmem:[%s9763_s7 + $0x1708] sm:$0xff] }
 0x1b6   : > { %6737 = vmatprep.subr.bf16.mxu0 %v8752_v58  ;;  %7065 = vmatprep.subr.bf16.mxu1 %v8754_v59  ;;  %v8802_v58 = vcombine.high %v1077_v17, %v1081_v11  ;;  %v1084_v59 = vld [vmem:[%s9763_s7 + $0x15c0] sm:$0xff]  ;;  %v1129_v51 = vld [vmem:[%s9763_s7 + $0x1728] sm:$0xff]  ;;  %v8841_v11 = vcombine.low %v1117_v56, %v1121_v41 }
 0x1b7   : > { %v8807_v18 = vcombine.low %v1084_v59, %v1088_v61 }
 0x1b8   : > { %6729 = vmatmul.mubr.bf16.vlgmr.msra.gmra.mrb[0].mxu0 %v10215_v1  ;;  %7057 = vmatmul.mubr.bf16.vlgmr.msra.gmra.mrb[0].mxu1 %v10215_v1 }
 0x1b9   : > { %6738 = vmatpush1.bf16.msra.mxu0 %v8751_v5  ;;  %7066 = vmatpush1.bf16.msra.mxu1 %v8753_v6  ;;  %v8808_v5 = vcombine.high %v1084_v59, %v1088_v61  ;;  %v8810_v6 = vcombine.high %v1085_v62, %v1089_v63  ;;  %v1133_v59 = vld [vmem:[%s9763_s7 + $0x1748] sm:$0xff]  ;;  %v8849_v63 = vcombine.low %v1125_v50, %v1129_v51 }
 0x1ba   : > { %6739 = vmatprep.subr.bf16.mxu0 %v8760_v7  ;;  %7067 = vmatprep.subr.bf16.mxu1 %v8762_v8  ;;  %v1092_v7 = vld [vmem:[%s9763_s7 + $0x1600] sm:$0xff]  ;;  %v1137_v61 = vld [vmem:[%s9763_s7 + $0x1768] sm:$0xff] }
 0x1bb   : > { %6769 = vmatprep.mubr.bf16.mxu0 %v10221_v32  ;;  %7097 = vmatprep.mubr.bf16.mxu1 %v10221_v32  ;;  %v1096_v8 = vld [vmem:[%s9763_s7 + $0x1620] sm:$0xff] }
 0x1bc   : > { %v8815_v22 = vcombine.low %v1092_v7, %v1096_v8 }
 0x1bd   : > { %6740 = vmatpush1.bf16.msra.mxu0 %v8759_v15  ;;  %7068 = vmatpush1.bf16.msra.mxu1 %v8761_v16  ;;  %v8816_v15 = vcombine.high %v1092_v7, %v1096_v8  ;;  %v8818_v16 = vcombine.high %v1093_v9, %v1097_v12  ;;  %v1141_v7 = vld [vmem:[%s9763_s7 + $0x1788] sm:$0xff]  ;;  %v8857_v12 = vcombine.low %v1133_v59, %v1137_v61 }
 0x1be   : > { %6741 = vmatprep.subr.bf16.mxu0 %v8768_v60  ;;  %7069 = vmatprep.subr.bf16.mxu1 %v8770_v19  ;;  %v1100_v60 = vld [vmem:[%s9763_s7 + $0x1640] sm:$0xff]  ;;  %v1145_v8 = vld [vmem:[%s9763_s7 + $0x17a8] sm:$0xff] }
 0x1bf   : > { %v1104_v19 = vld [vmem:[%s9763_s7 + $0x1660] sm:$0xff] }
 0x1c0   : > { %v8823_v34 = vcombine.low %v1100_v60, %v1104_v19 }
 0x1c1   : > { %6742 = vmatpush1.bf16.msra.mxu0 %v8767_v25  ;;  %7070 = vmatpush1.bf16.msra.mxu1 %v8769_v27  ;;  %v8824_v25 = vcombine.high %v1100_v60, %v1104_v19  ;;  %v8826_v27 = vcombine.high %v1101_v20, %v1105_v21  ;;  %v1149_v60 = vld [vmem:[%s9763_s7 + $0x17c8] sm:$0xff] }
 0x1c2   : > { %6743 = vmatprep.subr.bf16.mxu0 %v8776_v28  ;;  %7071 = vmatprep.subr.bf16.mxu1 %v8778_v29  ;;  %v1108_v28 = vld [vmem:[%s9763_s7 + $0x1680] sm:$0xff]  ;;  %v1153_v19 = vld [vmem:[%s9763_s7 + $0x17e8] sm:$0xff] }
 0x1c3   : > { %v1112_v29 = vld [vmem:[%s9763_s7 + $0x16a0] sm:$0xff]  ;;  %v10282_v20 = vld [vmem:[%s9782_s26 + $0x18] sm:$0xff] }
 0x1c4   : > { %v8831_v43 = vcombine.low %v1108_v28, %v1112_v29 }
 0x1c5   : > { %6744 = vmatpush1.bf16.msra.mxu0 %v8775_v36  ;;  %7072 = vmatpush1.bf16.msra.mxu1 %v8777_v37  ;;  %v8832_v36 = vcombine.high %v1108_v28, %v1112_v29  ;;  %v8834_v37 = vcombine.high %v1109_v31, %v1113_v33  ;;  %v1160_v28 = vld [vmem:[%s9763_s7 + $0x1820] sm:$0xff]  ;;  %v10288_v29 = vrot.slane %v10282_v20, %v9819_v54  ;;  %v1157_v31 = vld [vmem:[%s9763_s7 + $0x1808] sm:$0xff] }
 0x1c6   : > { %6745 = vmatprep.subr.bf16.mxu0 %v8784_v38  ;;  %7073 = vmatprep.subr.bf16.mxu1 %v8786_v39  ;;  %v1116_v38 = vld [vmem:[%s9763_s7 + $0x16c0] sm:$0xff]  ;;  %v1161_v33 = vld [vmem:[%s9763_s7 + $0x1828] sm:$0xff] }
 0x1c7   : > { %v1120_v39 = vld [vmem:[%s9763_s7 + $0x16e0] sm:$0xff] }
 0x1c8   : > { %v8839_v17 = vcombine.low %v1116_v38, %v1120_v39 }
 0x1c9   : > { %6746 = vmatpush1.bf16.msra.mxu0 %v8783_v46  ;;  %7074 = vmatpush1.bf16.msra.mxu1 %v8785_v47  ;;  %v8840_v46 = vcombine.high %v1116_v38, %v1120_v39  ;;  %v8842_v47 = vcombine.high %v1117_v56, %v1121_v41  ;;  %v1164_v38 = vld [vmem:[%s9763_s7 + $0x1840] sm:$0xff]  ;;  %v354_v56 = vcombine.high %v10288_v29, %v10288_v29 }
 0x1ca   : > { %6747 = vmatprep.subr.bf16.mxu0 %v8792_v48  ;;  %7075 = vmatprep.subr.bf16.mxu1 %v8794_v49  ;;  %v1124_v48 = vld [vmem:[%s9763_s7 + $0x1700] sm:$0xff]  ;;  %v10298_v41 = vpack.c.bf16 %v10205_v53, %v10205_v53  ;;  %v1173_v53 = vld [vmem:[%s9763_s7 + $0x1888] sm:$0xff] }
 0x1cb   : > { %v1128_v49 = vld [vmem:[%s9763_s7 + $0x1720] sm:$0xff] }
 0x1cc   : > { %v8847_v62 = vcombine.low %v1124_v48, %v1128_v49  ;;  %v1168_v39 = vld [vmem:[%s9763_s7 + $0x1860] sm:$0xff] }
 0x1cd   : > { %6748 = vmatpush1.bf16.msra.mxu0 %v8791_v55  ;;  %7076 = vmatpush1.bf16.msra.mxu1 %v8793_v24  ;;  %v8848_v55 = vcombine.high %v1124_v48, %v1128_v49  ;;  %v8850_v24 = vcombine.high %v1125_v50, %v1129_v51  ;;  %v8888_v48 = vcombine.high %v1164_v38, %v1168_v39  ;;  %v1172_v50 = vld [vmem:[%s9763_s7 + $0x1880] sm:$0xff] }
 0x1ce   : > { %6749 = vmatprep.subr.bf16.mxu0 %v8800_v57  ;;  %7077 = vmatprep.subr.bf16.mxu1 %v8802_v58  ;;  %v1132_v57 = vld [vmem:[%s9763_s7 + $0x1740] sm:$0xff] }
 0x1cf   : > { %v1136_v58 = vld [vmem:[%s9763_s7 + $0x1760] sm:$0xff] }
 0x1d0   : > { %v8855_v9 = vcombine.low %v1132_v57, %v1136_v58  ;;  %v1176_v51 = vld [vmem:[%s9763_s7 + $0x18a0] sm:$0xff] }
 0x1d1   : > { %6750 = vmatpush1.bf16.msra.mxu0 %v8799_v2  ;;  %7078 = vmatpush1.bf16.msra.mxu1 %v8801_v4  ;;  %v8856_v2 = vcombine.high %v1132_v57, %v1136_v58  ;;  %v8858_v4 = vcombine.high %v1133_v59, %v1137_v61  ;;  %v8896_v57 = vcombine.high %v1172_v50, %v1176_v51  ;;  %v1180_v59 = vld [vmem:[%s9763_s7 + $0x18c0] sm:$0xff] }
 0x1d2   : > { %6751 = vmatprep.subr.bf16.mxu0 %v8808_v5  ;;  %7079 = vmatprep.subr.bf16.mxu1 %v8810_v6  ;;  %v1140_v5 = vld [vmem:[%s9763_s7 + $0x1780] sm:$0xff] }
 0x1d3   : > { %v1144_v6 = vld [vmem:[%s9763_s7 + $0x17a0] sm:$0xff] }
 0x1d4   : > { %v8863_v21 = vcombine.low %v1140_v5, %v1144_v6  ;;  %v1184_v61 = vld [vmem:[%s9763_s7 + $0x18e0] sm:$0xff] }
 0x1d5   : > { %6752 = vmatpush1.bf16.msra.mxu0 %v8807_v18  ;;  %7080 = vmatpush1.bf16.msra.mxu1 %v8809_v14  ;;  %v8864_v18 = vcombine.high %v1140_v5, %v1144_v6  ;;  %v8866_v14 = vcombine.high %v1141_v7, %v1145_v8  ;;  %v8904_v5 = vcombine.high %v1180_v59, %v1184_v61 }
 0x1d6   : > { %6753 = vmatprep.subr.bf16.mxu0 %v8816_v15  ;;  %7081 = vmatprep.subr.bf16.mxu1 %v8818_v16  ;;  %v1148_v15 = vld [vmem:[%s9763_s7 + $0x17c0] sm:$0xff] }
 0x1d7   : > { %v1152_v16 = vld [vmem:[%s9763_s7 + $0x17e0] sm:$0xff] }
 0x1d9   : > { %6754 = vmatpush1.bf16.msra.mxu0 %v8815_v22  ;;  %7082 = vmatpush1.bf16.msra.mxu1 %v8817_v23  ;;  %v8865_v22 = vcombine.low %v1141_v7, %v1145_v8  ;;  %v8872_v23 = vcombine.high %v1148_v15, %v1152_v16  ;;  %v1188_v7 = vld [vmem:[%s9763_s7 + $0x1900] sm:$0xff] }
 0x1da   : > { %6755 = vmatprep.subr.bf16.mxu0 %v8824_v25  ;;  %7083 = vmatprep.subr.bf16.mxu1 %v8826_v27  ;;  %v8874_v25 = vcombine.high %v1149_v60, %v1153_v19  ;;  %v1156_v27 = vld [vmem:[%s9763_s7 + $0x1800] sm:$0xff] }
 0x1db   : > { %v1192_v8 = vld [vmem:[%s9763_s7 + $0x1920] sm:$0xff] }
 0x1dd   : > { %6756 = vmatpush1.bf16.msra.mxu0 %v8823_v34  ;;  %7084 = vmatpush1.bf16.msra.mxu1 %v8825_v0  ;;  %v8871_v34 = vcombine.low %v1148_v15, %v1152_v16  ;;  %v8873_v0 = vcombine.low %v1149_v60, %v1153_v19  ;;  %v8912_v15 = vcombine.high %v1188_v7, %v1192_v8  ;;  %v1196_v60 = vld [vmem:[%s9763_s7 + $0x1940] sm:$0xff] }
 0x1de   : > { %6757 = vmatprep.subr.bf16.mxu0 %v8832_v36  ;;  %7085 = vmatprep.subr.bf16.mxu1 %v8834_v37  ;;  %v8880_v36 = vcombine.high %v1156_v27, %v1160_v28  ;;  %v8882_v37 = vcombine.high %v1157_v31, %v1161_v33  ;;  %v1200_v19 = vld [vmem:[%s9763_s7 + $0x1960] sm:$0xff] }
 0x1e1   : > { %6758 = vmatpush1.bf16.msra.mxu0 %v8831_v43  ;;  %7086 = vmatpush1.bf16.msra.mxu1 %v8833_v44  ;;  %v1165_v43 = vld [vmem:[%s9763_s7 + $0x1848] sm:$0xff] }
 0x1e2   : > { %6759 = vmatprep.subr.bf16.mxu0 %v8840_v46  ;;  %7087 = vmatprep.subr.bf16.mxu1 %v8842_v47  ;;  %v1169_v44 = vld [vmem:[%s9763_s7 + $0x1868] sm:$0xff]  ;;  %v8879_v46 = vcombine.low %v1156_v27, %v1160_v28  ;;  %v8881_v47 = vcombine.low %v1157_v31, %v1161_v33  ;;  %v8920_v27 = vcombine.high %v1196_v60, %v1200_v19  ;;  %v1204_v31 = vld [vmem:[%s9763_s7 + $0x1980] sm:$0xff] }
 0x1e3   : > { %v8890_v49 = vcombine.high %v1165_v43, %v1169_v44  ;;  %v1208_v33 = vld [vmem:[%s9763_s7 + $0x19a0] sm:$0xff] }
 0x1e5   : > { %6760 = vmatpush1.bf16.msra.mxu0 %v8839_v17  ;;  %7088 = vmatpush1.bf16.msra.mxu1 %v8841_v11  ;;  %v10304_v17 = vpack.c.bf16 %v354_v56, %v354_v56  ;;  %v1177_v11 = vld [vmem:[%s9763_s7 + $0x18a8] sm:$0xff]  ;;  %v1212_v56 = vld [vmem:[%s9763_s7 + $0x19c0] sm:$0xff] }
 0x1e6   : > { %6761 = vmatprep.subr.bf16.mxu0 %v8848_v55  ;;  %7089 = vmatprep.subr.bf16.mxu1 %v8850_v24  ;;  %v8887_v55 = vcombine.low %v1164_v38, %v1168_v39  ;;  %v8889_v24 = vcombine.low %v1165_v43, %v1169_v44  ;;  %v8898_v58 = vcombine.high %v1173_v53, %v1177_v11  ;;  %v1216_v43 = vld [vmem:[%s9763_s7 + $0x19e0] sm:$0xff]  ;;  %v1213_v44 = vld [vmem:[%s9763_s7 + $0x19c8] sm:$0xff] }
 0x1e7   : > { %v8928_v38 = vcombine.high %v1204_v31, %v1208_v33 }
 0x1e9   : > { %6762 = vmatpush1.bf16.msra.mxu0 %v8847_v62  ;;  %7090 = vmatpush1.bf16.msra.mxu1 %v8849_v63  ;;  %v1181_v62 = vld [vmem:[%s9763_s7 + $0x18c8] sm:$0xff] }
 0x1ea   : > { %6763 = vmatprep.subr.bf16.mxu0 %v8856_v2  ;;  %7091 = vmatprep.subr.bf16.mxu1 %v8858_v4  ;;  %v1185_v63 = vld [vmem:[%s9763_s7 + $0x18e8] sm:$0xff]  ;;  %v8895_v2 = vcombine.low %v1172_v50, %v1176_v51  ;;  %v8897_v4 = vcombine.low %v1173_v53, %v1177_v11  ;;  %v1220_v51 = vld [vmem:[%s9763_s7 + $0x1a00] sm:$0xff] }
 0x1eb   : > { %v8906_v6 = vcombine.high %v1181_v62, %v1185_v63  ;;  %v1224_v53 = vld [vmem:[%s9763_s7 + $0x1a20] sm:$0xff]  ;;  %v1221_v11 = vld [vmem:[%s9763_s7 + $0x1a08] sm:$0xff] }
 0x1ed   : > { %6764 = vmatpush1.bf16.msra.mxu0 %v8855_v9  ;;  %7092 = vmatpush1.bf16.msra.mxu1 %v8857_v12  ;;  %v1189_v9 = vld [vmem:[%s9763_s7 + $0x1908] sm:$0xff] }
 0x1ee   : > { %6765 = vmatprep.subr.bf16.mxu0 %v8864_v18  ;;  %7093 = vmatprep.subr.bf16.mxu1 %v8866_v14  ;;  %v1193_v12 = vld [vmem:[%s9763_s7 + $0x1928] sm:$0xff]  ;;  %v8903_v18 = vcombine.low %v1180_v59, %v1184_v61  ;;  %v8905_v14 = vcombine.low %v1181_v62, %v1185_v63  ;;  %v1228_v61 = vld [vmem:[%s9763_s7 + $0x1a40] sm:$0xff] }
 0x1ef   : > { %v8914_v16 = vcombine.high %v1189_v9, %v1193_v12  ;;  %v1232_v62 = vld [vmem:[%s9763_s7 + $0x1a60] sm:$0xff]  ;;  %v1229_v63 = vld [vmem:[%s9763_s7 + $0x1a48] sm:$0xff] }
 0x1f1   : > { %6766 = vmatpush1.bf16.msra.mxu0 %v8863_v21  ;;  %7094 = vmatpush1.bf16.msra.mxu1 %v8865_v22  ;;  %v1197_v21 = vld [vmem:[%s9763_s7 + $0x1948] sm:$0xff] }
 0x1f2   : > { %6767 = vmatprep.subr.bf16.mxu0 %v8872_v23  ;;  %7095 = vmatprep.subr.bf16.mxu1 %v8874_v25  ;;  %v1201_v22 = vld [vmem:[%s9763_s7 + $0x1968] sm:$0xff]  ;;  %v8911_v23 = vcombine.low %v1188_v7, %v1192_v8  ;;  %v8913_v25 = vcombine.low %v1189_v9, %v1193_v12  ;;  %v1236_v8 = vld [vmem:[%s9763_s7 + $0x1a80] sm:$0xff] }
 0x1f3   : > { %v8922_v28 = vcombine.high %v1197_v21, %v1201_v22  ;;  %v1240_v9 = vld [vmem:[%s9763_s7 + $0x1aa0] sm:$0xff]  ;;  %v1237_v12 = vld [vmem:[%s9763_s7 + $0x1a88] sm:$0xff] }
 0x1f5   : > { %6768 = vmatpush1.bf16.msra.mxu0 %v8871_v34  ;;  %7096 = vmatpush1.bf16.msra.mxu1 %v8873_v0  ;;  %v1205_v34 = vld [vmem:[%s9763_s7 + $0x1988] sm:$0xff] }
 0x1f6   : > { %6778 = vmatprep.subr.bf16.mxu0 %v8880_v36  ;;  %7106 = vmatprep.subr.bf16.mxu1 %v8882_v37  ;;  %v1209_v0 = vld [vmem:[%s9763_s7 + $0x19a8] sm:$0xff]  ;;  %v8919_v36 = vcombine.low %v1196_v60, %v1200_v19  ;;  %v8921_v37 = vcombine.low %v1197_v21, %v1201_v22  ;;  %v1244_v19 = vld [vmem:[%s9763_s7 + $0x1ac0] sm:$0xff] }
 0x1f7   : > { %v8930_v39 = vcombine.high %v1205_v34, %v1209_v0  ;;  %v1248_v21 = vld [vmem:[%s9763_s7 + $0x1ae0] sm:$0xff]  ;;  %v1245_v22 = vld [vmem:[%s9763_s7 + $0x1ac8] sm:$0xff] }
 0x1f8   : > { %6770 = vmatmul.mubr.bf16.vlgmr.msra.gmra.mrb[0].mxu0 %v10298_v41  ;;  %7098 = vmatmul.mubr.bf16.vlgmr.msra.gmra.mrb[0].mxu1 %v10298_v41 }
 0x1f9   : > { %6779 = vmatpush1.bf16.msra.mxu0 %v8879_v46  ;;  %7107 = vmatpush1.bf16.msra.mxu1 %v8881_v47  ;;  %v1217_v46 = vld [vmem:[%s9763_s7 + $0x19e8] sm:$0xff]  ;;  %v8927_v47 = vcombine.low %v1204_v31, %v1208_v33  ;;  %v1252_v33 = vld [vmem:[%s9763_s7 + $0x1b00] sm:$0xff] }
 0x1fa   : > { %6780 = vmatprep.subr.bf16.mxu0 %v8888_v48  ;;  %7108 = vmatprep.subr.bf16.mxu1 %v8890_v49  ;;  %v8929_v48 = vcombine.low %v1205_v34, %v1209_v0  ;;  %v8936_v49 = vcombine.high %v1212_v56, %v1216_v43  ;;  %v8938_v50 = vcombine.high %v1213_v44, %v1217_v46  ;;  %v1256_v34 = vld [vmem:[%s9763_s7 + $0x1b20] sm:$0xff]  ;;  %v1253_v0 = vld [vmem:[%s9763_s7 + $0x1b08] sm:$0xff] }
 0x1fb   : > { %6810 = vmatprep.mubr.bf16.mxu0 %v10304_v17  ;;  %7138 = vmatprep.mubr.bf16.mxu1 %v10304_v17 }
 0x1fd   : > { %6781 = vmatpush1.bf16.msra.mxu0 %v8887_v55  ;;  %7109 = vmatpush1.bf16.msra.mxu1 %v8889_v24  ;;  %v1225_v55 = vld [vmem:[%s9763_s7 + $0x1a28] sm:$0xff]  ;;  %v8935_v24 = vcombine.low %v1212_v56, %v1216_v43  ;;  %v1260_v43 = vld [vmem:[%s9763_s7 + $0x1b40] sm:$0xff] }
 0x1fe   : > { %6782 = vmatprep.subr.bf16.mxu0 %v8896_v57  ;;  %7110 = vmatprep.subr.bf16.mxu1 %v8898_v58  ;;  %v8937_v57 = vcombine.low %v1213_v44, %v1217_v46  ;;  %v8944_v58 = vcombine.high %v1220_v51, %v1224_v53  ;;  %v8946_v59 = vcombine.high %v1221_v11, %v1225_v55  ;;  %v1264_v44 = vld [vmem:[%s9763_s7 + $0x1b60] sm:$0xff]  ;;  %v1261_v46 = vld [vmem:[%s9763_s7 + $0x1b48] sm:$0xff] }
 0x201   : > { %6783 = vmatpush1.bf16.msra.mxu0 %v8895_v2  ;;  %7111 = vmatpush1.bf16.msra.mxu1 %v8897_v4  ;;  %v1233_v2 = vld [vmem:[%s9763_s7 + $0x1a68] sm:$0xff]  ;;  %v8943_v4 = vcombine.low %v1220_v51, %v1224_v53  ;;  %v1268_v53 = vld [vmem:[%s9763_s7 + $0x1b80] sm:$0xff] }
 0x202   : > { %6784 = vmatprep.subr.bf16.mxu0 %v8904_v5  ;;  %7112 = vmatprep.subr.bf16.mxu1 %v8906_v6  ;;  %v8945_v5 = vcombine.low %v1221_v11, %v1225_v55  ;;  %v8952_v6 = vcombine.high %v1228_v61, %v1232_v62  ;;  %v8954_v7 = vcombine.high %v1229_v63, %v1233_v2  ;;  %v1272_v11 = vld [vmem:[%s9763_s7 + $0x1ba0] sm:$0xff]  ;;  %v1269_v55 = vld [vmem:[%s9763_s7 + $0x1b88] sm:$0xff] }
 0x205   : > { %6785 = vmatpush1.bf16.msra.mxu0 %v8903_v18  ;;  %7113 = vmatpush1.bf16.msra.mxu1 %v8905_v14  ;;  %v1241_v18 = vld [vmem:[%s9763_s7 + $0x1aa8] sm:$0xff]  ;;  %v8951_v14 = vcombine.low %v1228_v61, %v1232_v62  ;;  %v1276_v62 = vld [vmem:[%s9763_s7 + $0x1bc0] sm:$0xff] }
 0x206   : > { %6786 = vmatprep.subr.bf16.mxu0 %v8912_v15  ;;  %7114 = vmatprep.subr.bf16.mxu1 %v8914_v16  ;;  %v8953_v15 = vcombine.low %v1229_v63, %v1233_v2  ;;  %v8960_v16 = vcombine.high %v1236_v8, %v1240_v9  ;;  %v8962_v60 = vcombine.high %v1237_v12, %v1241_v18  ;;  %v1280_v63 = vld [vmem:[%s9763_s7 + $0x1be0] sm:$0xff] }
 0x207   : > { %v339_v2 = vcombine.high %v10282_v20, %v10282_v20  ;;  %v1285_v20 = vld [vmem:[%s9763_s7 + $0x1c08] sm:$0xff] }
 0x209   : > { %6787 = vmatpush1.bf16.msra.mxu0 %v8911_v23  ;;  %7115 = vmatpush1.bf16.msra.mxu1 %v8913_v25  ;;  %v1249_v23 = vld [vmem:[%s9763_s7 + $0x1ae8] sm:$0xff]  ;;  %v8959_v25 = vcombine.low %v1236_v8, %v1240_v9  ;;  %v9000_v8 = vcombine.high %v1276_v62, %v1280_v63 }
 0x20a   : > { %6788 = vmatprep.subr.bf16.mxu0 %v8920_v27  ;;  %7116 = vmatprep.subr.bf16.mxu1 %v8922_v28  ;;  %v8961_v27 = vcombine.low %v1237_v12, %v1241_v18  ;;  %v8968_v28 = vcombine.high %v1244_v19, %v1248_v21  ;;  %v8970_v31 = vcombine.high %v1245_v22, %v1249_v23  ;;  %v1284_v12 = vld [vmem:[%s9763_s7 + $0x1c00] sm:$0xff] }
 0x20b   : > { %v1288_v18 = vld [vmem:[%s9763_s7 + $0x1c20] sm:$0xff] }
 0x20d   : > { %6789 = vmatpush1.bf16.msra.mxu0 %v8919_v36  ;;  %7117 = vmatpush1.bf16.msra.mxu1 %v8921_v37  ;;  %v1257_v36 = vld [vmem:[%s9763_s7 + $0x1b28] sm:$0xff]  ;;  %v8967_v37 = vcombine.low %v1244_v19, %v1248_v21  ;;  %v9008_v19 = vcombine.high %v1284_v12, %v1288_v18 }
 0x20e   : > { %6790 = vmatprep.subr.bf16.mxu0 %v8928_v38  ;;  %7118 = vmatprep.subr.bf16.mxu1 %v8930_v39  ;;  %v8969_v38 = vcombine.low %v1245_v22, %v1249_v23  ;;  %v8976_v39 = vcombine.high %v1252_v33, %v1256_v34  ;;  %v8978_v56 = vcombine.high %v1253_v0, %v1257_v36  ;;  %v1292_v22 = vld [vmem:[%s9763_s7 + $0x1c40] sm:$0xff] }
 0x20f   : > { %v1296_v23 = vld [vmem:[%s9763_s7 + $0x1c60] sm:$0xff] }
 0x211   : > { %6791 = vmatpush1.bf16.msra.mxu0 %v8927_v47  ;;  %7119 = vmatpush1.bf16.msra.mxu1 %v8929_v48  ;;  %v1265_v47 = vld [vmem:[%s9763_s7 + $0x1b68] sm:$0xff]  ;;  %v8975_v48 = vcombine.low %v1252_v33, %v1256_v34  ;;  %v9007_v33 = vcombine.low %v1284_v12, %v1288_v18 }
 0x212   : > { %6792 = vmatprep.subr.bf16.mxu0 %v8936_v49  ;;  %7120 = vmatprep.subr.bf16.mxu1 %v8938_v50  ;;  %v8977_v49 = vcombine.low %v1253_v0, %v1257_v36  ;;  %v8984_v50 = vcombine.high %v1260_v43, %v1264_v44  ;;  %v8986_v51 = vcombine.high %v1261_v46, %v1265_v47 }
 0x213   : > { %v9016_v0 = vcombine.high %v1292_v22, %v1296_v23 }
 0x215   : > { %6793 = vmatpush1.bf16.msra.mxu0 %v8935_v24  ;;  %7121 = vmatpush1.bf16.msra.mxu1 %v8937_v57  ;;  %v1273_v24 = vld [vmem:[%s9763_s7 + $0x1ba8] sm:$0xff]  ;;  %v8983_v57 = vcombine.low %v1260_v43, %v1264_v44  ;;  %v9015_v43 = vcombine.low %v1292_v22, %v1296_v23 }
 0x216   : > { %6794 = vmatprep.subr.bf16.mxu0 %v8944_v58  ;;  %7122 = vmatprep.subr.bf16.mxu1 %v8946_v59  ;;  %v8985_v58 = vcombine.low %v1261_v46, %v1265_v47  ;;  %v8992_v59 = vcombine.high %v1268_v53, %v1272_v11  ;;  %v8994_v61 = vcombine.high %v1269_v55, %v1273_v24 }
 0x219   : > { %6795 = vmatpush1.bf16.msra.mxu0 %v8943_v4  ;;  %7123 = vmatpush1.bf16.msra.mxu1 %v8945_v5  ;;  %v1277_v4 = vld [vmem:[%s9763_s7 + $0x1bc8] sm:$0xff] }
 0x21a   : > { %6796 = vmatprep.subr.bf16.mxu0 %v8952_v6  ;;  %7124 = vmatprep.subr.bf16.mxu1 %v8954_v7  ;;  %v1281_v5 = vld [vmem:[%s9763_s7 + $0x1be8] sm:$0xff]  ;;  %v8991_v6 = vcombine.low %v1268_v53, %v1272_v11  ;;  %v8993_v7 = vcombine.low %v1269_v55, %v1273_v24 }
 0x21b   : > { %v9002_v9 = vcombine.high %v1277_v4, %v1281_v5 }
 0x21d   : > { %6797 = vmatpush1.bf16.msra.mxu0 %v8951_v14  ;;  %7125 = vmatpush1.bf16.msra.mxu1 %v8953_v15  ;;  %v10369_v14 = vrot.slane %v339_v2, %v9819_v54  ;;  %v1289_v15 = vld [vmem:[%s9763_s7 + $0x1c28] sm:$0xff] }
 0x21e   : > { %6798 = vmatprep.subr.bf16.mxu0 %v8960_v16  ;;  %7126 = vmatprep.subr.bf16.mxu1 %v8962_v60  ;;  %v8999_v16 = vcombine.low %v1276_v62, %v1280_v63  ;;  %v9001_v60 = vcombine.low %v1277_v4, %v1281_v5  ;;  %v9010_v21 = vcombine.high %v1285_v20, %v1289_v15  ;;  %v1324_v5 = vld [vmem:[%s9763_s7 + $0x1d40] sm:$0xff] }
 0x21f   : > { %v9009_v34 = vcombine.low %v1285_v20, %v1289_v15  ;;  %v1332_v15 = vld [vmem:[%s9763_s7 + $0x1d80] sm:$0xff] }
 0x221   : > { %6799 = vmatpush1.bf16.msra.mxu0 %v8959_v25  ;;  %7127 = vmatpush1.bf16.msra.mxu1 %v8961_v27  ;;  %v355_v25 = vcombine.high %v10369_v14, %v10369_v14  ;;  %v10379_v27 = vpack.c.bf16 %v10288_v29, %v10288_v29  ;;  %v1301_v29 = vld [vmem:[%s9763_s7 + $0x1c88] sm:$0xff] }
 0x222   : > { %6800 = vmatprep.subr.bf16.mxu0 %v8968_v28  ;;  %7128 = vmatprep.subr.bf16.mxu1 %v8970_v31  ;;  %v1293_v28 = vld [vmem:[%s9763_s7 + $0x1c48] sm:$0xff] }
 0x223   : > { %v1297_v31 = vld [vmem:[%s9763_s7 + $0x1c68] sm:$0xff] }
 0x224   : > { %v9018_v36 = vcombine.high %v1293_v28, %v1297_v31  ;;  %v9017_v44 = vcombine.low %v1293_v28, %v1297_v31  ;;  %v1340_v28 = vld [vmem:[%s9763_s7 + $0x1dc0] sm:$0xff] }
 0x225   : > { %6801 = vmatpush1.bf16.msra.mxu0 %v8967_v37  ;;  %7129 = vmatpush1.bf16.msra.mxu1 %v8969_v38  ;;  %v1300_v37 = vld [vmem:[%s9763_s7 + $0x1c80] sm:$0xff] }
 0x226   : > { %6802 = vmatprep.subr.bf16.mxu0 %v8976_v39  ;;  %7130 = vmatprep.subr.bf16.mxu1 %v8978_v56  ;;  %v1304_v38 = vld [vmem:[%s9763_s7 + $0x1ca0] sm:$0xff]  ;;  %v10385_v39 = vpack.c.bf16 %v355_v25, %v355_v25  ;;  %v1305_v56 = vld [vmem:[%s9763_s7 + $0x1ca8] sm:$0xff] }
 0x227   : > { %v9024_v46 = vcombine.high %v1300_v37, %v1304_v38  ;;  %v9026_v47 = vcombine.high %v1301_v29, %v1305_v56  ;;  %v9023_v53 = vcombine.low %v1300_v37, %v1304_v38  ;;  %v9025_v11 = vcombine.low %v1301_v29, %v1305_v56  ;;  %v1344_v31 = vld [vmem:[%s9763_s7 + $0x1de0] sm:$0xff] }
 0x228   : > { %v9064_v37 = vcombine.high %v1340_v28, %v1344_v31  ;;  %v1348_v29 = vld [vmem:[%s9763_s7 + $0x1e00] sm:$0xff] }
 0x229   : > { %6803 = vmatpush1.bf16.msra.mxu0 %v8975_v48  ;;  %7131 = vmatpush1.bf16.msra.mxu1 %v8977_v49  ;;  %v1308_v48 = vld [vmem:[%s9763_s7 + $0x1cc0] sm:$0xff] }
 0x22a   : > { %6804 = vmatprep.subr.bf16.mxu0 %v8984_v50  ;;  %7132 = vmatprep.subr.bf16.mxu1 %v8986_v51  ;;  %v1312_v49 = vld [vmem:[%s9763_s7 + $0x1ce0] sm:$0xff]  ;;  %v1309_v50 = vld [vmem:[%s9763_s7 + $0x1cc8] sm:$0xff] }
 0x22b   : > { %v1313_v51 = vld [vmem:[%s9763_s7 + $0x1ce8] sm:$0xff]  ;;  %v9032_v55 = vcombine.high %v1308_v48, %v1312_v49  ;;  %v9031_v62 = vcombine.low %v1308_v48, %v1312_v49  ;;  %v1352_v56 = vld [vmem:[%s9763_s7 + $0x1e20] sm:$0xff] }
 0x22c   : > { %v9034_v24 = vcombine.high %v1309_v50, %v1313_v51  ;;  %v9033_v63 = vcombine.low %v1309_v50, %v1313_v51  ;;  %v9072_v48 = vcombine.high %v1348_v29, %v1352_v56  ;;  %v1356_v50 = vld [vmem:[%s9763_s7 + $0x1e40] sm:$0xff] }
 0x22d   : > { %6805 = vmatpush1.bf16.msra.mxu0 %v8983_v57  ;;  %7133 = vmatpush1.bf16.msra.mxu1 %v8985_v58  ;;  %v1316_v57 = vld [vmem:[%s9763_s7 + $0x1d00] sm:$0xff] }
 0x22e   : > { %6806 = vmatprep.subr.bf16.mxu0 %v8992_v59  ;;  %7134 = vmatprep.subr.bf16.mxu1 %v8994_v61  ;;  %v1320_v58 = vld [vmem:[%s9763_s7 + $0x1d20] sm:$0xff]  ;;  %v1317_v59 = vld [vmem:[%s9763_s7 + $0x1d08] sm:$0xff] }
 0x22f   : > { %v1321_v61 = vld [vmem:[%s9763_s7 + $0x1d28] sm:$0xff]  ;;  %v9040_v2 = vcombine.high %v1316_v57, %v1320_v58  ;;  %v1360_v51 = vld [vmem:[%s9763_s7 + $0x1e60] sm:$0xff] }
 0x230   : > { %v9042_v4 = vcombine.high %v1317_v59, %v1321_v61  ;;  %v9041_v12 = vcombine.low %v1317_v59, %v1321_v61  ;;  %v1364_v59 = vld [vmem:[%s9763_s7 + $0x1e80] sm:$0xff] }
 0x231   : > { %6807 = vmatpush1.bf16.msra.mxu0 %v8991_v6  ;;  %7135 = vmatpush1.bf16.msra.mxu1 %v8993_v7  ;;  %v1328_v6 = vld [vmem:[%s9763_s7 + $0x1d60] sm:$0xff]  ;;  %v1325_v7 = vld [vmem:[%s9763_s7 + $0x1d48] sm:$0xff] }
 0x232   : > { %6808 = vmatprep.subr.bf16.mxu0 %v9000_v8  ;;  %7136 = vmatprep.subr.bf16.mxu1 %v9002_v9  ;;  %v1329_v8 = vld [vmem:[%s9763_s7 + $0x1d68] sm:$0xff]  ;;  %v9039_v9 = vcombine.low %v1316_v57, %v1320_v58  ;;  %v9048_v18 = vcombine.high %v1324_v5, %v1328_v6  ;;  %v9080_v57 = vcombine.high %v1356_v50, %v1360_v51  ;;  %v1368_v61 = vld [vmem:[%s9763_s7 + $0x1ea0] sm:$0xff] }
 0x233   : > { %v9050_v20 = vcombine.high %v1325_v7, %v1329_v8  ;;  %v9049_v22 = vcombine.low %v1325_v7, %v1329_v8  ;;  %v1372_v7 = vld [vmem:[%s9763_s7 + $0x1ec0] sm:$0xff] }
 0x234   : > { %v1376_v8 = vld [vmem:[%s9763_s7 + $0x1ee0] sm:$0xff] }
 0x235   : > { %6809 = vmatpush1.bf16.msra.mxu0 %v8999_v16  ;;  %7137 = vmatpush1.bf16.msra.mxu1 %v9001_v60  ;;  %v1336_v16 = vld [vmem:[%s9763_s7 + $0x1da0] sm:$0xff]  ;;  %v1333_v60 = vld [vmem:[%s9763_s7 + $0x1d88] sm:$0xff] }
 0x236   : > { %6819 = vmatprep.subr.bf16.mxu0 %v9008_v19  ;;  %7147 = vmatprep.subr.bf16.mxu1 %v9010_v21  ;;  %v1337_v19 = vld [vmem:[%s9763_s7 + $0x1da8] sm:$0xff]  ;;  %v9047_v21 = vcombine.low %v1324_v5, %v1328_v6  ;;  %v9056_v23 = vcombine.high %v1332_v15, %v1336_v16  ;;  %v9088_v5 = vcombine.high %v1364_v59, %v1368_v61 }
 0x237   : > { %v9058_v25 = vcombine.high %v1333_v60, %v1337_v19 }
 0x238   : > { %6811 = vmatmul.mubr.bf16.vlgmr.msra.gmra.mrb[0].mxu0 %v10379_v27  ;;  %7139 = vmatmul.mubr.bf16.vlgmr.msra.gmra.mrb[0].mxu1 %v10379_v27 }
 0x239   : > { %6820 = vmatpush1.bf16.msra.mxu0 %v9007_v33  ;;  %7148 = vmatpush1.bf16.msra.mxu1 %v9009_v34  ;;  %v1341_v33 = vld [vmem:[%s9763_s7 + $0x1dc8] sm:$0xff] }
 0x23a   : > { %6821 = vmatprep.subr.bf16.mxu0 %v9016_v0  ;;  %7149 = vmatprep.subr.bf16.mxu1 %v9018_v36  ;;  %v1345_v34 = vld [vmem:[%s9763_s7 + $0x1de8] sm:$0xff]  ;;  %v9055_v0 = vcombine.low %v1332_v15, %v1336_v16  ;;  %v9057_v36 = vcombine.low %v1333_v60, %v1337_v19  ;;  %v9096_v15 = vcombine.high %v1372_v7, %v1376_v8  ;;  %v1380_v60 = vld [vmem:[%s9763_s7 + $0x1f00] sm:$0xff] }
 0x23b   : > { %6851 = vmatprep.mubr.bf16.mxu0 %v10385_v39  ;;  %7179 = vmatprep.mubr.bf16.mxu1 %v10385_v39  ;;  %v9066_v38 = vcombine.high %v1341_v33, %v1345_v34  ;;  %v1384_v19 = vld [vmem:[%s9763_s7 + $0x1f20] sm:$0xff] }
 0x23d   : > { %6822 = vmatpush1.bf16.msra.mxu0 %v9015_v43  ;;  %7150 = vmatpush1.bf16.msra.mxu1 %v9017_v44  ;;  %v1349_v43 = vld [vmem:[%s9763_s7 + $0x1e08] sm:$0xff] }
 0x23e   : > { %6823 = vmatprep.subr.bf16.mxu0 %v9024_v46  ;;  %7151 = vmatprep.subr.bf16.mxu1 %v9026_v47  ;;  %v1353_v44 = vld [vmem:[%s9763_s7 + $0x1e28] sm:$0xff]  ;;  %v9063_v46 = vcombine.low %v1340_v28, %v1344_v31  ;;  %v9065_v47 = vcombine.low %v1341_v33, %v1345_v34  ;;  %v9104_v28 = vcombine.high %v1380_v60, %v1384_v19  ;;  %v1388_v33 = vld [vmem:[%s9763_s7 + $0x1f40] sm:$0xff] }
 0x23f   : > { %v9074_v49 = vcombine.high %v1349_v43, %v1353_v44  ;;  %v1392_v34 = vld [vmem:[%s9763_s7 + $0x1f60] sm:$0xff] }
 0x241   : > { %6824 = vmatpush1.bf16.msra.mxu0 %v9023_v53  ;;  %7152 = vmatpush1.bf16.msra.mxu1 %v9025_v11  ;;  %v1357_v53 = vld [vmem:[%s9763_s7 + $0x1e48] sm:$0xff] }
 0x242   : > { %6825 = vmatprep.subr.bf16.mxu0 %v9032_v55  ;;  %7153 = vmatprep.subr.bf16.mxu1 %v9034_v24  ;;  %v1361_v11 = vld [vmem:[%s9763_s7 + $0x1e68] sm:$0xff]  ;;  %v9071_v55 = vcombine.low %v1348_v29, %v1352_v56  ;;  %v9073_v24 = vcombine.low %v1349_v43, %v1353_v44  ;;  %v9112_v29 = vcombine.high %v1388_v33, %v1392_v34  ;;  %v1396_v43 = vld [vmem:[%s9763_s7 + $0x1f80] sm:$0xff] }
 0x243   : > { %v9082_v58 = vcombine.high %v1357_v53, %v1361_v11  ;;  %v1400_v44 = vld [vmem:[%s9763_s7 + $0x1fa0] sm:$0xff] }
 0x245   : > { %6826 = vmatpush1.bf16.msra.mxu0 %v9031_v62  ;;  %7154 = vmatpush1.bf16.msra.mxu1 %v9033_v63  ;;  %v1365_v62 = vld [vmem:[%s9763_s7 + $0x1e88] sm:$0xff] }
 0x246   : > { %6827 = vmatprep.subr.bf16.mxu0 %v9040_v2  ;;  %7155 = vmatprep.subr.bf16.mxu1 %v9042_v4  ;;  %v1369_v63 = vld [vmem:[%s9763_s7 + $0x1ea8] sm:$0xff]  ;;  %v9079_v2 = vcombine.low %v1356_v50, %v1360_v51  ;;  %v9081_v4 = vcombine.low %v1357_v53, %v1361_v11  ;;  %v9120_v50 = vcombine.high %v1396_v43, %v1400_v44  ;;  %v1404_v53 = vld [vmem:[%s9763_s7 + $0x1fc0] sm:$0xff] }
 0x247   : > { %v9090_v6 = vcombine.high %v1365_v62, %v1369_v63  ;;  %v1408_v11 = vld [vmem:[%s9763_s7 + $0x1fe0] sm:$0xff] }
 0x249   : > { %6828 = vmatpush1.bf16.msra.mxu0 %v9039_v9  ;;  %7156 = vmatpush1.bf16.msra.mxu1 %v9041_v12  ;;  %v1373_v9 = vld [vmem:[%s9763_s7 + $0x1ec8] sm:$0xff] }
 0x24a   : > { %6829 = vmatprep.subr.bf16.mxu0 %v9048_v18  ;;  %7157 = vmatprep.subr.bf16.mxu1 %v9050_v20  ;;  %v1377_v12 = vld [vmem:[%s9763_s7 + $0x1ee8] sm:$0xff]  ;;  %v9087_v18 = vcombine.low %v1364_v59, %v1368_v61  ;;  %v9089_v20 = vcombine.low %v1365_v62, %v1369_v63  ;;  %v9128_v59 = vcombine.high %v1404_v53, %v1408_v11  ;;  %v390_v62 = vld [vmem:[%s9763_s7 + $0x10] sm:$0xff] }
 0x24b   : > { %v9098_v16 = vcombine.high %v1373_v9, %v1377_v12  ;;  %v394_v63 = vld [vmem:[%s9763_s7 + $0x30] sm:$0xff] }
 0x24d   : > { %6830 = vmatpush1.bf16.msra.mxu0 %v9047_v21  ;;  %7158 = vmatpush1.bf16.msra.mxu1 %v9049_v22  ;;  %v1381_v21 = vld [vmem:[%s9763_s7 + $0x1f08] sm:$0xff] }
 0x24e   : > { %6831 = vmatprep.subr.bf16.mxu0 %v9056_v23  ;;  %7159 = vmatprep.subr.bf16.mxu1 %v9058_v25  ;;  %v1385_v22 = vld [vmem:[%s9763_s7 + $0x1f28] sm:$0xff]  ;;  %v9095_v23 = vcombine.low %v1372_v7, %v1376_v8  ;;  %v9097_v25 = vcombine.low %v1373_v9, %v1377_v12  ;;  %v8116_v7 = vcombine.high %v390_v62, %v394_v63  ;;  %v398_v9 = vld [vmem:[%s9763_s7 + $0x50] sm:$0xff] }
 0x24f   : > { %v9106_v31 = vcombine.high %v1381_v21, %v1385_v22  ;;  %v402_v12 = vld [vmem:[%s9763_s7 + $0x70] sm:$0xff] }
 0x251   : > { %6832 = vmatpush1.bf16.msra.mxu0 %v9055_v0  ;;  %7160 = vmatpush1.bf16.msra.mxu1 %v9057_v36  ;;  %v1389_v0 = vld [vmem:[%s9763_s7 + $0x1f48] sm:$0xff] }
 0x252   : > { %6833 = vmatprep.subr.bf16.mxu0 %v9064_v37  ;;  %7161 = vmatprep.subr.bf16.mxu1 %v9066_v38  ;;  %v1393_v36 = vld [vmem:[%s9763_s7 + $0x1f68] sm:$0xff]  ;;  %v9103_v37 = vcombine.low %v1380_v60, %v1384_v19  ;;  %v9105_v38 = vcombine.low %v1381_v21, %v1385_v22  ;;  %v8124_v19 = vcombine.high %v398_v9, %v402_v12  ;;  %v406_v22 = vld [vmem:[%s9763_s7 + $0x90] sm:$0xff] }
 0x253   : > { %v9114_v56 = vcombine.high %v1389_v0, %v1393_v36 }
 0x255   : > { %6834 = vmatpush1.bf16.msra.mxu0 %v9063_v46  ;;  %7162 = vmatpush1.bf16.msra.mxu1 %v9065_v47  ;;  %v1397_v46 = vld [vmem:[%s9763_s7 + $0x1f88] sm:$0xff] }
 0x256   : > { %6835 = vmatprep.subr.bf16.mxu0 %v9072_v48  ;;  %7163 = vmatprep.subr.bf16.mxu1 %v9074_v49  ;;  %v1401_v47 = vld [vmem:[%s9763_s7 + $0x1fa8] sm:$0xff]  ;;  %v9111_v48 = vcombine.low %v1388_v33, %v1392_v34  ;;  %v9113_v49 = vcombine.low %v1389_v0, %v1393_v36  ;;  %v414_v0 = vld [vmem:[%s9763_s7 + $0xd0] sm:$0xff] }
 0x257   : > { %v9122_v51 = vcombine.high %v1397_v46, %v1401_v47  ;;  %v418_v36 = vld [vmem:[%s9763_s7 + $0xf0] sm:$0xff] }
 0x259   : > { %6836 = vmatpush1.bf16.msra.mxu0 %v9071_v55  ;;  %7164 = vmatpush1.bf16.msra.mxu1 %v9073_v24  ;;  %v1405_v55 = vld [vmem:[%s9763_s7 + $0x1fc8] sm:$0xff] }
 0x25a   : > { %6837 = vmatprep.subr.bf16.mxu0 %v9080_v57  ;;  %7165 = vmatprep.subr.bf16.mxu1 %v9082_v58  ;;  %v1409_v24 = vld [vmem:[%s9763_s7 + $0x1fe8] sm:$0xff]  ;;  %v9119_v57 = vcombine.low %v1396_v43, %v1400_v44  ;;  %v9121_v58 = vcombine.low %v1397_v46, %v1401_v47  ;;  %v8140_v43 = vcombine.high %v414_v0, %v418_v36  ;;  %v422_v46 = vld [vmem:[%s9763_s7 + $0x110] sm:$0xff] }
 0x25b   : > { %v9130_v61 = vcombine.high %v1405_v55, %v1409_v24  ;;  %v426_v47 = vld [vmem:[%s9763_s7 + $0x130] sm:$0xff] }
 0x25d   : > { %6838 = vmatpush1.bf16.msra.mxu0 %v9079_v2  ;;  %7166 = vmatpush1.bf16.msra.mxu1 %v9081_v4  ;;  %v391_v2 = vld [vmem:[%s9763_s7 + $0x18] sm:$0xff] }
 0x25e   : > { %6839 = vmatprep.subr.bf16.mxu0 %v9088_v5  ;;  %7167 = vmatprep.subr.bf16.mxu1 %v9090_v6  ;;  %v395_v4 = vld [vmem:[%s9763_s7 + $0x38] sm:$0xff]  ;;  %v9127_v5 = vcombine.low %v1404_v53, %v1408_v11  ;;  %v9129_v6 = vcombine.low %v1405_v55, %v1409_v24  ;;  %v430_v11 = vld [vmem:[%s9763_s7 + $0x150] sm:$0xff] }
 0x25f   : > { %v8118_v8 = vcombine.high %v391_v2, %v395_v4  ;;  %v8117_v60 = vcombine.low %v391_v2, %v395_v4  ;;  %v434_v55 = vld [vmem:[%s9763_s7 + $0x170] sm:$0xff]  ;;  %v431_v24 = vld [vmem:[%s9763_s7 + $0x158] sm:$0xff] }
 0x260   : > { %v442_v2 = vld [vmem:[%s9763_s7 + $0x1b0] sm:$0xff]  ;;  %v439_v4 = vld [vmem:[%s9763_s7 + $0x198] sm:$0xff] }
 0x261   : > { %6840 = vmatpush1.bf16.msra.mxu0 %v9087_v18  ;;  %7168 = vmatpush1.bf16.msra.mxu1 %v9089_v20  ;;  %v10453_v18 = vpack.c.bf16 %v10369_v14, %v10369_v14  ;;  %v399_v20 = vld [vmem:[%s9763_s7 + $0x58] sm:$0xff] }
 0x262   : > { %6841 = vmatprep.subr.bf16.mxu0 %v9096_v15  ;;  %7169 = vmatprep.subr.bf16.mxu1 %v9098_v16  ;;  %v403_v15 = vld [vmem:[%s9763_s7 + $0x78] sm:$0xff]  ;;  %v8115_v16 = vcombine.low %v390_v62, %v394_v63  ;;  %v438_v63 = vld [vmem:[%s9763_s7 + $0x190] sm:$0xff] }
 0x263   : > { %v8126_v21 = vcombine.high %v399_v20, %v403_v15  ;;  %v407_v14 = vld [vmem:[%s9763_s7 + $0x98] sm:$0xff] }
 0x265   : > { %6842 = vmatpush1.bf16.msra.mxu0 %v9095_v23  ;;  %7170 = vmatpush1.bf16.msra.mxu1 %v9097_v25  ;;  %v410_v23 = vld [vmem:[%s9763_s7 + $0xb0] sm:$0xff]  ;;  %v411_v25 = vld [vmem:[%s9763_s7 + $0xb8] sm:$0xff] }
 0x266   : > { %6843 = vmatprep.subr.bf16.mxu0 %v9104_v28  ;;  %7171 = vmatprep.subr.bf16.mxu1 %v9106_v31  ;;  %v8123_v28 = vcombine.low %v398_v9, %v402_v12  ;;  %v8125_v31 = vcombine.low %v399_v20, %v403_v15  ;;  %v8132_v33 = vcombine.high %v406_v22, %v410_v23  ;;  %v446_v12 = vld [vmem:[%s9763_s7 + $0x1d0] sm:$0xff]  ;;  %v447_v15 = vld [vmem:[%s9763_s7 + $0x1d8] sm:$0xff] }
 0x267   : > { %v8134_v34 = vcombine.high %v407_v14, %v411_v25  ;;  %v450_v20 = vld [vmem:[%s9763_s7 + $0x1f0] sm:$0xff] }
 0x269   : > { %6844 = vmatpush1.bf16.msra.mxu0 %v9103_v37  ;;  %7172 = vmatpush1.bf16.msra.mxu1 %v9105_v38  ;;  %v415_v37 = vld [vmem:[%s9763_s7 + $0xd8] sm:$0xff] }
 0x26a   : > { %6845 = vmatprep.subr.bf16.mxu0 %v9112_v29  ;;  %7173 = vmatprep.subr.bf16.mxu1 %v9114_v56  ;;  %v419_v38 = vld [vmem:[%s9763_s7 + $0xf8] sm:$0xff]  ;;  %v8131_v29 = vcombine.low %v406_v22, %v410_v23  ;;  %v8133_v56 = vcombine.low %v407_v14, %v411_v25  ;;  %v454_v23 = vld [vmem:[%s9763_s7 + $0x210] sm:$0xff] }
 0x26b   : > { %v8142_v44 = vcombine.high %v415_v37, %v419_v38  ;;  %v458_v14 = vld [vmem:[%s9763_s7 + $0x230] sm:$0xff]  ;;  %v455_v25 = vld [vmem:[%s9763_s7 + $0x218] sm:$0xff] }
 0x26d   : > { %6846 = vmatpush1.bf16.msra.mxu0 %v9111_v48  ;;  %7174 = vmatpush1.bf16.msra.mxu1 %v9113_v49  ;;  %v423_v48 = vld [vmem:[%s9763_s7 + $0x118] sm:$0xff] }
 0x26e   : > { %6847 = vmatprep.subr.bf16.mxu0 %v9120_v50  ;;  %7175 = vmatprep.subr.bf16.mxu1 %v9122_v51  ;;  %v427_v49 = vld [vmem:[%s9763_s7 + $0x138] sm:$0xff]  ;;  %v8139_v50 = vcombine.low %v414_v0, %v418_v36  ;;  %v8148_v51 = vcombine.high %v422_v46, %v426_v47  ;;  %v462_v36 = vld [vmem:[%s9763_s7 + $0x250] sm:$0xff] }
 0x26f   : > { %v8150_v53 = vcombine.high %v423_v48, %v427_v49 }
 0x271   : > { %6848 = vmatpush1.bf16.msra.mxu0 %v9119_v57  ;;  %7176 = vmatpush1.bf16.msra.mxu1 %v9121_v58  ;;  %v435_v57 = vld [vmem:[%s9763_s7 + $0x178] sm:$0xff]  ;;  %v8147_v58 = vcombine.low %v422_v46, %v426_v47  ;;  %v470_v47 = vld [vmem:[%s9763_s7 + $0x290] sm:$0xff] }
 0x272   : > { %6849 = vmatprep.subr.bf16.mxu0 %v9128_v59  ;;  %7177 = vmatprep.subr.bf16.mxu1 %v9130_v61  ;;  %v8149_v59 = vcombine.low %v423_v48, %v427_v49  ;;  %v8156_v61 = vcombine.high %v430_v11, %v434_v55  ;;  %v8158_v62 = vcombine.high %v431_v24, %v435_v57  ;;  %v474_v48 = vld [vmem:[%s9763_s7 + $0x2b0] sm:$0xff]  ;;  %v471_v49 = vld [vmem:[%s9763_s7 + $0x298] sm:$0xff] }
 0x275   : > { %6850 = vmatpush1.bf16.msra.mxu0 %v9127_v5  ;;  %7178 = vmatpush1.bf16.msra.mxu1 %v9129_v6  ;;  %v443_v5 = vld [vmem:[%s9763_s7 + $0x1b8] sm:$0xff]  ;;  %v8155_v6 = vcombine.low %v430_v11, %v434_v55  ;;  %v478_v55 = vld [vmem:[%s9763_s7 + $0x2d0] sm:$0xff] }
 0x276   : > { %7188 = vmatprep.subr.bf16.mxu0 %v8116_v7  ;;  %7516 = vmatprep.subr.bf16.mxu1 %v8118_v8  ;;  %v8157_v7 = vcombine.low %v431_v24, %v435_v57  ;;  %v8164_v8 = vcombine.high %v438_v63, %v442_v2  ;;  %v8166_v9 = vcombine.high %v439_v4, %v443_v5  ;;  %v482_v24 = vld [vmem:[%s9763_s7 + $0x2f0] sm:$0xff]  ;;  %v479_v57 = vld [vmem:[%s9763_s7 + $0x2d8] sm:$0xff] }
 0x278   : > { %6852 = vmatmul.mubr.bf16.vlgmr.msra.gmra.mrb[0].mxu0 %v10453_v18  ;;  %7180 = vmatmul.mubr.bf16.vlgmr.msra.gmra.mrb[0].mxu1 %v10453_v18 }
 0x279   : > { %7189 = vmatpush1.bf16.msra.mxu0 %v8115_v16  ;;  %7517 = vmatpush1.bf16.msra.mxu1 %v8117_v60  ;;  %v451_v16 = vld [vmem:[%s9763_s7 + $0x1f8] sm:$0xff]  ;;  %v8163_v60 = vcombine.low %v438_v63, %v442_v2  ;;  %v486_v2 = vld [vmem:[%s9763_s7 + $0x310] sm:$0xff] }
 0x27a   : > { %7190 = vmatprep.subr.bf16.mxu0 %v8124_v19  ;;  %7518 = vmatprep.subr.bf16.mxu1 %v8126_v21  ;;  %v8165_v19 = vcombine.low %v439_v4, %v443_v5  ;;  %v8172_v21 = vcombine.high %v446_v12, %v450_v20  ;;  %v8174_v22 = vcombine.high %v447_v15, %v451_v16  ;;  %v490_v4 = vld [vmem:[%s9763_s7 + $0x330] sm:$0xff]  ;;  %v487_v5 = vld [vmem:[%s9763_s7 + $0x318] sm:$0xff] }
 0x27b   : > { %7220 = vmatprep.mubr.bf16.mxu0 %v9838_v10  ;;  %7548 = vmatprep.mubr.bf16.mxu1 %v9838_v10  ;;  %v8141_v10 = vcombine.low %v415_v37, %v419_v38  ;;  %v466_v37 = vld [vmem:[%s9763_s7 + $0x270] sm:$0xff]  ;;  %v463_v38 = vld [vmem:[%s9763_s7 + $0x258] sm:$0xff] }
 0x27d   : > { %7191 = vmatpush1.bf16.msra.mxu0 %v8123_v28  ;;  %7519 = vmatpush1.bf16.msra.mxu1 %v8125_v31  ;;  %v459_v28 = vld [vmem:[%s9763_s7 + $0x238] sm:$0xff]  ;;  %v8171_v31 = vcombine.low %v446_v12, %v450_v20  ;;  %v494_v20 = vld [vmem:[%s9763_s7 + $0x350] sm:$0xff] }
 0x27e   : > { %7192 = vmatprep.subr.bf16.mxu0 %v8132_v33  ;;  %7520 = vmatprep.subr.bf16.mxu1 %v8134_v34  ;;  %v8173_v33 = vcombine.low %v447_v15, %v451_v16  ;;  %v8180_v34 = vcombine.high %v454_v23, %v458_v14  ;;  %v8182_v0 = vcombine.high %v455_v25, %v459_v28  ;;  %v498_v15 = vld [vmem:[%s9763_s7 + $0x370] sm:$0xff]  ;;  %v495_v16 = vld [vmem:[%s9763_s7 + $0x358] sm:$0xff] }
 0x281   : > { %7193 = vmatpush1.bf16.msra.mxu0 %v8131_v29  ;;  %7521 = vmatpush1.bf16.msra.mxu1 %v8133_v56  ;;  %v467_v29 = vld [vmem:[%s9763_s7 + $0x278] sm:$0xff]  ;;  %v8179_v56 = vcombine.low %v454_v23, %v458_v14  ;;  %v502_v14 = vld [vmem:[%s9763_s7 + $0x390] sm:$0xff] }
 0x282   : > { %7194 = vmatprep.subr.bf16.mxu0 %v8140_v43  ;;  %7522 = vmatprep.subr.bf16.mxu1 %v8142_v44  ;;  %v8181_v43 = vcombine.low %v455_v25, %v459_v28  ;;  %v8188_v44 = vcombine.high %v462_v36, %v466_v37  ;;  %v8190_v46 = vcombine.high %v463_v38, %v467_v29  ;;  %v506_v25 = vld [vmem:[%s9763_s7 + $0x3b0] sm:$0xff]  ;;  %v503_v28 = vld [vmem:[%s9763_s7 + $0x398] sm:$0xff] }
 0x285   : > { %7195 = vmatpush1.bf16.msra.mxu0 %v8139_v50  ;;  %7523 = vmatpush1.bf16.msra.mxu1 %v8141_v10  ;;  %v475_v50 = vld [vmem:[%s9763_s7 + $0x2b8] sm:$0xff]  ;;  %v8187_v10 = vcombine.low %v462_v36, %v466_v37  ;;  %v510_v37 = vld [vmem:[%s9763_s7 + $0x3d0] sm:$0xff] }
 0x286   : > { %7196 = vmatprep.subr.bf16.mxu0 %v8148_v51  ;;  %7524 = vmatprep.subr.bf16.mxu1 %v8150_v53  ;;  %v8189_v51 = vcombine.low %v463_v38, %v467_v29  ;;  %v8196_v53 = vcombine.high %v470_v47, %v474_v48  ;;  %v8198_v11 = vcombine.high %v471_v49, %v475_v50  ;;  %v514_v38 = vld [vmem:[%s9763_s7 + $0x3f0] sm:$0xff]  ;;  %v511_v29 = vld [vmem:[%s9763_s7 + $0x3d8] sm:$0xff] }
 0x289   : > { %7197 = vmatpush1.bf16.msra.mxu0 %v8147_v58  ;;  %7525 = vmatpush1.bf16.msra.mxu1 %v8149_v59  ;;  %v483_v58 = vld [vmem:[%s9763_s7 + $0x2f8] sm:$0xff]  ;;  %v8195_v59 = vcombine.low %v470_v47, %v474_v48  ;;  %v518_v48 = vld [vmem:[%s9763_s7 + $0x410] sm:$0xff] }
 0x28a   : > { %7198 = vmatprep.subr.bf16.mxu0 %v8156_v61  ;;  %7526 = vmatprep.subr.bf16.mxu1 %v8158_v62  ;;  %v8197_v61 = vcombine.low %v471_v49, %v475_v50  ;;  %v8204_v62 = vcombine.high %v478_v55, %v482_v24  ;;  %v8206_v63 = vcombine.high %v479_v57, %v483_v58  ;;  %v522_v49 = vld [vmem:[%s9763_s7 + $0x430] sm:$0xff]  ;;  %v519_v50 = vld [vmem:[%s9763_s7 + $0x418] sm:$0xff] }
 0x28d   : > { %7199 = vmatpush1.bf16.msra.mxu0 %v8155_v6  ;;  %7527 = vmatpush1.bf16.msra.mxu1 %v8157_v7  ;;  %v491_v6 = vld [vmem:[%s9763_s7 + $0x338] sm:$0xff]  ;;  %v8203_v7 = vcombine.low %v478_v55, %v482_v24  ;;  %v526_v24 = vld [vmem:[%s9763_s7 + $0x450] sm:$0xff] }
 0x28e   : > { %7200 = vmatprep.subr.bf16.mxu0 %v8164_v8  ;;  %7528 = vmatprep.subr.bf16.mxu1 %v8166_v9  ;;  %v8205_v8 = vcombine.low %v479_v57, %v483_v58  ;;  %v8212_v9 = vcombine.high %v486_v2, %v490_v4  ;;  %v8214_v12 = vcombine.high %v487_v5, %v491_v6  ;;  %v530_v57 = vld [vmem:[%s9763_s7 + $0x470] sm:$0xff]  ;;  %v527_v58 = vld [vmem:[%s9763_s7 + $0x458] sm:$0xff] }
 0x291   : > { %7201 = vmatpush1.bf16.msra.mxu0 %v8163_v60  ;;  %7529 = vmatpush1.bf16.msra.mxu1 %v8165_v19  ;;  %v499_v60 = vld [vmem:[%s9763_s7 + $0x378] sm:$0xff]  ;;  %v8211_v19 = vcombine.low %v486_v2, %v490_v4  ;;  %v534_v4 = vld [vmem:[%s9763_s7 + $0x490] sm:$0xff] }
 0x292   : > { %7202 = vmatprep.subr.bf16.mxu0 %v8172_v21  ;;  %7530 = vmatprep.subr.bf16.mxu1 %v8174_v22  ;;  %v8213_v21 = vcombine.low %v487_v5, %v491_v6  ;;  %v8220_v22 = vcombine.high %v494_v20, %v498_v15  ;;  %v8222_v23 = vcombine.high %v495_v16, %v499_v60  ;;  %v538_v5 = vld [vmem:[%s9763_s7 + $0x4b0] sm:$0xff]  ;;  %v535_v6 = vld [vmem:[%s9763_s7 + $0x498] sm:$0xff] }
 0x295   : > { %7203 = vmatpush1.bf16.msra.mxu0 %v8171_v31  ;;  %7531 = vmatpush1.bf16.msra.mxu1 %v8173_v33  ;;  %v507_v31 = vld [vmem:[%s9763_s7 + $0x3b8] sm:$0xff]  ;;  %v8219_v33 = vcombine.low %v494_v20, %v498_v15  ;;  %v542_v15 = vld [vmem:[%s9763_s7 + $0x4d0] sm:$0xff] }
 0x296   : > { %7204 = vmatprep.subr.bf16.mxu0 %v8180_v34  ;;  %7532 = vmatprep.subr.bf16.mxu1 %v8182_v0  ;;  %v8221_v34 = vcombine.low %v495_v16, %v499_v60  ;;  %v8228_v0 = vcombine.high %v502_v14, %v506_v25  ;;  %v8230_v36 = vcombine.high %v503_v28, %v507_v31  ;;  %v546_v16 = vld [vmem:[%s9763_s7 + $0x4f0] sm:$0xff]  ;;  %v543_v60 = vld [vmem:[%s9763_s7 + $0x4d8] sm:$0xff] }
 0x299   : > { %7205 = vmatpush1.bf16.msra.mxu0 %v8179_v56  ;;  %7533 = vmatpush1.bf16.msra.mxu1 %v8181_v43  ;;  %v515_v56 = vld [vmem:[%s9763_s7 + $0x3f8] sm:$0xff]  ;;  %v8227_v43 = vcombine.low %v502_v14, %v506_v25  ;;  %v550_v14 = vld [vmem:[%s9763_s7 + $0x510] sm:$0xff] }
 0x29a   : > { %7206 = vmatprep.subr.bf16.mxu0 %v8188_v44  ;;  %7534 = vmatprep.subr.bf16.mxu1 %v8190_v46  ;;  %v8229_v44 = vcombine.low %v503_v28, %v507_v31  ;;  %v8236_v46 = vcombine.high %v510_v37, %v514_v38  ;;  %v8238_v47 = vcombine.high %v511_v29, %v515_v56  ;;  %v554_v25 = vld [vmem:[%s9763_s7 + $0x530] sm:$0xff]  ;;  %v551_v28 = vld [vmem:[%s9763_s7 + $0x518] sm:$0xff] }
 0x29b   : > { %v555_v31 = vld [vmem:[%s9763_s7 + $0x538] sm:$0xff] }
 0x29d   : > { %7207 = vmatpush1.bf16.msra.mxu0 %v8187_v10  ;;  %7535 = vmatpush1.bf16.msra.mxu1 %v8189_v51  ;;  %v523_v10 = vld [vmem:[%s9763_s7 + $0x438] sm:$0xff]  ;;  %v8235_v51 = vcombine.low %v510_v37, %v514_v38  ;;  %v562_v37 = vld [vmem:[%s9763_s7 + $0x570] sm:$0xff] }
 0x29e   : > { %7208 = vmatprep.subr.bf16.mxu0 %v8196_v53  ;;  %7536 = vmatprep.subr.bf16.mxu1 %v8198_v11  ;;  %v8237_v53 = vcombine.low %v511_v29, %v515_v56  ;;  %v8244_v11 = vcombine.high %v518_v48, %v522_v49  ;;  %v8246_v55 = vcombine.high %v519_v50, %v523_v10  ;;  %v559_v38 = vld [vmem:[%s9763_s7 + $0x558] sm:$0xff] }
 0x29f   : > { %v563_v29 = vld [vmem:[%s9763_s7 + $0x578] sm:$0xff]  ;;  %v8275_v56 = vcombine.low %v550_v14, %v554_v25 }
 0x2a1   : > { %7209 = vmatpush1.bf16.msra.mxu0 %v8195_v59  ;;  %7537 = vmatpush1.bf16.msra.mxu1 %v8197_v61  ;;  %v531_v59 = vld [vmem:[%s9763_s7 + $0x478] sm:$0xff]  ;;  %v8243_v61 = vcombine.low %v518_v48, %v522_v49  ;;  %v570_v48 = vld [vmem:[%s9763_s7 + $0x5b0] sm:$0xff] }
 0x2a2   : > { %7210 = vmatprep.subr.bf16.mxu0 %v8204_v62  ;;  %7538 = vmatprep.subr.bf16.mxu1 %v8206_v63  ;;  %v8245_v62 = vcombine.low %v519_v50, %v523_v10  ;;  %v8252_v63 = vcombine.high %v526_v24, %v530_v57  ;;  %v8254_v2 = vcombine.high %v527_v58, %v531_v59  ;;  %v567_v49 = vld [vmem:[%s9763_s7 + $0x598] sm:$0xff] }
 0x2a3   : > { %v571_v50 = vld [vmem:[%s9763_s7 + $0x5b8] sm:$0xff] }
 0x2a5   : > { %7211 = vmatpush1.bf16.msra.mxu0 %v8203_v7  ;;  %7539 = vmatpush1.bf16.msra.mxu1 %v8205_v8  ;;  %v539_v7 = vld [vmem:[%s9763_s7 + $0x4b8] sm:$0xff]  ;;  %v8251_v8 = vcombine.low %v526_v24, %v530_v57  ;;  %v578_v24 = vld [vmem:[%s9763_s7 + $0x5f0] sm:$0xff] }
 0x2a6   : > { %7212 = vmatprep.subr.bf16.mxu0 %v8212_v9  ;;  %7540 = vmatprep.subr.bf16.mxu1 %v8214_v12  ;;  %v8253_v9 = vcombine.low %v527_v58, %v531_v59  ;;  %v8260_v12 = vcombine.high %v534_v4, %v538_v5  ;;  %v8262_v20 = vcombine.high %v535_v6, %v539_v7  ;;  %v575_v57 = vld [vmem:[%s9763_s7 + $0x5d8] sm:$0xff] }
 0x2a7   : > { %v579_v58 = vld [vmem:[%s9763_s7 + $0x5f8] sm:$0xff] }
 0x2a9   : > { %7213 = vmatpush1.bf16.msra.mxu0 %v8211_v19  ;;  %7541 = vmatpush1.bf16.msra.mxu1 %v8213_v21  ;;  %v547_v19 = vld [vmem:[%s9763_s7 + $0x4f8] sm:$0xff]  ;;  %v8261_v21 = vcombine.low %v535_v6, %v539_v7 }
 0x2aa   : > { %7214 = vmatprep.subr.bf16.mxu0 %v8220_v22  ;;  %7542 = vmatprep.subr.bf16.mxu1 %v8222_v23  ;;  %v8268_v22 = vcombine.high %v542_v15, %v546_v16  ;;  %v8270_v23 = vcombine.high %v543_v60, %v547_v19  ;;  %v587_v6 = vld [vmem:[%s9763_s7 + $0x638] sm:$0xff] }
 0x2ad   : > { %7215 = vmatpush1.bf16.msra.mxu0 %v8219_v33  ;;  %7543 = vmatpush1.bf16.msra.mxu1 %v8221_v34  ;;  %v8267_v33 = vcombine.low %v542_v15, %v546_v16  ;;  %v8276_v34 = vcombine.high %v550_v14, %v554_v25  ;;  %v594_v15 = vld [vmem:[%s9763_s7 + $0x670] sm:$0xff]  ;;  %v591_v16 = vld [vmem:[%s9763_s7 + $0x658] sm:$0xff] }
 0x2ae   : > { %7216 = vmatprep.subr.bf16.mxu0 %v8228_v0  ;;  %7544 = vmatprep.subr.bf16.mxu1 %v8230_v36  ;;  %v8278_v0 = vcombine.high %v551_v28, %v555_v31  ;;  %v558_v36 = vld [vmem:[%s9763_s7 + $0x550] sm:$0xff]  ;;  %v599_v25 = vld [vmem:[%s9763_s7 + $0x698] sm:$0xff] }
 0x2af   : > { %v8283_v10 = vcombine.low %v558_v36, %v562_v37  ;;  %v602_v14 = vld [vmem:[%s9763_s7 + $0x6b0] sm:$0xff] }
 0x2b1   : > { %7217 = vmatpush1.bf16.msra.mxu0 %v8227_v43  ;;  %7545 = vmatpush1.bf16.msra.mxu1 %v8229_v44  ;;  %v8277_v43 = vcombine.low %v551_v28, %v555_v31  ;;  %v8284_v44 = vcombine.high %v558_v36, %v562_v37  ;;  %v603_v28 = vld [vmem:[%s9763_s7 + $0x6b8] sm:$0xff]  ;;  %v610_v36 = vld [vmem:[%s9763_s7 + $0x6f0] sm:$0xff] }
 0x2b2   : > { %7218 = vmatprep.subr.bf16.mxu0 %v8236_v46  ;;  %7546 = vmatprep.subr.bf16.mxu1 %v8238_v47  ;;  %v8286_v46 = vcombine.high %v559_v38, %v563_v29  ;;  %v566_v47 = vld [vmem:[%s9763_s7 + $0x590] sm:$0xff]  ;;  %v607_v37 = vld [vmem:[%s9763_s7 + $0x6d8] sm:$0xff] }
 0x2b3   : > { %v8291_v59 = vcombine.low %v566_v47, %v570_v48 }
 0x2b5   : > { %7219 = vmatpush1.bf16.msra.mxu0 %v8235_v51  ;;  %7547 = vmatpush1.bf16.msra.mxu1 %v8237_v53  ;;  %v8285_v51 = vcombine.low %v559_v38, %v563_v29  ;;  %v8292_v53 = vcombine.high %v566_v47, %v570_v48  ;;  %v611_v38 = vld [vmem:[%s9763_s7 + $0x6f8] sm:$0xff]  ;;  %v618_v47 = vld [vmem:[%s9763_s7 + $0x730] sm:$0xff] }
 0x2b6   : > { %7229 = vmatprep.subr.bf16.mxu0 %v8244_v11  ;;  %7557 = vmatprep.subr.bf16.mxu1 %v8246_v55  ;;  %v8294_v11 = vcombine.high %v567_v49, %v571_v50  ;;  %v574_v55 = vld [vmem:[%s9763_s7 + $0x5d0] sm:$0xff]  ;;  %v615_v48 = vld [vmem:[%s9763_s7 + $0x718] sm:$0xff] }
 0x2b7   : > { %v8299_v7 = vcombine.low %v574_v55, %v578_v24 }
 0x2b8   : > { %7221 = vmatmul.mubr.bf16.vlgmr.msra.gmra.mrb[4].mxu0 %v9887_v26  ;;  %7549 = vmatmul.mubr.bf16.vlgmr.msra.gmra.mrb[4].mxu1 %v9887_v26  ;;  %v8259_v26 = vcombine.low %v534_v4, %v538_v5  ;;  %v586_v4 = vld [vmem:[%s9763_s7 + $0x630] sm:$0xff]  ;;  %v583_v5 = vld [vmem:[%s9763_s7 + $0x618] sm:$0xff] }
 0x2b9   : > { %7230 = vmatpush1.bf16.msra.mxu0 %v8243_v61  ;;  %7558 = vmatpush1.bf16.msra.mxu1 %v8245_v62  ;;  %v8293_v61 = vcombine.low %v567_v49, %v571_v50  ;;  %v8300_v62 = vcombine.high %v574_v55, %v578_v24  ;;  %v619_v49 = vld [vmem:[%s9763_s7 + $0x738] sm:$0xff]  ;;  %v626_v55 = vld [vmem:[%s9763_s7 + $0x770] sm:$0xff] }
 0x2ba   : > { %7231 = vmatprep.subr.bf16.mxu0 %v8252_v63  ;;  %7559 = vmatprep.subr.bf16.mxu1 %v8254_v2  ;;  %v8302_v63 = vcombine.high %v575_v57, %v579_v58  ;;  %v582_v2 = vld [vmem:[%s9763_s7 + $0x610] sm:$0xff]  ;;  %v623_v24 = vld [vmem:[%s9763_s7 + $0x758] sm:$0xff] }
 0x2bb   : > { %7261 = vmatprep.mubr.bf16.mxu0 %v9893_v35  ;;  %7589 = vmatprep.mubr.bf16.mxu1 %v9893_v35  ;;  %v8269_v35 = vcombine.low %v543_v60, %v547_v19  ;;  %v595_v60 = vld [vmem:[%s9763_s7 + $0x678] sm:$0xff]  ;;  %v8307_v19 = vcombine.low %v582_v2, %v586_v4 }
 0x2bd   : > { %7232 = vmatpush1.bf16.msra.mxu0 %v8251_v8  ;;  %7560 = vmatpush1.bf16.msra.mxu1 %v8253_v9  ;;  %v8301_v8 = vcombine.low %v575_v57, %v579_v58  ;;  %v8308_v9 = vcombine.high %v582_v2, %v586_v4  ;;  %v627_v57 = vld [vmem:[%s9763_s7 + $0x778] sm:$0xff]  ;;  %v634_v2 = vld [vmem:[%s9763_s7 + $0x7b0] sm:$0xff] }
 0x2be   : > { %7233 = vmatprep.subr.bf16.mxu0 %v8260_v12  ;;  %7561 = vmatprep.subr.bf16.mxu1 %v8262_v20  ;;  %v8310_v12 = vcombine.high %v583_v5, %v587_v6  ;;  %v590_v20 = vld [vmem:[%s9763_s7 + $0x650] sm:$0xff]  ;;  %v631_v4 = vld [vmem:[%s9763_s7 + $0x798] sm:$0xff] }
 0x2bf   : > { %v8315_v31 = vcombine.low %v590_v20, %v594_v15 }
 0x2c1   : > { %7234 = vmatpush1.bf16.msra.mxu0 %v8259_v26  ;;  %7562 = vmatpush1.bf16.msra.mxu1 %v8261_v21  ;;  %v8309_v26 = vcombine.low %v583_v5, %v587_v6  ;;  %v8316_v21 = vcombine.high %v590_v20, %v594_v15  ;;  %v635_v5 = vld [vmem:[%s9763_s7 + $0x7b8] sm:$0xff]  ;;  %v642_v20 = vld [vmem:[%s9763_s7 + $0x7f0] sm:$0xff] }
 0x2c2   : > { %7235 = vmatprep.subr.bf16.mxu0 %v8268_v22  ;;  %7563 = vmatprep.subr.bf16.mxu1 %v8270_v23  ;;  %v8318_v22 = vcombine.high %v591_v16, %v595_v60  ;;  %v598_v23 = vld [vmem:[%s9763_s7 + $0x690] sm:$0xff]  ;;  %v639_v15 = vld [vmem:[%s9763_s7 + $0x7d8] sm:$0xff] }
 0x2c3   : > { %v8323_v29 = vcombine.low %v598_v23, %v602_v14 }
 0x2c5   : > { %7236 = vmatpush1.bf16.msra.mxu0 %v8267_v33  ;;  %7564 = vmatpush1.bf16.msra.mxu1 %v8269_v35  ;;  %v8317_v33 = vcombine.low %v591_v16, %v595_v60  ;;  %v8324_v35 = vcombine.high %v598_v23, %v602_v14  ;;  %v643_v16 = vld [vmem:[%s9763_s7 + $0x7f8] sm:$0xff]  ;;  %v650_v23 = vld [vmem:[%s9763_s7 + $0x830] sm:$0xff] }
 0x2c6   : > { %7237 = vmatprep.subr.bf16.mxu0 %v8276_v34  ;;  %7565 = vmatprep.subr.bf16.mxu1 %v8278_v0  ;;  %v8326_v34 = vcombine.high %v599_v25, %v603_v28  ;;  %v606_v0 = vld [vmem:[%s9763_s7 + $0x6d0] sm:$0xff]  ;;  %v647_v14 = vld [vmem:[%s9763_s7 + $0x818] sm:$0xff] }
 0x2c7   : > { %v8331_v50 = vcombine.low %v606_v0, %v610_v36 }
 0x2c9   : > { %7238 = vmatpush1.bf16.msra.mxu0 %v8275_v56  ;;  %7566 = vmatpush1.bf16.msra.mxu1 %v8277_v43  ;;  %v8325_v56 = vcombine.low %v599_v25, %v603_v28  ;;  %v8332_v43 = vcombine.high %v606_v0, %v610_v36  ;;  %v651_v25 = vld [vmem:[%s9763_s7 + $0x838] sm:$0xff]  ;;  %v658_v0 = vld [vmem:[%s9763_s7 + $0x870] sm:$0xff] }
 0x2ca   : > { %7239 = vmatprep.subr.bf16.mxu0 %v8284_v44  ;;  %7567 = vmatprep.subr.bf16.mxu1 %v8286_v46  ;;  %v8334_v44 = vcombine.high %v607_v37, %v611_v38  ;;  %v614_v46 = vld [vmem:[%s9763_s7 + $0x710] sm:$0xff]  ;;  %v655_v36 = vld [vmem:[%s9763_s7 + $0x858] sm:$0xff] }
 0x2cb   : > { %v8339_v58 = vcombine.low %v614_v46, %v618_v47 }
 0x2cd   : > { %7240 = vmatpush1.bf16.msra.mxu0 %v8283_v10  ;;  %7568 = vmatpush1.bf16.msra.mxu1 %v8285_v51  ;;  %v8333_v10 = vcombine.low %v607_v37, %v611_v38  ;;  %v8340_v51 = vcombine.high %v614_v46, %v618_v47  ;;  %v659_v37 = vld [vmem:[%s9763_s7 + $0x878] sm:$0xff]  ;;  %v666_v46 = vld [vmem:[%s9763_s7 + $0x8b0] sm:$0xff] }
 0x2ce   : > { %7241 = vmatprep.subr.bf16.mxu0 %v8292_v53  ;;  %7569 = vmatprep.subr.bf16.mxu1 %v8294_v11  ;;  %v8342_v53 = vcombine.high %v615_v48, %v619_v49  ;;  %v622_v11 = vld [vmem:[%s9763_s7 + $0x750] sm:$0xff]  ;;  %v663_v47 = vld [vmem:[%s9763_s7 + $0x898] sm:$0xff] }
 0x2cf   : > { %v8347_v6 = vcombine.low %v622_v11, %v626_v55 }
 0x2d1   : > { %7242 = vmatpush1.bf16.msra.mxu0 %v8291_v59  ;;  %7570 = vmatpush1.bf16.msra.mxu1 %v8293_v61  ;;  %v8341_v59 = vcombine.low %v615_v48, %v619_v49  ;;  %v8348_v61 = vcombine.high %v622_v11, %v626_v55  ;;  %v667_v48 = vld [vmem:[%s9763_s7 + $0x8b8] sm:$0xff]  ;;  %v674_v11 = vld [vmem:[%s9763_s7 + $0x8f0] sm:$0xff] }
 0x2d2   : > { %7243 = vmatprep.subr.bf16.mxu0 %v8300_v62  ;;  %7571 = vmatprep.subr.bf16.mxu1 %v8302_v63  ;;  %v8350_v62 = vcombine.high %v623_v24, %v627_v57  ;;  %v630_v63 = vld [vmem:[%s9763_s7 + $0x790] sm:$0xff]  ;;  %v671_v55 = vld [vmem:[%s9763_s7 + $0x8d8] sm:$0xff] }
 0x2d3   : > { %v8355_v60 = vcombine.low %v630_v63, %v634_v2 }
 0x2d5   : > { %7244 = vmatpush1.bf16.msra.mxu0 %v8299_v7  ;;  %7572 = vmatpush1.bf16.msra.mxu1 %v8301_v8  ;;  %v8349_v7 = vcombine.low %v623_v24, %v627_v57  ;;  %v8356_v8 = vcombine.high %v630_v63, %v634_v2  ;;  %v675_v24 = vld [vmem:[%s9763_s7 + $0x8f8] sm:$0xff]  ;;  %v8389_v57 = vcombine.low %v663_v47, %v667_v48 }
 0x2d6   : > { %7245 = vmatprep.subr.bf16.mxu0 %v8308_v9  ;;  %7573 = vmatprep.subr.bf16.mxu1 %v8310_v12  ;;  %v8358_v9 = vcombine.high %v631_v4, %v635_v5  ;;  %v638_v12 = vld [vmem:[%s9763_s7 + $0x7d0] sm:$0xff]  ;;  %v679_v63 = vld [vmem:[%s9763_s7 + $0x918] sm:$0xff] }
 0x2d7   : > { %v8363_v28 = vcombine.low %v638_v12, %v642_v20  ;;  %v683_v2 = vld [vmem:[%s9763_s7 + $0x938] sm:$0xff] }
 0x2d9   : > { %7246 = vmatpush1.bf16.msra.mxu0 %v8307_v19  ;;  %7574 = vmatpush1.bf16.msra.mxu1 %v8309_v26  ;;  %v8357_v19 = vcombine.low %v631_v4, %v635_v5  ;;  %v8364_v26 = vcombine.high %v638_v12, %v642_v20  ;;  %v691_v12 = vld [vmem:[%s9763_s7 + $0x978] sm:$0xff] }
 0x2da   : > { %7247 = vmatprep.subr.bf16.mxu0 %v8316_v21  ;;  %7575 = vmatprep.subr.bf16.mxu1 %v8318_v22  ;;  %v8366_v21 = vcombine.high %v639_v15, %v643_v16  ;;  %v646_v22 = vld [vmem:[%s9763_s7 + $0x810] sm:$0xff] }
 0x2db   : > { %v8371_v38 = vcombine.low %v646_v22, %v650_v23 }
 0x2dd   : > { %7248 = vmatpush1.bf16.msra.mxu0 %v8315_v31  ;;  %7576 = vmatpush1.bf16.msra.mxu1 %v8317_v33  ;;  %v8365_v31 = vcombine.low %v639_v15, %v643_v16  ;;  %v8372_v33 = vcombine.high %v646_v22, %v650_v23  ;;  %v8405_v15 = vcombine.low %v679_v63, %v683_v2  ;;  %v699_v22 = vld [vmem:[%s9763_s7 + $0x9b8] sm:$0xff] }
 0x2de   : > { %7249 = vmatprep.subr.bf16.mxu0 %v8324_v35  ;;  %7577 = vmatprep.subr.bf16.mxu1 %v8326_v34  ;;  %v8374_v35 = vcombine.high %v647_v14, %v651_v25  ;;  %v654_v34 = vld [vmem:[%s9763_s7 + $0x850] sm:$0xff] }
 0x2df   : > { %v8379_v49 = vcombine.low %v654_v34, %v658_v0 }
 0x2e1   : > { %7250 = vmatpush1.bf16.msra.mxu0 %v8323_v29  ;;  %7578 = vmatpush1.bf16.msra.mxu1 %v8325_v56  ;;  %v8373_v29 = vcombine.low %v647_v14, %v651_v25  ;;  %v8380_v56 = vcombine.high %v654_v34, %v658_v0  ;;  %v707_v34 = vld [vmem:[%s9763_s7 + $0x9f8] sm:$0xff] }
 0x2e2   : > { %7251 = vmatprep.subr.bf16.mxu0 %v8332_v43  ;;  %7579 = vmatprep.subr.bf16.mxu1 %v8334_v44  ;;  %v8382_v43 = vcombine.high %v655_v36, %v659_v37  ;;  %v662_v44 = vld [vmem:[%s9763_s7 + $0x890] sm:$0xff] }
 0x2e5   : > { %7252 = vmatpush1.bf16.msra.mxu0 %v8331_v50  ;;  %7580 = vmatpush1.bf16.msra.mxu1 %v8333_v10  ;;  %v8381_v50 = vcombine.low %v655_v36, %v659_v37  ;;  %v8388_v10 = vcombine.high %v662_v44, %v666_v46 }
 0x2e6   : > { %7253 = vmatprep.subr.bf16.mxu0 %v8340_v51  ;;  %7581 = vmatprep.subr.bf16.mxu1 %v8342_v53  ;;  %v8390_v51 = vcombine.high %v663_v47, %v667_v48  ;;  %v670_v53 = vld [vmem:[%s9763_s7 + $0x8d0] sm:$0xff] }
 0x2e7   : > { %v8395_v4 = vcombine.low %v670_v53, %v674_v11 }
 0x2e9   : > { %7254 = vmatpush1.bf16.msra.mxu0 %v8339_v58  ;;  %7582 = vmatpush1.bf16.msra.mxu1 %v8341_v59  ;;  %v8396_v58 = vcombine.high %v670_v53, %v674_v11  ;;  %v8398_v59 = vcombine.high %v671_v55, %v675_v24  ;;  %v723_v53 = vld [vmem:[%s9763_s7 + $0xa78] sm:$0xff] }
 0x2ea   : > { %7255 = vmatprep.subr.bf16.mxu0 %v8348_v61  ;;  %7583 = vmatprep.subr.bf16.mxu1 %v8350_v62  ;;  %v678_v61 = vld [vmem:[%s9763_s7 + $0x910] sm:$0xff] }
 0x2eb   : > { %v682_v62 = vld [vmem:[%s9763_s7 + $0x930] sm:$0xff] }
 0x2ec   : > { %v8404_v5 = vcombine.high %v678_v61, %v682_v62  ;;  %v8403_v20 = vcombine.low %v678_v61, %v682_v62  ;;  %v731_v61 = vld [vmem:[%s9763_s7 + $0xab8] sm:$0xff] }
 0x2ed   : > { %7256 = vmatpush1.bf16.msra.mxu0 %v8347_v6  ;;  %7584 = vmatpush1.bf16.msra.mxu1 %v8349_v7  ;;  %v8406_v6 = vcombine.high %v679_v63, %v683_v2  ;;  %v686_v7 = vld [vmem:[%s9763_s7 + $0x950] sm:$0xff] }
 0x2ee   : > { %7257 = vmatprep.subr.bf16.mxu0 %v8356_v8  ;;  %7585 = vmatprep.subr.bf16.mxu1 %v8358_v9  ;;  %v690_v8 = vld [vmem:[%s9763_s7 + $0x970] sm:$0xff]  ;;  %v687_v9 = vld [vmem:[%s9763_s7 + $0x958] sm:$0xff] }
 0x2ef   : > { %v8412_v16 = vcombine.high %v686_v7, %v690_v8  ;;  %v8411_v23 = vcombine.low %v686_v7, %v690_v8  ;;  %v8413_v14 = vcombine.low %v687_v9, %v691_v12  ;;  %v739_v7 = vld [vmem:[%s9763_s7 + $0xaf8] sm:$0xff] }
 0x2f1   : > { %7258 = vmatpush1.bf16.msra.mxu0 %v8355_v60  ;;  %7586 = vmatpush1.bf16.msra.mxu1 %v8357_v19  ;;  %v8414_v60 = vcombine.high %v687_v9, %v691_v12  ;;  %v694_v19 = vld [vmem:[%s9763_s7 + $0x990] sm:$0xff] }
 0x2f2   : > { %7259 = vmatprep.subr.bf16.mxu0 %v8364_v26  ;;  %7587 = vmatprep.subr.bf16.mxu1 %v8366_v21  ;;  %v698_v26 = vld [vmem:[%s9763_s7 + $0x9b0] sm:$0xff]  ;;  %v695_v21 = vld [vmem:[%s9763_s7 + $0x998] sm:$0xff] }
 0x2f3   : > { %v8420_v25 = vcombine.high %v694_v19, %v698_v26  ;;  %v8419_v0 = vcombine.low %v694_v19, %v698_v26  ;;  %v8421_v36 = vcombine.low %v695_v21, %v699_v22  ;;  %v747_v19 = vld [vmem:[%s9763_s7 + $0xb38] sm:$0xff] }
 0x2f5   : > { %7260 = vmatpush1.bf16.msra.mxu0 %v8363_v28  ;;  %7588 = vmatpush1.bf16.msra.mxu1 %v8365_v31  ;;  %v8422_v28 = vcombine.high %v695_v21, %v699_v22  ;;  %v702_v31 = vld [vmem:[%s9763_s7 + $0x9d0] sm:$0xff] }
 0x2f6   : > { %7270 = vmatprep.subr.bf16.mxu0 %v8372_v33  ;;  %7598 = vmatprep.subr.bf16.mxu1 %v8374_v35  ;;  %v706_v33 = vld [vmem:[%s9763_s7 + $0x9f0] sm:$0xff]  ;;  %v703_v35 = vld [vmem:[%s9763_s7 + $0x9d8] sm:$0xff] }
 0x2f7   : > { %v8428_v37 = vcombine.high %v702_v31, %v706_v33  ;;  %v8429_v47 = vcombine.low %v703_v35, %v707_v34 }
 0x2f8   : > { %7262 = vmatmul.mubr.bf16.vlgmr.msra.gmra.mrb[4].mxu0 %v9970_v42  ;;  %7590 = vmatmul.mubr.bf16.vlgmr.msra.gmra.mrb[4].mxu1 %v9970_v42  ;;  %v8387_v42 = vcombine.low %v662_v44, %v666_v46  ;;  %v715_v44 = vld [vmem:[%s9763_s7 + $0xa38] sm:$0xff]  ;;  %v8427_v46 = vcombine.low %v702_v31, %v706_v33 }
 0x2f9   : > { %7271 = vmatpush1.bf16.msra.mxu0 %v8371_v38  ;;  %7599 = vmatpush1.bf16.msra.mxu1 %v8373_v29  ;;  %v8430_v38 = vcombine.high %v703_v35, %v707_v34  ;;  %v710_v29 = vld [vmem:[%s9763_s7 + $0xa10] sm:$0xff]  ;;  %v755_v31 = vld [vmem:[%s9763_s7 + $0xb78] sm:$0xff] }
 0x2fa   : > { %7272 = vmatprep.subr.bf16.mxu0 %v8380_v56  ;;  %7600 = vmatprep.subr.bf16.mxu1 %v8382_v43  ;;  %v714_v56 = vld [vmem:[%s9763_s7 + $0xa30] sm:$0xff]  ;;  %v711_v43 = vld [vmem:[%s9763_s7 + $0xa18] sm:$0xff] }
 0x2fb   : > { %7302 = vmatprep.mubr.bf16.mxu0 %v9976_v52  ;;  %7630 = vmatprep.mubr.bf16.mxu1 %v9976_v52  ;;  %v8397_v52 = vcombine.low %v671_v55, %v675_v24  ;;  %v8436_v48 = vcombine.high %v710_v29, %v714_v56  ;;  %v8435_v11 = vcombine.low %v710_v29, %v714_v56  ;;  %v763_v29 = vld [vmem:[%s9763_s7 + $0xbb8] sm:$0xff] }
 0x2fc   : > { %v8437_v55 = vcombine.low %v711_v43, %v715_v44 }
 0x2fd   : > { %7273 = vmatpush1.bf16.msra.mxu0 %v8379_v49  ;;  %7601 = vmatpush1.bf16.msra.mxu1 %v8381_v50  ;;  %v8438_v49 = vcombine.high %v711_v43, %v715_v44  ;;  %v718_v50 = vld [vmem:[%s9763_s7 + $0xa50] sm:$0xff] }
 0x2fe   : > { %7274 = vmatprep.subr.bf16.mxu0 %v8388_v10  ;;  %7602 = vmatprep.subr.bf16.mxu1 %v8390_v51  ;;  %v722_v10 = vld [vmem:[%s9763_s7 + $0xa70] sm:$0xff]  ;;  %v719_v51 = vld [vmem:[%s9763_s7 + $0xa58] sm:$0xff] }
 0x2ff   : > { %v8444_v24 = vcombine.high %v718_v50, %v722_v10  ;;  %v8443_v62 = vcombine.low %v718_v50, %v722_v10  ;;  %v8445_v63 = vcombine.low %v719_v51, %v723_v53  ;;  %v771_v50 = vld [vmem:[%s9763_s7 + $0xbf8] sm:$0xff] }
 0x301   : > { %7275 = vmatpush1.bf16.msra.mxu0 %v8387_v42  ;;  %7603 = vmatpush1.bf16.msra.mxu1 %v8389_v57  ;;  %v8446_v42 = vcombine.high %v719_v51, %v723_v53  ;;  %v726_v57 = vld [vmem:[%s9763_s7 + $0xa90] sm:$0xff] }
 0x302   : > { %7276 = vmatprep.subr.bf16.mxu0 %v8396_v58  ;;  %7604 = vmatprep.subr.bf16.mxu1 %v8398_v59  ;;  %v730_v58 = vld [vmem:[%s9763_s7 + $0xab0] sm:$0xff]  ;;  %v727_v59 = vld [vmem:[%s9763_s7 + $0xa98] sm:$0xff] }
 0x303   : > { %v8452_v2 = vcombine.high %v726_v57, %v730_v58  ;;  %v8451_v8 = vcombine.low %v726_v57, %v730_v58  ;;  %v8453_v9 = vcombine.low %v727_v59, %v731_v61  ;;  %v779_v57 = vld [vmem:[%s9763_s7 + $0xc38] sm:$0xff] }
 0x305   : > { %7277 = vmatpush1.bf16.msra.mxu0 %v8395_v4  ;;  %7605 = vmatpush1.bf16.msra.mxu1 %v8397_v52  ;;  %v8454_v4 = vcombine.high %v727_v59, %v731_v61  ;;  %v734_v52 = vld [vmem:[%s9763_s7 + $0xad0] sm:$0xff] }
 0x306   : > { %7278 = vmatprep.subr.bf16.mxu0 %v8404_v5  ;;  %7606 = vmatprep.subr.bf16.mxu1 %v8406_v6  ;;  %v738_v5 = vld [vmem:[%s9763_s7 + $0xaf0] sm:$0xff]  ;;  %v735_v6 = vld [vmem:[%s9763_s7 + $0xad8] sm:$0xff] }
 0x307   : > { %v8460_v12 = vcombine.high %v734_v52, %v738_v5  ;;  %v8459_v26 = vcombine.low %v734_v52, %v738_v5  ;;  %v8461_v21 = vcombine.low %v735_v6, %v739_v7  ;;  %v787_v52 = vld [vmem:[%s9763_s7 + $0xc78] sm:$0xff] }
 0x309   : > { %7279 = vmatpush1.bf16.msra.mxu0 %v8403_v20  ;;  %7607 = vmatpush1.bf16.msra.mxu1 %v8405_v15  ;;  %v8462_v20 = vcombine.high %v735_v6, %v739_v7  ;;  %v742_v15 = vld [vmem:[%s9763_s7 + $0xb10] sm:$0xff] }
 0x30a   : > { %7280 = vmatprep.subr.bf16.mxu0 %v8412_v16  ;;  %7608 = vmatprep.subr.bf16.mxu1 %v8414_v60  ;;  %v746_v16 = vld [vmem:[%s9763_s7 + $0xb30] sm:$0xff]  ;;  %v743_v60 = vld [vmem:[%s9763_s7 + $0xb18] sm:$0xff] }
 0x30b   : > { %v8468_v22 = vcombine.high %v742_v15, %v746_v16  ;;  %v8467_v33 = vcombine.low %v742_v15, %v746_v16  ;;  %v8469_v35 = vcombine.low %v743_v60, %v747_v19  ;;  %v795_v15 = vld [vmem:[%s9763_s7 + $0xcb8] sm:$0xff] }
 0x30d   : > { %7281 = vmatpush1.bf16.msra.mxu0 %v8411_v23  ;;  %7609 = vmatpush1.bf16.msra.mxu1 %v8413_v14  ;;  %v8470_v23 = vcombine.high %v743_v60, %v747_v19  ;;  %v750_v14 = vld [vmem:[%s9763_s7 + $0xb50] sm:$0xff] }
 0x30e   : > { %7282 = vmatprep.subr.bf16.mxu0 %v8420_v25  ;;  %7610 = vmatprep.subr.bf16.mxu1 %v8422_v28  ;;  %v754_v25 = vld [vmem:[%s9763_s7 + $0xb70] sm:$0xff]  ;;  %v751_v28 = vld [vmem:[%s9763_s7 + $0xb58] sm:$0xff] }
 0x30f   : > { %v8476_v34 = vcombine.high %v750_v14, %v754_v25  ;;  %v8475_v56 = vcombine.low %v750_v14, %v754_v25  ;;  %v8477_v43 = vcombine.low %v751_v28, %v755_v31  ;;  %v803_v14 = vld [vmem:[%s9763_s7 + $0xcf8] sm:$0xff] }
 0x311   : > { %7283 = vmatpush1.bf16.msra.mxu0 %v8419_v0  ;;  %7611 = vmatpush1.bf16.msra.mxu1 %v8421_v36  ;;  %v8478_v0 = vcombine.high %v751_v28, %v755_v31  ;;  %v758_v36 = vld [vmem:[%s9763_s7 + $0xb90] sm:$0xff] }
 0x312   : > { %7284 = vmatprep.subr.bf16.mxu0 %v8428_v37  ;;  %7612 = vmatprep.subr.bf16.mxu1 %v8430_v38  ;;  %v762_v37 = vld [vmem:[%s9763_s7 + $0xbb0] sm:$0xff]  ;;  %v759_v38 = vld [vmem:[%s9763_s7 + $0xb98] sm:$0xff] }
 0x313   : > { %v8484_v44 = vcombine.high %v758_v36, %v762_v37  ;;  %v8483_v10 = vcombine.low %v758_v36, %v762_v37  ;;  %v8485_v51 = vcombine.low %v759_v38, %v763_v29 }
 0x315   : > { %7285 = vmatpush1.bf16.msra.mxu0 %v8427_v46  ;;  %7613 = vmatpush1.bf16.msra.mxu1 %v8429_v47  ;;  %v8486_v46 = vcombine.high %v759_v38, %v763_v29  ;;  %v766_v47 = vld [vmem:[%s9763_s7 + $0xbd0] sm:$0xff] }
 0x316   : > { %7286 = vmatprep.subr.bf16.mxu0 %v8436_v48  ;;  %7614 = vmatprep.subr.bf16.mxu1 %v8438_v49  ;;  %v770_v48 = vld [vmem:[%s9763_s7 + $0xbf0] sm:$0xff]  ;;  %v767_v49 = vld [vmem:[%s9763_s7 + $0xbd8] sm:$0xff] }
 0x317   : > { %v8492_v53 = vcombine.high %v766_v47, %v770_v48  ;;  %v8491_v58 = vcombine.low %v766_v47, %v770_v48  ;;  %v8493_v59 = vcombine.low %v767_v49, %v771_v50  ;;  %v814_v29 = vld [vmem:[%s9763_s7 + $0xd50] sm:$0xff] }
 0x319   : > { %7287 = vmatpush1.bf16.msra.mxu0 %v8435_v11  ;;  %7615 = vmatpush1.bf16.msra.mxu1 %v8437_v55  ;;  %v8494_v11 = vcombine.high %v767_v49, %v771_v50  ;;  %v774_v55 = vld [vmem:[%s9763_s7 + $0xc10] sm:$0xff] }
 0x31a   : > { %7288 = vmatprep.subr.bf16.mxu0 %v8444_v24  ;;  %7616 = vmatprep.subr.bf16.mxu1 %v8446_v42  ;;  %v778_v24 = vld [vmem:[%s9763_s7 + $0xc30] sm:$0xff]  ;;  %v775_v42 = vld [vmem:[%s9763_s7 + $0xc18] sm:$0xff] }
 0x31b   : > { %v8500_v61 = vcombine.high %v774_v55, %v778_v24  ;;  %v8499_v5 = vcombine.low %v774_v55, %v778_v24  ;;  %v8501_v6 = vcombine.low %v775_v42, %v779_v57  ;;  %v822_v50 = vld [vmem:[%s9763_s7 + $0xd90] sm:$0xff] }
 0x31d   : > { %7289 = vmatpush1.bf16.msra.mxu0 %v8443_v62  ;;  %7617 = vmatpush1.bf16.msra.mxu1 %v8445_v63  ;;  %v8502_v62 = vcombine.high %v775_v42, %v779_v57  ;;  %v782_v63 = vld [vmem:[%s9763_s7 + $0xc50] sm:$0xff] }
 0x31e   : > { %7290 = vmatprep.subr.bf16.mxu0 %v8452_v2  ;;  %7618 = vmatprep.subr.bf16.mxu1 %v8454_v4  ;;  %v786_v2 = vld [vmem:[%s9763_s7 + $0xc70] sm:$0xff]  ;;  %v783_v4 = vld [vmem:[%s9763_s7 + $0xc58] sm:$0xff] }
 0x31f   : > { %v8508_v7 = vcombine.high %v782_v63, %v786_v2  ;;  %v8507_v16 = vcombine.low %v782_v63, %v786_v2  ;;  %v8509_v60 = vcombine.low %v783_v4, %v787_v52  ;;  %v831_v63 = vld [vmem:[%s9763_s7 + $0xdd8] sm:$0xff] }
 0x320   : > { %v835_v2 = vld [vmem:[%s9763_s7 + $0xdf8] sm:$0xff] }
 0x321   : > { %7291 = vmatpush1.bf16.msra.mxu0 %v8451_v8  ;;  %7619 = vmatpush1.bf16.msra.mxu1 %v8453_v9  ;;  %v8510_v8 = vcombine.high %v783_v4, %v787_v52  ;;  %v790_v9 = vld [vmem:[%s9763_s7 + $0xc90] sm:$0xff] }
 0x322   : > { %7292 = vmatprep.subr.bf16.mxu0 %v8460_v12  ;;  %7620 = vmatprep.subr.bf16.mxu1 %v8462_v20  ;;  %v794_v12 = vld [vmem:[%s9763_s7 + $0xcb0] sm:$0xff]  ;;  %v791_v20 = vld [vmem:[%s9763_s7 + $0xc98] sm:$0xff] }
 0x323   : > { %v8516_v19 = vcombine.high %v790_v9, %v794_v12  ;;  %v8517_v25 = vcombine.low %v791_v20, %v795_v15 }
 0x325   : > { %7293 = vmatpush1.bf16.msra.mxu0 %v8459_v26  ;;  %7621 = vmatpush1.bf16.msra.mxu1 %v8461_v21  ;;  %v8518_v26 = vcombine.high %v791_v20, %v795_v15  ;;  %v798_v21 = vld [vmem:[%s9763_s7 + $0xcd0] sm:$0xff] }
 0x326   : > { %7294 = vmatprep.subr.bf16.mxu0 %v8468_v22  ;;  %7622 = vmatprep.subr.bf16.mxu1 %v8470_v23  ;;  %v802_v22 = vld [vmem:[%s9763_s7 + $0xcf0] sm:$0xff]  ;;  %v799_v23 = vld [vmem:[%s9763_s7 + $0xcd8] sm:$0xff] }
 0x327   : > { %v8524_v28 = vcombine.high %v798_v21, %v802_v22  ;;  %v8526_v31 = vcombine.high %v799_v23, %v803_v14  ;;  %v8523_v36 = vcombine.low %v798_v21, %v802_v22  ;;  %v839_v22 = vld [vmem:[%s9763_s7 + $0xe18] sm:$0xff] }
 0x329   : > { %7295 = vmatpush1.bf16.msra.mxu0 %v8467_v33  ;;  %7623 = vmatpush1.bf16.msra.mxu1 %v8469_v35  ;;  %v806_v33 = vld [vmem:[%s9763_s7 + $0xd10] sm:$0xff] }
 0x32a   : > { %7296 = vmatprep.subr.bf16.mxu0 %v8476_v34  ;;  %7624 = vmatprep.subr.bf16.mxu1 %v8478_v0  ;;  %v810_v35 = vld [vmem:[%s9763_s7 + $0xd30] sm:$0xff]  ;;  %v807_v34 = vld [vmem:[%s9763_s7 + $0xd18] sm:$0xff] }
 0x32b   : > { %v811_v0 = vld [vmem:[%s9763_s7 + $0xd38] sm:$0xff]  ;;  %v8532_v37 = vcombine.high %v806_v33, %v810_v35 }
 0x32c   : > { %v8534_v38 = vcombine.high %v807_v34, %v811_v0  ;;  %v8533_v47 = vcombine.low %v807_v34, %v811_v0  ;;  %v850_v34 = vld [vmem:[%s9763_s7 + $0xe70] sm:$0xff] }
 0x32d   : > { %7297 = vmatpush1.bf16.msra.mxu0 %v8475_v56  ;;  %7625 = vmatpush1.bf16.msra.mxu1 %v8477_v43  ;;  %v818_v56 = vld [vmem:[%s9763_s7 + $0xd70] sm:$0xff]  ;;  %v815_v43 = vld [vmem:[%s9763_s7 + $0xd58] sm:$0xff] }
 0x32e   : > { %7298 = vmatprep.subr.bf16.mxu0 %v8484_v44  ;;  %7626 = vmatprep.subr.bf16.mxu1 %v8486_v46  ;;  %v819_v44 = vld [vmem:[%s9763_s7 + $0xd78] sm:$0xff]  ;;  %v8531_v46 = vcombine.low %v806_v33, %v810_v35  ;;  %v8540_v48 = vcombine.high %v814_v29, %v818_v56  ;;  %v846_v35 = vld [vmem:[%s9763_s7 + $0xe50] sm:$0xff] }
 0x32f   : > { %v8542_v49 = vcombine.high %v815_v43, %v819_v44  ;;  %v8541_v55 = vcombine.low %v815_v43, %v819_v44  ;;  %v854_v43 = vld [vmem:[%s9763_s7 + $0xe90] sm:$0xff] }
 0x330   : > { %v858_v44 = vld [vmem:[%s9763_s7 + $0xeb0] sm:$0xff] }
 0x331   : > { %7299 = vmatpush1.bf16.msra.mxu0 %v8483_v10  ;;  %7627 = vmatpush1.bf16.msra.mxu1 %v8485_v51  ;;  %v826_v10 = vld [vmem:[%s9763_s7 + $0xdb0] sm:$0xff]  ;;  %v823_v51 = vld [vmem:[%s9763_s7 + $0xd98] sm:$0xff] }
 0x332   : > { %7300 = vmatprep.subr.bf16.mxu0 %v8492_v53  ;;  %7628 = vmatprep.subr.bf16.mxu1 %v8494_v11  ;;  %v827_v53 = vld [vmem:[%s9763_s7 + $0xdb8] sm:$0xff]  ;;  %v8539_v11 = vcombine.low %v814_v29, %v818_v56  ;;  %v8548_v24 = vcombine.high %v822_v50, %v826_v10  ;;  %v8572_v29 = vcombine.high %v846_v35, %v850_v34 }
 0x333   : > { %v8550_v57 = vcombine.high %v823_v51, %v827_v53 }
 0x335   : > { %7301 = vmatpush1.bf16.msra.mxu0 %v8491_v58  ;;  %7629 = vmatpush1.bf16.msra.mxu1 %v8493_v59  ;;  %v830_v58 = vld [vmem:[%s9763_s7 + $0xdd0] sm:$0xff] }
 0x336   : > { %7311 = vmatprep.subr.bf16.mxu0 %v8500_v61  ;;  %7639 = vmatprep.subr.bf16.mxu1 %v8502_v62  ;;  %v834_v59 = vld [vmem:[%s9763_s7 + $0xdf0] sm:$0xff] }
 0x337   : > { %v8556_v20 = vcombine.high %v830_v58, %v834_v59 }
 0x338   : > { %7303 = vmatmul.mubr.bf16.vlgmr.msra.gmra.mrb[4].mxu0 %v10051_v3  ;;  %7631 = vmatmul.mubr.bf16.vlgmr.msra.gmra.mrb[4].mxu1 %v10051_v3  ;;  %v8515_v3 = vcombine.low %v790_v9, %v794_v12  ;;  %v8549_v12 = vcombine.low %v823_v51, %v827_v53  ;;  %v862_v51 = vld [vmem:[%s9763_s7 + $0xed0] sm:$0xff] }
 0x339   : > { %7312 = vmatpush1.bf16.msra.mxu0 %v8499_v5  ;;  %7640 = vmatpush1.bf16.msra.mxu1 %v8501_v6  ;;  %v8547_v6 = vcombine.low %v822_v50, %v826_v10  ;;  %v8580_v50 = vcombine.high %v854_v43, %v858_v44  ;;  %v866_v53 = vld [vmem:[%s9763_s7 + $0xef0] sm:$0xff] }
 0x33a   : > { %7313 = vmatprep.subr.bf16.mxu0 %v8508_v7  ;;  %7641 = vmatprep.subr.bf16.mxu1 %v8510_v8 }
 0x33b   : > { %7343 = vmatprep.mubr.bf16.mxu0 %v10057_v13  ;;  %7671 = vmatprep.mubr.bf16.mxu1 %v10057_v13  ;;  %v8525_v13 = vcombine.low %v799_v23, %v803_v14  ;;  %v843_v23 = vld [vmem:[%s9763_s7 + $0xe38] sm:$0xff]  ;;  %v278_v14 = vld [vmem:[#allocation2] sm:$0xff] }
 0x33c   : > { %v8566_v33 = vcombine.high %v839_v22, %v843_v23 }
 0x33d   : > { %7314 = vmatpush1.bf16.msra.mxu0 %v8507_v16  ;;  %7642 = vmatpush1.bf16.msra.mxu1 %v8509_v60  ;;  %v8558_v60 = vcombine.high %v831_v63, %v835_v2 }
 0x33e   : > { %7315 = vmatprep.subr.bf16.mxu0 %v8516_v19  ;;  %7643 = vmatprep.subr.bf16.mxu1 %v8518_v26  ;;  %v838_v19 = vld [vmem:[%s9763_s7 + $0xe10] sm:$0xff] }
 0x33f   : > { %v842_v26 = vld [vmem:[%s9763_s7 + $0xe30] sm:$0xff] }
 0x341   : > { %7316 = vmatpush1.bf16.msra.mxu0 %v8515_v3  ;;  %7644 = vmatpush1.bf16.msra.mxu1 %v8517_v25  ;;  %v8555_v3 = vcombine.low %v830_v58, %v834_v59  ;;  %v870_v59 = vld [vmem:[%s9763_s7 + $0xf10] sm:$0xff] }
 0x342   : > { %7317 = vmatprep.subr.bf16.mxu0 %v8524_v28  ;;  %7645 = vmatprep.subr.bf16.mxu1 %v8526_v31  ;;  %v8557_v28 = vcombine.low %v831_v63, %v835_v2  ;;  %v8564_v31 = vcombine.high %v838_v19, %v842_v26  ;;  %v875_v63 = vld [vmem:[%s9763_s7 + $0xf38] sm:$0xff]  ;;  %v8587_v2 = vcombine.low %v862_v51, %v866_v53 }
 0x345   : > { %7318 = vmatpush1.bf16.msra.mxu0 %v8523_v36  ;;  %7646 = vmatpush1.bf16.msra.mxu1 %v8525_v13  ;;  %v847_v36 = vld [vmem:[%s9763_s7 + $0xe58] sm:$0xff] }
 0x346   : > { %7319 = vmatprep.subr.bf16.mxu0 %v8532_v37  ;;  %7647 = vmatprep.subr.bf16.mxu1 %v8534_v38  ;;  %v851_v13 = vld [vmem:[%s9763_s7 + $0xe78] sm:$0xff]  ;;  %v8563_v37 = vcombine.low %v838_v19, %v842_v26  ;;  %v8565_v38 = vcombine.low %v839_v22, %v843_v23  ;;  %v890_v19 = vld [vmem:[%s9763_s7 + $0xfb0] sm:$0xff] }
 0x347   : > { %v8574_v56 = vcombine.high %v847_v36, %v851_v13  ;;  %v887_v26 = vld [vmem:[%s9763_s7 + $0xf98] sm:$0xff] }
 0x349   : > { %7320 = vmatpush1.bf16.msra.mxu0 %v8531_v46  ;;  %7648 = vmatpush1.bf16.msra.mxu1 %v8533_v47  ;;  %v855_v46 = vld [vmem:[%s9763_s7 + $0xe98] sm:$0xff] }
 0x34a   : > { %7321 = vmatprep.subr.bf16.mxu0 %v8540_v48  ;;  %7649 = vmatprep.subr.bf16.mxu1 %v8542_v49  ;;  %v859_v47 = vld [vmem:[%s9763_s7 + $0xeb8] sm:$0xff]  ;;  %v8571_v48 = vcombine.low %v846_v35, %v850_v34  ;;  %v8573_v49 = vcombine.low %v847_v36, %v851_v13  ;;  %v902_v13 = vld [vmem:[%s9763_s7 + $0x1010] sm:$0xff] }
 0x34b   : > { %v6853_v42 = vpop.f32.mrb[0].mxu0  ;;  %v7181_v61 = vpop.f32.mrb[0].mxu1  ;;  %v8582_v10 = vcombine.high %v855_v46, %v859_v47 }
 0x34c   : > { %v6855_v62 = vpop.f32.mrb[1].mxu0  ;;  %v7183_v52 = vpop.f32.mrb[1].mxu1 }
 0x34d   : > { %v7852_v4 = vcombine.low %v6853_v42, %v6855_v62  ;;  %v6857_v5 = vpop.f32.mrb[2].mxu0  ;;  %7322 = vmatpush1.bf16.msra.mxu0 %v8539_v11  ;;  %v7853_v7 = vcombine.low %v7181_v61, %v7183_v52  ;;  %v7185_v8 = vpop.f32.mrb[2].mxu1  ;;  %7650 = vmatpush1.bf16.msra.mxu1 %v8541_v55  ;;  %v863_v11 = vld [vmem:[%s9763_s7 + $0xed8] sm:$0xff]  ;;  %v8581_v42 = vcombine.low %v855_v46, %v859_v47  ;;  %v874_v61 = vld [vmem:[%s9763_s7 + $0xf30] sm:$0xff] }
 0x34e   : > { %v6858_v9 = vpop.f32.mrb[3].mxu0  ;;  %7323 = vmatprep.subr.bf16.mxu0 %v8548_v24  ;;  %v7186_v16 = vpop.f32.mrb[3].mxu1  ;;  %7651 = vmatprep.subr.bf16.mxu1 %v8550_v57  ;;  %v867_v55 = vld [vmem:[%s9763_s7 + $0xef8] sm:$0xff]  ;;  %v8579_v24 = vcombine.low %v854_v43, %v858_v44  ;;  %v8588_v57 = vcombine.high %v862_v51, %v866_v53  ;;  %v8596_v52 = vcombine.high %v870_v59, %v874_v61  ;;  %v910_v47 = vld [vmem:[%s9763_s7 + $0x1050] sm:$0xff] }
 0x34f   : > { %v7860_v15 = vrot.slane %v7852_v4, %v9819_v54  ;;  %v7867_v21 = vrot.slane %v7853_v7, %v9819_v54  ;;  %v8590_v58 = vcombine.high %v863_v11, %v867_v55  ;;  %v871_v62 = vld [vmem:[%s9763_s7 + $0xf18] sm:$0xff]  ;;  %v8589_v4 = vcombine.low %v863_v11, %v867_v55  ;;  %v882_v7 = vld [vmem:[%s9763_s7 + $0xf70] sm:$0xff] }
 0x350   : > { %v8598_v5 = vcombine.high %v871_v62, %v875_v63  ;;  %v879_v8 = vld [vmem:[%s9763_s7 + $0xf58] sm:$0xff]  ;;  %v918_v55 = vld [vmem:[%s9763_s7 + $0x1090] sm:$0xff] }
 0x351   : > { %7324 = vmatpush1.bf16.msra.mxu0 %v8547_v6  ;;  %v7868_v25 = vcombine.low %v7860_v15, %v7867_v21  ;;  %7652 = vmatpush1.bf16.msra.mxu1 %v8549_v12  ;;  %v878_v6 = vld [vmem:[%s9763_s7 + $0xf50] sm:$0xff]  ;;  %v883_v9 = vld [vmem:[%s9763_s7 + $0xf78] sm:$0xff]  ;;  %v8595_v12 = vcombine.low %v870_v59, %v874_v61 }
 0x352   : > { %7325 = vmatprep.subr.bf16.mxu0 %v8556_v20  ;;  %7653 = vmatprep.subr.bf16.mxu1 %v8558_v60  ;;  %v8597_v20 = vcombine.low %v871_v62, %v875_v63  ;;  %v8604_v15 = vcombine.high %v878_v6, %v882_v7  ;;  %v8606_v16 = vcombine.high %v879_v8, %v883_v9  ;;  %v886_v60 = vld [vmem:[%s9763_s7 + $0xf90] sm:$0xff]  ;;  %v891_v21 = vld [vmem:[%s9763_s7 + $0xfb8] sm:$0xff] }
 0x353   : > { %v7888_v0 = vadd.f32 %v7868_v25, %v278_v14  ;;  %v8603_v22 = vcombine.low %v878_v6, %v882_v7  ;;  %v8605_v23 = vcombine.low %v879_v8, %v883_v9  ;;  %v8612_v14 = vcombine.high %v886_v60, %v890_v19  ;;  %v894_v25 = vld [vmem:[%s9763_s7 + $0xfd0] sm:$0xff] }
 0x354   : > { %v8611_v35 = vcombine.low %v886_v60, %v890_v19  ;;  %v8613_v34 = vcombine.low %v887_v26, %v891_v21  ;;  %v926_v63 = vld [vmem:[%s9763_s7 + $0x10d0] sm:$0xff] }
 0x355   : > { %7326 = vmatpush1.bf16.msra.mxu0 %v8555_v3  ;;  %7890 = vst [vmem:[#allocation2] sm:$0xff] %v7888_v0  ;;  %7654 = vmatpush1.bf16.msra.mxu1 %v8557_v28  ;;  %v8614_v3 = vcombine.high %v887_v26, %v891_v21  ;;  %v898_v28 = vld [vmem:[%s9763_s7 + $0xff0] sm:$0xff]  ;;  %v943_v21 = vld [vmem:[%s9763_s7 + $0x1158] sm:$0xff] }
 0x356   : > { %7327 = vmatprep.subr.bf16.mxu0 %v8564_v31  ;;  %7655 = vmatprep.subr.bf16.mxu1 %v8566_v33  ;;  %v895_v31 = vld [vmem:[%s9763_s7 + $0xfd8] sm:$0xff]  ;;  %v8620_v0 = vcombine.high %v894_v25, %v898_v28  ;;  %v934_v8 = vld [vmem:[%s9763_s7 + $0x1110] sm:$0xff] }
 0x357   : > { %v899_v33 = vld [vmem:[%s9763_s7 + $0xff8] sm:$0xff]  ;;  %v938_v9 = vld [vmem:[%s9763_s7 + $0x1130] sm:$0xff] }
 0x358   : > { %v8622_v36 = vcombine.high %v895_v31, %v899_v33  ;;  %v8621_v43 = vcombine.low %v895_v31, %v899_v33  ;;  %v942_v19 = vld [vmem:[%s9763_s7 + $0x1150] sm:$0xff]  ;;  %v951_v33 = vld [vmem:[%s9763_s7 + $0x1198] sm:$0xff] }
 0x359   : > { %7328 = vmatpush1.bf16.msra.mxu0 %v8563_v37  ;;  %7656 = vmatpush1.bf16.msra.mxu1 %v8565_v38  ;;  %v906_v37 = vld [vmem:[%s9763_s7 + $0x1030] sm:$0xff]  ;;  %v903_v38 = vld [vmem:[%s9763_s7 + $0x1018] sm:$0xff] }
 0x35a   : > { %7329 = vmatprep.subr.bf16.mxu0 %v8572_v29  ;;  %7657 = vmatprep.subr.bf16.mxu1 %v8574_v56  ;;  %v907_v29 = vld [vmem:[%s9763_s7 + $0x1038] sm:$0xff]  ;;  %v8619_v56 = vcombine.low %v894_v25, %v898_v28  ;;  %v8628_v44 = vcombine.high %v902_v13, %v906_v37  ;;  %v946_v26 = vld [vmem:[%s9763_s7 + $0x1170] sm:$0xff] }
 0x35b   : > { %v8630_v46 = vcombine.high %v903_v38, %v907_v29  ;;  %v8629_v51 = vcombine.low %v903_v38, %v907_v29  ;;  %v950_v28 = vld [vmem:[%s9763_s7 + $0x1190] sm:$0xff]  ;;  %v959_v29 = vld [vmem:[%s9763_s7 + $0x11d8] sm:$0xff] }
 0x35c   : > { %v954_v31 = vld [vmem:[%s9763_s7 + $0x11b0] sm:$0xff] }
 0x35d   : > { %7330 = vmatpush1.bf16.msra.mxu0 %v8571_v48  ;;  %7658 = vmatpush1.bf16.msra.mxu1 %v8573_v49  ;;  %v914_v48 = vld [vmem:[%s9763_s7 + $0x1070] sm:$0xff]  ;;  %v911_v49 = vld [vmem:[%s9763_s7 + $0x1058] sm:$0xff] }
 0x35e   : > { %7331 = vmatprep.subr.bf16.mxu0 %v8580_v50  ;;  %7659 = vmatprep.subr.bf16.mxu1 %v8582_v10  ;;  %v915_v50 = vld [vmem:[%s9763_s7 + $0x1078] sm:$0xff]  ;;  %v8627_v10 = vcombine.low %v902_v13, %v906_v37  ;;  %v8636_v53 = vcombine.high %v910_v47, %v914_v48  ;;  %v958_v37 = vld [vmem:[%s9763_s7 + $0x11d0] sm:$0xff] }
 0x35f   : > { %v8638_v11 = vcombine.high %v911_v49, %v915_v50  ;;  %v8637_v59 = vcombine.low %v911_v49, %v915_v50  ;;  %v962_v38 = vld [vmem:[%s9763_s7 + $0x11f0] sm:$0xff]  ;;  %v967_v50 = vld [vmem:[%s9763_s7 + $0x1218] sm:$0xff] }
 0x360   : > { %v970_v49 = vld [vmem:[%s9763_s7 + $0x1230] sm:$0xff] }
 0x361   : > { %7332 = vmatpush1.bf16.msra.mxu0 %v8579_v24  ;;  %7660 = vmatpush1.bf16.msra.mxu1 %v8581_v42  ;;  %v922_v24 = vld [vmem:[%s9763_s7 + $0x10b0] sm:$0xff]  ;;  %v919_v42 = vld [vmem:[%s9763_s7 + $0x1098] sm:$0xff] }
 0x362   : > { %7333 = vmatprep.subr.bf16.mxu0 %v8588_v57  ;;  %7661 = vmatprep.subr.bf16.mxu1 %v8590_v58  ;;  %v923_v57 = vld [vmem:[%s9763_s7 + $0x10b8] sm:$0xff]  ;;  %v8635_v58 = vcombine.low %v910_v47, %v914_v48  ;;  %v8644_v61 = vcombine.high %v918_v55, %v922_v24  ;;  %v966_v48 = vld [vmem:[%s9763_s7 + $0x1210] sm:$0xff] }
 0x363   : > { %v8646_v62 = vcombine.high %v919_v42, %v923_v57 }
 0x365   : > { %7334 = vmatpush1.bf16.msra.mxu0 %v8587_v2  ;;  %7662 = vmatpush1.bf16.msra.mxu1 %v8589_v4  ;;  %v930_v2 = vld [vmem:[%s9763_s7 + $0x10f0] sm:$0xff]  ;;  %v927_v4 = vld [vmem:[%s9763_s7 + $0x10d8] sm:$0xff] }
 0x366   : > { %7335 = vmatprep.subr.bf16.mxu0 %v8596_v52  ;;  %7663 = vmatprep.subr.bf16.mxu1 %v8598_v5  ;;  %v931_v52 = vld [vmem:[%s9763_s7 + $0x10f8] sm:$0xff]  ;;  %v8645_v5 = vcombine.low %v919_v42, %v923_v57  ;;  %v8652_v6 = vcombine.high %v926_v63, %v930_v2  ;;  %v978_v42 = vld [vmem:[%s9763_s7 + $0x1270] sm:$0xff] }
 0x367   : > { %v8654_v7 = vcombine.high %v927_v4, %v931_v52  ;;  %v975_v57 = vld [vmem:[%s9763_s7 + $0x1258] sm:$0xff] }
 0x369   : > { %7336 = vmatpush1.bf16.msra.mxu0 %v8595_v12  ;;  %7664 = vmatpush1.bf16.msra.mxu1 %v8597_v20  ;;  %v935_v12 = vld [vmem:[%s9763_s7 + $0x1118] sm:$0xff] }
 0x36a   : > { %7337 = vmatprep.subr.bf16.mxu0 %v8604_v15  ;;  %7665 = vmatprep.subr.bf16.mxu1 %v8606_v16  ;;  %v939_v20 = vld [vmem:[%s9763_s7 + $0x1138] sm:$0xff]  ;;  %v8651_v15 = vcombine.low %v926_v63, %v930_v2  ;;  %v8660_v16 = vcombine.high %v934_v8, %v938_v9  ;;  %v982_v2 = vld [vmem:[%s9763_s7 + $0x1290] sm:$0xff] }
 0x36b   : > { %v8662_v60 = vcombine.high %v935_v12, %v939_v20 }
 0x36d   : > { %7338 = vmatpush1.bf16.msra.mxu0 %v8603_v22  ;;  %7666 = vmatpush1.bf16.msra.mxu1 %v8605_v23  ;;  %v947_v22 = vld [vmem:[%s9763_s7 + $0x1178] sm:$0xff]  ;;  %v8659_v23 = vcombine.low %v934_v8, %v938_v9  ;;  %v990_v9 = vld [vmem:[%s9763_s7 + $0x12d0] sm:$0xff] }
 0x36e   : > { %7339 = vmatprep.subr.bf16.mxu0 %v8612_v14  ;;  %7667 = vmatprep.subr.bf16.mxu1 %v8614_v3  ;;  %v8661_v14 = vcombine.low %v935_v12, %v939_v20  ;;  %v8668_v3 = vcombine.high %v942_v19, %v946_v26  ;;  %v8670_v25 = vcombine.high %v943_v21, %v947_v22  ;;  %v994_v12 = vld [vmem:[%s9763_s7 + $0x12f0] sm:$0xff]  ;;  %v991_v20 = vld [vmem:[%s9763_s7 + $0x12d8] sm:$0xff] }
 0x371   : > { %7340 = vmatpush1.bf16.msra.mxu0 %v8611_v35  ;;  %7668 = vmatpush1.bf16.msra.mxu1 %v8613_v34  ;;  %v955_v35 = vld [vmem:[%s9763_s7 + $0x11b8] sm:$0xff]  ;;  %v8667_v34 = vcombine.low %v942_v19, %v946_v26  ;;  %v998_v26 = vld [vmem:[%s9763_s7 + $0x1310] sm:$0xff] }
 0x372   : > { %7341 = vmatprep.subr.bf16.mxu0 %v8620_v0  ;;  %7669 = vmatprep.subr.bf16.mxu1 %v8622_v36  ;;  %v8669_v0 = vcombine.low %v943_v21, %v947_v22  ;;  %v8676_v36 = vcombine.high %v950_v28, %v954_v31  ;;  %v8678_v13 = vcombine.high %v951_v33, %v955_v35  ;;  %v1002_v21 = vld [vmem:[%s9763_s7 + $0x1330] sm:$0xff]  ;;  %v999_v22 = vld [vmem:[%s9763_s7 + $0x1318] sm:$0xff] }
 0x375   : > { %7342 = vmatpush1.bf16.msra.mxu0 %v8619_v56  ;;  %7670 = vmatpush1.bf16.msra.mxu1 %v8621_v43  ;;  %v963_v56 = vld [vmem:[%s9763_s7 + $0x11f8] sm:$0xff]  ;;  %v8675_v43 = vcombine.low %v950_v28, %v954_v31  ;;  %v1006_v31 = vld [vmem:[%s9763_s7 + $0x1350] sm:$0xff] }
 0x376   : > { %7352 = vmatprep.subr.bf16.mxu0 %v8628_v44  ;;  %7680 = vmatprep.subr.bf16.mxu1 %v8630_v46  ;;  %v8677_v44 = vcombine.low %v951_v33, %v955_v35  ;;  %v8684_v46 = vcombine.high %v958_v37, %v962_v38  ;;  %v8686_v47 = vcombine.high %v959_v29, %v963_v56  ;;  %v1010_v33 = vld [vmem:[%s9763_s7 + $0x1370] sm:$0xff]  ;;  %v1007_v35 = vld [vmem:[%s9763_s7 + $0x1358] sm:$0xff] }
 0x378   : > { %7344 = vmatmul.mubr.bf16.vlgmr.msra.gmra.mrb[4].mxu0 %v10134_v30  ;;  %7672 = vmatmul.mubr.bf16.vlgmr.msra.gmra.mrb[4].mxu1 %v10134_v30  ;;  %v8643_v30 = vcombine.low %v918_v55, %v922_v24  ;;  %v974_v24 = vld [vmem:[%s9763_s7 + $0x1250] sm:$0xff] }
 0x379   : > { %7353 = vmatpush1.bf16.msra.mxu0 %v8627_v10  ;;  %7681 = vmatpush1.bf16.msra.mxu1 %v8629_v51  ;;  %v971_v10 = vld [vmem:[%s9763_s7 + $0x1238] sm:$0xff]  ;;  %v8683_v51 = vcombine.low %v958_v37, %v962_v38  ;;  %v1014_v38 = vld [vmem:[%s9763_s7 + $0x1390] sm:$0xff] }
 0x37a   : > { %7354 = vmatprep.subr.bf16.mxu0 %v8636_v53  ;;  %7682 = vmatprep.subr.bf16.mxu1 %v8638_v11  ;;  %v8685_v53 = vcombine.low %v959_v29, %v963_v56  ;;  %v8692_v11 = vcombine.high %v966_v48, %v970_v49  ;;  %v8694_v55 = vcombine.high %v967_v50, %v971_v10  ;;  %v1018_v29 = vld [vmem:[%s9763_s7 + $0x13b0] sm:$0xff]  ;;  %v1015_v56 = vld [vmem:[%s9763_s7 + $0x1398] sm:$0xff] }
 0x37b   : > { %7384 = vmatprep.mubr.bf16.mxu0 %v10140_v40  ;;  %7712 = vmatprep.mubr.bf16.mxu1 %v10140_v40  ;;  %v8653_v40 = vcombine.low %v927_v4, %v931_v52  ;;  %v986_v4 = vld [vmem:[%s9763_s7 + $0x12b0] sm:$0xff]  ;;  %v983_v52 = vld [vmem:[%s9763_s7 + $0x1298] sm:$0xff] }
 0x37d   : > { %7355 = vmatpush1.bf16.msra.mxu0 %v8635_v58  ;;  %7683 = vmatpush1.bf16.msra.mxu1 %v8637_v59  ;;  %v979_v58 = vld [vmem:[%s9763_s7 + $0x1278] sm:$0xff]  ;;  %v8691_v59 = vcombine.low %v966_v48, %v970_v49  ;;  %v1022_v49 = vld [vmem:[%s9763_s7 + $0x13d0] sm:$0xff] }
 0x37e   : > { %7356 = vmatprep.subr.bf16.mxu0 %v8644_v61  ;;  %7684 = vmatprep.subr.bf16.mxu1 %v8646_v62  ;;  %v8693_v61 = vcombine.low %v967_v50, %v971_v10  ;;  %v8700_v62 = vcombine.high %v974_v24, %v978_v42  ;;  %v8702_v63 = vcombine.high %v975_v57, %v979_v58  ;;  %v1026_v50 = vld [vmem:[%s9763_s7 + $0x13f0] sm:$0xff]  ;;  %v1023_v10 = vld [vmem:[%s9763_s7 + $0x13d8] sm:$0xff] }
 0x381   : > { %7357 = vmatpush1.bf16.msra.mxu0 %v8643_v30  ;;  %7685 = vmatpush1.bf16.msra.mxu1 %v8645_v5  ;;  %v987_v30 = vld [vmem:[%s9763_s7 + $0x12b8] sm:$0xff]  ;;  %v8699_v5 = vcombine.low %v974_v24, %v978_v42  ;;  %v1030_v42 = vld [vmem:[%s9763_s7 + $0x1410] sm:$0xff] }
 0x382   : > { %7358 = vmatprep.subr.bf16.mxu0 %v8652_v6  ;;  %7686 = vmatprep.subr.bf16.mxu1 %v8654_v7  ;;  %v8701_v6 = vcombine.low %v975_v57, %v979_v58  ;;  %v8708_v7 = vcombine.high %v982_v2, %v986_v4  ;;  %v8710_v8 = vcombine.high %v983_v52, %v987_v30  ;;  %v1034_v57 = vld [vmem:[%s9763_s7 + $0x1430] sm:$0xff]  ;;  %v1031_v58 = vld [vmem:[%s9763_s7 + $0x1418] sm:$0xff] }
 0x385   : > { %7359 = vmatpush1.bf16.msra.mxu0 %v8651_v15  ;;  %7687 = vmatpush1.bf16.msra.mxu1 %v8653_v40  ;;  %v995_v15 = vld [vmem:[%s9763_s7 + $0x12f8] sm:$0xff]  ;;  %v8707_v40 = vcombine.low %v982_v2, %v986_v4  ;;  %v1038_v4 = vld [vmem:[%s9763_s7 + $0x1450] sm:$0xff] }
 0x386   : > { %7360 = vmatprep.subr.bf16.mxu0 %v8660_v16  ;;  %7688 = vmatprep.subr.bf16.mxu1 %v8662_v60  ;;  %v8709_v16 = vcombine.low %v983_v52, %v987_v30  ;;  %v8716_v60 = vcombine.high %v990_v9, %v994_v12  ;;  %v8718_v19 = vcombine.high %v991_v20, %v995_v15  ;;  %v1042_v52 = vld [vmem:[%s9763_s7 + $0x1470] sm:$0xff]  ;;  %v1039_v30 = vld [vmem:[%s9763_s7 + $0x1458] sm:$0xff] }
 0x389   : > { %7361 = vmatpush1.bf16.msra.mxu0 %v8659_v23  ;;  %7689 = vmatpush1.bf16.msra.mxu1 %v8661_v14  ;;  %v1003_v23 = vld [vmem:[%s9763_s7 + $0x1338] sm:$0xff]  ;;  %v8715_v14 = vcombine.low %v990_v9, %v994_v12  ;;  %v1046_v12 = vld [vmem:[%s9763_s7 + $0x1490] sm:$0xff] }
 0x38a   : > { %7362 = vmatprep.subr.bf16.mxu0 %v8668_v3  ;;  %7690 = vmatprep.subr.bf16.mxu1 %v8670_v25  ;;  %v8717_v3 = vcombine.low %v991_v20, %v995_v15  ;;  %v8724_v25 = vcombine.high %v998_v26, %v1002_v21  ;;  %v8726_v28 = vcombine.high %v999_v22, %v1003_v23  ;;  %v1050_v20 = vld [vmem:[%s9763_s7 + $0x14b0] sm:$0xff]  ;;  %v1047_v15 = vld [vmem:[%s9763_s7 + $0x1498] sm:$0xff] }
 0x38d   : > { %7363 = vmatpush1.bf16.msra.mxu0 %v8667_v34  ;;  %7691 = vmatpush1.bf16.msra.mxu1 %v8669_v0  ;;  %v1011_v34 = vld [vmem:[%s9763_s7 + $0x1378] sm:$0xff]  ;;  %v8723_v0 = vcombine.low %v998_v26, %v1002_v21  ;;  %v1054_v21 = vld [vmem:[%s9763_s7 + $0x14d0] sm:$0xff] }
 0x38e   : > { %7364 = vmatprep.subr.bf16.mxu0 %v8676_v36  ;;  %7692 = vmatprep.subr.bf16.mxu1 %v8678_v13  ;;  %v8725_v36 = vcombine.low %v999_v22, %v1003_v23  ;;  %v8732_v13 = vcombine.high %v1006_v31, %v1010_v33  ;;  %v8734_v37 = vcombine.high %v1007_v35, %v1011_v34  ;;  %v1058_v22 = vld [vmem:[%s9763_s7 + $0x14f0] sm:$0xff]  ;;  %v1055_v23 = vld [vmem:[%s9763_s7 + $0x14d8] sm:$0xff] }
 0x391   : > { %7365 = vmatpush1.bf16.msra.mxu0 %v8675_v43  ;;  %7693 = vmatpush1.bf16.msra.mxu1 %v8677_v44  ;;  %v1019_v43 = vld [vmem:[%s9763_s7 + $0x13b8] sm:$0xff]  ;;  %v8731_v44 = vcombine.low %v1006_v31, %v1010_v33  ;;  %v1062_v31 = vld [vmem:[%s9763_s7 + $0x1510] sm:$0xff] }
 0x392   : > { %7366 = vmatprep.subr.bf16.mxu0 %v8684_v46  ;;  %7694 = vmatprep.subr.bf16.mxu1 %v8686_v47  ;;  %v8733_v46 = vcombine.low %v1007_v35, %v1011_v34  ;;  %v8740_v47 = vcombine.high %v1014_v38, %v1018_v29  ;;  %v8742_v48 = vcombine.high %v1015_v56, %v1019_v43  ;;  %v1066_v33 = vld [vmem:[%s9763_s7 + $0x1530] sm:$0xff]  ;;  %v1063_v35 = vld [vmem:[%s9763_s7 + $0x1518] sm:$0xff] }
 0x393   : > { %v1067_v34 = vld [vmem:[%s9763_s7 + $0x1538] sm:$0xff] }
 0x395   : > { %7367 = vmatpush1.bf16.msra.mxu0 %v8683_v51  ;;  %7695 = vmatpush1.bf16.msra.mxu1 %v8685_v53  ;;  %v1027_v51 = vld [vmem:[%s9763_s7 + $0x13f8] sm:$0xff]  ;;  %v8739_v53 = vcombine.low %v1014_v38, %v1018_v29  ;;  %v1074_v38 = vld [vmem:[%s9763_s7 + $0x1570] sm:$0xff] }
 0x396   : > { %7368 = vmatprep.subr.bf16.mxu0 %v8692_v11  ;;  %7696 = vmatprep.subr.bf16.mxu1 %v8694_v55  ;;  %v8741_v11 = vcombine.low %v1015_v56, %v1019_v43  ;;  %v8748_v55 = vcombine.high %v1022_v49, %v1026_v50  ;;  %v8750_v24 = vcombine.high %v1023_v10, %v1027_v51  ;;  %v1071_v29 = vld [vmem:[%s9763_s7 + $0x1558] sm:$0xff] }
 0x397   : > { %v1075_v56 = vld [vmem:[%s9763_s7 + $0x1578] sm:$0xff]  ;;  %v8787_v43 = vcombine.low %v1062_v31, %v1066_v33 }
 0x399   : > { %7369 = vmatpush1.bf16.msra.mxu0 %v8691_v59  ;;  %7697 = vmatpush1.bf16.msra.mxu1 %v8693_v61  ;;  %v1035_v59 = vld [vmem:[%s9763_s7 + $0x1438] sm:$0xff]  ;;  %v8747_v61 = vcombine.low %v1022_v49, %v1026_v50  ;;  %v1082_v49 = vld [vmem:[%s9763_s7 + $0x15b0] sm:$0xff] }
 0x39a   : > { %7370 = vmatprep.subr.bf16.mxu0 %v8700_v62  ;;  %7698 = vmatprep.subr.bf16.mxu1 %v8702_v63  ;;  %v8749_v62 = vcombine.low %v1023_v10, %v1027_v51  ;;  %v8756_v63 = vcombine.high %v1030_v42, %v1034_v57  ;;  %v8758_v2 = vcombine.high %v1031_v58, %v1035_v59  ;;  %v1079_v50 = vld [vmem:[%s9763_s7 + $0x1598] sm:$0xff] }
 0x39b   : > { %v1083_v10 = vld [vmem:[%s9763_s7 + $0x15b8] sm:$0xff] }
 0x39d   : > { %7371 = vmatpush1.bf16.msra.mxu0 %v8699_v5  ;;  %7699 = vmatpush1.bf16.msra.mxu1 %v8701_v6  ;;  %v1043_v5 = vld [vmem:[%s9763_s7 + $0x1478] sm:$0xff]  ;;  %v8755_v6 = vcombine.low %v1030_v42, %v1034_v57  ;;  %v1090_v42 = vld [vmem:[%s9763_s7 + $0x15f0] sm:$0xff] }
 0x39e   : > { %7372 = vmatprep.subr.bf16.mxu0 %v8708_v7  ;;  %7700 = vmatprep.subr.bf16.mxu1 %v8710_v8  ;;  %v8757_v7 = vcombine.low %v1031_v58, %v1035_v59  ;;  %v8764_v8 = vcombine.high %v1038_v4, %v1042_v52  ;;  %v8766_v9 = vcombine.high %v1039_v30, %v1043_v5  ;;  %v1087_v57 = vld [vmem:[%s9763_s7 + $0x15d8] sm:$0xff] }
 0x39f   : > { %v1091_v58 = vld [vmem:[%s9763_s7 + $0x15f8] sm:$0xff] }
 0x3a1   : > { %7373 = vmatpush1.bf16.msra.mxu0 %v8707_v40  ;;  %7701 = vmatpush1.bf16.msra.mxu1 %v8709_v16  ;;  %v1051_v40 = vld [vmem:[%s9763_s7 + $0x14b8] sm:$0xff]  ;;  %v8763_v16 = vcombine.low %v1038_v4, %v1042_v52  ;;  %v1098_v4 = vld [vmem:[%s9763_s7 + $0x1630] sm:$0xff] }
 0x3a2   : > { %7374 = vmatprep.subr.bf16.mxu0 %v8716_v60  ;;  %7702 = vmatprep.subr.bf16.mxu1 %v8718_v19  ;;  %v8765_v60 = vcombine.low %v1039_v30, %v1043_v5  ;;  %v8772_v19 = vcombine.high %v1046_v12, %v1050_v20  ;;  %v8774_v26 = vcombine.high %v1047_v15, %v1051_v40  ;;  %v1095_v52 = vld [vmem:[%s9763_s7 + $0x1618] sm:$0xff] }
 0x3a3   : > { %v1099_v30 = vld [vmem:[%s9763_s7 + $0x1638] sm:$0xff] }
 0x3a5   : > { %7375 = vmatpush1.bf16.msra.mxu0 %v8715_v14  ;;  %7703 = vmatpush1.bf16.msra.mxu1 %v8717_v3  ;;  %v1059_v14 = vld [vmem:[%s9763_s7 + $0x14f8] sm:$0xff]  ;;  %v8773_v3 = vcombine.low %v1047_v15, %v1051_v40 }
 0x3a6   : > { %7376 = vmatprep.subr.bf16.mxu0 %v8724_v25  ;;  %7704 = vmatprep.subr.bf16.mxu1 %v8726_v28  ;;  %v8780_v25 = vcombine.high %v1054_v21, %v1058_v22  ;;  %v8782_v28 = vcombine.high %v1055_v23, %v1059_v14  ;;  %v1107_v15 = vld [vmem:[%s9763_s7 + $0x1678] sm:$0xff] }
 0x3a9   : > { %7377 = vmatpush1.bf16.msra.mxu0 %v8723_v0  ;;  %7705 = vmatpush1.bf16.msra.mxu1 %v8725_v36  ;;  %v8779_v0 = vcombine.low %v1054_v21, %v1058_v22  ;;  %v8788_v36 = vcombine.high %v1062_v31, %v1066_v33  ;;  %v1114_v21 = vld [vmem:[%s9763_s7 + $0x16b0] sm:$0xff]  ;;  %v1111_v22 = vld [vmem:[%s9763_s7 + $0x1698] sm:$0xff] }
 0x3aa   : > { %7378 = vmatprep.subr.bf16.mxu0 %v8732_v13  ;;  %7706 = vmatprep.subr.bf16.mxu1 %v8734_v37  ;;  %v8790_v13 = vcombine.high %v1063_v35, %v1067_v34  ;;  %v1070_v37 = vld [vmem:[%s9763_s7 + $0x1550] sm:$0xff]  ;;  %v1119_v33 = vld [vmem:[%s9763_s7 + $0x16d8] sm:$0xff] }
 0x3ab   : > { %v8795_v51 = vcombine.low %v1070_v37, %v1074_v38  ;;  %v1122_v31 = vld [vmem:[%s9763_s7 + $0x16f0] sm:$0xff] }
 0x3ad   : > { %7379 = vmatpush1.bf16.msra.mxu0 %v8731_v44  ;;  %7707 = vmatpush1.bf16.msra.mxu1 %v8733_v46  ;;  %v8789_v44 = vcombine.low %v1063_v35, %v1067_v34  ;;  %v8796_v46 = vcombine.high %v1070_v37, %v1074_v38  ;;  %v1123_v35 = vld [vmem:[%s9763_s7 + $0x16f8] sm:$0xff]  ;;  %v1130_v37 = vld [vmem:[%s9763_s7 + $0x1730] sm:$0xff] }
 0x3ae   : > { %7380 = vmatprep.subr.bf16.mxu0 %v8740_v47  ;;  %7708 = vmatprep.subr.bf16.mxu1 %v8742_v48  ;;  %v8798_v47 = vcombine.high %v1071_v29, %v1075_v56  ;;  %v1078_v48 = vld [vmem:[%s9763_s7 + $0x1590] sm:$0xff]  ;;  %v1127_v38 = vld [vmem:[%s9763_s7 + $0x1718] sm:$0xff] }
 0x3af   : > { %v8803_v59 = vcombine.low %v1078_v48, %v1082_v49 }
 0x3b1   : > { %7381 = vmatpush1.bf16.msra.mxu0 %v8739_v53  ;;  %7709 = vmatpush1.bf16.msra.mxu1 %v8741_v11  ;;  %v8797_v53 = vcombine.low %v1071_v29, %v1075_v56  ;;  %v8804_v11 = vcombine.high %v1078_v48, %v1082_v49  ;;  %v1131_v29 = vld [vmem:[%s9763_s7 + $0x1738] sm:$0xff]  ;;  %v1138_v48 = vld [vmem:[%s9763_s7 + $0x1770] sm:$0xff] }
 0x3b2   : > { %7382 = vmatprep.subr.bf16.mxu0 %v8748_v55  ;;  %7710 = vmatprep.subr.bf16.mxu1 %v8750_v24  ;;  %v8806_v55 = vcombine.high %v1079_v50, %v1083_v10  ;;  %v1086_v24 = vld [vmem:[%s9763_s7 + $0x15d0] sm:$0xff]  ;;  %v1135_v49 = vld [vmem:[%s9763_s7 + $0x1758] sm:$0xff] }
 0x3b3   : > { %v8811_v5 = vcombine.low %v1086_v24, %v1090_v42 }
 0x3b5   : > { %7383 = vmatpush1.bf16.msra.mxu0 %v8747_v61  ;;  %7711 = vmatpush1.bf16.msra.mxu1 %v8749_v62  ;;  %v8805_v61 = vcombine.low %v1079_v50, %v1083_v10  ;;  %v8812_v62 = vcombine.high %v1086_v24, %v1090_v42  ;;  %v1139_v50 = vld [vmem:[%s9763_s7 + $0x1778] sm:$0xff]  ;;  %v1146_v24 = vld [vmem:[%s9763_s7 + $0x17b0] sm:$0xff] }
 0x3b6   : > { %7393 = vmatprep.subr.bf16.mxu0 %v8756_v63  ;;  %7721 = vmatprep.subr.bf16.mxu1 %v8758_v2  ;;  %v8814_v63 = vcombine.high %v1087_v57, %v1091_v58  ;;  %v1094_v2 = vld [vmem:[%s9763_s7 + $0x1610] sm:$0xff]  ;;  %v1143_v42 = vld [vmem:[%s9763_s7 + $0x1798] sm:$0xff] }
 0x3b7   : > { %v8819_v40 = vcombine.low %v1094_v2, %v1098_v4 }
 0x3b8   : > { %7385 = vmatmul.mubr.bf16.vlgmr.msra.gmra.mrb[4].mxu0 %v10215_v1  ;;  %7713 = vmatmul.mubr.bf16.vlgmr.msra.gmra.mrb[4].mxu1 %v10215_v1  ;;  %v8771_v1 = vcombine.low %v1046_v12, %v1050_v20  ;;  %v1106_v12 = vld [vmem:[%s9763_s7 + $0x1670] sm:$0xff]  ;;  %v1103_v20 = vld [vmem:[%s9763_s7 + $0x1658] sm:$0xff] }
 0x3b9   : > { %7394 = vmatpush1.bf16.msra.mxu0 %v8755_v6  ;;  %7722 = vmatpush1.bf16.msra.mxu1 %v8757_v7  ;;  %v8813_v6 = vcombine.low %v1087_v57, %v1091_v58  ;;  %v8820_v7 = vcombine.high %v1094_v2, %v1098_v4  ;;  %v1147_v57 = vld [vmem:[%s9763_s7 + $0x17b8] sm:$0xff]  ;;  %v1154_v2 = vld [vmem:[%s9763_s7 + $0x17f0] sm:$0xff] }
 0x3ba   : > { %7395 = vmatprep.subr.bf16.mxu0 %v8764_v8  ;;  %7723 = vmatprep.subr.bf16.mxu1 %v8766_v9  ;;  %v8822_v8 = vcombine.high %v1095_v52, %v1099_v30  ;;  %v1102_v9 = vld [vmem:[%s9763_s7 + $0x1650] sm:$0xff]  ;;  %v1151_v4 = vld [vmem:[%s9763_s7 + $0x17d8] sm:$0xff] }
 0x3bb   : > { %7425 = vmatprep.mubr.bf16.mxu0 %v10221_v32  ;;  %7753 = vmatprep.mubr.bf16.mxu1 %v10221_v32  ;;  %v8781_v32 = vcombine.low %v1055_v23, %v1059_v14  ;;  %v1115_v23 = vld [vmem:[%s9763_s7 + $0x16b8] sm:$0xff]  ;;  %v8827_v14 = vcombine.low %v1102_v9, %v1106_v12 }
 0x3bd   : > { %7396 = vmatpush1.bf16.msra.mxu0 %v8763_v16  ;;  %7724 = vmatpush1.bf16.msra.mxu1 %v8765_v60  ;;  %v8821_v16 = vcombine.low %v1095_v52, %v1099_v30  ;;  %v8828_v60 = vcombine.high %v1102_v9, %v1106_v12  ;;  %v1155_v52 = vld [vmem:[%s9763_s7 + $0x17f8] sm:$0xff]  ;;  %v1162_v9 = vld [vmem:[%s9763_s7 + $0x1830] sm:$0xff] }
 0x3be   : > { %7397 = vmatprep.subr.bf16.mxu0 %v8772_v19  ;;  %7725 = vmatprep.subr.bf16.mxu1 %v8774_v26  ;;  %v8830_v19 = vcombine.high %v1103_v20, %v1107_v15  ;;  %v1110_v26 = vld [vmem:[%s9763_s7 + $0x1690] sm:$0xff]  ;;  %v1159_v12 = vld [vmem:[%s9763_s7 + $0x1818] sm:$0xff] }
 0x3bf   : > { %v8835_v34 = vcombine.low %v1110_v26, %v1114_v21 }
 0x3c1   : > { %7398 = vmatpush1.bf16.msra.mxu0 %v8771_v1  ;;  %7726 = vmatpush1.bf16.msra.mxu1 %v8773_v3  ;;  %v8829_v1 = vcombine.low %v1103_v20, %v1107_v15  ;;  %v8836_v3 = vcombine.high %v1110_v26, %v1114_v21  ;;  %v1163_v20 = vld [vmem:[%s9763_s7 + $0x1838] sm:$0xff]  ;;  %v1170_v26 = vld [vmem:[%s9763_s7 + $0x1870] sm:$0xff] }
 0x3c2   : > { %7399 = vmatprep.subr.bf16.mxu0 %v8780_v25  ;;  %7727 = vmatprep.subr.bf16.mxu1 %v8782_v28  ;;  %v8838_v25 = vcombine.high %v1111_v22, %v1115_v23  ;;  %v1118_v28 = vld [vmem:[%s9763_s7 + $0x16d0] sm:$0xff]  ;;  %v1167_v21 = vld [vmem:[%s9763_s7 + $0x1858] sm:$0xff] }
 0x3c3   : > { %v8843_v56 = vcombine.low %v1118_v28, %v1122_v31 }
 0x3c5   : > { %7400 = vmatpush1.bf16.msra.mxu0 %v8779_v0  ;;  %7728 = vmatpush1.bf16.msra.mxu1 %v8781_v32  ;;  %v8837_v0 = vcombine.low %v1111_v22, %v1115_v23  ;;  %v8844_v32 = vcombine.high %v1118_v28, %v1122_v31  ;;  %v1171_v22 = vld [vmem:[%s9763_s7 + $0x1878] sm:$0xff]  ;;  %v1178_v28 = vld [vmem:[%s9763_s7 + $0x18b0] sm:$0xff] }
 0x3c6   : > { %7401 = vmatprep.subr.bf16.mxu0 %v8788_v36  ;;  %7729 = vmatprep.subr.bf16.mxu1 %v8790_v13  ;;  %v8846_v36 = vcombine.high %v1119_v33, %v1123_v35  ;;  %v1126_v13 = vld [vmem:[%s9763_s7 + $0x1710] sm:$0xff]  ;;  %v1175_v31 = vld [vmem:[%s9763_s7 + $0x1898] sm:$0xff] }
 0x3c7   : > { %v8851_v10 = vcombine.low %v1126_v13, %v1130_v37 }
 0x3c9   : > { %7402 = vmatpush1.bf16.msra.mxu0 %v8787_v43  ;;  %7730 = vmatpush1.bf16.msra.mxu1 %v8789_v44  ;;  %v8845_v43 = vcombine.low %v1119_v33, %v1123_v35  ;;  %v8852_v44 = vcombine.high %v1126_v13, %v1130_v37  ;;  %v1179_v33 = vld [vmem:[%s9763_s7 + $0x18b8] sm:$0xff]  ;;  %v1186_v13 = vld [vmem:[%s9763_s7 + $0x18f0] sm:$0xff] }
 0x3ca   : > { %7403 = vmatprep.subr.bf16.mxu0 %v8796_v46  ;;  %7731 = vmatprep.subr.bf16.mxu1 %v8798_v47  ;;  %v8854_v46 = vcombine.high %v1127_v38, %v1131_v29  ;;  %v1134_v47 = vld [vmem:[%s9763_s7 + $0x1750] sm:$0xff]  ;;  %v1183_v37 = vld [vmem:[%s9763_s7 + $0x18d8] sm:$0xff] }
 0x3cb   : > { %v8859_v58 = vcombine.low %v1134_v47, %v1138_v48 }
 0x3cd   : > { %7404 = vmatpush1.bf16.msra.mxu0 %v8795_v51  ;;  %7732 = vmatpush1.bf16.msra.mxu1 %v8797_v53  ;;  %v8853_v51 = vcombine.low %v1127_v38, %v1131_v29  ;;  %v8860_v53 = vcombine.high %v1134_v47, %v1138_v48  ;;  %v1187_v38 = vld [vmem:[%s9763_s7 + $0x18f8] sm:$0xff]  ;;  %v8901_v29 = vcombine.low %v1175_v31, %v1179_v33 }
 0x3ce   : > { %7405 = vmatprep.subr.bf16.mxu0 %v8804_v11  ;;  %7733 = vmatprep.subr.bf16.mxu1 %v8806_v55  ;;  %v8862_v11 = vcombine.high %v1135_v49, %v1139_v50  ;;  %v1142_v55 = vld [vmem:[%s9763_s7 + $0x1790] sm:$0xff]  ;;  %v1191_v47 = vld [vmem:[%s9763_s7 + $0x1918] sm:$0xff] }
 0x3cf   : > { %v8867_v30 = vcombine.low %v1142_v55, %v1146_v24  ;;  %v1195_v48 = vld [vmem:[%s9763_s7 + $0x1938] sm:$0xff] }
 0x3d1   : > { %7406 = vmatpush1.bf16.msra.mxu0 %v8803_v59  ;;  %7734 = vmatpush1.bf16.msra.mxu1 %v8805_v61  ;;  %v8861_v59 = vcombine.low %v1135_v49, %v1139_v50  ;;  %v8868_v61 = vcombine.high %v1142_v55, %v1146_v24  ;;  %v1203_v55 = vld [vmem:[%s9763_s7 + $0x1978] sm:$0xff] }
 0x3d2   : > { %7407 = vmatprep.subr.bf16.mxu0 %v8812_v62  ;;  %7735 = vmatprep.subr.bf16.mxu1 %v8814_v63  ;;  %v8870_v62 = vcombine.high %v1143_v42, %v1147_v57  ;;  %v1150_v63 = vld [vmem:[%s9763_s7 + $0x17d0] sm:$0xff] }
 0x3d3   : > { %v8875_v15 = vcombine.low %v1150_v63, %v1154_v2 }
 0x3d5   : > { %7408 = vmatpush1.bf16.msra.mxu0 %v8811_v5  ;;  %7736 = vmatpush1.bf16.msra.mxu1 %v8813_v6  ;;  %v8869_v5 = vcombine.low %v1143_v42, %v1147_v57  ;;  %v8876_v6 = vcombine.high %v1150_v63, %v1154_v2  ;;  %v8917_v42 = vcombine.low %v1191_v47, %v1195_v48  ;;  %v1211_v63 = vld [vmem:[%s9763_s7 + $0x19b8] sm:$0xff] }
 0x3d6   : > { %7409 = vmatprep.subr.bf16.mxu0 %v8820_v7  ;;  %7737 = vmatprep.subr.bf16.mxu1 %v8822_v8  ;;  %v8878_v7 = vcombine.high %v1151_v4, %v1155_v52  ;;  %v1158_v8 = vld [vmem:[%s9763_s7 + $0x1810] sm:$0xff] }
 0x3d7   : > { %v8883_v23 = vcombine.low %v1158_v8, %v1162_v9 }
 0x3d9   : > { %7410 = vmatpush1.bf16.msra.mxu0 %v8819_v40  ;;  %7738 = vmatpush1.bf16.msra.mxu1 %v8821_v16  ;;  %v8877_v40 = vcombine.low %v1151_v4, %v1155_v52  ;;  %v8884_v16 = vcombine.high %v1158_v8, %v1162_v9  ;;  %v1219_v8 = vld [vmem:[%s9763_s7 + $0x19f8] sm:$0xff] }
 0x3da   : > { %7411 = vmatprep.subr.bf16.mxu0 %v8828_v60  ;;  %7739 = vmatprep.subr.bf16.mxu1 %v8830_v19  ;;  %v8886_v60 = vcombine.high %v1159_v12, %v1163_v20  ;;  %v1166_v19 = vld [vmem:[%s9763_s7 + $0x1850] sm:$0xff] }
 0x3db   : > { %v8891_v35 = vcombine.low %v1166_v19, %v1170_v26 }
 0x3dd   : > { %7412 = vmatpush1.bf16.msra.mxu0 %v8827_v14  ;;  %7740 = vmatpush1.bf16.msra.mxu1 %v8829_v1  ;;  %v8885_v14 = vcombine.low %v1159_v12, %v1163_v20  ;;  %v8892_v1 = vcombine.high %v1166_v19, %v1170_v26  ;;  %v1227_v19 = vld [vmem:[%s9763_s7 + $0x1a38] sm:$0xff] }
 0x3de   : > { %7413 = vmatprep.subr.bf16.mxu0 %v8836_v3  ;;  %7741 = vmatprep.subr.bf16.mxu1 %v8838_v25  ;;  %v8894_v3 = vcombine.high %v1167_v21, %v1171_v22  ;;  %v1174_v25 = vld [vmem:[%s9763_s7 + $0x1890] sm:$0xff] }
 0x3e1   : > { %7414 = vmatpush1.bf16.msra.mxu0 %v8835_v34  ;;  %7742 = vmatpush1.bf16.msra.mxu1 %v8837_v0  ;;  %v8893_v34 = vcombine.low %v1167_v21, %v1171_v22  ;;  %v8900_v0 = vcombine.high %v1174_v25, %v1178_v28 }
 0x3e2   : > { %7415 = vmatprep.subr.bf16.mxu0 %v8844_v32  ;;  %7743 = vmatprep.subr.bf16.mxu1 %v8846_v36  ;;  %v8902_v32 = vcombine.high %v1175_v31, %v1179_v33  ;;  %v1182_v36 = vld [vmem:[%s9763_s7 + $0x18d0] sm:$0xff] }
 0x3e3   : > { %v8907_v49 = vcombine.low %v1182_v36, %v1186_v13 }
 0x3e5   : > { %7416 = vmatpush1.bf16.msra.mxu0 %v8843_v56  ;;  %7744 = vmatpush1.bf16.msra.mxu1 %v8845_v43  ;;  %v8908_v56 = vcombine.high %v1182_v36, %v1186_v13  ;;  %v8910_v43 = vcombine.high %v1183_v37, %v1187_v38  ;;  %v1243_v36 = vld [vmem:[%s9763_s7 + $0x1ab8] sm:$0xff] }
 0x3e6   : > { %7417 = vmatprep.subr.bf16.mxu0 %v8852_v44  ;;  %7745 = vmatprep.subr.bf16.mxu1 %v8854_v46  ;;  %v1190_v44 = vld [vmem:[%s9763_s7 + $0x1910] sm:$0xff] }
 0x3e7   : > { %v1194_v46 = vld [vmem:[%s9763_s7 + $0x1930] sm:$0xff] }
 0x3e8   : > { %v8916_v50 = vcombine.high %v1190_v44, %v1194_v46  ;;  %v8915_v24 = vcombine.low %v1190_v44, %v1194_v46  ;;  %v1251_v44 = vld [vmem:[%s9763_s7 + $0x1af8] sm:$0xff] }
 0x3e9   : > { %7418 = vmatpush1.bf16.msra.mxu0 %v8851_v10  ;;  %7746 = vmatpush1.bf16.msra.mxu1 %v8853_v51  ;;  %v8918_v10 = vcombine.high %v1191_v47, %v1195_v48  ;;  %v1198_v51 = vld [vmem:[%s9763_s7 + $0x1950] sm:$0xff] }
 0x3ea   : > { %7419 = vmatprep.subr.bf16.mxu0 %v8860_v53  ;;  %7747 = vmatprep.subr.bf16.mxu1 %v8862_v11  ;;  %v1202_v53 = vld [vmem:[%s9763_s7 + $0x1970] sm:$0xff]  ;;  %v1199_v11 = vld [vmem:[%s9763_s7 + $0x1958] sm:$0xff] }
 0x3eb   : > { %v8924_v57 = vcombine.high %v1198_v51, %v1202_v53  ;;  %v8923_v2 = vcombine.low %v1198_v51, %v1202_v53  ;;  %v8925_v4 = vcombine.low %v1199_v11, %v1203_v55  ;;  %v1259_v51 = vld [vmem:[%s9763_s7 + $0x1b38] sm:$0xff] }
 0x3ed   : > { %7420 = vmatpush1.bf16.msra.mxu0 %v8859_v58  ;;  %7748 = vmatpush1.bf16.msra.mxu1 %v8861_v59  ;;  %v8926_v58 = vcombine.high %v1199_v11, %v1203_v55  ;;  %v1206_v59 = vld [vmem:[%s9763_s7 + $0x1990] sm:$0xff] }
 0x3ee   : > { %7421 = vmatprep.subr.bf16.mxu0 %v8868_v61  ;;  %7749 = vmatprep.subr.bf16.mxu1 %v8870_v62  ;;  %v1210_v61 = vld [vmem:[%s9763_s7 + $0x19b0] sm:$0xff]  ;;  %v1207_v62 = vld [vmem:[%s9763_s7 + $0x1998] sm:$0xff] }
 0x3ef   : > { %v8932_v52 = vcombine.high %v1206_v59, %v1210_v61  ;;  %v8931_v9 = vcombine.low %v1206_v59, %v1210_v61  ;;  %v8933_v12 = vcombine.low %v1207_v62, %v1211_v63  ;;  %v1267_v59 = vld [vmem:[%s9763_s7 + $0x1b78] sm:$0xff] }
 0x3f1   : > { %7422 = vmatpush1.bf16.msra.mxu0 %v8867_v30  ;;  %7750 = vmatpush1.bf16.msra.mxu1 %v8869_v5  ;;  %v8934_v30 = vcombine.high %v1207_v62, %v1211_v63  ;;  %v1214_v5 = vld [vmem:[%s9763_s7 + $0x19d0] sm:$0xff] }
 0x3f2   : > { %7423 = vmatprep.subr.bf16.mxu0 %v8876_v6  ;;  %7751 = vmatprep.subr.bf16.mxu1 %v8878_v7  ;;  %v1218_v6 = vld [vmem:[%s9763_s7 + $0x19f0] sm:$0xff]  ;;  %v1215_v7 = vld [vmem:[%s9763_s7 + $0x19d8] sm:$0xff] }
 0x3f3   : > { %v8940_v20 = vcombine.high %v1214_v5, %v1218_v6  ;;  %v8939_v26 = vcombine.low %v1214_v5, %v1218_v6  ;;  %v8941_v21 = vcombine.low %v1215_v7, %v1219_v8  ;;  %v1275_v5 = vld [vmem:[%s9763_s7 + $0x1bb8] sm:$0xff] }
 0x3f5   : > { %7424 = vmatpush1.bf16.msra.mxu0 %v8875_v15  ;;  %7752 = vmatpush1.bf16.msra.mxu1 %v8877_v40  ;;  %v8942_v15 = vcombine.high %v1215_v7, %v1219_v8  ;;  %v1222_v40 = vld [vmem:[%s9763_s7 + $0x1a10] sm:$0xff] }
 0x3f6   : > { %7434 = vmatprep.subr.bf16.mxu0 %v8884_v16  ;;  %7762 = vmatprep.subr.bf16.mxu1 %v8886_v60  ;;  %v1226_v16 = vld [vmem:[%s9763_s7 + $0x1a30] sm:$0xff]  ;;  %v1223_v60 = vld [vmem:[%s9763_s7 + $0x1a18] sm:$0xff] }
 0x3f7   : > { %v8948_v22 = vcombine.high %v1222_v40, %v1226_v16  ;;  %v8949_v31 = vcombine.low %v1223_v60, %v1227_v19 }
 0x3f8   : > { %7426 = vmatmul.mubr.bf16.vlgmr.msra.gmra.mrb[4].mxu0 %v10298_v41  ;;  %7754 = vmatmul.mubr.bf16.vlgmr.msra.gmra.mrb[4].mxu1 %v10298_v41  ;;  %v8899_v41 = vcombine.low %v1174_v25, %v1178_v28  ;;  %v1235_v25 = vld [vmem:[%s9763_s7 + $0x1a78] sm:$0xff]  ;;  %v8947_v28 = vcombine.low %v1222_v40, %v1226_v16 }
 0x3f9   : > { %7435 = vmatpush1.bf16.msra.mxu0 %v8883_v23  ;;  %7763 = vmatpush1.bf16.msra.mxu1 %v8885_v14  ;;  %v8950_v23 = vcombine.high %v1223_v60, %v1227_v19  ;;  %v1230_v14 = vld [vmem:[%s9763_s7 + $0x1a50] sm:$0xff]  ;;  %v1283_v40 = vld [vmem:[%s9763_s7 + $0x1bf8] sm:$0xff] }
 0x3fa   : > { %7436 = vmatprep.subr.bf16.mxu0 %v8892_v1  ;;  %7764 = vmatprep.subr.bf16.mxu1 %v8894_v3  ;;  %v1234_v1 = vld [vmem:[%s9763_s7 + $0x1a70] sm:$0xff]  ;;  %v1231_v3 = vld [vmem:[%s9763_s7 + $0x1a58] sm:$0xff] }
 0x3fb   : > { %7466 = vmatprep.mubr.bf16.mxu0 %v10304_v17  ;;  %7794 = vmatprep.mubr.bf16.mxu1 %v10304_v17  ;;  %v8909_v17 = vcombine.low %v1183_v37, %v1187_v38  ;;  %v8956_v33 = vcombine.high %v1230_v14, %v1234_v1  ;;  %v8955_v13 = vcombine.low %v1230_v14, %v1234_v1  ;;  %v1291_v14 = vld [vmem:[%s9763_s7 + $0x1c38] sm:$0xff] }
 0x3fc   : > { %v8957_v37 = vcombine.low %v1231_v3, %v1235_v25 }
 0x3fd   : > { %7437 = vmatpush1.bf16.msra.mxu0 %v8891_v35  ;;  %7765 = vmatpush1.bf16.msra.mxu1 %v8893_v34  ;;  %v8958_v35 = vcombine.high %v1231_v3, %v1235_v25  ;;  %v1238_v34 = vld [vmem:[%s9763_s7 + $0x1a90] sm:$0xff] }
 0x3fe   : > { %7438 = vmatprep.subr.bf16.mxu0 %v8900_v0  ;;  %7766 = vmatprep.subr.bf16.mxu1 %v8902_v32  ;;  %v1242_v0 = vld [vmem:[%s9763_s7 + $0x1ab0] sm:$0xff]  ;;  %v1239_v32 = vld [vmem:[%s9763_s7 + $0x1a98] sm:$0xff] }
 0x3ff   : > { %v8964_v38 = vcombine.high %v1238_v34, %v1242_v0  ;;  %v8963_v46 = vcombine.low %v1238_v34, %v1242_v0  ;;  %v8965_v47 = vcombine.low %v1239_v32, %v1243_v36  ;;  %v1299_v34 = vld [vmem:[%s9763_s7 + $0x1c78] sm:$0xff] }
 0x401   : > { %7439 = vmatpush1.bf16.msra.mxu0 %v8899_v41  ;;  %7767 = vmatpush1.bf16.msra.mxu1 %v8901_v29  ;;  %v8966_v41 = vcombine.high %v1239_v32, %v1243_v36  ;;  %v1246_v29 = vld [vmem:[%s9763_s7 + $0x1ad0] sm:$0xff] }
 0x402   : > { %7440 = vmatprep.subr.bf16.mxu0 %v8908_v56  ;;  %7768 = vmatprep.subr.bf16.mxu1 %v8910_v43  ;;  %v1250_v56 = vld [vmem:[%s9763_s7 + $0x1af0] sm:$0xff]  ;;  %v1247_v43 = vld [vmem:[%s9763_s7 + $0x1ad8] sm:$0xff] }
 0x403   : > { %v8972_v48 = vcombine.high %v1246_v29, %v1250_v56  ;;  %v8971_v53 = vcombine.low %v1246_v29, %v1250_v56  ;;  %v8973_v11 = vcombine.low %v1247_v43, %v1251_v44  ;;  %v1307_v29 = vld [vmem:[%s9763_s7 + $0x1cb8] sm:$0xff] }
 0x405   : > { %7441 = vmatpush1.bf16.msra.mxu0 %v8907_v49  ;;  %7769 = vmatpush1.bf16.msra.mxu1 %v8909_v17  ;;  %v8974_v49 = vcombine.high %v1247_v43, %v1251_v44  ;;  %v1254_v17 = vld [vmem:[%s9763_s7 + $0x1b10] sm:$0xff] }
 0x406   : > { %7442 = vmatprep.subr.bf16.mxu0 %v8916_v50  ;;  %7770 = vmatprep.subr.bf16.mxu1 %v8918_v10  ;;  %v1258_v50 = vld [vmem:[%s9763_s7 + $0x1b30] sm:$0xff]  ;;  %v1255_v10 = vld [vmem:[%s9763_s7 + $0x1b18] sm:$0xff] }
 0x407   : > { %v8980_v55 = vcombine.high %v1254_v17, %v1258_v50  ;;  %v8979_v61 = vcombine.low %v1254_v17, %v1258_v50  ;;  %v8981_v62 = vcombine.low %v1255_v10, %v1259_v51  ;;  %v1315_v17 = vld [vmem:[%s9763_s7 + $0x1cf8] sm:$0xff] }
 0x409   : > { %7443 = vmatpush1.bf16.msra.mxu0 %v8915_v24  ;;  %7771 = vmatpush1.bf16.msra.mxu1 %v8917_v42  ;;  %v8982_v24 = vcombine.high %v1255_v10, %v1259_v51  ;;  %v1262_v42 = vld [vmem:[%s9763_s7 + $0x1b50] sm:$0xff] }
 0x40a   : > { %7444 = vmatprep.subr.bf16.mxu0 %v8924_v57  ;;  %7772 = vmatprep.subr.bf16.mxu1 %v8926_v58  ;;  %v1266_v57 = vld [vmem:[%s9763_s7 + $0x1b70] sm:$0xff]  ;;  %v1263_v58 = vld [vmem:[%s9763_s7 + $0x1b58] sm:$0xff] }
 0x40b   : > { %v8988_v63 = vcombine.high %v1262_v42, %v1266_v57  ;;  %v8987_v6 = vcombine.low %v1262_v42, %v1266_v57  ;;  %v8989_v7 = vcombine.low %v1263_v58, %v1267_v59 }
 0x40d   : > { %7445 = vmatpush1.bf16.msra.mxu0 %v8923_v2  ;;  %7773 = vmatpush1.bf16.msra.mxu1 %v8925_v4  ;;  %v8990_v2 = vcombine.high %v1263_v58, %v1267_v59  ;;  %v1270_v4 = vld [vmem:[%s9763_s7 + $0x1b90] sm:$0xff] }
 0x40e   : > { %7446 = vmatprep.subr.bf16.mxu0 %v8932_v52  ;;  %7774 = vmatprep.subr.bf16.mxu1 %v8934_v30  ;;  %v1274_v52 = vld [vmem:[%s9763_s7 + $0x1bb0] sm:$0xff]  ;;  %v1271_v30 = vld [vmem:[%s9763_s7 + $0x1b98] sm:$0xff] }
 0x40f   : > { %v8996_v8 = vcombine.high %v1270_v4, %v1274_v52  ;;  %v8995_v16 = vcombine.low %v1270_v4, %v1274_v52  ;;  %v8997_v60 = vcombine.low %v1271_v30, %v1275_v5  ;;  %v1326_v59 = vld [vmem:[%s9763_s7 + $0x1d50] sm:$0xff] }
 0x411   : > { %7447 = vmatpush1.bf16.msra.mxu0 %v8931_v9  ;;  %7775 = vmatpush1.bf16.msra.mxu1 %v8933_v12  ;;  %v8998_v9 = vcombine.high %v1271_v30, %v1275_v5  ;;  %v1278_v12 = vld [vmem:[%s9763_s7 + $0x1bd0] sm:$0xff] }
 0x412   : > { %7448 = vmatprep.subr.bf16.mxu0 %v8940_v20  ;;  %7776 = vmatprep.subr.bf16.mxu1 %v8942_v15  ;;  %v1282_v20 = vld [vmem:[%s9763_s7 + $0x1bf0] sm:$0xff]  ;;  %v1279_v15 = vld [vmem:[%s9763_s7 + $0x1bd8] sm:$0xff] }
 0x413   : > { %v9004_v19 = vcombine.high %v1278_v12, %v1282_v20  ;;  %v9003_v1 = vcombine.low %v1278_v12, %v1282_v20  ;;  %v9005_v3 = vcombine.low %v1279_v15, %v1283_v40  ;;  %v1334_v5 = vld [vmem:[%s9763_s7 + $0x1d90] sm:$0xff] }
 0x415   : > { %7449 = vmatpush1.bf16.msra.mxu0 %v8939_v26  ;;  %7777 = vmatpush1.bf16.msra.mxu1 %v8941_v21  ;;  %v9006_v26 = vcombine.high %v1279_v15, %v1283_v40  ;;  %v1286_v21 = vld [vmem:[%s9763_s7 + $0x1c10] sm:$0xff] }
 0x416   : > { %7450 = vmatprep.subr.bf16.mxu0 %v8948_v22  ;;  %7778 = vmatprep.subr.bf16.mxu1 %v8950_v23  ;;  %v1290_v22 = vld [vmem:[%s9763_s7 + $0x1c30] sm:$0xff]  ;;  %v1287_v23 = vld [vmem:[%s9763_s7 + $0x1c18] sm:$0xff] }
 0x417   : > { %v9012_v25 = vcombine.high %v1286_v21, %v1290_v22  ;;  %v9011_v0 = vcombine.low %v1286_v21, %v1290_v22  ;;  %v9013_v32 = vcombine.low %v1287_v23, %v1291_v14  ;;  %v1342_v40 = vld [vmem:[%s9763_s7 + $0x1dd0] sm:$0xff] }
 0x419   : > { %7451 = vmatpush1.bf16.msra.mxu0 %v8947_v28  ;;  %7779 = vmatpush1.bf16.msra.mxu1 %v8949_v31  ;;  %v9014_v28 = vcombine.high %v1287_v23, %v1291_v14  ;;  %v1294_v31 = vld [vmem:[%s9763_s7 + $0x1c50] sm:$0xff] }
 0x41a   : > { %7452 = vmatprep.subr.bf16.mxu0 %v8956_v33  ;;  %7780 = vmatprep.subr.bf16.mxu1 %v8958_v35  ;;  %v1298_v33 = vld [vmem:[%s9763_s7 + $0x1c70] sm:$0xff]  ;;  %v1295_v35 = vld [vmem:[%s9763_s7 + $0x1c58] sm:$0xff] }
 0x41b   : > { %v9020_v36 = vcombine.high %v1294_v31, %v1298_v33  ;;  %v9019_v56 = vcombine.low %v1294_v31, %v1298_v33  ;;  %v9021_v43 = vcombine.low %v1295_v35, %v1299_v34  ;;  %v1350_v14 = vld [vmem:[%s9763_s7 + $0x1e10] sm:$0xff] }
 0x41d   : > { %7453 = vmatpush1.bf16.msra.mxu0 %v8955_v13  ;;  %7781 = vmatpush1.bf16.msra.mxu1 %v8957_v37  ;;  %v9022_v13 = vcombine.high %v1295_v35, %v1299_v34  ;;  %v1302_v37 = vld [vmem:[%s9763_s7 + $0x1c90] sm:$0xff] }
 0x41e   : > { %7454 = vmatprep.subr.bf16.mxu0 %v8964_v38  ;;  %7782 = vmatprep.subr.bf16.mxu1 %v8966_v41  ;;  %v1306_v38 = vld [vmem:[%s9763_s7 + $0x1cb0] sm:$0xff]  ;;  %v1303_v41 = vld [vmem:[%s9763_s7 + $0x1c98] sm:$0xff] }
 0x41f   : > { %v9028_v44 = vcombine.high %v1302_v37, %v1306_v38  ;;  %v9029_v50 = vcombine.low %v1303_v41, %v1307_v29  ;;  %v1358_v34 = vld [vmem:[%s9763_s7 + $0x1e50] sm:$0xff] }
 0x421   : > { %7455 = vmatpush1.bf16.msra.mxu0 %v8963_v46  ;;  %7783 = vmatpush1.bf16.msra.mxu1 %v8965_v47  ;;  %v9030_v46 = vcombine.high %v1303_v41, %v1307_v29  ;;  %v1310_v47 = vld [vmem:[%s9763_s7 + $0x1cd0] sm:$0xff] }
 0x422   : > { %7456 = vmatprep.subr.bf16.mxu0 %v8972_v48  ;;  %7784 = vmatprep.subr.bf16.mxu1 %v8974_v49  ;;  %v1314_v48 = vld [vmem:[%s9763_s7 + $0x1cf0] sm:$0xff]  ;;  %v1311_v49 = vld [vmem:[%s9763_s7 + $0x1cd8] sm:$0xff] }
 0x423   : > { %v9036_v10 = vcombine.high %v1310_v47, %v1314_v48  ;;  %v9038_v51 = vcombine.high %v1311_v49, %v1315_v17  ;;  %v9035_v42 = vcombine.low %v1310_v47, %v1314_v48  ;;  %v1366_v29 = vld [vmem:[%s9763_s7 + $0x1e90] sm:$0xff] }
 0x425   : > { %7457 = vmatpush1.bf16.msra.mxu0 %v8971_v53  ;;  %7785 = vmatpush1.bf16.msra.mxu1 %v8973_v11  ;;  %v1318_v53 = vld [vmem:[%s9763_s7 + $0x1d10] sm:$0xff] }
 0x426   : > { %7458 = vmatprep.subr.bf16.mxu0 %v8980_v55  ;;  %7786 = vmatprep.subr.bf16.mxu1 %v8982_v24  ;;  %v1322_v11 = vld [vmem:[%s9763_s7 + $0x1d30] sm:$0xff]  ;;  %v1319_v55 = vld [vmem:[%s9763_s7 + $0x1d18] sm:$0xff] }
 0x427   : > { %v1323_v24 = vld [vmem:[%s9763_s7 + $0x1d38] sm:$0xff]  ;;  %v9044_v57 = vcombine.high %v1318_v53, %v1322_v11 }
 0x428   : > { %v9046_v58 = vcombine.high %v1319_v55, %v1323_v24  ;;  %v9045_v4 = vcombine.low %v1319_v55, %v1323_v24  ;;  %v1382_v24 = vld [vmem:[%s9763_s7 + $0x1f10] sm:$0xff] }
 0x429   : > { %7459 = vmatpush1.bf16.msra.mxu0 %v8979_v61  ;;  %7787 = vmatpush1.bf16.msra.mxu1 %v8981_v62  ;;  %v1330_v61 = vld [vmem:[%s9763_s7 + $0x1d70] sm:$0xff]  ;;  %v1327_v62 = vld [vmem:[%s9763_s7 + $0x1d58] sm:$0xff] }
 0x42a   : > { %7460 = vmatprep.subr.bf16.mxu0 %v8988_v63  ;;  %7788 = vmatprep.subr.bf16.mxu1 %v8990_v2  ;;  %v1331_v63 = vld [vmem:[%s9763_s7 + $0x1d78] sm:$0xff]  ;;  %v9043_v2 = vcombine.low %v1318_v53, %v1322_v11  ;;  %v9052_v52 = vcombine.high %v1326_v59, %v1330_v61 }
 0x42b   : > { %v9054_v30 = vcombine.high %v1327_v62, %v1331_v63  ;;  %v9053_v12 = vcombine.low %v1327_v62, %v1331_v63  ;;  %v1390_v63 = vld [vmem:[%s9763_s7 + $0x1f50] sm:$0xff] }
 0x42d   : > { %7461 = vmatpush1.bf16.msra.mxu0 %v8987_v6  ;;  %7789 = vmatpush1.bf16.msra.mxu1 %v8989_v7  ;;  %v1338_v6 = vld [vmem:[%s9763_s7 + $0x1db0] sm:$0xff]  ;;  %v1335_v7 = vld [vmem:[%s9763_s7 + $0x1d98] sm:$0xff] }
 0x42e   : > { %7462 = vmatprep.subr.bf16.mxu0 %v8996_v8  ;;  %7790 = vmatprep.subr.bf16.mxu1 %v8998_v9  ;;  %v1339_v8 = vld [vmem:[%s9763_s7 + $0x1db8] sm:$0xff]  ;;  %v9051_v9 = vcombine.low %v1326_v59, %v1330_v61  ;;  %v9060_v20 = vcombine.high %v1334_v5, %v1338_v6 }
 0x42f   : > { %v9062_v15 = vcombine.high %v1335_v7, %v1339_v8  ;;  %v9061_v21 = vcombine.low %v1335_v7, %v1339_v8  ;;  %v1398_v8 = vld [vmem:[%s9763_s7 + $0x1f90] sm:$0xff] }
 0x431   : > { %7463 = vmatpush1.bf16.msra.mxu0 %v8995_v16  ;;  %7791 = vmatpush1.bf16.msra.mxu1 %v8997_v60  ;;  %v1346_v16 = vld [vmem:[%s9763_s7 + $0x1df0] sm:$0xff]  ;;  %v1343_v60 = vld [vmem:[%s9763_s7 + $0x1dd8] sm:$0xff] }
 0x432   : > { %7464 = vmatprep.subr.bf16.mxu0 %v9004_v19  ;;  %7792 = vmatprep.subr.bf16.mxu1 %v9006_v26  ;;  %v1347_v19 = vld [vmem:[%s9763_s7 + $0x1df8] sm:$0xff]  ;;  %v9059_v26 = vcombine.low %v1334_v5, %v1338_v6  ;;  %v9068_v22 = vcombine.high %v1342_v40, %v1346_v16 }
 0x433   : > { %v9070_v23 = vcombine.high %v1343_v60, %v1347_v19  ;;  %v9069_v31 = vcombine.low %v1343_v60, %v1347_v19  ;;  %v1406_v19 = vld [vmem:[%s9763_s7 + $0x1fd0] sm:$0xff] }
 0x435   : > { %7465 = vmatpush1.bf16.msra.mxu0 %v9003_v1  ;;  %7793 = vmatpush1.bf16.msra.mxu1 %v9005_v3  ;;  %v1354_v1 = vld [vmem:[%s9763_s7 + $0x1e30] sm:$0xff]  ;;  %v1351_v3 = vld [vmem:[%s9763_s7 + $0x1e18] sm:$0xff] }
 0x436   : > { %7475 = vmatprep.subr.bf16.mxu0 %v9012_v25  ;;  %7803 = vmatprep.subr.bf16.mxu1 %v9014_v28  ;;  %v1355_v25 = vld [vmem:[%s9763_s7 + $0x1e38] sm:$0xff]  ;;  %v9067_v28 = vcombine.low %v1342_v40, %v1346_v16  ;;  %v9076_v33 = vcombine.high %v1350_v14, %v1354_v1 }
 0x437   : > { %v9078_v35 = vcombine.high %v1351_v3, %v1355_v25 }
 0x438   : > { %7467 = vmatmul.mubr.bf16.vlgmr.msra.gmra.mrb[4].mxu0 %v10379_v27  ;;  %7795 = vmatmul.mubr.bf16.vlgmr.msra.gmra.mrb[4].mxu1 %v10379_v27  ;;  %v9027_v27 = vcombine.low %v1302_v37, %v1306_v38  ;;  %v9077_v37 = vcombine.low %v1351_v3, %v1355_v25 }
 0x439   : > { %7476 = vmatpush1.bf16.msra.mxu0 %v9011_v0  ;;  %7804 = vmatpush1.bf16.msra.mxu1 %v9013_v32  ;;  %v1362_v0 = vld [vmem:[%s9763_s7 + $0x1e70] sm:$0xff]  ;;  %v1359_v32 = vld [vmem:[%s9763_s7 + $0x1e58] sm:$0xff] }
 0x43a   : > { %7477 = vmatprep.subr.bf16.mxu0 %v9020_v36  ;;  %7805 = vmatprep.subr.bf16.mxu1 %v9022_v13  ;;  %v1363_v36 = vld [vmem:[%s9763_s7 + $0x1e78] sm:$0xff]  ;;  %v9075_v13 = vcombine.low %v1350_v14, %v1354_v1  ;;  %v9084_v38 = vcombine.high %v1358_v34, %v1362_v0 }
 0x43b   : > { %7507 = vmatprep.mubr.bf16.mxu0 %v10385_v39  ;;  %7835 = vmatprep.mubr.bf16.mxu1 %v10385_v39  ;;  %v9037_v39 = vcombine.low %v1311_v49, %v1315_v17  ;;  %v9086_v41 = vcombine.high %v1359_v32, %v1363_v36  ;;  %v9085_v47 = vcombine.low %v1359_v32, %v1363_v36  ;;  %v1374_v17 = vld [vmem:[%s9763_s7 + $0x1ed0] sm:$0xff] }
 0x43d   : > { %7478 = vmatpush1.bf16.msra.mxu0 %v9019_v56  ;;  %7806 = vmatpush1.bf16.msra.mxu1 %v9021_v43  ;;  %v1370_v56 = vld [vmem:[%s9763_s7 + $0x1eb0] sm:$0xff]  ;;  %v1367_v43 = vld [vmem:[%s9763_s7 + $0x1e98] sm:$0xff] }
 0x43e   : > { %7479 = vmatprep.subr.bf16.mxu0 %v9028_v44  ;;  %7807 = vmatprep.subr.bf16.mxu1 %v9030_v46  ;;  %v1371_v44 = vld [vmem:[%s9763_s7 + $0x1eb8] sm:$0xff]  ;;  %v9083_v46 = vcombine.low %v1358_v34, %v1362_v0  ;;  %v9092_v48 = vcombine.high %v1366_v29, %v1370_v56 }
 0x43f   : > { %v9094_v49 = vcombine.high %v1367_v43, %v1371_v44  ;;  %v9093_v53 = vcombine.low %v1367_v43, %v1371_v44 }
 0x441   : > { %7480 = vmatpush1.bf16.msra.mxu0 %v9027_v27  ;;  %7808 = vmatpush1.bf16.msra.mxu1 %v9029_v50  ;;  %v1378_v27 = vld [vmem:[%s9763_s7 + $0x1ef0] sm:$0xff]  ;;  %v1375_v50 = vld [vmem:[%s9763_s7 + $0x1ed8] sm:$0xff] }
 0x442   : > { %7481 = vmatprep.subr.bf16.mxu0 %v9036_v10  ;;  %7809 = vmatprep.subr.bf16.mxu1 %v9038_v51  ;;  %v1379_v10 = vld [vmem:[%s9763_s7 + $0x1ef8] sm:$0xff]  ;;  %v9091_v51 = vcombine.low %v1366_v29, %v1370_v56  ;;  %v9100_v11 = vcombine.high %v1374_v17, %v1378_v27 }
 0x443   : > { %v9102_v55 = vcombine.high %v1375_v50, %v1379_v10  ;;  %v9101_v59 = vcombine.low %v1375_v50, %v1379_v10  ;;  %v279_v56 = vld [vmem:[#allocation2 + $0x8] sm:$0xff]  ;;  %v7926_v50 = vsub.s32 (!%p9135_p3), 6, %v9812_v45  ;;  %v7930_v10 = vsub.s32 (!%p9135_p3), 7, %v9812_v45 }
 0x445   : > { %7482 = vmatpush1.bf16.msra.mxu0 %v9035_v42  ;;  %7810 = vmatpush1.bf16.msra.mxu1 %v9037_v39  ;;  %v1386_v42 = vld [vmem:[%s9763_s7 + $0x1f30] sm:$0xff]  ;;  %v1383_v39 = vld [vmem:[%s9763_s7 + $0x1f18] sm:$0xff] }
 0x446   : > { %7483 = vmatprep.subr.bf16.mxu0 %v9044_v57  ;;  %7811 = vmatprep.subr.bf16.mxu1 %v9046_v58  ;;  %v1387_v57 = vld [vmem:[%s9763_s7 + $0x1f38] sm:$0xff]  ;;  %v9099_v58 = vcombine.low %v1374_v17, %v1378_v27  ;;  %v9108_v61 = vcombine.high %v1382_v24, %v1386_v42  ;;  %v7918_v17 = vsub.s32 (!%p9135_p3), 4, %v9812_v45  ;;  %v7922_v27 = vsub.s32 (!%p9135_p3), 5, %v9812_v45 }
 0x447   : > { %v9110_v62 = vcombine.high %v1383_v39, %v1387_v57  ;;  %v9109_v5 = vcombine.low %v1383_v39, %v1387_v57 }
 0x449   : > { %7484 = vmatpush1.bf16.msra.mxu0 %v9043_v2  ;;  %7812 = vmatpush1.bf16.msra.mxu1 %v9045_v4  ;;  %v1394_v2 = vld [vmem:[%s9763_s7 + $0x1f70] sm:$0xff]  ;;  %v1391_v4 = vld [vmem:[%s9763_s7 + $0x1f58] sm:$0xff] }
 0x44a   : > { %7485 = vmatprep.subr.bf16.mxu0 %v9052_v52  ;;  %7813 = vmatprep.subr.bf16.mxu1 %v9054_v30  ;;  %v1395_v52 = vld [vmem:[%s9763_s7 + $0x1f78] sm:$0xff]  ;;  %v9107_v30 = vcombine.low %v1382_v24, %v1386_v42  ;;  %v9116_v6 = vcombine.high %v1390_v63, %v1394_v2 }
 0x44b   : > { %v9118_v7 = vcombine.high %v1391_v4, %v1395_v52  ;;  %v9117_v40 = vcombine.low %v1391_v4, %v1395_v52  ;;  %v7896_v4 = vld [vmem:[#allocation2] sm:$0xff] (!%p9135_p3) }
 0x44d   : > { %7486 = vmatpush1.bf16.msra.mxu0 %v9051_v9  ;;  %7814 = vmatpush1.bf16.msra.mxu1 %v9053_v12  ;;  %v1402_v9 = vld [vmem:[%s9763_s7 + $0x1fb0] sm:$0xff]  ;;  %v1399_v12 = vld [vmem:[%s9763_s7 + $0x1f98] sm:$0xff] }
 0x44e   : > { %7487 = vmatprep.subr.bf16.mxu0 %v9060_v20  ;;  %7815 = vmatprep.subr.bf16.mxu1 %v9062_v15  ;;  %v1403_v20 = vld [vmem:[%s9763_s7 + $0x1fb8] sm:$0xff]  ;;  %v9115_v15 = vcombine.low %v1390_v63, %v1394_v2  ;;  %v9124_v16 = vcombine.high %v1398_v8, %v1402_v9 }
 0x44f   : > { %v9126_v60 = vcombine.high %v1399_v12, %v1403_v20  ;;  %v9125_v14 = vcombine.low %v1399_v12, %v1403_v20 }
 0x451   : > { %7488 = vmatpush1.bf16.msra.mxu0 %v9059_v26  ;;  %7816 = vmatpush1.bf16.msra.mxu1 %v9061_v21  ;;  %v1410_v26 = vld [vmem:[%s9763_s7 + $0x1ff0] sm:$0xff]  ;;  %v1407_v21 = vld [vmem:[%s9763_s7 + $0x1fd8] sm:$0xff] }
 0x452   : > { %7489 = vmatprep.subr.bf16.mxu0 %v9068_v22  ;;  %7817 = vmatprep.subr.bf16.mxu1 %v9070_v23  ;;  %v1411_v22 = vld [vmem:[%s9763_s7 + $0x1ff8] sm:$0xff]  ;;  %v9123_v23 = vcombine.low %v1398_v8, %v1402_v9  ;;  %v9132_v1 = vcombine.high %v1406_v19, %v1410_v26  ;;  %v9131_v25 = vcombine.low %v1406_v19, %v1410_v26 }
 0x453   : > { %v9134_v3 = vcombine.high %v1407_v21, %v1411_v22 }
 0x455   : > { %7490 = vmatpush1.bf16.msra.mxu0 %v9067_v28  ;;  %7818 = vmatpush1.bf16.msra.mxu1 %v9069_v31  ;;  %v9133_v28 = vcombine.low %v1407_v21, %v1411_v22 }
 0x456   : > { %7491 = vmatprep.subr.bf16.mxu0 %v9076_v33  ;;  %7819 = vmatprep.subr.bf16.mxu1 %v9078_v35 }
 0x459   : > { %7492 = vmatpush1.bf16.msra.mxu0 %v9075_v13  ;;  %7820 = vmatpush1.bf16.msra.mxu1 %v9077_v37 }
 0x45a   : > { %7493 = vmatprep.subr.bf16.mxu0 %v9084_v38  ;;  %7821 = vmatprep.subr.bf16.mxu1 %v9086_v41 }
 0x45d   : > { %7494 = vmatpush1.bf16.msra.mxu0 %v9083_v46  ;;  %7822 = vmatpush1.bf16.msra.mxu1 %v9085_v47  ;;  %v7902_v46 = vsub.s32 (!%p9135_p3), 0, %v9812_v45  ;;  %v7906_v47 = vsub.s32 (!%p9135_p3), 1, %v9812_v45 }
 0x45e   : > { %7495 = vmatprep.subr.bf16.mxu0 %v9092_v48  ;;  %7823 = vmatprep.subr.bf16.mxu1 %v9094_v49  ;;  %v7910_v48 = vsub.s32 (!%p9135_p3), 2, %v9812_v45  ;;  %v7914_v49 = vsub.s32 (!%p9135_p3), 3, %v9812_v45 }
 0x461   : > { %7496 = vmatpush1.bf16.msra.mxu0 %v9091_v51  ;;  %7824 = vmatpush1.bf16.msra.mxu1 %v9093_v53 }
 0x462   : > { %7497 = vmatprep.subr.bf16.mxu0 %v9100_v11  ;;  %7825 = vmatprep.subr.bf16.mxu1 %v9102_v55 }
 0x465   : > { %7498 = vmatpush1.bf16.msra.mxu0 %v9099_v58  ;;  %7826 = vmatpush1.bf16.msra.mxu1 %v9101_v59 }
 0x466   : > { %7499 = vmatprep.subr.bf16.mxu0 %v9108_v61  ;;  %7827 = vmatprep.subr.bf16.mxu1 %v9110_v62 }
 0x469   : > { %7500 = vmatpush1.bf16.msra.mxu0 %v9107_v30  ;;  %7828 = vmatpush1.bf16.msra.mxu1 %v9109_v5 }
 0x46a   : > { %7501 = vmatprep.subr.bf16.mxu0 %v9116_v6  ;;  %7829 = vmatprep.subr.bf16.mxu1 %v9118_v7 }
 0x46d   : > { %7502 = vmatpush1.bf16.msra.mxu0 %v9115_v15  ;;  %7830 = vmatpush1.bf16.msra.mxu1 %v9117_v40 }
 0x46e   : > { %7503 = vmatprep.subr.bf16.mxu0 %v9124_v16  ;;  %7831 = vmatprep.subr.bf16.mxu1 %v9126_v60 }
 0x471   : > { %7504 = vmatpush1.bf16.msra.mxu0 %v9123_v23  ;;  %7832 = vmatpush1.bf16.msra.mxu1 %v9125_v14 }
 0x472   : > { %7505 = vmatprep.subr.bf16.mxu0 %v9132_v1  ;;  %7833 = vmatprep.subr.bf16.mxu1 %v9134_v3 }
 0x475   : > { %7506 = vmatpush1.bf16.msra.mxu0 %v9131_v25  ;;  %7834 = vmatpush1.bf16.msra.mxu1 %v9133_v28 }
 0x478   : > { %7508 = vmatmul.mubr.bf16.vlgmr.msra.gmra.mrb[4].mxu0 %v10453_v18  ;;  %7836 = vmatmul.mubr.bf16.vlgmr.msra.gmra.mrb[4].mxu1 %v10453_v18  ;;  %v7898_v18 = vld [vmem:[%s224_s10] sm:$0xff] (!%p9135_p3) }
 0x479   : > { %v7903_v51 = vrot.slane (!%p9135_p3), %v7898_v18, %v7902_v46  ;;  %v7907_v53 = vrot.slane (!%p9135_p3), %v7898_v18, %v7906_v47  ;;  %v7911_v11 = vrot.slane (!%p9135_p3), %v7898_v18, %v7910_v48  ;;  %v7915_v55 = vrot.slane (!%p9135_p3), %v7898_v18, %v7914_v49 }
 0x47a   : > { %v7919_v24 = vrot.slane (!%p9135_p3), %v7898_v18, %v7918_v17  ;;  %v7923_v42 = vrot.slane (!%p9135_p3), %v7898_v18, %v7922_v27  ;;  %v7927_v39 = vrot.slane (!%p9135_p3), %v7898_v18, %v7926_v50  ;;  %v7931_v57 = vrot.slane (!%p9135_p3), %v7898_v18, %v7930_v10 }
 0x47b   : > { %v7932_v58 = vcombine.low (!%p9135_p3), %v7903_v51, %v7907_v53  ;;  %v7933_v59 = vcombine.low (!%p9135_p3), %v7911_v11, %v7915_v55 }
 0x47c   : > { %v7949_v61 = vcombine.low (!%p9135_p3), %v7919_v24, %v7923_v42  ;;  %v7950_v62 = vcombine.low (!%p9135_p3), %v7927_v39, %v7931_v57 }
 0x47d   : > { %v7940_v63 = vrot.slane (!%p9135_p3), %v7932_v58, %v9819_v54  ;;  %v7947_v2 = vrot.slane (!%p9135_p3), %v7933_v59, %v9819_v54 }
 0x47e   : > { %v7957_v45 = vrot.slane (!%p9135_p3), %v7949_v61, %v9819_v54  ;;  %v7964_v52 = vrot.slane (!%p9135_p3), %v7950_v62, %v9819_v54 }
 0x47f   : > { %v7948_v30 = vcombine.low (!%p9135_p3), %v7940_v63, %v7947_v2 }
 0x480   : > { %v7965_v6 = vcombine.low (!%p9135_p3), %v7957_v45, %v7964_v52 }
 0x481   : > { %v7968_v7 = vadd.f32 (!%p9135_p3), %v7948_v30, %v7896_v4 }
 0x483   : > { %v7970_v9 = vmax.f32 (!%p9135_p3), %v7968_v7, 0.0 }
 0x485   : > { %7972 = vst [vmem:[%s9787_s4] sm:$0xff] (!%p9135_p3), %v7970_v9 }
 0x54b   : > { %v7509_v31 = vpop.f32.mrb[4].mxu0  ;;  %v7837_v33 = vpop.f32.mrb[4].mxu1 }
 0x54c   : > { %v7511_v35 = vpop.f32.mrb[5].mxu0  ;;  %v7839_v0 = vpop.f32.mrb[5].mxu1 }
 0x54d   : > { %v7869_v34 = vcombine.low %v7509_v31, %v7511_v35  ;;  %v7513_v32 = vpop.f32.mrb[6].mxu0  ;;  %v7870_v36 = vcombine.low %v7837_v33, %v7839_v0  ;;  %v7841_v13 = vpop.f32.mrb[6].mxu1 }
 0x54e   : > { %v7514_v37 = vpop.f32.mrb[7].mxu0  ;;  %v7842_v41 = vpop.f32.mrb[7].mxu1 }
 0x54f   : > { %v7877_v38 = vrot.slane %v7869_v34, %v9819_v54  ;;  %v7884_v29 = vrot.slane %v7870_v36, %v9819_v54  ;;  %7895 = sbr.rel (%p9135_p3) target bundleno = 1378 (0x562), region = 48 }
 0x551   : > { %v7885_v43 = vcombine.low %v7877_v38, %v7884_v29 }
 0x553   : > { %v7889_v44 = vadd.f32 %v7885_v43, %v279_v56 }
 0x555   : > { %7891 = vst [vmem:[#allocation2 + $0x8] sm:$0xff] %v7889_v44 }
 0x55c   : > { %v7897_v5 = vld [vmem:[#allocation2 + $0x8] sm:$0xff] }
 0x55d   : > { %v7969_v8 = vadd.f32 %v7965_v6, %v7897_v5 }
 0x55f   : > { %v7971_v12 = vmax.f32 %v7969_v8, 0.0 }
 0x561   : > { %7973 = vst [vmem:[%s9787_s4 + $0x8] sm:$0xff] %v7971_v12 }
 0x562 PF: > { %s19_s22 = sadd.s32 1, %s9515_s22   ;;  %s11074_s7 = sld [smem:[#allocation9_spill]] }
 0x563   : > { %p16_p11 = scmp.ge.s32.totalorder %s19_s22, 6   ;;  %s11075_s12 = smov %s9479_s13 }
 0x564   : > { %s11076_s13 = smov %s9483_s14  ;;  %s11077_s14 = smov %s9712_s29 }
 0x565   : > { %s11078_s15 = smov %s9491_s16  ;;  %s11079_s16 = smov %s9495_s17 }
 0x566   : > { %s11080_s17 = smov %s9717_s6  ;;  %s11081_s18 = smov %s9507_s20 }
 0x567   : > { %s11082_s19 = smov %s9511_s21  ;;  %s11083_s20 = smov %s11086_s23 }
 0x568   : > { %s11084_s21 = smov %s11074_s7  ;;  %18 = sbr.rel (!%p16_p11) target bundleno = 11 (0xb), region = 96 }
 0x56f   :  { %7996 = vsyncpa [#allocation4], 1 }
 0x570   :  { %7998 = vsyncpa [#allocation4 + $0x1], 1 }
 0x571   :  { %7999 = vsyncpa [#allocation6], 1 }
 0x572   :  { %8001 = vsyncpa [#allocation6 + $0x1], 1 }

</bundles_post_ra>
